<compile_context>
chip_gen: v7x
topology: tpu7x:2x2x1
jax: 0.10.0
libtpu: 0.0.40
codegen_flags: <defaults>
</compile_context>

<pallas_src>
import math
from functools import partial

import jax
import jax.numpy as jnp
from jax.experimental import pallas as pl
from jax.experimental.pallas import tpu as pltpu

_COMPUTE_DTYPE = jnp.bfloat16        # MXU operand dtype; accumulation is f32
_NEG = -1e30                         # finite "-inf" mask sentinel
_SQRT_HALF = 0.7071067811865476
_VMEM_LIMIT = 48 * 1024 * 1024       # safe on v5e/v6e (128 MiB) and v7x (64 MiB)


def _pick_tile(dim, candidates):
    """Largest candidate tile that evenly divides `dim`, else the full dim."""
    for c in candidates:
        if dim >= c and dim % c == 0:
            return c
    return dim


# ----------------------------------------------------------------------------
# In-kernel math helpers
# ----------------------------------------------------------------------------
def _erf(x):
    # Abramowitz & Stegun 7.1.26 (max abs err ~1.5e-7); exp + elementwise only,
    # so it fuses into the matmul epilogue and lowers cleanly in Mosaic.
    a1, a2, a3, a4, a5 = (0.254829592, -0.284496736, 1.421413741,
                          -1.453152027, 1.061405429)
    p = 0.3275911
    sign = jnp.where(x >= 0.0, 1.0, -1.0)
    ax = jnp.abs(x)
    t = 1.0 / (1.0 + p * ax)
    poly = ((((a5 * t + a4) * t + a3) * t + a2) * t + a1) * t
    return sign * (1.0 - poly * jnp.exp(-ax * ax))


def _gelu(x):
    # exact (erf) GELU, matching F.gelu's default
    return 0.5 * x * (1.0 + _erf(x * _SQRT_HALF))


# ----------------------------------------------------------------------------
# Tiled matmul (+optional bias, fused GELU, fused residual add epilogue)
# ----------------------------------------------------------------------------
def _matmul_kernel(*refs, activation, has_bias, has_residual):
    x_ref, w_ref = refs[0], refs[1]
    idx = 2
    b_ref = None
    r_ref = None
    if has_bias:
        b_ref = refs[idx]
        idx += 1
    if has_residual:
        r_ref = refs[idx]
        idx += 1
    o_ref, acc_ref = refs[idx], refs[idx + 1]

    k = pl.program_id(2)

    @pl.when(k == 0)
    def _():
        acc_ref[...] = jnp.zeros_like(acc_ref)

    acc_ref[...] += jnp.dot(x_ref[...], w_ref[...],
                            preferred_element_type=jnp.float32)

    @pl.when(k == pl.num_programs(2) - 1)
    def _():
        out = acc_ref[...]
        if has_bias:
            out = out + b_ref[...]
        if activation == "gelu":
            out = _gelu(out)
        if has_residual:
            out = out + r_ref[...].astype(jnp.float32)
        o_ref[...] = out.astype(o_ref.dtype)


def matmul_bias(x2d, w, b=None, activation=None, residual=None,
                out_dtype=jnp.float32):
    M, K = x2d.shape
    N = w.shape[1]
    tm = _pick_tile(M, (512, 256, 128, 64, 32, 16, 8))
    tn = _pick_tile(N, (512, 256, 128))
    tk = _pick_tile(K, (512, 256, 128))
    grid = (M // tm, N // tn, K // tk)

    in_specs = [pl.BlockSpec((tm, tk), lambda i, j, k: (i, k)),
                pl.BlockSpec((tk, tn), lambda i, j, k: (k, j))]
    args = [x2d.astype(_COMPUTE_DTYPE), w.astype(_COMPUTE_DTYPE)]
    if b is not None:
        in_specs.append(pl.BlockSpec((1, tn), lambda i, j, k: (0, j)))
        args.append(b.reshape(1, N).astype(jnp.float32))
    if residual is not None:
        in_specs.append(pl.BlockSpec((tm, tn), lambda i, j, k: (i, j)))
        args.append(residual.astype(jnp.float32))

    kernel = partial(_matmul_kernel, activation=activation,
                     has_bias=b is not None, has_residual=residual is not None)
    return pl.pallas_call(
        kernel,
        grid=grid,
        in_specs=in_specs,
        out_specs=pl.BlockSpec((tm, tn), lambda i, j, k: (i, j)),
        out_shape=jax.ShapeDtypeStruct((M, N), out_dtype),
        scratch_shapes=[pltpu.VMEM((tm, tn), jnp.float32)],
        compiler_params=pltpu.CompilerParams(
            dimension_semantics=("parallel", "parallel", "arbitrary"),
            vmem_limit_bytes=_VMEM_LIMIT),
    )(*args)


# ----------------------------------------------------------------------------
# Row-tiled LayerNorm (torch eps=1e-5, affine); out_dtype bf16 when consumer
# is a matmul so the downstream cast is a no-op.
# ----------------------------------------------------------------------------
def _layernorm_kernel(x_ref, g_ref, b_ref, o_ref):
    x = x_ref[...].astype(jnp.float32)
    mean = jnp.mean(x, axis=-1, keepdims=True)
    var = jnp.mean(jnp.square(x - mean), axis=-1, keepdims=True)
    y = (x - mean) * jax.lax.rsqrt(var + 1e-5)
    o_ref[...] = (y * g_ref[...] + b_ref[...]).astype(o_ref.dtype)


def layer_norm(x2d, gamma, beta, out_dtype=jnp.float32):
    M, D = x2d.shape
    tm = _pick_tile(M, (512, 256, 128, 64, 32, 16, 8))
    return pl.pallas_call(
        _layernorm_kernel,
        grid=(M // tm,),
        in_specs=[pl.BlockSpec((tm, D), lambda i: (i, 0)),
                  pl.BlockSpec((1, D), lambda i: (0, 0)),
                  pl.BlockSpec((1, D), lambda i: (0, 0))],
        out_specs=pl.BlockSpec((tm, D), lambda i: (i, 0)),
        out_shape=jax.ShapeDtypeStruct((M, D), out_dtype),
        compiler_params=pltpu.CompilerParams(
            dimension_semantics=("parallel",),
            vmem_limit_bytes=_VMEM_LIMIT),
    )(x2d.astype(jnp.float32), gamma.reshape(1, D).astype(jnp.float32),
      beta.reshape(1, D).astype(jnp.float32))


# ----------------------------------------------------------------------------
# Attention: grid (B, n_q, n_kv), flash-style online softmax over the kv axis,
# masks built in-kernel, heads sliced from the lane dim, lane-dense (Tq, D)
# output with heads merged in the epilogue. Softmax scale pre-folded into Wq.
# ----------------------------------------------------------------------------
def _attention_kernel(*refs, n_heads, hd, causal, use_kpad, q_blk, k_blk):
    if use_kpad:
        q_ref, k_ref, v_ref, kpad_ref = refs[:4]
        o_ref, m_sc, l_sc, acc_sc = refs[4:]
    else:
        q_ref, k_ref, v_ref = refs[:3]
        o_ref, m_sc, l_sc, acc_sc = refs[3:]

    qi = pl.program_id(1)
    kv = pl.program_id(2)

    @pl.when(kv == 0)
    def _():
        m_sc[...] = jnp.full_like(m_sc, _NEG)
        l_sc[...] = jnp.zeros_like(l_sc)
        acc_sc[...] = jnp.zeros_like(acc_sc)

    q = q_ref[0]          # (q_blk, D)  bf16
    k = k_ref[0]          # (k_blk, D)  bf16
    v = v_ref[0]          # (k_blk, D)  bf16

    # additive bias tile, built once per grid step and shared by all heads
    bias = None
    if use_kpad:
        bias = kpad_ref[0].astype(jnp.float32)                      # (1, k_blk)
    if causal:
        q_pos = qi * q_blk + jax.lax.broadcasted_iota(jnp.int32, (q_blk, k_blk), 0)
        k_pos = kv * k_blk + jax.lax.broadcasted_iota(jnp.int32, (q_blk, k_blk), 1)
        cmask = jnp.where(q_pos >= k_pos, 0.0, _NEG).astype(jnp.float32)
        bias = cmask if bias is None else bias + cmask

    for h in range(n_heads):
        sl = slice(h * hd, (h + 1) * hd)
        s = jax.lax.dot_general(q[:, sl], k[:, sl], (((1,), (1,)), ((), ())),
                                preferred_element_type=jnp.float32)  # (q_blk, k_blk)
        if bias is not None:
            s = s + bias
        m_prev = m_sc[:, h:h + 1]                                    # (q_blk, 1)
        m_new = jnp.maximum(m_prev, jnp.max(s, axis=-1, keepdims=True))
        alpha = jnp.exp(m_prev - m_new)
        p = jnp.exp(s - m_new)
        l_sc[:, h:h + 1] = alpha * l_sc[:, h:h + 1] + jnp.sum(p, axis=-1, keepdims=True)
        acc_sc[h] = alpha * acc_sc[h] + jnp.dot(p.astype(v.dtype), v[:, sl],
                                                preferred_element_type=jnp.float32)
        m_sc[:, h:h + 1] = m_new

    @pl.when(kv == pl.num_programs(2) - 1)
    def _():
        heads = []
        for h in range(n_heads):
            inv_l = pl.reciprocal(l_sc[:, h:h + 1], approx=True)
            heads.append(acc_sc[h] * inv_l)
        # heads merged in-kernel -> lane-dense (q_blk, D) store, no XLA transpose
        o_ref[0] = jnp.concatenate(heads, axis=-1).astype(o_ref.dtype)


def _attention_call(q_arr, q_col, k_arr, k_col, v_arr, v_col, *, d_model,
                    n_heads, kpad=None, causal=False):
    B, Tq, _ = q_arr.shape
    Tk = k_arr.shape[1]
    hd = d_model // n_heads
    tq = _pick_tile(Tq, (256, 128))
    tkb = _pick_tile(Tk, (512, 256, 128))
    grid = (B, Tq // tq, Tk // tkb)

    def q_map(c):
        return lambda b, qi, kv: (b, qi, c)

    def kv_map(c):
        return lambda b, qi, kv: (b, kv, c)

    in_specs = [pl.BlockSpec((1, tq, d_model), q_map(q_col)),
                pl.BlockSpec((1, tkb, d_model), kv_map(k_col)),
                pl.BlockSpec((1, tkb, d_model), kv_map(v_col))]
    args = [q_arr.astype(_COMPUTE_DTYPE), k_arr.astype(_COMPUTE_DTYPE),
            v_arr.astype(_COMPUTE_DTYPE)]
    use_kpad = kpad is not None
    if use_kpad:
        in_specs.append(pl.BlockSpec((1, 1, tkb), lambda b, qi, kv: (b, 0, kv)))
        args.append(kpad.astype(jnp.float32))

    kernel = partial(_attention_kernel, n_heads=n_heads, hd=hd, causal=causal,
                     use_kpad=use_kpad, q_blk=tq, k_blk=tkb)
    # TODO(synk): m/l running stats are still column-sliced (lane-masked) writes;
    # a fully lane-dense stats layout is a remaining micro-opt.
    return pl.pallas_call(
        kernel,
        grid=grid,
        in_specs=in_specs,
        out_specs=pl.BlockSpec((1, tq, d_model), lambda b, qi, kv: (b, qi, 0)),
        out_shape=jax.ShapeDtypeStruct((B, Tq, d_model), jnp.bfloat16),
        scratch_shapes=[pltpu.VMEM((tq, n_heads), jnp.float32),
                        pltpu.VMEM((tq, n_heads), jnp.float32),
                        pltpu.VMEM((n_heads, tq, hd), jnp.float32)],
        compiler_params=pltpu.CompilerParams(
            dimension_semantics=("parallel", "parallel", "arbitrary"),
            vmem_limit_bytes=_VMEM_LIMIT),
    )(*args)


def self_attention(qkv2d, B, T, d_model, n_heads, kpad, causal):
    qkv = qkv2d.reshape(B, T, 3 * d_model)
    if d_model % 128 == 0:
        # Consume the fused (B, T, 3D) projection directly via column blocks.
        return _attention_call(qkv, 0, qkv, 1, qkv, 2, d_model=d_model,
                               n_heads=n_heads, kpad=kpad, causal=causal)
    # Fallback for tiny d_model (lane-block slicing needs D % 128 == 0).
    q = qkv[..., :d_model]
    k = qkv[..., d_model:2 * d_model]
    v = qkv[..., 2 * d_model:]
    return _attention_call(q, 0, k, 0, v, 0, d_model=d_model, n_heads=n_heads,
                           kpad=kpad, causal=causal)


def cross_attention(q2d, kv2d, B, Tq, Tk, d_model, n_heads):
    q = q2d.reshape(B, Tq, d_model)
    kv = kv2d.reshape(B, Tk, 2 * d_model)
    if d_model % 128 == 0:
        return _attention_call(q, 0, kv, 0, kv, 1, d_model=d_model,
                               n_heads=n_heads)
    k = kv[..., :d_model]
    v = kv[..., d_model:]
    return _attention_call(q, 0, k, 0, v, 0, d_model=d_model, n_heads=n_heads)


# ----------------------------------------------------------------------------
# Model forward (plain JAX glue around the Pallas kernels)
# ----------------------------------------------------------------------------
def forward(params, x, targets, *, n_heads, sos_id, pad_id):
    """Matches EncoderDecoderTransformer2.forward (dropout=0)."""
    B, S = x.shape
    T = targets.shape[1]
    D = params["src_emb"].shape[1]
    V = params["tgt_emb"].shape[0]
    bf16 = jnp.bfloat16

    # targets shifted right: [SOS, targets[:, :-1]]
    sos = jnp.full((B, 1), sos_id, dtype=targets.dtype)
    tgt_tokens = jnp.concatenate([sos, targets[:, :-1]], axis=1)

    # embeddings + learned positional encodings (gathers = glue)
    src = params["src_emb"][x] + params["src_pos"][:S][None, :, :]
    tgt = params["tgt_emb"][tgt_tokens] + params["tgt_pos"][:T][None, :, :]

    # only the tiny (B, 1, Tk) key-padding rows leave HBM; full (Tq, Tk) masks
    # are generated inside the attention kernel. -1e30 finite sentinel.
    src_kpad = jnp.where(x == pad_id, _NEG, 0.0).astype(jnp.float32).reshape(B, 1, S)
    tgt_kpad = jnp.where(tgt_tokens == pad_id, _NEG, 0.0).astype(jnp.float32).reshape(B, 1, T)

    # ---- encoder (norm_first) ----
    h = src.reshape(B * S, D).astype(jnp.float32)
    for layer in params["enc_layers"]:
        sa, ffn = layer["sa"], layer["ffn"]
        n1 = layer_norm(h, *layer["norm1"], out_dtype=bf16)
        qkv = matmul_bias(n1, sa["w_qkv"], sa["b_qkv"], out_dtype=bf16)
        attn = self_attention(qkv, B, S, D, n_heads, kpad=src_kpad, causal=False)
        h = matmul_bias(attn.reshape(B * S, D), sa["wo"], sa["bo"], residual=h)
        n2 = layer_norm(h, *layer["norm2"], out_dtype=bf16)
        ff = matmul_bias(n2, ffn["w1"], ffn["b1"], activation="gelu", out_dtype=bf16)
        h = matmul_bias(ff, ffn["w2"], ffn["b2"], residual=h)
    memory = layer_norm(h, *params["enc_norm"], out_dtype=bf16)        # (B*S, D)

    # ---- decoder (norm_first) ----
    h = tgt.reshape(B * T, D).astype(jnp.float32)
    for layer in params["dec_layers"]:
        sa, ca, ffn = layer["sa"], layer["ca"], layer["ffn"]
        n1 = layer_norm(h, *layer["norm1"], out_dtype=bf16)
        qkv = matmul_bias(n1, sa["w_qkv"], sa["b_qkv"], out_dtype=bf16)
        attn = self_attention(qkv, B, T, D, n_heads, kpad=tgt_kpad, causal=True)
        h = matmul_bias(attn.reshape(B * T, D), sa["wo"], sa["bo"], residual=h)

        n2 = layer_norm(h, *layer["norm2"], out_dtype=bf16)
        q = matmul_bias(n2, ca["wq"], ca["bq"], out_dtype=bf16)
        kv = matmul_bias(memory, ca["w_kv"], ca["b_kv"], out_dtype=bf16)
        attn = cross_attention(q, kv, B, T, S, D, n_heads)   # reference: no memory mask
        h = matmul_bias(attn.reshape(B * T, D), ca["wo"], ca["bo"], residual=h)

        n3 = layer_norm(h, *layer["norm3"], out_dtype=bf16)
        ff = matmul_bias(n3, ffn["w1"], ffn["b1"], activation="gelu", out_dtype=bf16)
        h = matmul_bias(ff, ffn["w2"], ffn["b2"], residual=h)
    dec_out = layer_norm(h, *params["dec_norm"], out_dtype=bf16)

    # tied lm_head: logits = dec_out @ E_tgt^T via pre-transposed (D, V) weight
    logits = matmul_bias(dec_out, params["tgt_emb_T"], b=None)
    return logits.reshape(B, T, V)


# ----------------------------------------------------------------------------
# Parameter init (synthetic; shapes follow the module __init__, with fused
# QKV / KV projection weights) and one-time parameter preparation (fold the
# 1/sqrt(hd) softmax scale into Wq/bq, pre-cast matmul weights to bf16,
# pre-transpose the tied lm_head weight to (D, V)).
# ----------------------------------------------------------------------------
def init_params(key, vocab, d_model, block_size, n_layers, d_ff):
    keys = iter(jax.random.split(key, 512))

    def nrm(shape, scale=0.02):
        return scale * jax.random.normal(next(keys), shape, jnp.float32)

    def ln():
        return (jnp.ones((d_model,), jnp.float32), jnp.zeros((d_model,), jnp.float32))

    def mha_self():
        return {"w_qkv": nrm((d_model, 3 * d_model)), "b_qkv": nrm((3 * d_model,)),
                "wo": nrm((d_model, d_model)), "bo": nrm((d_model,))}

    def mha_cross():
        return {"wq": nrm((d_model, d_model)), "bq": nrm((d_model,)),
                "w_kv": nrm((d_model, 2 * d_model)), "b_kv": nrm((2 * d_model,)),
                "wo": nrm((d_model, d_model)), "bo": nrm((d_model,))}

    def ffn():
        return {"w1": nrm((d_model, d_ff)), "b1": nrm((d_ff,)),
                "w2": nrm((d_ff, d_model)), "b2": nrm((d_model,))}

    params = {
        "src_emb": nrm((vocab, d_model), 1.0),
        "src_pos": nrm((block_size, d_model), 1.0),
        "tgt_emb": nrm((vocab, d_model), 1.0),   # tied with lm_head
        "tgt_pos": nrm((block_size, d_model), 1.0),
        "enc_norm": ln(),
        "dec_norm": ln(),
        "enc_layers": [],
        "dec_layers": [],
    }
    for _ in range(n_layers):
        params["enc_layers"].append(
            {"sa": mha_self(), "norm1": ln(), "norm2": ln(), "ffn": ffn()})
        params["dec_layers"].append(
            {"sa": mha_self(), "ca": mha_cross(),
             "norm1": ln(), "norm2": ln(), "norm3": ln(), "ffn": ffn()})
    return params


def prepare_params(raw, n_heads):
    D = raw["src_emb"].shape[1]
    hd = D // n_heads
    q_scale = 1.0 / math.sqrt(hd)
    bf = lambda a: a.astype(_COMPUTE_DTYPE)
    f32 = lambda a: a.astype(jnp.float32)

    def prep_sa(sa):
        w = sa["w_qkv"].at[:, :D].multiply(q_scale)   # fold softmax scale into Wq
        b = sa["b_qkv"].at[:D].multiply(q_scale)
        return {"w_qkv": bf(w), "b_qkv": f32(b),
                "wo": bf(sa["wo"]), "bo": f32(sa["bo"])}

    def prep_ca(ca):
        return {"wq": bf(ca["wq"] * q_scale), "bq": f32(ca["bq"] * q_scale),
                "w_kv": bf(ca["w_kv"]), "b_kv": f32(ca["b_kv"]),
                "wo": bf(ca["wo"]), "bo": f32(ca["bo"])}

    def prep_ffn(f):
        return {"w1": bf(f["w1"]), "b1": f32(f["b1"]),
                "w2": bf(f["w2"]), "b2": f32(f["b2"])}

    return {
        "src_emb": raw["src_emb"], "src_pos": raw["src_pos"],
        "tgt_emb": raw["tgt_emb"], "tgt_pos": raw["tgt_pos"],
        "tgt_emb_T": bf(raw["tgt_emb"].T),   # (D, V) for the tied lm_head
        "enc_norm": raw["enc_norm"], "dec_norm": raw["dec_norm"],
        "enc_layers": [{"sa": prep_sa(l["sa"]), "norm1": l["norm1"],
                        "norm2": l["norm2"], "ffn": prep_ffn(l["ffn"])}
                       for l in raw["enc_layers"]],
        "dec_layers": [{"sa": prep_sa(l["sa"]), "ca": prep_ca(l["ca"]),
                        "norm1": l["norm1"], "norm2": l["norm2"],
                        "norm3": l["norm3"], "ffn": prep_ffn(l["ffn"])}
                       for l in raw["dec_layers"]],
    }


# ----------------------------------------------------------------------------
if __name__ == "__main__":
    B, S, T = 2, 16, 16
    d_model, n_heads, n_layers, d_ff = 128, 4, 2, 256
    vocab, block_size = 128, 16
    sos_id, eos_id, pad_id = 1, 2, 0

    key = jax.random.PRNGKey(0)
    kp, kx, kt = jax.random.split(key, 3)
    raw_params = init_params(kp, vocab, d_model, block_size, n_layers, d_ff)
    params = prepare_params(raw_params, n_heads)

    x = jax.random.randint(kx, (B, S), 3, vocab, dtype=jnp.int32)
    targets = jax.random.randint(kt, (B, T), 3, vocab, dtype=jnp.int32)
    # introduce some padding to exercise the key-padding masks
    x = x.at[:, -3:].set(pad_id)
    targets = targets.at[1, 10:].set(pad_id)

    fwd = jax.jit(partial(forward, n_heads=n_heads, sos_id=sos_id, pad_id=pad_id))
    logits = fwd(params, x, targets)
    jax.block_until_ready(logits)

    assert logits.shape == (B, T, vocab), logits.shape
    assert bool(jnp.all(jnp.isfinite(logits)))
    print("KERNEL_OK")
</pallas_src>

<mosaic_0001>
module attributes {stable_mosaic.version = 11 : i64} {
  func.func @_layernorm_kernel(%arg0: i32, %arg1: memref<32x128xf32, #tpu.memory_space<vmem>>, %arg2: memref<1x128xf32, #tpu.memory_space<vmem>>, %arg3: memref<1x128xf32, #tpu.memory_space<vmem>>, %arg4: memref<32x128xbf16, #tpu.memory_space<vmem>>) attributes {dimension_semantics = [#tpu.dimension_semantics<parallel>], iteration_bounds = array<i64: 1>, scalar_prefetch = 0 : i64, scratch_operands = 0 : i64, tpu.core_type = #tpu.core_type<tc>, window_params = [{transform_indices = @transform_0, window_bounds = array<i64: 32, 128>}, {pipeline_mode = #tpu.pipeline_mode<synchronous>, transform_indices = @transform_1, window_bounds = array<i64: 1, 128>}, {pipeline_mode = #tpu.pipeline_mode<synchronous>, transform_indices = @transform_2, window_bounds = array<i64: 1, 128>}, {transform_indices = @transform_3, window_bounds = array<i64: 32, 128>}]} {
    %c0 = arith.constant 0 : index
    %c0_0 = arith.constant 0 : index
    %0 = vector.load %arg1[%c0, %c0_0] : memref<32x128xf32, #tpu.memory_space<vmem>>, vector<32x128xf32>
    %cst = arith.constant dense<0.000000e+00> : vector<32xf32>
    %1 = vector.multi_reduction <add>, %0, %cst [1] : vector<32x128xf32> to vector<32xf32>
    %2 = vector.shape_cast %1 : vector<32xf32> to vector<32x1xf32>
    %cst_1 = arith.constant 1.280000e+02 : f32
    %3 = vector.broadcast %cst_1 : f32 to vector<32x1xf32>
    %4 = arith.divf %2, %3 : vector<32x1xf32>
    %5 = vector.broadcast %4 : vector<32x1xf32> to vector<32x128xf32>
    %6 = arith.subf %0, %5 : vector<32x128xf32>
    %7 = arith.mulf %6, %6 : vector<32x128xf32>
    %cst_2 = arith.constant dense<0.000000e+00> : vector<32xf32>
    %8 = vector.multi_reduction <add>, %7, %cst_2 [1] : vector<32x128xf32> to vector<32xf32>
    %9 = vector.shape_cast %8 : vector<32xf32> to vector<32x1xf32>
    %cst_3 = arith.constant 1.280000e+02 : f32
    %10 = vector.broadcast %cst_3 : f32 to vector<32x1xf32>
    %11 = arith.divf %9, %10 : vector<32x1xf32>
    %12 = vector.broadcast %4 : vector<32x1xf32> to vector<32x128xf32>
    %13 = arith.subf %0, %12 : vector<32x128xf32>
    %cst_4 = arith.constant 9.99999974E-6 : f32
    %14 = vector.broadcast %cst_4 : f32 to vector<32x1xf32>
    %15 = arith.addf %11, %14 : vector<32x1xf32>
    %16 = math.rsqrt %15 : vector<32x1xf32>
    %17 = vector.broadcast %16 : vector<32x1xf32> to vector<32x128xf32>
    %18 = arith.mulf %13, %17 : vector<32x128xf32>
    %c0_5 = arith.constant 0 : index
    %c0_6 = arith.constant 0 : index
    %19 = vector.load %arg2[%c0_5, %c0_6] : memref<1x128xf32, #tpu.memory_space<vmem>>, vector<1x128xf32>
    %20 = vector.broadcast %19 : vector<1x128xf32> to vector<32x128xf32>
    %21 = arith.mulf %18, %20 : vector<32x128xf32>
    %c0_7 = arith.constant 0 : index
    %c0_8 = arith.constant 0 : index
    %22 = vector.load %arg3[%c0_7, %c0_8] : memref<1x128xf32, #tpu.memory_space<vmem>>, vector<1x128xf32>
    %23 = vector.broadcast %22 : vector<1x128xf32> to vector<32x128xf32>
    %24 = arith.addf %21, %23 : vector<32x128xf32>
    %25 = arith.truncf %24 : vector<32x128xf32> to vector<32x128xbf16>
    %c0_9 = arith.constant 0 : index
    %c0_10 = arith.constant 0 : index
    %26 = vector.load %arg4[%c0_9, %c0_10] : memref<32x128xbf16, #tpu.memory_space<vmem>>, vector<32x128xbf16>
    tpu.vector_store %arg4[%c0_9, %c0_10], %25 {strides = array<i32>} : memref<32x128xbf16, #tpu.memory_space<vmem>>, vector<32x128xbf16>,
    return
  }
  func.func @transform_0(%arg0: i32) -> (i32, i32) {
    %c0_i32 = arith.constant 0 : i32
    %c0_i32_0 = arith.constant 0 : i32
    return %arg0, %c0_i32 : i32, i32
  }
  func.func @transform_1(%arg0: i32) -> (i32, i32) {
    %c0_i32 = arith.constant 0 : i32
    %c0_i32_0 = arith.constant 0 : i32
    %c0_i32_1 = arith.constant 0 : i32
    return %c0_i32, %c0_i32_0 : i32, i32
  }
  func.func @transform_2(%arg0: i32) -> (i32, i32) {
    %c0_i32 = arith.constant 0 : i32
    %c0_i32_0 = arith.constant 0 : i32
    %c0_i32_1 = arith.constant 0 : i32
    return %c0_i32, %c0_i32_0 : i32, i32
  }
  func.func @transform_3(%arg0: i32) -> (i32, i32) {
    %c0_i32 = arith.constant 0 : i32
    %c0_i32_0 = arith.constant 0 : i32
    return %arg0, %c0_i32 : i32, i32
  }
}

module attributes {stable_mosaic.version = 11 : i64} {
  func.func @_matmul_kernel(%arg0: i32, %arg1: i32, %arg2: i32, %arg3: memref<32x128xbf16, #tpu.memory_space<vmem>>, %arg4: memref<128x128xbf16, #tpu.memory_space<vmem>>, %arg5: memref<1x128xf32, #tpu.memory_space<vmem>>, %arg6: memref<32x128xbf16, #tpu.memory_space<vmem>>, %arg7: memref<32x128xf32, #tpu.memory_space<vmem>>) attributes {dimension_semantics = [#tpu.dimension_semantics<parallel>, #tpu.dimension_semantics<parallel>, #tpu.dimension_semantics<arbitrary>], iteration_bounds = array<i64: 1, 3, 1>, scalar_prefetch = 0 : i64, scratch_operands = 1 : i64, tpu.core_type = #tpu.core_type<tc>, window_params = [{transform_indices = @transform_0, window_bounds = array<i64: 32, 128>}, {transform_indices = @transform_1, window_bounds = array<i64: 128, 128>}, {transform_indices = @transform_2, window_bounds = array<i64: 1, 128>}, {transform_indices = @transform_3, window_bounds = array<i64: 32, 128>}]} {
    %c0_i32 = arith.constant 0 : i32
    %0 = arith.cmpi eq, %arg2, %c0_i32 : i32
    %1 = arith.extui %0 : i1 to i32
    %c0_i32_0 = arith.constant 0 : i32
    %2 = arith.cmpi ne, %1, %c0_i32_0 : i32
    scf.if %2 {
      %cst_10 = arith.constant 0.000000e+00 : f32
      %12 = vector.broadcast %cst_10 : f32 to vector<32x128xf32>
      %c0_11 = arith.constant 0 : index
      %c0_12 = arith.constant 0 : index
      %13 = vector.load %arg7[%c0_11, %c0_12] : memref<32x128xf32, #tpu.memory_space<vmem>>, vector<32x128xf32>
      tpu.vector_store %arg7[%c0_11, %c0_12], %12 {strides = array<i32>} : memref<32x128xf32, #tpu.memory_space<vmem>>, vector<32x128xf32>,
    } else {
    }
    %c0 = arith.constant 0 : index
    %c0_1 = arith.constant 0 : index
    %3 = vector.load %arg7[%c0, %c0_1] : memref<32x128xf32, #tpu.memory_space<vmem>>, vector<32x128xf32>
    %c0_2 = arith.constant 0 : index
    %c0_3 = arith.constant 0 : index
    %4 = vector.load %arg3[%c0_2, %c0_3] : memref<32x128xbf16, #tpu.memory_space<vmem>>, vector<32x128xbf16>
    %c0_4 = arith.constant 0 : index
    %c0_5 = arith.constant 0 : index
    %5 = vector.load %arg4[%c0_4, %c0_5] : memref<128x128xbf16, #tpu.memory_space<vmem>>, vector<128x128xbf16>
    %cst = arith.constant dense<0.000000e+00> : vector<32x128xf32>
    %6 = tpu.matmul %4, %5, %cst {dimension_numbers = #tpu.dot_dimension_numbers<[1], [0], [0], [1], [0, 0, 1, 1], [], []>} : vector<32x128xbf16>, vector<128x128xbf16>, vector<32x128xf32> -> vector<32x128xf32>
    %7 = arith.addf %3, %6 : vector<32x128xf32>
    %c0_6 = arith.constant 0 : index
    %c0_7 = arith.constant 0 : index
    %8 = vector.load %arg7[%c0_6, %c0_7] : memref<32x128xf32, #tpu.memory_space<vmem>>, vector<32x128xf32>
    tpu.vector_store %arg7[%c0_6, %c0_7], %7 {strides = array<i32>} : memref<32x128xf32, #tpu.memory_space<vmem>>, vector<32x128xf32>,
    %c0_i32_8 = arith.constant 0 : i32
    %9 = arith.cmpi eq, %arg2, %c0_i32_8 : i32
    %10 = arith.extui %9 : i1 to i32
    %c0_i32_9 = arith.constant 0 : i32
    %11 = arith.cmpi ne, %10, %c0_i32_9 : i32
    scf.if %11 {
      %c0_10 = arith.constant 0 : index
      %c0_11 = arith.constant 0 : index
      %12 = vector.load %arg7[%c0_10, %c0_11] : memref<32x128xf32, #tpu.memory_space<vmem>>, vector<32x128xf32>
      %c0_12 = arith.constant 0 : index
      %c0_13 = arith.constant 0 : index
      %13 = vector.load %arg5[%c0_12, %c0_13] : memref<1x128xf32, #tpu.memory_space<vmem>>, vector<1x128xf32>
      %14 = vector.broadcast %13 : vector<1x128xf32> to vector<32x128xf32>
      %15 = arith.addf %12, %14 : vector<32x128xf32>
      %16 = arith.truncf %15 : vector<32x128xf32> to vector<32x128xbf16>
      %c0_14 = arith.constant 0 : index
      %c0_15 = arith.constant 0 : index
      %17 = vector.load %arg6[%c0_14, %c0_15] : memref<32x128xbf16, #tpu.memory_space<vmem>>, vector<32x128xbf16>
      tpu.vector_store %arg6[%c0_14, %c0_15], %16 {strides = array<i32>} : memref<32x128xbf16, #tpu.memory_space<vmem>>, vector<32x128xbf16>,
    } else {
    }
    return
  }
  func.func @transform_0(%arg0: i32, %arg1: i32, %arg2: i32) -> (i32, i32) {
    %c0_i32 = arith.constant 0 : i32
    return %arg0, %arg2 : i32, i32
  }
  func.func @transform_1(%arg0: i32, %arg1: i32, %arg2: i32) -> (i32, i32) {
    %c0_i32 = arith.constant 0 : i32
    return %arg2, %arg1 : i32, i32
  }
  func.func @transform_2(%arg0: i32, %arg1: i32, %arg2: i32) -> (i32, i32) {
    %c0_i32 = arith.constant 0 : i32
    %c0_i32_0 = arith.constant 0 : i32
    return %c0_i32, %arg1 : i32, i32
  }
  func.func @transform_3(%arg0: i32, %arg1: i32, %arg2: i32) -> (i32, i32) {
    %c0_i32 = arith.constant 0 : i32
    return %arg0, %arg1 : i32, i32
  }
}

module attributes {stable_mosaic.version = 11 : i64} {
  func.func @_matmul_kernel(%arg0: i32, %arg1: i32, %arg2: i32, %arg3: memref<32x128xbf16, #tpu.memory_space<vmem>>, %arg4: memref<128x128xbf16, #tpu.memory_space<vmem>>, %arg5: memref<1x128xf32, #tpu.memory_space<vmem>>, %arg6: memref<32x128xf32, #tpu.memory_space<vmem>>, %arg7: memref<32x128xf32, #tpu.memory_space<vmem>>, %arg8: memref<32x128xf32, #tpu.memory_space<vmem>>) attributes {dimension_semantics = [#tpu.dimension_semantics<parallel>, #tpu.dimension_semantics<parallel>, #tpu.dimension_semantics<arbitrary>], iteration_bounds = array<i64: 1, 1, 1>, scalar_prefetch = 0 : i64, scratch_operands = 1 : i64, tpu.core_type = #tpu.core_type<tc>, window_params = [{transform_indices = @transform_0, window_bounds = array<i64: 32, 128>}, {transform_indices = @transform_1, window_bounds = array<i64: 128, 128>}, {transform_indices = @transform_2, window_bounds = array<i64: 1, 128>}, {transform_indices = @transform_3, window_bounds = array<i64: 32, 128>}, {transform_indices = @transform_4, window_bounds = array<i64: 32, 128>}]} {
    %c0_i32 = arith.constant 0 : i32
    %0 = arith.cmpi eq, %arg2, %c0_i32 : i32
    %1 = arith.extui %0 : i1 to i32
    %c0_i32_0 = arith.constant 0 : i32
    %2 = arith.cmpi ne, %1, %c0_i32_0 : i32
    scf.if %2 {
      %cst_10 = arith.constant 0.000000e+00 : f32
      %12 = vector.broadcast %cst_10 : f32 to vector<32x128xf32>
      %c0_11 = arith.constant 0 : index
      %c0_12 = arith.constant 0 : index
      %13 = vector.load %arg8[%c0_11, %c0_12] : memref<32x128xf32, #tpu.memory_space<vmem>>, vector<32x128xf32>
      tpu.vector_store %arg8[%c0_11, %c0_12], %12 {strides = array<i32>} : memref<32x128xf32, #tpu.memory_space<vmem>>, vector<32x128xf32>,
    } else {
    }
    %c0 = arith.constant 0 : index
    %c0_1 = arith.constant 0 : index
    %3 = vector.load %arg8[%c0, %c0_1] : memref<32x128xf32, #tpu.memory_space<vmem>>, vector<32x128xf32>
    %c0_2 = arith.constant 0 : index
    %c0_3 = arith.constant 0 : index
    %4 = vector.load %arg3[%c0_2, %c0_3] : memref<32x128xbf16, #tpu.memory_space<vmem>>, vector<32x128xbf16>
    %c0_4 = arith.constant 0 : index
    %c0_5 = arith.constant 0 : index
    %5 = vector.load %arg4[%c0_4, %c0_5] : memref<128x128xbf16, #tpu.memory_space<vmem>>, vector<128x128xbf16>
    %cst = arith.constant dense<0.000000e+00> : vector<32x128xf32>
    %6 = tpu.matmul %4, %5, %cst {dimension_numbers = #tpu.dot_dimension_numbers<[1], [0], [0], [1], [0, 0, 1, 1], [], []>} : vector<32x128xbf16>, vector<128x128xbf16>, vector<32x128xf32> -> vector<32x128xf32>
    %7 = arith.addf %3, %6 : vector<32x128xf32>
    %c0_6 = arith.constant 0 : index
    %c0_7 = arith.constant 0 : index
    %8 = vector.load %arg8[%c0_6, %c0_7] : memref<32x128xf32, #tpu.memory_space<vmem>>, vector<32x128xf32>
    tpu.vector_store %arg8[%c0_6, %c0_7], %7 {strides = array<i32>} : memref<32x128xf32, #tpu.memory_space<vmem>>, vector<32x128xf32>,
    %c0_i32_8 = arith.constant 0 : i32
    %9 = arith.cmpi eq, %arg2, %c0_i32_8 : i32
    %10 = arith.extui %9 : i1 to i32
    %c0_i32_9 = arith.constant 0 : i32
    %11 = arith.cmpi ne, %10, %c0_i32_9 : i32
    scf.if %11 {
      %c0_10 = arith.constant 0 : index
      %c0_11 = arith.constant 0 : index
      %12 = vector.load %arg8[%c0_10, %c0_11] : memref<32x128xf32, #tpu.memory_space<vmem>>, vector<32x128xf32>
      %c0_12 = arith.constant 0 : index
      %c0_13 = arith.constant 0 : index
      %13 = vector.load %arg5[%c0_12, %c0_13] : memref<1x128xf32, #tpu.memory_space<vmem>>, vector<1x128xf32>
      %14 = vector.broadcast %13 : vector<1x128xf32> to vector<32x128xf32>
      %15 = arith.addf %12, %14 : vector<32x128xf32>
      %c0_14 = arith.constant 0 : index
      %c0_15 = arith.constant 0 : index
      %16 = vector.load %arg6[%c0_14, %c0_15] : memref<32x128xf32, #tpu.memory_space<vmem>>, vector<32x128xf32>
      %17 = arith.addf %15, %16 : vector<32x128xf32>
      %c0_16 = arith.constant 0 : index
      %c0_17 = arith.constant 0 : index
      %18 = vector.load %arg7[%c0_16, %c0_17] : memref<32x128xf32, #tpu.memory_space<vmem>>, vector<32x128xf32>
      tpu.vector_store %arg7[%c0_16, %c0_17], %17 {strides = array<i32>} : memref<32x128xf32, #tpu.memory_space<vmem>>, vector<32x128xf32>,
    } else {
    }
    return
  }
  func.func @transform_0(%arg0: i32, %arg1: i32, %arg2: i32) -> (i32, i32) {
    %c0_i32 = arith.constant 0 : i32
    return %arg0, %arg2 : i32, i32
  }
  func.func @transform_1(%arg0: i32, %arg1: i32, %arg2: i32) -> (i32, i32) {
    %c0_i32 = arith.constant 0 : i32
    return %arg2, %arg1 : i32, i32
  }
  func.func @transform_2(%arg0: i32, %arg1: i32, %arg2: i32) -> (i32, i32) {
    %c0_i32 = arith.constant 0 : i32
    %c0_i32_0 = arith.constant 0 : i32
    return %c0_i32, %arg1 : i32, i32
  }
  func.func @transform_3(%arg0: i32, %arg1: i32, %arg2: i32) -> (i32, i32) {
    %c0_i32 = arith.constant 0 : i32
    return %arg0, %arg1 : i32, i32
  }
  func.func @transform_4(%arg0: i32, %arg1: i32, %arg2: i32) -> (i32, i32) {
    %c0_i32 = arith.constant 0 : i32
    return %arg0, %arg1 : i32, i32
  }
}

module attributes {stable_mosaic.version = 11 : i64} {
  func.func @_attention_kernel(%arg0: i32, %arg1: i32, %arg2: i32, %arg3: memref<1x16x128xbf16, #tpu.memory_space<vmem>>, %arg4: memref<1x16x128xbf16, #tpu.memory_space<vmem>>, %arg5: memref<1x16x128xbf16, #tpu.memory_space<vmem>>, %arg6: memref<1x1x16xf32, #tpu.memory_space<vmem>>, %arg7: memref<1x16x128xbf16, #tpu.memory_space<vmem>>, %arg8: memref<16x4xf32, #tpu.memory_space<vmem>>, %arg9: memref<16x4xf32, #tpu.memory_space<vmem>>, %arg10: memref<4x16x32xf32, #tpu.memory_space<vmem>>) attributes {dimension_semantics = [#tpu.dimension_semantics<parallel>, #tpu.dimension_semantics<parallel>, #tpu.dimension_semantics<arbitrary>], iteration_bounds = array<i64: 2, 1, 1>, scalar_prefetch = 0 : i64, scratch_operands = 3 : i64, tpu.core_type = #tpu.core_type<tc>, window_params = [{transform_indices = @transform_0, window_bounds = array<i64: 1, 16, 128>}, {transform_indices = @transform_1, window_bounds = array<i64: 1, 16, 128>}, {transform_indices = @transform_2, window_bounds = array<i64: 1, 16, 128>}, {transform_indices = @transform_3, window_bounds = array<i64: 1, 1, 16>}, {transform_indices = @transform_4, window_bounds = array<i64: 1, 16, 128>}]} {
    %c0_i32 = arith.constant 0 : i32
    %0 = arith.cmpi eq, %arg2, %c0_i32 : i32
    %1 = arith.extui %0 : i1 to i32
    %c0_i32_0 = arith.constant 0 : i32
    %2 = arith.cmpi ne, %1, %c0_i32_0 : i32
    scf.if %2 {
      %cst_82 = arith.constant -1.000000e+30 : f32
      %142 = vector.broadcast %cst_82 : f32 to vector<16x4xf32>
      %c0_83 = arith.constant 0 : index
      %c0_84 = arith.constant 0 : index
      %143 = vector.load %arg8[%c0_83, %c0_84] : memref<16x4xf32, #tpu.memory_space<vmem>>, vector<16x4xf32>
      tpu.vector_store %arg8[%c0_83, %c0_84], %142 {strides = array<i32>} : memref<16x4xf32, #tpu.memory_space<vmem>>, vector<16x4xf32>,
      %cst_85 = arith.constant 0.000000e+00 : f32
      %144 = vector.broadcast %cst_85 : f32 to vector<16x4xf32>
      %c0_86 = arith.constant 0 : index
      %c0_87 = arith.constant 0 : index
      %145 = vector.load %arg9[%c0_86, %c0_87] : memref<16x4xf32, #tpu.memory_space<vmem>>, vector<16x4xf32>
      tpu.vector_store %arg9[%c0_86, %c0_87], %144 {strides = array<i32>} : memref<16x4xf32, #tpu.memory_space<vmem>>, vector<16x4xf32>,
      %cst_88 = arith.constant 0.000000e+00 : f32
      %146 = vector.broadcast %cst_88 : f32 to vector<4x16x32xf32>
      %c0_89 = arith.constant 0 : index
      %c0_90 = arith.constant 0 : index
      %c0_91 = arith.constant 0 : index
      %147 = vector.load %arg10[%c0_89, %c0_90, %c0_91] : memref<4x16x32xf32, #tpu.memory_space<vmem>>, vector<4x16x32xf32>
      tpu.vector_store %arg10[%c0_89, %c0_90, %c0_91], %146 {strides = array<i32>} : memref<4x16x32xf32, #tpu.memory_space<vmem>>, vector<4x16x32xf32>,
    } else {
    }
    %c0 = arith.constant 0 : index
    %c0_1 = arith.constant 0 : index
    %c0_2 = arith.constant 0 : index
    %3 = vector.load %arg3[%c0, %c0_1, %c0_2] : memref<1x16x128xbf16, #tpu.memory_space<vmem>>, vector<1x16x128xbf16>
    %4 = vector.shape_cast %3 : vector<1x16x128xbf16> to vector<16x128xbf16>
    %c0_3 = arith.constant 0 : index
    %c0_4 = arith.constant 0 : index
    %c0_5 = arith.constant 0 : index
    %5 = vector.load %arg4[%c0_3, %c0_4, %c0_5] : memref<1x16x128xbf16, #tpu.memory_space<vmem>>, vector<1x16x128xbf16>
    %6 = vector.shape_cast %5 : vector<1x16x128xbf16> to vector<16x128xbf16>
    %c0_6 = arith.constant 0 : index
    %c0_7 = arith.constant 0 : index
    %c0_8 = arith.constant 0 : index
    %7 = vector.load %arg5[%c0_6, %c0_7, %c0_8] : memref<1x16x128xbf16, #tpu.memory_space<vmem>>, vector<1x16x128xbf16>
    %8 = vector.shape_cast %7 : vector<1x16x128xbf16> to vector<16x128xbf16>
    %c0_9 = arith.constant 0 : index
    %c0_10 = arith.constant 0 : index
    %c0_11 = arith.constant 0 : index
    %9 = vector.load %arg6[%c0_9, %c0_10, %c0_11] : memref<1x1x16xf32, #tpu.memory_space<vmem>>, vector<1x1x16xf32>
    %10 = vector.shape_cast %9 : vector<1x1x16xf32> to vector<1x16xf32>
    %11 = vector.extract_strided_slice %4 {offsets = [0, 0], sizes = [16, 32], strides = [1, 1]} : vector<16x128xbf16> to vector<16x32xbf16>
    %12 = vector.extract_strided_slice %6 {offsets = [0, 0], sizes = [16, 32], strides = [1, 1]} : vector<16x128xbf16> to vector<16x32xbf16>
    %cst = arith.constant dense<0.000000e+00> : vector<16x16xf32>
    %13 = tpu.matmul %11, %12, %cst {dimension_numbers = #tpu.dot_dimension_numbers<[1], [1], [0], [0], [0, 0, 1, 0], [], []>} : vector<16x32xbf16>, vector<16x32xbf16>, vector<16x16xf32> -> vector<16x16xf32>
    %14 = vector.broadcast %10 : vector<1x16xf32> to vector<16x16xf32>
    %15 = arith.addf %13, %14 : vector<16x16xf32>
    %c0_12 = arith.constant 0 : index
    %c0_13 = arith.constant 0 : index
    %16 = vector.load %arg8[%c0_12, %c0_13] : memref<16x4xf32, #tpu.memory_space<vmem>>, vector<16x1xf32>
    %cst_14 = arith.constant dense<0xFF800000> : vector<16xf32>
    %17 = vector.multi_reduction <maximumf>, %15, %cst_14 [1] : vector<16x16xf32> to vector<16xf32>
    %18 = vector.shape_cast %17 : vector<16xf32> to vector<16x1xf32>
    %19 = arith.maximumf %16, %18 : vector<16x1xf32>
    %20 = arith.subf %16, %19 : vector<16x1xf32>
    %21 = math.exp %20 : vector<16x1xf32>
    %22 = vector.broadcast %19 : vector<16x1xf32> to vector<16x16xf32>
    %23 = arith.subf %15, %22 : vector<16x16xf32>
    %24 = math.exp %23 : vector<16x16xf32>
    %c0_15 = arith.constant 0 : index
    %c0_16 = arith.constant 0 : index
    %25 = vector.load %arg9[%c0_15, %c0_16] : memref<16x4xf32, #tpu.memory_space<vmem>>, vector<16x1xf32>
    %26 = arith.mulf %21, %25 : vector<16x1xf32>
    %cst_17 = arith.constant dense<0.000000e+00> : vector<16xf32>
    %27 = vector.multi_reduction <add>, %24, %cst_17 [1] : vector<16x16xf32> to vector<16xf32>
    %28 = vector.shape_cast %27 : vector<16xf32> to vector<16x1xf32>
    %29 = arith.addf %26, %28 : vector<16x1xf32>
    %c0_18 = arith.constant 0 : index
    %c0_19 = arith.constant 0 : index
    %30 = vector.load %arg9[%c0_18, %c0_19] : memref<16x4xf32, #tpu.memory_space<vmem>>, vector<16x1xf32>
    tpu.vector_store %arg9[%c0_18, %c0_19], %29 {strides = array<i32>} : memref<16x4xf32, #tpu.memory_space<vmem>>, vector<16x1xf32>,
    %c0_20 = arith.constant 0 : index
    %c0_21 = arith.constant 0 : index
    %c0_22 = arith.constant 0 : index
    %31 = vector.load %arg10[%c0_20, %c0_21, %c0_22] : memref<4x16x32xf32, #tpu.memory_space<vmem>>, vector<1x16x32xf32>
    %32 = vector.shape_cast %31 : vector<1x16x32xf32> to vector<16x32xf32>
    %33 = vector.broadcast %21 : vector<16x1xf32> to vector<16x32xf32>
    %34 = arith.mulf %33, %32 : vector<16x32xf32>
    %35 = arith.truncf %24 : vector<16x16xf32> to vector<16x16xbf16>
    %36 = vector.extract_strided_slice %8 {offsets = [0, 0], sizes = [16, 32], strides = [1, 1]} : vector<16x128xbf16> to vector<16x32xbf16>
    %cst_23 = arith.constant dense<0.000000e+00> : vector<16x32xf32>
    %37 = tpu.matmul %35, %36, %cst_23 {dimension_numbers = #tpu.dot_dimension_numbers<[1], [0], [0], [1], [0, 0, 1, 1], [], []>} : vector<16x16xbf16>, vector<16x32xbf16>, vector<16x32xf32> -> vector<16x32xf32>
    %38 = arith.addf %34, %37 : vector<16x32xf32>
    %c0_24 = arith.constant 0 : index
    %c0_25 = arith.constant 0 : index
    %c0_26 = arith.constant 0 : index
    %39 = vector.load %arg10[%c0_24, %c0_25, %c0_26] : memref<4x16x32xf32, #tpu.memory_space<vmem>>, vector<1x16x32xf32>
    %40 = vector.shape_cast %39 : vector<1x16x32xf32> to vector<16x32xf32>
    %41 = vector.shape_cast %38 : vector<16x32xf32> to vector<1x16x32xf32>
    tpu.vector_store %arg10[%c0_24, %c0_25, %c0_26], %41 {strides = array<i32>} : memref<4x16x32xf32, #tpu.memory_space<vmem>>, vector<1x16x32xf32>,
    %c0_27 = arith.constant 0 : index
    %c0_28 = arith.constant 0 : index
    %42 = vector.load %arg8[%c0_27, %c0_28] : memref<16x4xf32, #tpu.memory_space<vmem>>, vector<16x1xf32>
    tpu.vector_store %arg8[%c0_27, %c0_28], %19 {strides = array<i32>} : memref<16x4xf32, #tpu.memory_space<vmem>>, vector<16x1xf32>,
    %43 = vector.extract_strided_slice %4 {offsets = [0, 32], sizes = [16, 32], strides = [1, 1]} : vector<16x128xbf16> to vector<16x32xbf16>
    %44 = vector.extract_strided_slice %6 {offsets = [0, 32], sizes = [16, 32], strides = [1, 1]} : vector<16x128xbf16> to vector<16x32xbf16>
    %cst_29 = arith.constant dense<0.000000e+00> : vector<16x16xf32>
    %45 = tpu.matmul %43, %44, %cst_29 {dimension_numbers = #tpu.dot_dimension_numbers<[1], [1], [0], [0], [0, 0, 1, 0], [], []>} : vector<16x32xbf16>, vector<16x32xbf16>, vector<16x16xf32> -> vector<16x16xf32>
    %46 = vector.broadcast %10 : vector<1x16xf32> to vector<16x16xf32>
    %47 = arith.addf %45, %46 : vector<16x16xf32>
    %c0_30 = arith.constant 0 : index
    %c1 = arith.constant 1 : index
    %48 = vector.load %arg8[%c0_30, %c1] : memref<16x4xf32, #tpu.memory_space<vmem>>, vector<16x1xf32>
    %cst_31 = arith.constant dense<0xFF800000> : vector<16xf32>
    %49 = vector.multi_reduction <maximumf>, %47, %cst_31 [1] : vector<16x16xf32> to vector<16xf32>
    %50 = vector.shape_cast %49 : vector<16xf32> to vector<16x1xf32>
    %51 = arith.maximumf %48, %50 : vector<16x1xf32>
    %52 = arith.subf %48, %51 : vector<16x1xf32>
    %53 = math.exp %52 : vector<16x1xf32>
    %54 = vector.broadcast %51 : vector<16x1xf32> to vector<16x16xf32>
    %55 = arith.subf %47, %54 : vector<16x16xf32>
    %56 = math.exp %55 : vector<16x16xf32>
    %c0_32 = arith.constant 0 : index
    %c1_33 = arith.constant 1 : index
    %57 = vector.load %arg9[%c0_32, %c1_33] : memref<16x4xf32, #tpu.memory_space<vmem>>, vector<16x1xf32>
    %58 = arith.mulf %53, %57 : vector<16x1xf32>
    %cst_34 = arith.constant dense<0.000000e+00> : vector<16xf32>
    %59 = vector.multi_reduction <add>, %56, %cst_34 [1] : vector<16x16xf32> to vector<16xf32>
    %60 = vector.shape_cast %59 : vector<16xf32> to vector<16x1xf32>
    %61 = arith.addf %58, %60 : vector<16x1xf32>
    %c0_35 = arith.constant 0 : index
    %c1_36 = arith.constant 1 : index
    %62 = vector.load %arg9[%c0_35, %c1_36] : memref<16x4xf32, #tpu.memory_space<vmem>>, vector<16x1xf32>
    tpu.vector_store %arg9[%c0_35, %c1_36], %61 {strides = array<i32>} : memref<16x4xf32, #tpu.memory_space<vmem>>, vector<16x1xf32>,
    %c1_37 = arith.constant 1 : index
    %c0_38 = arith.constant 0 : index
    %c0_39 = arith.constant 0 : index
    %63 = vector.load %arg10[%c1_37, %c0_38, %c0_39] : memref<4x16x32xf32, #tpu.memory_space<vmem>>, vector<1x16x32xf32>
    %64 = vector.shape_cast %63 : vector<1x16x32xf32> to vector<16x32xf32>
    %65 = vector.broadcast %53 : vector<16x1xf32> to vector<16x32xf32>
    %66 = arith.mulf %65, %64 : vector<16x32xf32>
    %67 = arith.truncf %56 : vector<16x16xf32> to vector<16x16xbf16>
    %68 = vector.extract_strided_slice %8 {offsets = [0, 32], sizes = [16, 32], strides = [1, 1]} : vector<16x128xbf16> to vector<16x32xbf16>
    %cst_40 = arith.constant dense<0.000000e+00> : vector<16x32xf32>
    %69 = tpu.matmul %67, %68, %cst_40 {dimension_numbers = #tpu.dot_dimension_numbers<[1], [0], [0], [1], [0, 0, 1, 1], [], []>} : vector<16x16xbf16>, vector<16x32xbf16>, vector<16x32xf32> -> vector<16x32xf32>
    %70 = arith.addf %66, %69 : vector<16x32xf32>
    %c1_41 = arith.constant 1 : index
    %c0_42 = arith.constant 0 : index
    %c0_43 = arith.constant 0 : index
    %71 = vector.load %arg10[%c1_41, %c0_42, %c0_43] : memref<4x16x32xf32, #tpu.memory_space<vmem>>, vector<1x16x32xf32>
    %72 = vector.shape_cast %71 : vector<1x16x32xf32> to vector<16x32xf32>
    %73 = vector.shape_cast %70 : vector<16x32xf32> to vector<1x16x32xf32>
    tpu.vector_store %arg10[%c1_41, %c0_42, %c0_43], %73 {strides = array<i32>} : memref<4x16x32xf32, #tpu.memory_space<vmem>>, vector<1x16x32xf32>,
    %c0_44 = arith.constant 0 : index
    %c1_45 = arith.constant 1 : index
    %74 = vector.load %arg8[%c0_44, %c1_45] : memref<16x4xf32, #tpu.memory_space<vmem>>, vector<16x1xf32>
    tpu.vector_store %arg8[%c0_44, %c1_45], %51 {strides = array<i32>} : memref<16x4xf32, #tpu.memory_space<vmem>>, vector<16x1xf32>,
    %75 = vector.extract_strided_slice %4 {offsets = [0, 64], sizes = [16, 32], strides = [1, 1]} : vector<16x128xbf16> to vector<16x32xbf16>
    %76 = vector.extract_strided_slice %6 {offsets = [0, 64], sizes = [16, 32], strides = [1, 1]} : vector<16x128xbf16> to vector<16x32xbf16>
    %cst_46 = arith.constant dense<0.000000e+00> : vector<16x16xf32>
    %77 = tpu.matmul %75, %76, %cst_46 {dimension_numbers = #tpu.dot_dimension_numbers<[1], [1], [0], [0], [0, 0, 1, 0], [], []>} : vector<16x32xbf16>, vector<16x32xbf16>, vector<16x16xf32> -> vector<16x16xf32>
    %78 = vector.broadcast %10 : vector<1x16xf32> to vector<16x16xf32>
    %79 = arith.addf %77, %78 : vector<16x16xf32>
    %c0_47 = arith.constant 0 : index
    %c2 = arith.constant 2 : index
    %80 = vector.load %arg8[%c0_47, %c2] : memref<16x4xf32, #tpu.memory_space<vmem>>, vector<16x1xf32>
    %cst_48 = arith.constant dense<0xFF800000> : vector<16xf32>
    %81 = vector.multi_reduction <maximumf>, %79, %cst_48 [1] : vector<16x16xf32> to vector<16xf32>
    %82 = vector.shape_cast %81 : vector<16xf32> to vector<16x1xf32>
    %83 = arith.maximumf %80, %82 : vector<16x1xf32>
    %84 = arith.subf %80, %83 : vector<16x1xf32>
    %85 = math.exp %84 : vector<16x1xf32>
    %86 = vector.broadcast %83 : vector<16x1xf32> to vector<16x16xf32>
    %87 = arith.subf %79, %86 : vector<16x16xf32>
    %88 = math.exp %87 : vector<16x16xf32>
    %c0_49 = arith.constant 0 : index
    %c2_50 = arith.constant 2 : index
    %89 = vector.load %arg9[%c0_49, %c2_50] : memref<16x4xf32, #tpu.memory_space<vmem>>, vector<16x1xf32>
    %90 = arith.mulf %85, %89 : vector<16x1xf32>
    %cst_51 = arith.constant dense<0.000000e+00> : vector<16xf32>
    %91 = vector.multi_reduction <add>, %88, %cst_51 [1] : vector<16x16xf32> to vector<16xf32>
    %92 = vector.shape_cast %91 : vector<16xf32> to vector<16x1xf32>
    %93 = arith.addf %90, %92 : vector<16x1xf32>
    %c0_52 = arith.constant 0 : index
    %c2_53 = arith.constant 2 : index
    %94 = vector.load %arg9[%c0_52, %c2_53] : memref<16x4xf32, #tpu.memory_space<vmem>>, vector<16x1xf32>
    tpu.vector_store %arg9[%c0_52, %c2_53], %93 {strides = array<i32>} : memref<16x4xf32, #tpu.memory_space<vmem>>, vector<16x1xf32>,
    %c2_54 = arith.constant 2 : index
    %c0_55 = arith.constant 0 : index
    %c0_56 = arith.constant 0 : index
    %95 = vector.load %arg10[%c2_54, %c0_55, %c0_56] : memref<4x16x32xf32, #tpu.memory_space<vmem>>, vector<1x16x32xf32>
    %96 = vector.shape_cast %95 : vector<1x16x32xf32> to vector<16x32xf32>
    %97 = vector.broadcast %85 : vector<16x1xf32> to vector<16x32xf32>
    %98 = arith.mulf %97, %96 : vector<16x32xf32>
    %99 = arith.truncf %88 : vector<16x16xf32> to vector<16x16xbf16>
    %100 = vector.extract_strided_slice %8 {offsets = [0, 64], sizes = [16, 32], strides = [1, 1]} : vector<16x128xbf16> to vector<16x32xbf16>
    %cst_57 = arith.constant dense<0.000000e+00> : vector<16x32xf32>
    %101 = tpu.matmul %99, %100, %cst_57 {dimension_numbers = #tpu.dot_dimension_numbers<[1], [0], [0], [1], [0, 0, 1, 1], [], []>} : vector<16x16xbf16>, vector<16x32xbf16>, vector<16x32xf32> -> vector<16x32xf32>
    %102 = arith.addf %98, %101 : vector<16x32xf32>
    %c2_58 = arith.constant 2 : index
    %c0_59 = arith.constant 0 : index
    %c0_60 = arith.constant 0 : index
    %103 = vector.load %arg10[%c2_58, %c0_59, %c0_60] : memref<4x16x32xf32, #tpu.memory_space<vmem>>, vector<1x16x32xf32>
    %104 = vector.shape_cast %103 : vector<1x16x32xf32> to vector<16x32xf32>
    %105 = vector.shape_cast %102 : vector<16x32xf32> to vector<1x16x32xf32>
    tpu.vector_store %arg10[%c2_58, %c0_59, %c0_60], %105 {strides = array<i32>} : memref<4x16x32xf32, #tpu.memory_space<vmem>>, vector<1x16x32xf32>,
    %c0_61 = arith.constant 0 : index
    %c2_62 = arith.constant 2 : index
    %106 = vector.load %arg8[%c0_61, %c2_62] : memref<16x4xf32, #tpu.memory_space<vmem>>, vector<16x1xf32>
    tpu.vector_store %arg8[%c0_61, %c2_62], %83 {strides = array<i32>} : memref<16x4xf32, #tpu.memory_space<vmem>>, vector<16x1xf32>,
    %107 = vector.extract_strided_slice %4 {offsets = [0, 96], sizes = [16, 32], strides = [1, 1]} : vector<16x128xbf16> to vector<16x32xbf16>
    %108 = vector.extract_strided_slice %6 {offsets = [0, 96], sizes = [16, 32], strides = [1, 1]} : vector<16x128xbf16> to vector<16x32xbf16>
    %cst_63 = arith.constant dense<0.000000e+00> : vector<16x16xf32>
    %109 = tpu.matmul %107, %108, %cst_63 {dimension_numbers = #tpu.dot_dimension_numbers<[1], [1], [0], [0], [0, 0, 1, 0], [], []>} : vector<16x32xbf16>, vector<16x32xbf16>, vector<16x16xf32> -> vector<16x16xf32>
    %110 = vector.broadcast %10 : vector<1x16xf32> to vector<16x16xf32>
    %111 = arith.addf %109, %110 : vector<16x16xf32>
    %c0_64 = arith.constant 0 : index
    %c3 = arith.constant 3 : index
    %112 = vector.load %arg8[%c0_64, %c3] : memref<16x4xf32, #tpu.memory_space<vmem>>, vector<16x1xf32>
    %cst_65 = arith.constant dense<0xFF800000> : vector<16xf32>
    %113 = vector.multi_reduction <maximumf>, %111, %cst_65 [1] : vector<16x16xf32> to vector<16xf32>
    %114 = vector.shape_cast %113 : vector<16xf32> to vector<16x1xf32>
    %115 = arith.maximumf %112, %114 : vector<16x1xf32>
    %116 = arith.subf %112, %115 : vector<16x1xf32>
    %117 = math.exp %116 : vector<16x1xf32>
    %118 = vector.broadcast %115 : vector<16x1xf32> to vector<16x16xf32>
    %119 = arith.subf %111, %118 : vector<16x16xf32>
    %120 = math.exp %119 : vector<16x16xf32>
    %c0_66 = arith.constant 0 : index
    %c3_67 = arith.constant 3 : index
    %121 = vector.load %arg9[%c0_66, %c3_67] : memref<16x4xf32, #tpu.memory_space<vmem>>, vector<16x1xf32>
    %122 = arith.mulf %117, %121 : vector<16x1xf32>
    %cst_68 = arith.constant dense<0.000000e+00> : vector<16xf32>
    %123 = vector.multi_reduction <add>, %120, %cst_68 [1] : vector<16x16xf32> to vector<16xf32>
    %124 = vector.shape_cast %123 : vector<16xf32> to vector<16x1xf32>
    %125 = arith.addf %122, %124 : vector<16x1xf32>
    %c0_69 = arith.constant 0 : index
    %c3_70 = arith.constant 3 : index
    %126 = vector.load %arg9[%c0_69, %c3_70] : memref<16x4xf32, #tpu.memory_space<vmem>>, vector<16x1xf32>
    tpu.vector_store %arg9[%c0_69, %c3_70], %125 {strides = array<i32>} : memref<16x4xf32, #tpu.memory_space<vmem>>, vector<16x1xf32>,
    %c3_71 = arith.constant 3 : index
    %c0_72 = arith.constant 0 : index
    %c0_73 = arith.constant 0 : index
    %127 = vector.load %arg10[%c3_71, %c0_72, %c0_73] : memref<4x16x32xf32, #tpu.memory_space<vmem>>, vector<1x16x32xf32>
    %128 = vector.shape_cast %127 : vector<1x16x32xf32> to vector<16x32xf32>
    %129 = vector.broadcast %117 : vector<16x1xf32> to vector<16x32xf32>
    %130 = arith.mulf %129, %128 : vector<16x32xf32>
    %131 = arith.truncf %120 : vector<16x16xf32> to vector<16x16xbf16>
    %132 = vector.extract_strided_slice %8 {offsets = [0, 96], sizes = [16, 32], strides = [1, 1]} : vector<16x128xbf16> to vector<16x32xbf16>
    %cst_74 = arith.constant dense<0.000000e+00> : vector<16x32xf32>
    %133 = tpu.matmul %131, %132, %cst_74 {dimension_numbers = #tpu.dot_dimension_numbers<[1], [0], [0], [1], [0, 0, 1, 1], [], []>} : vector<16x16xbf16>, vector<16x32xbf16>, vector<16x32xf32> -> vector<16x32xf32>
    %134 = arith.addf %130, %133 : vector<16x32xf32>
    %c3_75 = arith.constant 3 : index
    %c0_76 = arith.constant 0 : index
    %c0_77 = arith.constant 0 : index
    %135 = vector.load %arg10[%c3_75, %c0_76, %c0_77] : memref<4x16x32xf32, #tpu.memory_space<vmem>>, vector<1x16x32xf32>
    %136 = vector.shape_cast %135 : vector<1x16x32xf32> to vector<16x32xf32>
    %137 = vector.shape_cast %134 : vector<16x32xf32> to vector<1x16x32xf32>
    tpu.vector_store %arg10[%c3_75, %c0_76, %c0_77], %137 {strides = array<i32>} : memref<4x16x32xf32, #tpu.memory_space<vmem>>, vector<1x16x32xf32>,
    %c0_78 = arith.constant 0 : index
    %c3_79 = arith.constant 3 : index
    %138 = vector.load %arg8[%c0_78, %c3_79] : memref<16x4xf32, #tpu.memory_space<vmem>>, vector<16x1xf32>
    tpu.vector_store %arg8[%c0_78, %c3_79], %115 {strides = array<i32>} : memref<16x4xf32, #tpu.memory_space<vmem>>, vector<16x1xf32>,
    %c0_i32_80 = arith.constant 0 : i32
    %139 = arith.cmpi eq, %arg2, %c0_i32_80 : i32
    %140 = arith.extui %139 : i1 to i32
    %c0_i32_81 = arith.constant 0 : i32
    %141 = arith.cmpi ne, %140, %c0_i32_81 : i32
    scf.if %141 {
      %c0_82 = arith.constant 0 : index
      %c0_83 = arith.constant 0 : index
      %142 = vector.load %arg9[%c0_82, %c0_83] : memref<16x4xf32, #tpu.memory_space<vmem>>, vector<16x1xf32>
      %143 = tpu.reciprocal %142 {approx = true} : vector<16x1xf32> -> vector<16x1xf32>
      %c0_84 = arith.constant 0 : index
      %c0_85 = arith.constant 0 : index
      %c0_86 = arith.constant 0 : index
      %144 = vector.load %arg10[%c0_84, %c0_85, %c0_86] : memref<4x16x32xf32, #tpu.memory_space<vmem>>, vector<1x16x32xf32>
      %145 = vector.shape_cast %144 : vector<1x16x32xf32> to vector<16x32xf32>
      %146 = vector.broadcast %143 : vector<16x1xf32> to vector<16x32xf32>
      %147 = arith.mulf %145, %146 : vector<16x32xf32>
      %c0_87 = arith.constant 0 : index
      %c1_88 = arith.constant 1 : index
      %148 = vector.load %arg9[%c0_87, %c1_88] : memref<16x4xf32, #tpu.memory_space<vmem>>, vector<16x1xf32>
      %149 = tpu.reciprocal %148 {approx = true} : vector<16x1xf32> -> vector<16x1xf32>
      %c1_89 = arith.constant 1 : index
      %c0_90 = arith.constant 0 : index
      %c0_91 = arith.constant 0 : index
      %150 = vector.load %arg10[%c1_89, %c0_90, %c0_91] : memref<4x16x32xf32, #tpu.memory_space<vmem>>, vector<1x16x32xf32>
      %151 = vector.shape_cast %150 : vector<1x16x32xf32> to vector<16x32xf32>
      %152 = vector.broadcast %149 : vector<16x1xf32> to vector<16x32xf32>
      %153 = arith.mulf %151, %152 : vector<16x32xf32>
      %c0_92 = arith.constant 0 : index
      %c2_93 = arith.constant 2 : index
      %154 = vector.load %arg9[%c0_92, %c2_93] : memref<16x4xf32, #tpu.memory_space<vmem>>, vector<16x1xf32>
      %155 = tpu.reciprocal %154 {approx = true} : vector<16x1xf32> -> vector<16x1xf32>
      %c2_94 = arith.constant 2 : index
      %c0_95 = arith.constant 0 : index
      %c0_96 = arith.constant 0 : index
      %156 = vector.load %arg10[%c2_94, %c0_95, %c0_96] : memref<4x16x32xf32, #tpu.memory_space<vmem>>, vector<1x16x32xf32>
      %157 = vector.shape_cast %156 : vector<1x16x32xf32> to vector<16x32xf32>
      %158 = vector.broadcast %155 : vector<16x1xf32> to vector<16x32xf32>
      %159 = arith.mulf %157, %158 : vector<16x32xf32>
      %c0_97 = arith.constant 0 : index
      %c3_98 = arith.constant 3 : index
      %160 = vector.load %arg9[%c0_97, %c3_98] : memref<16x4xf32, #tpu.memory_space<vmem>>, vector<16x1xf32>
      %161 = tpu.reciprocal %160 {approx = true} : vector<16x1xf32> -> vector<16x1xf32>
      %c3_99 = arith.constant 3 : index
      %c0_100 = arith.constant 0 : index
      %c0_101 = arith.constant 0 : index
      %162 = vector.load %arg10[%c3_99, %c0_100, %c0_101] : memref<4x16x32xf32, #tpu.memory_space<vmem>>, vector<1x16x32xf32>
      %163 = vector.shape_cast %162 : vector<1x16x32xf32> to vector<16x32xf32>
      %164 = vector.broadcast %161 : vector<16x1xf32> to vector<16x32xf32>
      %165 = arith.mulf %163, %164 : vector<16x32xf32>
      %166 = tpu.concatenate %147, %153, %159, %165 in 1 : vector<16x32xf32>, vector<16x32xf32>, vector<16x32xf32>, vector<16x32xf32> -> vector<16x128xf32>
      %167 = arith.truncf %166 : vector<16x128xf32> to vector<16x128xbf16>
      %c0_102 = arith.constant 0 : index
      %c0_103 = arith.constant 0 : index
      %c0_104 = arith.constant 0 : index
      %168 = vector.load %arg7[%c0_102, %c0_103, %c0_104] : memref<1x16x128xbf16, #tpu.memory_space<vmem>>, vector<1x16x128xbf16>
      %169 = vector.shape_cast %168 : vector<1x16x128xbf16> to vector<16x128xbf16>
      %170 = vector.shape_cast %167 : vector<16x128xbf16> to vector<1x16x128xbf16>
      tpu.vector_store %arg7[%c0_102, %c0_103, %c0_104], %170 {strides = array<i32>} : memref<1x16x128xbf16, #tpu.memory_space<vmem>>, vector<1x16x128xbf16>,
    } else {
    }
    return
  }
  func.func @transform_0(%arg0: i32, %arg1: i32, %arg2: i32) -> (i32, i32, i32) {
    %c0_i32 = arith.constant 0 : i32
    %c0_i32_0 = arith.constant 0 : i32
    return %arg0, %arg1, %c0_i32 : i32, i32, i32
  }
  func.func @transform_1(%arg0: i32, %arg1: i32, %arg2: i32) -> (i32, i32, i32) {
    %c1_i32 = arith.constant 1 : i32
    %c0_i32 = arith.constant 0 : i32
    return %arg0, %arg2, %c1_i32 : i32, i32, i32
  }
  func.func @transform_2(%arg0: i32, %arg1: i32, %arg2: i32) -> (i32, i32, i32) {
    %c2_i32 = arith.constant 2 : i32
    %c0_i32 = arith.constant 0 : i32
    return %arg0, %arg2, %c2_i32 : i32, i32, i32
  }
  func.func @transform_3(%arg0: i32, %arg1: i32, %arg2: i32) -> (i32, i32, i32) {
    %c0_i32 = arith.constant 0 : i32
    %c0_i32_0 = arith.constant 0 : i32
    return %arg0, %c0_i32, %arg2 : i32, i32, i32
  }
  func.func @transform_4(%arg0: i32, %arg1: i32, %arg2: i32) -> (i32, i32, i32) {
    %c0_i32 = arith.constant 0 : i32
    %c0_i32_0 = arith.constant 0 : i32
    return %arg0, %arg1, %c0_i32 : i32, i32, i32
  }
}

module attributes {stable_mosaic.version = 11 : i64} {
  func.func @_matmul_kernel(%arg0: i32, %arg1: i32, %arg2: i32, %arg3: memref<32x128xbf16, #tpu.memory_space<vmem>>, %arg4: memref<128x256xbf16, #tpu.memory_space<vmem>>, %arg5: memref<1x256xf32, #tpu.memory_space<vmem>>, %arg6: memref<32x256xbf16, #tpu.memory_space<vmem>>, %arg7: memref<32x256xf32, #tpu.memory_space<vmem>>) attributes {dimension_semantics = [#tpu.dimension_semantics<parallel>, #tpu.dimension_semantics<parallel>, #tpu.dimension_semantics<arbitrary>], iteration_bounds = array<i64: 1, 1, 1>, scalar_prefetch = 0 : i64, scratch_operands = 1 : i64, tpu.core_type = #tpu.core_type<tc>, window_params = [{transform_indices = @transform_0, window_bounds = array<i64: 32, 128>}, {transform_indices = @transform_1, window_bounds = array<i64: 128, 256>}, {transform_indices = @transform_2, window_bounds = array<i64: 1, 256>}, {transform_indices = @transform_3, window_bounds = array<i64: 32, 256>}]} {
    %c0_i32 = arith.constant 0 : i32
    %0 = arith.cmpi eq, %arg2, %c0_i32 : i32
    %1 = arith.extui %0 : i1 to i32
    %c0_i32_0 = arith.constant 0 : i32
    %2 = arith.cmpi ne, %1, %c0_i32_0 : i32
    scf.if %2 {
      %cst_10 = arith.constant 0.000000e+00 : f32
      %12 = vector.broadcast %cst_10 : f32 to vector<32x256xf32>
      %c0_11 = arith.constant 0 : index
      %c0_12 = arith.constant 0 : index
      %13 = vector.load %arg7[%c0_11, %c0_12] : memref<32x256xf32, #tpu.memory_space<vmem>>, vector<32x256xf32>
      tpu.vector_store %arg7[%c0_11, %c0_12], %12 {strides = array<i32>} : memref<32x256xf32, #tpu.memory_space<vmem>>, vector<32x256xf32>,
    } else {
    }
    %c0 = arith.constant 0 : index
    %c0_1 = arith.constant 0 : index
    %3 = vector.load %arg7[%c0, %c0_1] : memref<32x256xf32, #tpu.memory_space<vmem>>, vector<32x256xf32>
    %c0_2 = arith.constant 0 : index
    %c0_3 = arith.constant 0 : index
    %4 = vector.load %arg3[%c0_2, %c0_3] : memref<32x128xbf16, #tpu.memory_space<vmem>>, vector<32x128xbf16>
    %c0_4 = arith.constant 0 : index
    %c0_5 = arith.constant 0 : index
    %5 = vector.load %arg4[%c0_4, %c0_5] : memref<128x256xbf16, #tpu.memory_space<vmem>>, vector<128x256xbf16>
    %cst = arith.constant dense<0.000000e+00> : vector<32x256xf32>
    %6 = tpu.matmul %4, %5, %cst {dimension_numbers = #tpu.dot_dimension_numbers<[1], [0], [0], [1], [0, 0, 1, 1], [], []>} : vector<32x128xbf16>, vector<128x256xbf16>, vector<32x256xf32> -> vector<32x256xf32>
    %7 = arith.addf %3, %6 : vector<32x256xf32>
    %c0_6 = arith.constant 0 : index
    %c0_7 = arith.constant 0 : index
    %8 = vector.load %arg7[%c0_6, %c0_7] : memref<32x256xf32, #tpu.memory_space<vmem>>, vector<32x256xf32>
    tpu.vector_store %arg7[%c0_6, %c0_7], %7 {strides = array<i32>} : memref<32x256xf32, #tpu.memory_space<vmem>>, vector<32x256xf32>,
    %c0_i32_8 = arith.constant 0 : i32
    %9 = arith.cmpi eq, %arg2, %c0_i32_8 : i32
    %10 = arith.extui %9 : i1 to i32
    %c0_i32_9 = arith.constant 0 : i32
    %11 = arith.cmpi ne, %10, %c0_i32_9 : i32
    scf.if %11 {
      %c0_10 = arith.constant 0 : index
      %c0_11 = arith.constant 0 : index
      %12 = vector.load %arg7[%c0_10, %c0_11] : memref<32x256xf32, #tpu.memory_space<vmem>>, vector<32x256xf32>
      %c0_12 = arith.constant 0 : index
      %c0_13 = arith.constant 0 : index
      %13 = vector.load %arg5[%c0_12, %c0_13] : memref<1x256xf32, #tpu.memory_space<vmem>>, vector<1x256xf32>
      %14 = vector.broadcast %13 : vector<1x256xf32> to vector<32x256xf32>
      %15 = arith.addf %12, %14 : vector<32x256xf32>
      %cst_14 = arith.constant 5.000000e-01 : f32
      %16 = vector.broadcast %cst_14 : f32 to vector<32x256xf32>
      %17 = arith.mulf %16, %15 : vector<32x256xf32>
      %cst_15 = arith.constant 0.707106769 : f32
      %18 = vector.broadcast %cst_15 : f32 to vector<32x256xf32>
      %19 = arith.mulf %15, %18 : vector<32x256xf32>
      %cst_16 = arith.constant 0.000000e+00 : f32
      %20 = vector.broadcast %cst_16 : f32 to vector<32x256xf32>
      %21 = arith.cmpf oge, %19, %20 : vector<32x256xf32>
      %cst_17 = arith.constant 1.000000e+00 : f32
      %cst_18 = arith.constant -1.000000e+00 : f32
      %22 = vector.broadcast %cst_17 : f32 to vector<32x256xf32>
      %23 = vector.broadcast %cst_18 : f32 to vector<32x256xf32>
      %24 = arith.select %21, %22, %23 : vector<32x256xi1>, vector<32x256xf32>
      %25 = math.absf %19 : vector<32x256xf32>
      %cst_19 = arith.constant 0.327591091 : f32
      %26 = vector.broadcast %cst_19 : f32 to vector<32x256xf32>
      %27 = arith.mulf %26, %25 : vector<32x256xf32>
      %cst_20 = arith.constant 1.000000e+00 : f32
      %28 = vector.broadcast %cst_20 : f32 to vector<32x256xf32>
      %29 = arith.addf %28, %27 : vector<32x256xf32>
      %cst_21 = arith.constant 1.000000e+00 : f32
      %30 = vector.broadcast %cst_21 : f32 to vector<32x256xf32>
      %31 = arith.divf %30, %29 : vector<32x256xf32>
      %cst_22 = arith.constant 1.06140542 : f32
      %32 = vector.broadcast %cst_22 : f32 to vector<32x256xf32>
      %33 = arith.mulf %32, %31 : vector<32x256xf32>
      %cst_23 = arith.constant -1.45315206 : f32
      %34 = vector.broadcast %cst_23 : f32 to vector<32x256xf32>
      %35 = arith.addf %33, %34 : vector<32x256xf32>
      %36 = arith.mulf %35, %31 : vector<32x256xf32>
      %cst_24 = arith.constant 1.42141378 : f32
      %37 = vector.broadcast %cst_24 : f32 to vector<32x256xf32>
      %38 = arith.addf %36, %37 : vector<32x256xf32>
      %39 = arith.mulf %38, %31 : vector<32x256xf32>
      %cst_25 = arith.constant -0.284496725 : f32
      %40 = vector.broadcast %cst_25 : f32 to vector<32x256xf32>
      %41 = arith.addf %39, %40 : vector<32x256xf32>
      %42 = arith.mulf %41, %31 : vector<32x256xf32>
      %cst_26 = arith.constant 0.254829586 : f32
      %43 = vector.broadcast %cst_26 : f32 to vector<32x256xf32>
      %44 = arith.addf %42, %43 : vector<32x256xf32>
      %45 = arith.mulf %44, %31 : vector<32x256xf32>
      %cst_27 = arith.constant 0.000000e+00 : f32
      %46 = vector.broadcast %cst_27 : f32 to vector<32x256xf32>
      %47 = arith.subf %46, %25 : vector<32x256xf32>
      %48 = arith.mulf %47, %25 : vector<32x256xf32>
      %49 = math.exp %48 : vector<32x256xf32>
      %50 = arith.mulf %45, %49 : vector<32x256xf32>
      %cst_28 = arith.constant 1.000000e+00 : f32
      %51 = vector.broadcast %cst_28 : f32 to vector<32x256xf32>
      %52 = arith.subf %51, %50 : vector<32x256xf32>
      %53 = arith.mulf %24, %52 : vector<32x256xf32>
      %cst_29 = arith.constant 1.000000e+00 : f32
      %54 = vector.broadcast %cst_29 : f32 to vector<32x256xf32>
      %55 = arith.addf %54, %53 : vector<32x256xf32>
      %56 = arith.mulf %17, %55 : vector<32x256xf32>
      %57 = arith.truncf %56 : vector<32x256xf32> to vector<32x256xbf16>
      %c0_30 = arith.constant 0 : index
      %c0_31 = arith.constant 0 : index
      %58 = vector.load %arg6[%c0_30, %c0_31] : memref<32x256xbf16, #tpu.memory_space<vmem>>, vector<32x256xbf16>
      tpu.vector_store %arg6[%c0_30, %c0_31], %57 {strides = array<i32>} : memref<32x256xbf16, #tpu.memory_space<vmem>>, vector<32x256xbf16>,
    } else {
    }
    return
  }
  func.func @transform_0(%arg0: i32, %arg1: i32, %arg2: i32) -> (i32, i32) {
    %c0_i32 = arith.constant 0 : i32
    return %arg0, %arg2 : i32, i32
  }
  func.func @transform_1(%arg0: i32, %arg1: i32, %arg2: i32) -> (i32, i32) {
    %c0_i32 = arith.constant 0 : i32
    return %arg2, %arg1 : i32, i32
  }
  func.func @transform_2(%arg0: i32, %arg1: i32, %arg2: i32) -> (i32, i32) {
    %c0_i32 = arith.constant 0 : i32
    %c0_i32_0 = arith.constant 0 : i32
    return %c0_i32, %arg1 : i32, i32
  }
  func.func @transform_3(%arg0: i32, %arg1: i32, %arg2: i32) -> (i32, i32) {
    %c0_i32 = arith.constant 0 : i32
    return %arg0, %arg1 : i32, i32
  }
}

module attributes {stable_mosaic.version = 11 : i64} {
  func.func @_matmul_kernel(%arg0: i32, %arg1: i32, %arg2: i32, %arg3: memref<32x256xbf16, #tpu.memory_space<vmem>>, %arg4: memref<256x128xbf16, #tpu.memory_space<vmem>>, %arg5: memref<1x128xf32, #tpu.memory_space<vmem>>, %arg6: memref<32x128xf32, #tpu.memory_space<vmem>>, %arg7: memref<32x128xf32, #tpu.memory_space<vmem>>, %arg8: memref<32x128xf32, #tpu.memory_space<vmem>>) attributes {dimension_semantics = [#tpu.dimension_semantics<parallel>, #tpu.dimension_semantics<parallel>, #tpu.dimension_semantics<arbitrary>], iteration_bounds = array<i64: 1, 1, 1>, scalar_prefetch = 0 : i64, scratch_operands = 1 : i64, tpu.core_type = #tpu.core_type<tc>, window_params = [{transform_indices = @transform_0, window_bounds = array<i64: 32, 256>}, {transform_indices = @transform_1, window_bounds = array<i64: 256, 128>}, {transform_indices = @transform_2, window_bounds = array<i64: 1, 128>}, {transform_indices = @transform_3, window_bounds = array<i64: 32, 128>}, {transform_indices = @transform_4, window_bounds = array<i64: 32, 128>}]} {
    %c0_i32 = arith.constant 0 : i32
    %0 = arith.cmpi eq, %arg2, %c0_i32 : i32
    %1 = arith.extui %0 : i1 to i32
    %c0_i32_0 = arith.constant 0 : i32
    %2 = arith.cmpi ne, %1, %c0_i32_0 : i32
    scf.if %2 {
      %cst_10 = arith.constant 0.000000e+00 : f32
      %12 = vector.broadcast %cst_10 : f32 to vector<32x128xf32>
      %c0_11 = arith.constant 0 : index
      %c0_12 = arith.constant 0 : index
      %13 = vector.load %arg8[%c0_11, %c0_12] : memref<32x128xf32, #tpu.memory_space<vmem>>, vector<32x128xf32>
      tpu.vector_store %arg8[%c0_11, %c0_12], %12 {strides = array<i32>} : memref<32x128xf32, #tpu.memory_space<vmem>>, vector<32x128xf32>,
    } else {
    }
    %c0 = arith.constant 0 : index
    %c0_1 = arith.constant 0 : index
    %3 = vector.load %arg8[%c0, %c0_1] : memref<32x128xf32, #tpu.memory_space<vmem>>, vector<32x128xf32>
    %c0_2 = arith.constant 0 : index
    %c0_3 = arith.constant 0 : index
    %4 = vector.load %arg3[%c0_2, %c0_3] : memref<32x256xbf16, #tpu.memory_space<vmem>>, vector<32x256xbf16>
    %c0_4 = arith.constant 0 : index
    %c0_5 = arith.constant 0 : index
    %5 = vector.load %arg4[%c0_4, %c0_5] : memref<256x128xbf16, #tpu.memory_space<vmem>>, vector<256x128xbf16>
    %cst = arith.constant dense<0.000000e+00> : vector<32x128xf32>
    %6 = tpu.matmul %4, %5, %cst {dimension_numbers = #tpu.dot_dimension_numbers<[1], [0], [0], [1], [0, 0, 1, 1], [], []>} : vector<32x256xbf16>, vector<256x128xbf16>, vector<32x128xf32> -> vector<32x128xf32>
    %7 = arith.addf %3, %6 : vector<32x128xf32>
    %c0_6 = arith.constant 0 : index
    %c0_7 = arith.constant 0 : index
    %8 = vector.load %arg8[%c0_6, %c0_7] : memref<32x128xf32, #tpu.memory_space<vmem>>, vector<32x128xf32>
    tpu.vector_store %arg8[%c0_6, %c0_7], %7 {strides = array<i32>} : memref<32x128xf32, #tpu.memory_space<vmem>>, vector<32x128xf32>,
    %c0_i32_8 = arith.constant 0 : i32
    %9 = arith.cmpi eq, %arg2, %c0_i32_8 : i32
    %10 = arith.extui %9 : i1 to i32
    %c0_i32_9 = arith.constant 0 : i32
    %11 = arith.cmpi ne, %10, %c0_i32_9 : i32
    scf.if %11 {
      %c0_10 = arith.constant 0 : index
      %c0_11 = arith.constant 0 : index
      %12 = vector.load %arg8[%c0_10, %c0_11] : memref<32x128xf32, #tpu.memory_space<vmem>>, vector<32x128xf32>
      %c0_12 = arith.constant 0 : index
      %c0_13 = arith.constant 0 : index
      %13 = vector.load %arg5[%c0_12, %c0_13] : memref<1x128xf32, #tpu.memory_space<vmem>>, vector<1x128xf32>
      %14 = vector.broadcast %13 : vector<1x128xf32> to vector<32x128xf32>
      %15 = arith.addf %12, %14 : vector<32x128xf32>
      %c0_14 = arith.constant 0 : index
      %c0_15 = arith.constant 0 : index
      %16 = vector.load %arg6[%c0_14, %c0_15] : memref<32x128xf32, #tpu.memory_space<vmem>>, vector<32x128xf32>
      %17 = arith.addf %15, %16 : vector<32x128xf32>
      %c0_16 = arith.constant 0 : index
      %c0_17 = arith.constant 0 : index
      %18 = vector.load %arg7[%c0_16, %c0_17] : memref<32x128xf32, #tpu.memory_space<vmem>>, vector<32x128xf32>
      tpu.vector_store %arg7[%c0_16, %c0_17], %17 {strides = array<i32>} : memref<32x128xf32, #tpu.memory_space<vmem>>, vector<32x128xf32>,
    } else {
    }
    return
  }
  func.func @transform_0(%arg0: i32, %arg1: i32, %arg2: i32) -> (i32, i32) {
    %c0_i32 = arith.constant 0 : i32
    return %arg0, %arg2 : i32, i32
  }
  func.func @transform_1(%arg0: i32, %arg1: i32, %arg2: i32) -> (i32, i32) {
    %c0_i32 = arith.constant 0 : i32
    return %arg2, %arg1 : i32, i32
  }
  func.func @transform_2(%arg0: i32, %arg1: i32, %arg2: i32) -> (i32, i32) {
    %c0_i32 = arith.constant 0 : i32
    %c0_i32_0 = arith.constant 0 : i32
    return %c0_i32, %arg1 : i32, i32
  }
  func.func @transform_3(%arg0: i32, %arg1: i32, %arg2: i32) -> (i32, i32) {
    %c0_i32 = arith.constant 0 : i32
    return %arg0, %arg1 : i32, i32
  }
  func.func @transform_4(%arg0: i32, %arg1: i32, %arg2: i32) -> (i32, i32) {
    %c0_i32 = arith.constant 0 : i32
    return %arg0, %arg1 : i32, i32
  }
}

module attributes {stable_mosaic.version = 11 : i64} {
  func.func @_matmul_kernel(%arg0: i32, %arg1: i32, %arg2: i32, %arg3: memref<32x128xbf16, #tpu.memory_space<vmem>>, %arg4: memref<128x256xbf16, #tpu.memory_space<vmem>>, %arg5: memref<1x256xf32, #tpu.memory_space<vmem>>, %arg6: memref<32x256xbf16, #tpu.memory_space<vmem>>, %arg7: memref<32x256xf32, #tpu.memory_space<vmem>>) attributes {dimension_semantics = [#tpu.dimension_semantics<parallel>, #tpu.dimension_semantics<parallel>, #tpu.dimension_semantics<arbitrary>], iteration_bounds = array<i64: 1, 1, 1>, scalar_prefetch = 0 : i64, scratch_operands = 1 : i64, tpu.core_type = #tpu.core_type<tc>, window_params = [{transform_indices = @transform_0, window_bounds = array<i64: 32, 128>}, {transform_indices = @transform_1, window_bounds = array<i64: 128, 256>}, {transform_indices = @transform_2, window_bounds = array<i64: 1, 256>}, {transform_indices = @transform_3, window_bounds = array<i64: 32, 256>}]} {
    %c0_i32 = arith.constant 0 : i32
    %0 = arith.cmpi eq, %arg2, %c0_i32 : i32
    %1 = arith.extui %0 : i1 to i32
    %c0_i32_0 = arith.constant 0 : i32
    %2 = arith.cmpi ne, %1, %c0_i32_0 : i32
    scf.if %2 {
      %cst_10 = arith.constant 0.000000e+00 : f32
      %12 = vector.broadcast %cst_10 : f32 to vector<32x256xf32>
      %c0_11 = arith.constant 0 : index
      %c0_12 = arith.constant 0 : index
      %13 = vector.load %arg7[%c0_11, %c0_12] : memref<32x256xf32, #tpu.memory_space<vmem>>, vector<32x256xf32>
      tpu.vector_store %arg7[%c0_11, %c0_12], %12 {strides = array<i32>} : memref<32x256xf32, #tpu.memory_space<vmem>>, vector<32x256xf32>,
    } else {
    }
    %c0 = arith.constant 0 : index
    %c0_1 = arith.constant 0 : index
    %3 = vector.load %arg7[%c0, %c0_1] : memref<32x256xf32, #tpu.memory_space<vmem>>, vector<32x256xf32>
    %c0_2 = arith.constant 0 : index
    %c0_3 = arith.constant 0 : index
    %4 = vector.load %arg3[%c0_2, %c0_3] : memref<32x128xbf16, #tpu.memory_space<vmem>>, vector<32x128xbf16>
    %c0_4 = arith.constant 0 : index
    %c0_5 = arith.constant 0 : index
    %5 = vector.load %arg4[%c0_4, %c0_5] : memref<128x256xbf16, #tpu.memory_space<vmem>>, vector<128x256xbf16>
    %cst = arith.constant dense<0.000000e+00> : vector<32x256xf32>
    %6 = tpu.matmul %4, %5, %cst {dimension_numbers = #tpu.dot_dimension_numbers<[1], [0], [0], [1], [0, 0, 1, 1], [], []>} : vector<32x128xbf16>, vector<128x256xbf16>, vector<32x256xf32> -> vector<32x256xf32>
    %7 = arith.addf %3, %6 : vector<32x256xf32>
    %c0_6 = arith.constant 0 : index
    %c0_7 = arith.constant 0 : index
    %8 = vector.load %arg7[%c0_6, %c0_7] : memref<32x256xf32, #tpu.memory_space<vmem>>, vector<32x256xf32>
    tpu.vector_store %arg7[%c0_6, %c0_7], %7 {strides = array<i32>} : memref<32x256xf32, #tpu.memory_space<vmem>>, vector<32x256xf32>,
    %c0_i32_8 = arith.constant 0 : i32
    %9 = arith.cmpi eq, %arg2, %c0_i32_8 : i32
    %10 = arith.extui %9 : i1 to i32
    %c0_i32_9 = arith.constant 0 : i32
    %11 = arith.cmpi ne, %10, %c0_i32_9 : i32
    scf.if %11 {
      %c0_10 = arith.constant 0 : index
      %c0_11 = arith.constant 0 : index
      %12 = vector.load %arg7[%c0_10, %c0_11] : memref<32x256xf32, #tpu.memory_space<vmem>>, vector<32x256xf32>
      %c0_12 = arith.constant 0 : index
      %c0_13 = arith.constant 0 : index
      %13 = vector.load %arg5[%c0_12, %c0_13] : memref<1x256xf32, #tpu.memory_space<vmem>>, vector<1x256xf32>
      %14 = vector.broadcast %13 : vector<1x256xf32> to vector<32x256xf32>
      %15 = arith.addf %12, %14 : vector<32x256xf32>
      %16 = arith.truncf %15 : vector<32x256xf32> to vector<32x256xbf16>
      %c0_14 = arith.constant 0 : index
      %c0_15 = arith.constant 0 : index
      %17 = vector.load %arg6[%c0_14, %c0_15] : memref<32x256xbf16, #tpu.memory_space<vmem>>, vector<32x256xbf16>
      tpu.vector_store %arg6[%c0_14, %c0_15], %16 {strides = array<i32>} : memref<32x256xbf16, #tpu.memory_space<vmem>>, vector<32x256xbf16>,
    } else {
    }
    return
  }
  func.func @transform_0(%arg0: i32, %arg1: i32, %arg2: i32) -> (i32, i32) {
    %c0_i32 = arith.constant 0 : i32
    return %arg0, %arg2 : i32, i32
  }
  func.func @transform_1(%arg0: i32, %arg1: i32, %arg2: i32) -> (i32, i32) {
    %c0_i32 = arith.constant 0 : i32
    return %arg2, %arg1 : i32, i32
  }
  func.func @transform_2(%arg0: i32, %arg1: i32, %arg2: i32) -> (i32, i32) {
    %c0_i32 = arith.constant 0 : i32
    %c0_i32_0 = arith.constant 0 : i32
    return %c0_i32, %arg1 : i32, i32
  }
  func.func @transform_3(%arg0: i32, %arg1: i32, %arg2: i32) -> (i32, i32) {
    %c0_i32 = arith.constant 0 : i32
    return %arg0, %arg1 : i32, i32
  }
}

module attributes {stable_mosaic.version = 11 : i64} {
  func.func @_matmul_kernel(%arg0: i32, %arg1: i32, %arg2: i32, %arg3: memref<32x128xbf16, #tpu.memory_space<vmem>>, %arg4: memref<128x128xbf16, #tpu.memory_space<vmem>>, %arg5: memref<1x128xf32, #tpu.memory_space<vmem>>, %arg6: memref<32x128xbf16, #tpu.memory_space<vmem>>, %arg7: memref<32x128xf32, #tpu.memory_space<vmem>>) attributes {dimension_semantics = [#tpu.dimension_semantics<parallel>, #tpu.dimension_semantics<parallel>, #tpu.dimension_semantics<arbitrary>], iteration_bounds = array<i64: 1, 1, 1>, scalar_prefetch = 0 : i64, scratch_operands = 1 : i64, tpu.core_type = #tpu.core_type<tc>, window_params = [{transform_indices = @transform_0, window_bounds = array<i64: 32, 128>}, {transform_indices = @transform_1, window_bounds = array<i64: 128, 128>}, {transform_indices = @transform_2, window_bounds = array<i64: 1, 128>}, {transform_indices = @transform_3, window_bounds = array<i64: 32, 128>}]} {
    %c0_i32 = arith.constant 0 : i32
    %0 = arith.cmpi eq, %arg2, %c0_i32 : i32
    %1 = arith.extui %0 : i1 to i32
    %c0_i32_0 = arith.constant 0 : i32
    %2 = arith.cmpi ne, %1, %c0_i32_0 : i32
    scf.if %2 {
      %cst_10 = arith.constant 0.000000e+00 : f32
      %12 = vector.broadcast %cst_10 : f32 to vector<32x128xf32>
      %c0_11 = arith.constant 0 : index
      %c0_12 = arith.constant 0 : index
      %13 = vector.load %arg7[%c0_11, %c0_12] : memref<32x128xf32, #tpu.memory_space<vmem>>, vector<32x128xf32>
      tpu.vector_store %arg7[%c0_11, %c0_12], %12 {strides = array<i32>} : memref<32x128xf32, #tpu.memory_space<vmem>>, vector<32x128xf32>,
    } else {
    }
    %c0 = arith.constant 0 : index
    %c0_1 = arith.constant 0 : index
    %3 = vector.load %arg7[%c0, %c0_1] : memref<32x128xf32, #tpu.memory_space<vmem>>, vector<32x128xf32>
    %c0_2 = arith.constant 0 : index
    %c0_3 = arith.constant 0 : index
    %4 = vector.load %arg3[%c0_2, %c0_3] : memref<32x128xbf16, #tpu.memory_space<vmem>>, vector<32x128xbf16>
    %c0_4 = arith.constant 0 : index
    %c0_5 = arith.constant 0 : index
    %5 = vector.load %arg4[%c0_4, %c0_5] : memref<128x128xbf16, #tpu.memory_space<vmem>>, vector<128x128xbf16>
    %cst = arith.constant dense<0.000000e+00> : vector<32x128xf32>
    %6 = tpu.matmul %4, %5, %cst {dimension_numbers = #tpu.dot_dimension_numbers<[1], [0], [0], [1], [0, 0, 1, 1], [], []>} : vector<32x128xbf16>, vector<128x128xbf16>, vector<32x128xf32> -> vector<32x128xf32>
    %7 = arith.addf %3, %6 : vector<32x128xf32>
    %c0_6 = arith.constant 0 : index
    %c0_7 = arith.constant 0 : index
    %8 = vector.load %arg7[%c0_6, %c0_7] : memref<32x128xf32, #tpu.memory_space<vmem>>, vector<32x128xf32>
    tpu.vector_store %arg7[%c0_6, %c0_7], %7 {strides = array<i32>} : memref<32x128xf32, #tpu.memory_space<vmem>>, vector<32x128xf32>,
    %c0_i32_8 = arith.constant 0 : i32
    %9 = arith.cmpi eq, %arg2, %c0_i32_8 : i32
    %10 = arith.extui %9 : i1 to i32
    %c0_i32_9 = arith.constant 0 : i32
    %11 = arith.cmpi ne, %10, %c0_i32_9 : i32
    scf.if %11 {
      %c0_10 = arith.constant 0 : index
      %c0_11 = arith.constant 0 : index
      %12 = vector.load %arg7[%c0_10, %c0_11] : memref<32x128xf32, #tpu.memory_space<vmem>>, vector<32x128xf32>
      %c0_12 = arith.constant 0 : index
      %c0_13 = arith.constant 0 : index
      %13 = vector.load %arg5[%c0_12, %c0_13] : memref<1x128xf32, #tpu.memory_space<vmem>>, vector<1x128xf32>
      %14 = vector.broadcast %13 : vector<1x128xf32> to vector<32x128xf32>
      %15 = arith.addf %12, %14 : vector<32x128xf32>
      %16 = arith.truncf %15 : vector<32x128xf32> to vector<32x128xbf16>
      %c0_14 = arith.constant 0 : index
      %c0_15 = arith.constant 0 : index
      %17 = vector.load %arg6[%c0_14, %c0_15] : memref<32x128xbf16, #tpu.memory_space<vmem>>, vector<32x128xbf16>
      tpu.vector_store %arg6[%c0_14, %c0_15], %16 {strides = array<i32>} : memref<32x128xbf16, #tpu.memory_space<vmem>>, vector<32x128xbf16>,
    } else {
    }
    return
  }
  func.func @transform_0(%arg0: i32, %arg1: i32, %arg2: i32) -> (i32, i32) {
    %c0_i32 = arith.constant 0 : i32
    return %arg0, %arg2 : i32, i32
  }
  func.func @transform_1(%arg0: i32, %arg1: i32, %arg2: i32) -> (i32, i32) {
    %c0_i32 = arith.constant 0 : i32
    return %arg2, %arg1 : i32, i32
  }
  func.func @transform_2(%arg0: i32, %arg1: i32, %arg2: i32) -> (i32, i32) {
    %c0_i32 = arith.constant 0 : i32
    %c0_i32_0 = arith.constant 0 : i32
    return %c0_i32, %arg1 : i32, i32
  }
  func.func @transform_3(%arg0: i32, %arg1: i32, %arg2: i32) -> (i32, i32) {
    %c0_i32 = arith.constant 0 : i32
    return %arg0, %arg1 : i32, i32
  }
}

module attributes {stable_mosaic.version = 11 : i64} {
  func.func @_attention_kernel(%arg0: i32, %arg1: i32, %arg2: i32, %arg3: memref<1x16x128xbf16, #tpu.memory_space<vmem>>, %arg4: memref<1x16x128xbf16, #tpu.memory_space<vmem>>, %arg5: memref<1x16x128xbf16, #tpu.memory_space<vmem>>, %arg6: memref<1x1x16xf32, #tpu.memory_space<vmem>>, %arg7: memref<1x16x128xbf16, #tpu.memory_space<vmem>>, %arg8: memref<16x4xf32, #tpu.memory_space<vmem>>, %arg9: memref<16x4xf32, #tpu.memory_space<vmem>>, %arg10: memref<4x16x32xf32, #tpu.memory_space<vmem>>) attributes {dimension_semantics = [#tpu.dimension_semantics<parallel>, #tpu.dimension_semantics<parallel>, #tpu.dimension_semantics<arbitrary>], iteration_bounds = array<i64: 2, 1, 1>, scalar_prefetch = 0 : i64, scratch_operands = 3 : i64, tpu.core_type = #tpu.core_type<tc>, window_params = [{transform_indices = @transform_0, window_bounds = array<i64: 1, 16, 128>}, {transform_indices = @transform_1, window_bounds = array<i64: 1, 16, 128>}, {transform_indices = @transform_2, window_bounds = array<i64: 1, 16, 128>}, {transform_indices = @transform_3, window_bounds = array<i64: 1, 1, 16>}, {transform_indices = @transform_4, window_bounds = array<i64: 1, 16, 128>}]} {
    %c0_i32 = arith.constant 0 : i32
    %0 = arith.cmpi eq, %arg2, %c0_i32 : i32
    %1 = arith.extui %0 : i1 to i32
    %c0_i32_0 = arith.constant 0 : i32
    %2 = arith.cmpi ne, %1, %c0_i32_0 : i32
    scf.if %2 {
      %cst_85 = arith.constant -1.000000e+30 : f32
      %152 = vector.broadcast %cst_85 : f32 to vector<16x4xf32>
      %c0_86 = arith.constant 0 : index
      %c0_87 = arith.constant 0 : index
      %153 = vector.load %arg8[%c0_86, %c0_87] : memref<16x4xf32, #tpu.memory_space<vmem>>, vector<16x4xf32>
      tpu.vector_store %arg8[%c0_86, %c0_87], %152 {strides = array<i32>} : memref<16x4xf32, #tpu.memory_space<vmem>>, vector<16x4xf32>,
      %cst_88 = arith.constant 0.000000e+00 : f32
      %154 = vector.broadcast %cst_88 : f32 to vector<16x4xf32>
      %c0_89 = arith.constant 0 : index
      %c0_90 = arith.constant 0 : index
      %155 = vector.load %arg9[%c0_89, %c0_90] : memref<16x4xf32, #tpu.memory_space<vmem>>, vector<16x4xf32>
      tpu.vector_store %arg9[%c0_89, %c0_90], %154 {strides = array<i32>} : memref<16x4xf32, #tpu.memory_space<vmem>>, vector<16x4xf32>,
      %cst_91 = arith.constant 0.000000e+00 : f32
      %156 = vector.broadcast %cst_91 : f32 to vector<4x16x32xf32>
      %c0_92 = arith.constant 0 : index
      %c0_93 = arith.constant 0 : index
      %c0_94 = arith.constant 0 : index
      %157 = vector.load %arg10[%c0_92, %c0_93, %c0_94] : memref<4x16x32xf32, #tpu.memory_space<vmem>>, vector<4x16x32xf32>
      tpu.vector_store %arg10[%c0_92, %c0_93, %c0_94], %156 {strides = array<i32>} : memref<4x16x32xf32, #tpu.memory_space<vmem>>, vector<4x16x32xf32>,
    } else {
    }
    %c0 = arith.constant 0 : index
    %c0_1 = arith.constant 0 : index
    %c0_2 = arith.constant 0 : index
    %3 = vector.load %arg3[%c0, %c0_1, %c0_2] : memref<1x16x128xbf16, #tpu.memory_space<vmem>>, vector<1x16x128xbf16>
    %4 = vector.shape_cast %3 : vector<1x16x128xbf16> to vector<16x128xbf16>
    %c0_3 = arith.constant 0 : index
    %c0_4 = arith.constant 0 : index
    %c0_5 = arith.constant 0 : index
    %5 = vector.load %arg4[%c0_3, %c0_4, %c0_5] : memref<1x16x128xbf16, #tpu.memory_space<vmem>>, vector<1x16x128xbf16>
    %6 = vector.shape_cast %5 : vector<1x16x128xbf16> to vector<16x128xbf16>
    %c0_6 = arith.constant 0 : index
    %c0_7 = arith.constant 0 : index
    %c0_8 = arith.constant 0 : index
    %7 = vector.load %arg5[%c0_6, %c0_7, %c0_8] : memref<1x16x128xbf16, #tpu.memory_space<vmem>>, vector<1x16x128xbf16>
    %8 = vector.shape_cast %7 : vector<1x16x128xbf16> to vector<16x128xbf16>
    %c0_9 = arith.constant 0 : index
    %c0_10 = arith.constant 0 : index
    %c0_11 = arith.constant 0 : index
    %9 = vector.load %arg6[%c0_9, %c0_10, %c0_11] : memref<1x1x16xf32, #tpu.memory_space<vmem>>, vector<1x1x16xf32>
    %10 = vector.shape_cast %9 : vector<1x1x16xf32> to vector<1x16xf32>
    %c16_i32 = arith.constant 16 : i32
    %11 = arith.muli %arg1, %c16_i32 : i32
    %12 = tpu.iota {dimensions = array<i32: 0>} : vector<16x16xi32>
    %13 = vector.broadcast %11 : i32 to vector<16x16xi32>
    %14 = arith.addi %13, %12 : vector<16x16xi32>
    %c16_i32_12 = arith.constant 16 : i32
    %15 = arith.muli %arg2, %c16_i32_12 : i32
    %16 = tpu.iota {dimensions = array<i32: 1>} : vector<16x16xi32>
    %17 = vector.broadcast %15 : i32 to vector<16x16xi32>
    %18 = arith.addi %17, %16 : vector<16x16xi32>
    %19 = arith.cmpi sge, %14, %18 : vector<16x16xi32>
    %cst = arith.constant 0.000000e+00 : f32
    %cst_13 = arith.constant -1.000000e+30 : f32
    %20 = vector.broadcast %cst : f32 to vector<16x16xf32>
    %21 = vector.broadcast %cst_13 : f32 to vector<16x16xf32>
    %22 = arith.select %19, %20, %21 : vector<16x16xi1>, vector<16x16xf32>
    %23 = vector.broadcast %10 : vector<1x16xf32> to vector<16x16xf32>
    %24 = arith.addf %23, %22 : vector<16x16xf32>
    %25 = vector.extract_strided_slice %4 {offsets = [0, 0], sizes = [16, 32], strides = [1, 1]} : vector<16x128xbf16> to vector<16x32xbf16>
    %26 = vector.extract_strided_slice %6 {offsets = [0, 0], sizes = [16, 32], strides = [1, 1]} : vector<16x128xbf16> to vector<16x32xbf16>
    %cst_14 = arith.constant dense<0.000000e+00> : vector<16x16xf32>
    %27 = tpu.matmul %25, %26, %cst_14 {dimension_numbers = #tpu.dot_dimension_numbers<[1], [1], [0], [0], [0, 0, 1, 0], [], []>} : vector<16x32xbf16>, vector<16x32xbf16>, vector<16x16xf32> -> vector<16x16xf32>
    %28 = arith.addf %27, %24 : vector<16x16xf32>
    %c0_15 = arith.constant 0 : index
    %c0_16 = arith.constant 0 : index
    %29 = vector.load %arg8[%c0_15, %c0_16] : memref<16x4xf32, #tpu.memory_space<vmem>>, vector<16x1xf32>
    %cst_17 = arith.constant dense<0xFF800000> : vector<16xf32>
    %30 = vector.multi_reduction <maximumf>, %28, %cst_17 [1] : vector<16x16xf32> to vector<16xf32>
    %31 = vector.shape_cast %30 : vector<16xf32> to vector<16x1xf32>
    %32 = arith.maximumf %29, %31 : vector<16x1xf32>
    %33 = arith.subf %29, %32 : vector<16x1xf32>
    %34 = math.exp %33 : vector<16x1xf32>
    %35 = vector.broadcast %32 : vector<16x1xf32> to vector<16x16xf32>
    %36 = arith.subf %28, %35 : vector<16x16xf32>
    %37 = math.exp %36 : vector<16x16xf32>
    %c0_18 = arith.constant 0 : index
    %c0_19 = arith.constant 0 : index
    %38 = vector.load %arg9[%c0_18, %c0_19] : memref<16x4xf32, #tpu.memory_space<vmem>>, vector<16x1xf32>
    %39 = arith.mulf %34, %38 : vector<16x1xf32>
    %cst_20 = arith.constant dense<0.000000e+00> : vector<16xf32>
    %40 = vector.multi_reduction <add>, %37, %cst_20 [1] : vector<16x16xf32> to vector<16xf32>
    %41 = vector.shape_cast %40 : vector<16xf32> to vector<16x1xf32>
    %42 = arith.addf %39, %41 : vector<16x1xf32>
    %c0_21 = arith.constant 0 : index
    %c0_22 = arith.constant 0 : index
    %43 = vector.load %arg9[%c0_21, %c0_22] : memref<16x4xf32, #tpu.memory_space<vmem>>, vector<16x1xf32>
    tpu.vector_store %arg9[%c0_21, %c0_22], %42 {strides = array<i32>} : memref<16x4xf32, #tpu.memory_space<vmem>>, vector<16x1xf32>,
    %c0_23 = arith.constant 0 : index
    %c0_24 = arith.constant 0 : index
    %c0_25 = arith.constant 0 : index
    %44 = vector.load %arg10[%c0_23, %c0_24, %c0_25] : memref<4x16x32xf32, #tpu.memory_space<vmem>>, vector<1x16x32xf32>
    %45 = vector.shape_cast %44 : vector<1x16x32xf32> to vector<16x32xf32>
    %46 = vector.broadcast %34 : vector<16x1xf32> to vector<16x32xf32>
    %47 = arith.mulf %46, %45 : vector<16x32xf32>
    %48 = arith.truncf %37 : vector<16x16xf32> to vector<16x16xbf16>
    %49 = vector.extract_strided_slice %8 {offsets = [0, 0], sizes = [16, 32], strides = [1, 1]} : vector<16x128xbf16> to vector<16x32xbf16>
    %cst_26 = arith.constant dense<0.000000e+00> : vector<16x32xf32>
    %50 = tpu.matmul %48, %49, %cst_26 {dimension_numbers = #tpu.dot_dimension_numbers<[1], [0], [0], [1], [0, 0, 1, 1], [], []>} : vector<16x16xbf16>, vector<16x32xbf16>, vector<16x32xf32> -> vector<16x32xf32>
    %51 = arith.addf %47, %50 : vector<16x32xf32>
    %c0_27 = arith.constant 0 : index
    %c0_28 = arith.constant 0 : index
    %c0_29 = arith.constant 0 : index
    %52 = vector.load %arg10[%c0_27, %c0_28, %c0_29] : memref<4x16x32xf32, #tpu.memory_space<vmem>>, vector<1x16x32xf32>
    %53 = vector.shape_cast %52 : vector<1x16x32xf32> to vector<16x32xf32>
    %54 = vector.shape_cast %51 : vector<16x32xf32> to vector<1x16x32xf32>
    tpu.vector_store %arg10[%c0_27, %c0_28, %c0_29], %54 {strides = array<i32>} : memref<4x16x32xf32, #tpu.memory_space<vmem>>, vector<1x16x32xf32>,
    %c0_30 = arith.constant 0 : index
    %c0_31 = arith.constant 0 : index
    %55 = vector.load %arg8[%c0_30, %c0_31] : memref<16x4xf32, #tpu.memory_space<vmem>>, vector<16x1xf32>
    tpu.vector_store %arg8[%c0_30, %c0_31], %32 {strides = array<i32>} : memref<16x4xf32, #tpu.memory_space<vmem>>, vector<16x1xf32>,
    %56 = vector.extract_strided_slice %4 {offsets = [0, 32], sizes = [16, 32], strides = [1, 1]} : vector<16x128xbf16> to vector<16x32xbf16>
    %57 = vector.extract_strided_slice %6 {offsets = [0, 32], sizes = [16, 32], strides = [1, 1]} : vector<16x128xbf16> to vector<16x32xbf16>
    %cst_32 = arith.constant dense<0.000000e+00> : vector<16x16xf32>
    %58 = tpu.matmul %56, %57, %cst_32 {dimension_numbers = #tpu.dot_dimension_numbers<[1], [1], [0], [0], [0, 0, 1, 0], [], []>} : vector<16x32xbf16>, vector<16x32xbf16>, vector<16x16xf32> -> vector<16x16xf32>
    %59 = arith.addf %58, %24 : vector<16x16xf32>
    %c0_33 = arith.constant 0 : index
    %c1 = arith.constant 1 : index
    %60 = vector.load %arg8[%c0_33, %c1] : memref<16x4xf32, #tpu.memory_space<vmem>>, vector<16x1xf32>
    %cst_34 = arith.constant dense<0xFF800000> : vector<16xf32>
    %61 = vector.multi_reduction <maximumf>, %59, %cst_34 [1] : vector<16x16xf32> to vector<16xf32>
    %62 = vector.shape_cast %61 : vector<16xf32> to vector<16x1xf32>
    %63 = arith.maximumf %60, %62 : vector<16x1xf32>
    %64 = arith.subf %60, %63 : vector<16x1xf32>
    %65 = math.exp %64 : vector<16x1xf32>
    %66 = vector.broadcast %63 : vector<16x1xf32> to vector<16x16xf32>
    %67 = arith.subf %59, %66 : vector<16x16xf32>
    %68 = math.exp %67 : vector<16x16xf32>
    %c0_35 = arith.constant 0 : index
    %c1_36 = arith.constant 1 : index
    %69 = vector.load %arg9[%c0_35, %c1_36] : memref<16x4xf32, #tpu.memory_space<vmem>>, vector<16x1xf32>
    %70 = arith.mulf %65, %69 : vector<16x1xf32>
    %cst_37 = arith.constant dense<0.000000e+00> : vector<16xf32>
    %71 = vector.multi_reduction <add>, %68, %cst_37 [1] : vector<16x16xf32> to vector<16xf32>
    %72 = vector.shape_cast %71 : vector<16xf32> to vector<16x1xf32>
    %73 = arith.addf %70, %72 : vector<16x1xf32>
    %c0_38 = arith.constant 0 : index
    %c1_39 = arith.constant 1 : index
    %74 = vector.load %arg9[%c0_38, %c1_39] : memref<16x4xf32, #tpu.memory_space<vmem>>, vector<16x1xf32>
    tpu.vector_store %arg9[%c0_38, %c1_39], %73 {strides = array<i32>} : memref<16x4xf32, #tpu.memory_space<vmem>>, vector<16x1xf32>,
    %c1_40 = arith.constant 1 : index
    %c0_41 = arith.constant 0 : index
    %c0_42 = arith.constant 0 : index
    %75 = vector.load %arg10[%c1_40, %c0_41, %c0_42] : memref<4x16x32xf32, #tpu.memory_space<vmem>>, vector<1x16x32xf32>
    %76 = vector.shape_cast %75 : vector<1x16x32xf32> to vector<16x32xf32>
    %77 = vector.broadcast %65 : vector<16x1xf32> to vector<16x32xf32>
    %78 = arith.mulf %77, %76 : vector<16x32xf32>
    %79 = arith.truncf %68 : vector<16x16xf32> to vector<16x16xbf16>
    %80 = vector.extract_strided_slice %8 {offsets = [0, 32], sizes = [16, 32], strides = [1, 1]} : vector<16x128xbf16> to vector<16x32xbf16>
    %cst_43 = arith.constant dense<0.000000e+00> : vector<16x32xf32>
    %81 = tpu.matmul %79, %80, %cst_43 {dimension_numbers = #tpu.dot_dimension_numbers<[1], [0], [0], [1], [0, 0, 1, 1], [], []>} : vector<16x16xbf16>, vector<16x32xbf16>, vector<16x32xf32> -> vector<16x32xf32>
    %82 = arith.addf %78, %81 : vector<16x32xf32>
    %c1_44 = arith.constant 1 : index
    %c0_45 = arith.constant 0 : index
    %c0_46 = arith.constant 0 : index
    %83 = vector.load %arg10[%c1_44, %c0_45, %c0_46] : memref<4x16x32xf32, #tpu.memory_space<vmem>>, vector<1x16x32xf32>
    %84 = vector.shape_cast %83 : vector<1x16x32xf32> to vector<16x32xf32>
    %85 = vector.shape_cast %82 : vector<16x32xf32> to vector<1x16x32xf32>
    tpu.vector_store %arg10[%c1_44, %c0_45, %c0_46], %85 {strides = array<i32>} : memref<4x16x32xf32, #tpu.memory_space<vmem>>, vector<1x16x32xf32>,
    %c0_47 = arith.constant 0 : index
    %c1_48 = arith.constant 1 : index
    %86 = vector.load %arg8[%c0_47, %c1_48] : memref<16x4xf32, #tpu.memory_space<vmem>>, vector<16x1xf32>
    tpu.vector_store %arg8[%c0_47, %c1_48], %63 {strides = array<i32>} : memref<16x4xf32, #tpu.memory_space<vmem>>, vector<16x1xf32>,
    %87 = vector.extract_strided_slice %4 {offsets = [0, 64], sizes = [16, 32], strides = [1, 1]} : vector<16x128xbf16> to vector<16x32xbf16>
    %88 = vector.extract_strided_slice %6 {offsets = [0, 64], sizes = [16, 32], strides = [1, 1]} : vector<16x128xbf16> to vector<16x32xbf16>
    %cst_49 = arith.constant dense<0.000000e+00> : vector<16x16xf32>
    %89 = tpu.matmul %87, %88, %cst_49 {dimension_numbers = #tpu.dot_dimension_numbers<[1], [1], [0], [0], [0, 0, 1, 0], [], []>} : vector<16x32xbf16>, vector<16x32xbf16>, vector<16x16xf32> -> vector<16x16xf32>
    %90 = arith.addf %89, %24 : vector<16x16xf32>
    %c0_50 = arith.constant 0 : index
    %c2 = arith.constant 2 : index
    %91 = vector.load %arg8[%c0_50, %c2] : memref<16x4xf32, #tpu.memory_space<vmem>>, vector<16x1xf32>
    %cst_51 = arith.constant dense<0xFF800000> : vector<16xf32>
    %92 = vector.multi_reduction <maximumf>, %90, %cst_51 [1] : vector<16x16xf32> to vector<16xf32>
    %93 = vector.shape_cast %92 : vector<16xf32> to vector<16x1xf32>
    %94 = arith.maximumf %91, %93 : vector<16x1xf32>
    %95 = arith.subf %91, %94 : vector<16x1xf32>
    %96 = math.exp %95 : vector<16x1xf32>
    %97 = vector.broadcast %94 : vector<16x1xf32> to vector<16x16xf32>
    %98 = arith.subf %90, %97 : vector<16x16xf32>
    %99 = math.exp %98 : vector<16x16xf32>
    %c0_52 = arith.constant 0 : index
    %c2_53 = arith.constant 2 : index
    %100 = vector.load %arg9[%c0_52, %c2_53] : memref<16x4xf32, #tpu.memory_space<vmem>>, vector<16x1xf32>
    %101 = arith.mulf %96, %100 : vector<16x1xf32>
    %cst_54 = arith.constant dense<0.000000e+00> : vector<16xf32>
    %102 = vector.multi_reduction <add>, %99, %cst_54 [1] : vector<16x16xf32> to vector<16xf32>
    %103 = vector.shape_cast %102 : vector<16xf32> to vector<16x1xf32>
    %104 = arith.addf %101, %103 : vector<16x1xf32>
    %c0_55 = arith.constant 0 : index
    %c2_56 = arith.constant 2 : index
    %105 = vector.load %arg9[%c0_55, %c2_56] : memref<16x4xf32, #tpu.memory_space<vmem>>, vector<16x1xf32>
    tpu.vector_store %arg9[%c0_55, %c2_56], %104 {strides = array<i32>} : memref<16x4xf32, #tpu.memory_space<vmem>>, vector<16x1xf32>,
    %c2_57 = arith.constant 2 : index
    %c0_58 = arith.constant 0 : index
    %c0_59 = arith.constant 0 : index
    %106 = vector.load %arg10[%c2_57, %c0_58, %c0_59] : memref<4x16x32xf32, #tpu.memory_space<vmem>>, vector<1x16x32xf32>
    %107 = vector.shape_cast %106 : vector<1x16x32xf32> to vector<16x32xf32>
    %108 = vector.broadcast %96 : vector<16x1xf32> to vector<16x32xf32>
    %109 = arith.mulf %108, %107 : vector<16x32xf32>
    %110 = arith.truncf %99 : vector<16x16xf32> to vector<16x16xbf16>
    %111 = vector.extract_strided_slice %8 {offsets = [0, 64], sizes = [16, 32], strides = [1, 1]} : vector<16x128xbf16> to vector<16x32xbf16>
    %cst_60 = arith.constant dense<0.000000e+00> : vector<16x32xf32>
    %112 = tpu.matmul %110, %111, %cst_60 {dimension_numbers = #tpu.dot_dimension_numbers<[1], [0], [0], [1], [0, 0, 1, 1], [], []>} : vector<16x16xbf16>, vector<16x32xbf16>, vector<16x32xf32> -> vector<16x32xf32>
    %113 = arith.addf %109, %112 : vector<16x32xf32>
    %c2_61 = arith.constant 2 : index
    %c0_62 = arith.constant 0 : index
    %c0_63 = arith.constant 0 : index
    %114 = vector.load %arg10[%c2_61, %c0_62, %c0_63] : memref<4x16x32xf32, #tpu.memory_space<vmem>>, vector<1x16x32xf32>
    %115 = vector.shape_cast %114 : vector<1x16x32xf32> to vector<16x32xf32>
    %116 = vector.shape_cast %113 : vector<16x32xf32> to vector<1x16x32xf32>
    tpu.vector_store %arg10[%c2_61, %c0_62, %c0_63], %116 {strides = array<i32>} : memref<4x16x32xf32, #tpu.memory_space<vmem>>, vector<1x16x32xf32>,
    %c0_64 = arith.constant 0 : index
    %c2_65 = arith.constant 2 : index
    %117 = vector.load %arg8[%c0_64, %c2_65] : memref<16x4xf32, #tpu.memory_space<vmem>>, vector<16x1xf32>
    tpu.vector_store %arg8[%c0_64, %c2_65], %94 {strides = array<i32>} : memref<16x4xf32, #tpu.memory_space<vmem>>, vector<16x1xf32>,
    %118 = vector.extract_strided_slice %4 {offsets = [0, 96], sizes = [16, 32], strides = [1, 1]} : vector<16x128xbf16> to vector<16x32xbf16>
    %119 = vector.extract_strided_slice %6 {offsets = [0, 96], sizes = [16, 32], strides = [1, 1]} : vector<16x128xbf16> to vector<16x32xbf16>
    %cst_66 = arith.constant dense<0.000000e+00> : vector<16x16xf32>
    %120 = tpu.matmul %118, %119, %cst_66 {dimension_numbers = #tpu.dot_dimension_numbers<[1], [1], [0], [0], [0, 0, 1, 0], [], []>} : vector<16x32xbf16>, vector<16x32xbf16>, vector<16x16xf32> -> vector<16x16xf32>
    %121 = arith.addf %120, %24 : vector<16x16xf32>
    %c0_67 = arith.constant 0 : index
    %c3 = arith.constant 3 : index
    %122 = vector.load %arg8[%c0_67, %c3] : memref<16x4xf32, #tpu.memory_space<vmem>>, vector<16x1xf32>
    %cst_68 = arith.constant dense<0xFF800000> : vector<16xf32>
    %123 = vector.multi_reduction <maximumf>, %121, %cst_68 [1] : vector<16x16xf32> to vector<16xf32>
    %124 = vector.shape_cast %123 : vector<16xf32> to vector<16x1xf32>
    %125 = arith.maximumf %122, %124 : vector<16x1xf32>
    %126 = arith.subf %122, %125 : vector<16x1xf32>
    %127 = math.exp %126 : vector<16x1xf32>
    %128 = vector.broadcast %125 : vector<16x1xf32> to vector<16x16xf32>
    %129 = arith.subf %121, %128 : vector<16x16xf32>
    %130 = math.exp %129 : vector<16x16xf32>
    %c0_69 = arith.constant 0 : index
    %c3_70 = arith.constant 3 : index
    %131 = vector.load %arg9[%c0_69, %c3_70] : memref<16x4xf32, #tpu.memory_space<vmem>>, vector<16x1xf32>
    %132 = arith.mulf %127, %131 : vector<16x1xf32>
    %cst_71 = arith.constant dense<0.000000e+00> : vector<16xf32>
    %133 = vector.multi_reduction <add>, %130, %cst_71 [1] : vector<16x16xf32> to vector<16xf32>
    %134 = vector.shape_cast %133 : vector<16xf32> to vector<16x1xf32>
    %135 = arith.addf %132, %134 : vector<16x1xf32>
    %c0_72 = arith.constant 0 : index
    %c3_73 = arith.constant 3 : index
    %136 = vector.load %arg9[%c0_72, %c3_73] : memref<16x4xf32, #tpu.memory_space<vmem>>, vector<16x1xf32>
    tpu.vector_store %arg9[%c0_72, %c3_73], %135 {strides = array<i32>} : memref<16x4xf32, #tpu.memory_space<vmem>>, vector<16x1xf32>,
    %c3_74 = arith.constant 3 : index
    %c0_75 = arith.constant 0 : index
    %c0_76 = arith.constant 0 : index
    %137 = vector.load %arg10[%c3_74, %c0_75, %c0_76] : memref<4x16x32xf32, #tpu.memory_space<vmem>>, vector<1x16x32xf32>
    %138 = vector.shape_cast %137 : vector<1x16x32xf32> to vector<16x32xf32>
    %139 = vector.broadcast %127 : vector<16x1xf32> to vector<16x32xf32>
    %140 = arith.mulf %139, %138 : vector<16x32xf32>
    %141 = arith.truncf %130 : vector<16x16xf32> to vector<16x16xbf16>
    %142 = vector.extract_strided_slice %8 {offsets = [0, 96], sizes = [16, 32], strides = [1, 1]} : vector<16x128xbf16> to vector<16x32xbf16>
    %cst_77 = arith.constant dense<0.000000e+00> : vector<16x32xf32>
    %143 = tpu.matmul %141, %142, %cst_77 {dimension_numbers = #tpu.dot_dimension_numbers<[1], [0], [0], [1], [0, 0, 1, 1], [], []>} : vector<16x16xbf16>, vector<16x32xbf16>, vector<16x32xf32> -> vector<16x32xf32>
    %144 = arith.addf %140, %143 : vector<16x32xf32>
    %c3_78 = arith.constant 3 : index
    %c0_79 = arith.constant 0 : index
    %c0_80 = arith.constant 0 : index
    %145 = vector.load %arg10[%c3_78, %c0_79, %c0_80] : memref<4x16x32xf32, #tpu.memory_space<vmem>>, vector<1x16x32xf32>
    %146 = vector.shape_cast %145 : vector<1x16x32xf32> to vector<16x32xf32>
    %147 = vector.shape_cast %144 : vector<16x32xf32> to vector<1x16x32xf32>
    tpu.vector_store %arg10[%c3_78, %c0_79, %c0_80], %147 {strides = array<i32>} : memref<4x16x32xf32, #tpu.memory_space<vmem>>, vector<1x16x32xf32>,
    %c0_81 = arith.constant 0 : index
    %c3_82 = arith.constant 3 : index
    %148 = vector.load %arg8[%c0_81, %c3_82] : memref<16x4xf32, #tpu.memory_space<vmem>>, vector<16x1xf32>
    tpu.vector_store %arg8[%c0_81, %c3_82], %125 {strides = array<i32>} : memref<16x4xf32, #tpu.memory_space<vmem>>, vector<16x1xf32>,
    %c0_i32_83 = arith.constant 0 : i32
    %149 = arith.cmpi eq, %arg2, %c0_i32_83 : i32
    %150 = arith.extui %149 : i1 to i32
    %c0_i32_84 = arith.constant 0 : i32
    %151 = arith.cmpi ne, %150, %c0_i32_84 : i32
    scf.if %151 {
      %c0_85 = arith.constant 0 : index
      %c0_86 = arith.constant 0 : index
      %152 = vector.load %arg9[%c0_85, %c0_86] : memref<16x4xf32, #tpu.memory_space<vmem>>, vector<16x1xf32>
      %153 = tpu.reciprocal %152 {approx = true} : vector<16x1xf32> -> vector<16x1xf32>
      %c0_87 = arith.constant 0 : index
      %c0_88 = arith.constant 0 : index
      %c0_89 = arith.constant 0 : index
      %154 = vector.load %arg10[%c0_87, %c0_88, %c0_89] : memref<4x16x32xf32, #tpu.memory_space<vmem>>, vector<1x16x32xf32>
      %155 = vector.shape_cast %154 : vector<1x16x32xf32> to vector<16x32xf32>
      %156 = vector.broadcast %153 : vector<16x1xf32> to vector<16x32xf32>
      %157 = arith.mulf %155, %156 : vector<16x32xf32>
      %c0_90 = arith.constant 0 : index
      %c1_91 = arith.constant 1 : index
      %158 = vector.load %arg9[%c0_90, %c1_91] : memref<16x4xf32, #tpu.memory_space<vmem>>, vector<16x1xf32>
      %159 = tpu.reciprocal %158 {approx = true} : vector<16x1xf32> -> vector<16x1xf32>
      %c1_92 = arith.constant 1 : index
      %c0_93 = arith.constant 0 : index
      %c0_94 = arith.constant 0 : index
      %160 = vector.load %arg10[%c1_92, %c0_93, %c0_94] : memref<4x16x32xf32, #tpu.memory_space<vmem>>, vector<1x16x32xf32>
      %161 = vector.shape_cast %160 : vector<1x16x32xf32> to vector<16x32xf32>
      %162 = vector.broadcast %159 : vector<16x1xf32> to vector<16x32xf32>
      %163 = arith.mulf %161, %162 : vector<16x32xf32>
      %c0_95 = arith.constant 0 : index
      %c2_96 = arith.constant 2 : index
      %164 = vector.load %arg9[%c0_95, %c2_96] : memref<16x4xf32, #tpu.memory_space<vmem>>, vector<16x1xf32>
      %165 = tpu.reciprocal %164 {approx = true} : vector<16x1xf32> -> vector<16x1xf32>
      %c2_97 = arith.constant 2 : index
      %c0_98 = arith.constant 0 : index
      %c0_99 = arith.constant 0 : index
      %166 = vector.load %arg10[%c2_97, %c0_98, %c0_99] : memref<4x16x32xf32, #tpu.memory_space<vmem>>, vector<1x16x32xf32>
      %167 = vector.shape_cast %166 : vector<1x16x32xf32> to vector<16x32xf32>
      %168 = vector.broadcast %165 : vector<16x1xf32> to vector<16x32xf32>
      %169 = arith.mulf %167, %168 : vector<16x32xf32>
      %c0_100 = arith.constant 0 : index
      %c3_101 = arith.constant 3 : index
      %170 = vector.load %arg9[%c0_100, %c3_101] : memref<16x4xf32, #tpu.memory_space<vmem>>, vector<16x1xf32>
      %171 = tpu.reciprocal %170 {approx = true} : vector<16x1xf32> -> vector<16x1xf32>
      %c3_102 = arith.constant 3 : index
      %c0_103 = arith.constant 0 : index
      %c0_104 = arith.constant 0 : index
      %172 = vector.load %arg10[%c3_102, %c0_103, %c0_104] : memref<4x16x32xf32, #tpu.memory_space<vmem>>, vector<1x16x32xf32>
      %173 = vector.shape_cast %172 : vector<1x16x32xf32> to vector<16x32xf32>
      %174 = vector.broadcast %171 : vector<16x1xf32> to vector<16x32xf32>
      %175 = arith.mulf %173, %174 : vector<16x32xf32>
      %176 = tpu.concatenate %157, %163, %169, %175 in 1 : vector<16x32xf32>, vector<16x32xf32>, vector<16x32xf32>, vector<16x32xf32> -> vector<16x128xf32>
      %177 = arith.truncf %176 : vector<16x128xf32> to vector<16x128xbf16>
      %c0_105 = arith.constant 0 : index
      %c0_106 = arith.constant 0 : index
      %c0_107 = arith.constant 0 : index
      %178 = vector.load %arg7[%c0_105, %c0_106, %c0_107] : memref<1x16x128xbf16, #tpu.memory_space<vmem>>, vector<1x16x128xbf16>
      %179 = vector.shape_cast %178 : vector<1x16x128xbf16> to vector<16x128xbf16>
      %180 = vector.shape_cast %177 : vector<16x128xbf16> to vector<1x16x128xbf16>
      tpu.vector_store %arg7[%c0_105, %c0_106, %c0_107], %180 {strides = array<i32>} : memref<1x16x128xbf16, #tpu.memory_space<vmem>>, vector<1x16x128xbf16>,
    } else {
    }
    return
  }
  func.func @transform_0(%arg0: i32, %arg1: i32, %arg2: i32) -> (i32, i32, i32) {
    %c0_i32 = arith.constant 0 : i32
    %c0_i32_0 = arith.constant 0 : i32
    return %arg0, %arg1, %c0_i32 : i32, i32, i32
  }
  func.func @transform_1(%arg0: i32, %arg1: i32, %arg2: i32) -> (i32, i32, i32) {
    %c1_i32 = arith.constant 1 : i32
    %c0_i32 = arith.constant 0 : i32
    return %arg0, %arg2, %c1_i32 : i32, i32, i32
  }
  func.func @transform_2(%arg0: i32, %arg1: i32, %arg2: i32) -> (i32, i32, i32) {
    %c2_i32 = arith.constant 2 : i32
    %c0_i32 = arith.constant 0 : i32
    return %arg0, %arg2, %c2_i32 : i32, i32, i32
  }
  func.func @transform_3(%arg0: i32, %arg1: i32, %arg2: i32) -> (i32, i32, i32) {
    %c0_i32 = arith.constant 0 : i32
    %c0_i32_0 = arith.constant 0 : i32
    return %arg0, %c0_i32, %arg2 : i32, i32, i32
  }
  func.func @transform_4(%arg0: i32, %arg1: i32, %arg2: i32) -> (i32, i32, i32) {
    %c0_i32 = arith.constant 0 : i32
    %c0_i32_0 = arith.constant 0 : i32
    return %arg0, %arg1, %c0_i32 : i32, i32, i32
  }
}

module attributes {stable_mosaic.version = 11 : i64} {
  func.func @_matmul_kernel(%arg0: i32, %arg1: i32, %arg2: i32, %arg3: memref<32x128xbf16, #tpu.memory_space<vmem>>, %arg4: memref<128x128xbf16, #tpu.memory_space<vmem>>, %arg5: memref<32x128xf32, #tpu.memory_space<vmem>>, %arg6: memref<32x128xf32, #tpu.memory_space<vmem>>) attributes {dimension_semantics = [#tpu.dimension_semantics<parallel>, #tpu.dimension_semantics<parallel>, #tpu.dimension_semantics<arbitrary>], iteration_bounds = array<i64: 1, 1, 1>, scalar_prefetch = 0 : i64, scratch_operands = 1 : i64, tpu.core_type = #tpu.core_type<tc>, window_params = [{transform_indices = @transform_0, window_bounds = array<i64: 32, 128>}, {transform_indices = @transform_1, window_bounds = array<i64: 128, 128>}, {transform_indices = @transform_2, window_bounds = array<i64: 32, 128>}]} {
    %c0_i32 = arith.constant 0 : i32
    %0 = arith.cmpi eq, %arg2, %c0_i32 : i32
    %1 = arith.extui %0 : i1 to i32
    %c0_i32_0 = arith.constant 0 : i32
    %2 = arith.cmpi ne, %1, %c0_i32_0 : i32
    scf.if %2 {
      %cst_10 = arith.constant 0.000000e+00 : f32
      %12 = vector.broadcast %cst_10 : f32 to vector<32x128xf32>
      %c0_11 = arith.constant 0 : index
      %c0_12 = arith.constant 0 : index
      %13 = vector.load %arg6[%c0_11, %c0_12] : memref<32x128xf32, #tpu.memory_space<vmem>>, vector<32x128xf32>
      tpu.vector_store %arg6[%c0_11, %c0_12], %12 {strides = array<i32>} : memref<32x128xf32, #tpu.memory_space<vmem>>, vector<32x128xf32>,
    } else {
    }
    %c0 = arith.constant 0 : index
    %c0_1 = arith.constant 0 : index
    %3 = vector.load %arg6[%c0, %c0_1] : memref<32x128xf32, #tpu.memory_space<vmem>>, vector<32x128xf32>
    %c0_2 = arith.constant 0 : index
    %c0_3 = arith.constant 0 : index
    %4 = vector.load %arg3[%c0_2, %c0_3] : memref<32x128xbf16, #tpu.memory_space<vmem>>, vector<32x128xbf16>
    %c0_4 = arith.constant 0 : index
    %c0_5 = arith.constant 0 : index
    %5 = vector.load %arg4[%c0_4, %c0_5] : memref<128x128xbf16, #tpu.memory_space<vmem>>, vector<128x128xbf16>
    %cst = arith.constant dense<0.000000e+00> : vector<32x128xf32>
    %6 = tpu.matmul %4, %5, %cst {dimension_numbers = #tpu.dot_dimension_numbers<[1], [0], [0], [1], [0, 0, 1, 1], [], []>} : vector<32x128xbf16>, vector<128x128xbf16>, vector<32x128xf32> -> vector<32x128xf32>
    %7 = arith.addf %3, %6 : vector<32x128xf32>
    %c0_6 = arith.constant 0 : index
    %c0_7 = arith.constant 0 : index
    %8 = vector.load %arg6[%c0_6, %c0_7] : memref<32x128xf32, #tpu.memory_space<vmem>>, vector<32x128xf32>
    tpu.vector_store %arg6[%c0_6, %c0_7], %7 {strides = array<i32>} : memref<32x128xf32, #tpu.memory_space<vmem>>, vector<32x128xf32>,
    %c0_i32_8 = arith.constant 0 : i32
    %9 = arith.cmpi eq, %arg2, %c0_i32_8 : i32
    %10 = arith.extui %9 : i1 to i32
    %c0_i32_9 = arith.constant 0 : i32
    %11 = arith.cmpi ne, %10, %c0_i32_9 : i32
    scf.if %11 {
      %c0_10 = arith.constant 0 : index
      %c0_11 = arith.constant 0 : index
      %12 = vector.load %arg6[%c0_10, %c0_11] : memref<32x128xf32, #tpu.memory_space<vmem>>, vector<32x128xf32>
      %c0_12 = arith.constant 0 : index
      %c0_13 = arith.constant 0 : index
      %13 = vector.load %arg5[%c0_12, %c0_13] : memref<32x128xf32, #tpu.memory_space<vmem>>, vector<32x128xf32>
      tpu.vector_store %arg5[%c0_12, %c0_13], %12 {strides = array<i32>} : memref<32x128xf32, #tpu.memory_space<vmem>>, vector<32x128xf32>,
    } else {
    }
    return
  }
  func.func @transform_0(%arg0: i32, %arg1: i32, %arg2: i32) -> (i32, i32) {
    %c0_i32 = arith.constant 0 : i32
    return %arg0, %arg2 : i32, i32
  }
  func.func @transform_1(%arg0: i32, %arg1: i32, %arg2: i32) -> (i32, i32) {
    %c0_i32 = arith.constant 0 : i32
    return %arg2, %arg1 : i32, i32
  }
  func.func @transform_2(%arg0: i32, %arg1: i32, %arg2: i32) -> (i32, i32) {
    %c0_i32 = arith.constant 0 : i32
    return %arg0, %arg1 : i32, i32
  }
}

module attributes {stable_mosaic.version = 11 : i64} {
  func.func @_attention_kernel(%arg0: i32, %arg1: i32, %arg2: i32, %arg3: memref<1x16x128xbf16, #tpu.memory_space<vmem>>, %arg4: memref<1x16x128xbf16, #tpu.memory_space<vmem>>, %arg5: memref<1x16x128xbf16, #tpu.memory_space<vmem>>, %arg6: memref<1x16x128xbf16, #tpu.memory_space<vmem>>, %arg7: memref<16x4xf32, #tpu.memory_space<vmem>>, %arg8: memref<16x4xf32, #tpu.memory_space<vmem>>, %arg9: memref<4x16x32xf32, #tpu.memory_space<vmem>>) attributes {dimension_semantics = [#tpu.dimension_semantics<parallel>, #tpu.dimension_semantics<parallel>, #tpu.dimension_semantics<arbitrary>], iteration_bounds = array<i64: 2, 1, 1>, scalar_prefetch = 0 : i64, scratch_operands = 3 : i64, tpu.core_type = #tpu.core_type<tc>, window_params = [{transform_indices = @transform_0, window_bounds = array<i64: 1, 16, 128>}, {transform_indices = @transform_1, window_bounds = array<i64: 1, 16, 128>}, {transform_indices = @transform_2, window_bounds = array<i64: 1, 16, 128>}, {transform_indices = @transform_3, window_bounds = array<i64: 1, 16, 128>}]} {
    %c0_i32 = arith.constant 0 : i32
    %0 = arith.cmpi eq, %arg2, %c0_i32 : i32
    %1 = arith.extui %0 : i1 to i32
    %c0_i32_0 = arith.constant 0 : i32
    %2 = arith.cmpi ne, %1, %c0_i32_0 : i32
    scf.if %2 {
      %cst_79 = arith.constant -1.000000e+30 : f32
      %132 = vector.broadcast %cst_79 : f32 to vector<16x4xf32>
      %c0_80 = arith.constant 0 : index
      %c0_81 = arith.constant 0 : index
      %133 = vector.load %arg7[%c0_80, %c0_81] : memref<16x4xf32, #tpu.memory_space<vmem>>, vector<16x4xf32>
      tpu.vector_store %arg7[%c0_80, %c0_81], %132 {strides = array<i32>} : memref<16x4xf32, #tpu.memory_space<vmem>>, vector<16x4xf32>,
      %cst_82 = arith.constant 0.000000e+00 : f32
      %134 = vector.broadcast %cst_82 : f32 to vector<16x4xf32>
      %c0_83 = arith.constant 0 : index
      %c0_84 = arith.constant 0 : index
      %135 = vector.load %arg8[%c0_83, %c0_84] : memref<16x4xf32, #tpu.memory_space<vmem>>, vector<16x4xf32>
      tpu.vector_store %arg8[%c0_83, %c0_84], %134 {strides = array<i32>} : memref<16x4xf32, #tpu.memory_space<vmem>>, vector<16x4xf32>,
      %cst_85 = arith.constant 0.000000e+00 : f32
      %136 = vector.broadcast %cst_85 : f32 to vector<4x16x32xf32>
      %c0_86 = arith.constant 0 : index
      %c0_87 = arith.constant 0 : index
      %c0_88 = arith.constant 0 : index
      %137 = vector.load %arg9[%c0_86, %c0_87, %c0_88] : memref<4x16x32xf32, #tpu.memory_space<vmem>>, vector<4x16x32xf32>
      tpu.vector_store %arg9[%c0_86, %c0_87, %c0_88], %136 {strides = array<i32>} : memref<4x16x32xf32, #tpu.memory_space<vmem>>, vector<4x16x32xf32>,
    } else {
    }
    %c0 = arith.constant 0 : index
    %c0_1 = arith.constant 0 : index
    %c0_2 = arith.constant 0 : index
    %3 = vector.load %arg3[%c0, %c0_1, %c0_2] : memref<1x16x128xbf16, #tpu.memory_space<vmem>>, vector<1x16x128xbf16>
    %4 = vector.shape_cast %3 : vector<1x16x128xbf16> to vector<16x128xbf16>
    %c0_3 = arith.constant 0 : index
    %c0_4 = arith.constant 0 : index
    %c0_5 = arith.constant 0 : index
    %5 = vector.load %arg4[%c0_3, %c0_4, %c0_5] : memref<1x16x128xbf16, #tpu.memory_space<vmem>>, vector<1x16x128xbf16>
    %6 = vector.shape_cast %5 : vector<1x16x128xbf16> to vector<16x128xbf16>
    %c0_6 = arith.constant 0 : index
    %c0_7 = arith.constant 0 : index
    %c0_8 = arith.constant 0 : index
    %7 = vector.load %arg5[%c0_6, %c0_7, %c0_8] : memref<1x16x128xbf16, #tpu.memory_space<vmem>>, vector<1x16x128xbf16>
    %8 = vector.shape_cast %7 : vector<1x16x128xbf16> to vector<16x128xbf16>
    %9 = vector.extract_strided_slice %4 {offsets = [0, 0], sizes = [16, 32], strides = [1, 1]} : vector<16x128xbf16> to vector<16x32xbf16>
    %10 = vector.extract_strided_slice %6 {offsets = [0, 0], sizes = [16, 32], strides = [1, 1]} : vector<16x128xbf16> to vector<16x32xbf16>
    %cst = arith.constant dense<0.000000e+00> : vector<16x16xf32>
    %11 = tpu.matmul %9, %10, %cst {dimension_numbers = #tpu.dot_dimension_numbers<[1], [1], [0], [0], [0, 0, 1, 0], [], []>} : vector<16x32xbf16>, vector<16x32xbf16>, vector<16x16xf32> -> vector<16x16xf32>
    %c0_9 = arith.constant 0 : index
    %c0_10 = arith.constant 0 : index
    %12 = vector.load %arg7[%c0_9, %c0_10] : memref<16x4xf32, #tpu.memory_space<vmem>>, vector<16x1xf32>
    %cst_11 = arith.constant dense<0xFF800000> : vector<16xf32>
    %13 = vector.multi_reduction <maximumf>, %11, %cst_11 [1] : vector<16x16xf32> to vector<16xf32>
    %14 = vector.shape_cast %13 : vector<16xf32> to vector<16x1xf32>
    %15 = arith.maximumf %12, %14 : vector<16x1xf32>
    %16 = arith.subf %12, %15 : vector<16x1xf32>
    %17 = math.exp %16 : vector<16x1xf32>
    %18 = vector.broadcast %15 : vector<16x1xf32> to vector<16x16xf32>
    %19 = arith.subf %11, %18 : vector<16x16xf32>
    %20 = math.exp %19 : vector<16x16xf32>
    %c0_12 = arith.constant 0 : index
    %c0_13 = arith.constant 0 : index
    %21 = vector.load %arg8[%c0_12, %c0_13] : memref<16x4xf32, #tpu.memory_space<vmem>>, vector<16x1xf32>
    %22 = arith.mulf %17, %21 : vector<16x1xf32>
    %cst_14 = arith.constant dense<0.000000e+00> : vector<16xf32>
    %23 = vector.multi_reduction <add>, %20, %cst_14 [1] : vector<16x16xf32> to vector<16xf32>
    %24 = vector.shape_cast %23 : vector<16xf32> to vector<16x1xf32>
    %25 = arith.addf %22, %24 : vector<16x1xf32>
    %c0_15 = arith.constant 0 : index
    %c0_16 = arith.constant 0 : index
    %26 = vector.load %arg8[%c0_15, %c0_16] : memref<16x4xf32, #tpu.memory_space<vmem>>, vector<16x1xf32>
    tpu.vector_store %arg8[%c0_15, %c0_16], %25 {strides = array<i32>} : memref<16x4xf32, #tpu.memory_space<vmem>>, vector<16x1xf32>,
    %c0_17 = arith.constant 0 : index
    %c0_18 = arith.constant 0 : index
    %c0_19 = arith.constant 0 : index
    %27 = vector.load %arg9[%c0_17, %c0_18, %c0_19] : memref<4x16x32xf32, #tpu.memory_space<vmem>>, vector<1x16x32xf32>
    %28 = vector.shape_cast %27 : vector<1x16x32xf32> to vector<16x32xf32>
    %29 = vector.broadcast %17 : vector<16x1xf32> to vector<16x32xf32>
    %30 = arith.mulf %29, %28 : vector<16x32xf32>
    %31 = arith.truncf %20 : vector<16x16xf32> to vector<16x16xbf16>
    %32 = vector.extract_strided_slice %8 {offsets = [0, 0], sizes = [16, 32], strides = [1, 1]} : vector<16x128xbf16> to vector<16x32xbf16>
    %cst_20 = arith.constant dense<0.000000e+00> : vector<16x32xf32>
    %33 = tpu.matmul %31, %32, %cst_20 {dimension_numbers = #tpu.dot_dimension_numbers<[1], [0], [0], [1], [0, 0, 1, 1], [], []>} : vector<16x16xbf16>, vector<16x32xbf16>, vector<16x32xf32> -> vector<16x32xf32>
    %34 = arith.addf %30, %33 : vector<16x32xf32>
    %c0_21 = arith.constant 0 : index
    %c0_22 = arith.constant 0 : index
    %c0_23 = arith.constant 0 : index
    %35 = vector.load %arg9[%c0_21, %c0_22, %c0_23] : memref<4x16x32xf32, #tpu.memory_space<vmem>>, vector<1x16x32xf32>
    %36 = vector.shape_cast %35 : vector<1x16x32xf32> to vector<16x32xf32>
    %37 = vector.shape_cast %34 : vector<16x32xf32> to vector<1x16x32xf32>
    tpu.vector_store %arg9[%c0_21, %c0_22, %c0_23], %37 {strides = array<i32>} : memref<4x16x32xf32, #tpu.memory_space<vmem>>, vector<1x16x32xf32>,
    %c0_24 = arith.constant 0 : index
    %c0_25 = arith.constant 0 : index
    %38 = vector.load %arg7[%c0_24, %c0_25] : memref<16x4xf32, #tpu.memory_space<vmem>>, vector<16x1xf32>
    tpu.vector_store %arg7[%c0_24, %c0_25], %15 {strides = array<i32>} : memref<16x4xf32, #tpu.memory_space<vmem>>, vector<16x1xf32>,
    %39 = vector.extract_strided_slice %4 {offsets = [0, 32], sizes = [16, 32], strides = [1, 1]} : vector<16x128xbf16> to vector<16x32xbf16>
    %40 = vector.extract_strided_slice %6 {offsets = [0, 32], sizes = [16, 32], strides = [1, 1]} : vector<16x128xbf16> to vector<16x32xbf16>
    %cst_26 = arith.constant dense<0.000000e+00> : vector<16x16xf32>
    %41 = tpu.matmul %39, %40, %cst_26 {dimension_numbers = #tpu.dot_dimension_numbers<[1], [1], [0], [0], [0, 0, 1, 0], [], []>} : vector<16x32xbf16>, vector<16x32xbf16>, vector<16x16xf32> -> vector<16x16xf32>
    %c0_27 = arith.constant 0 : index
    %c1 = arith.constant 1 : index
    %42 = vector.load %arg7[%c0_27, %c1] : memref<16x4xf32, #tpu.memory_space<vmem>>, vector<16x1xf32>
    %cst_28 = arith.constant dense<0xFF800000> : vector<16xf32>
    %43 = vector.multi_reduction <maximumf>, %41, %cst_28 [1] : vector<16x16xf32> to vector<16xf32>
    %44 = vector.shape_cast %43 : vector<16xf32> to vector<16x1xf32>
    %45 = arith.maximumf %42, %44 : vector<16x1xf32>
    %46 = arith.subf %42, %45 : vector<16x1xf32>
    %47 = math.exp %46 : vector<16x1xf32>
    %48 = vector.broadcast %45 : vector<16x1xf32> to vector<16x16xf32>
    %49 = arith.subf %41, %48 : vector<16x16xf32>
    %50 = math.exp %49 : vector<16x16xf32>
    %c0_29 = arith.constant 0 : index
    %c1_30 = arith.constant 1 : index
    %51 = vector.load %arg8[%c0_29, %c1_30] : memref<16x4xf32, #tpu.memory_space<vmem>>, vector<16x1xf32>
    %52 = arith.mulf %47, %51 : vector<16x1xf32>
    %cst_31 = arith.constant dense<0.000000e+00> : vector<16xf32>
    %53 = vector.multi_reduction <add>, %50, %cst_31 [1] : vector<16x16xf32> to vector<16xf32>
    %54 = vector.shape_cast %53 : vector<16xf32> to vector<16x1xf32>
    %55 = arith.addf %52, %54 : vector<16x1xf32>
    %c0_32 = arith.constant 0 : index
    %c1_33 = arith.constant 1 : index
    %56 = vector.load %arg8[%c0_32, %c1_33] : memref<16x4xf32, #tpu.memory_space<vmem>>, vector<16x1xf32>
    tpu.vector_store %arg8[%c0_32, %c1_33], %55 {strides = array<i32>} : memref<16x4xf32, #tpu.memory_space<vmem>>, vector<16x1xf32>,
    %c1_34 = arith.constant 1 : index
    %c0_35 = arith.constant 0 : index
    %c0_36 = arith.constant 0 : index
    %57 = vector.load %arg9[%c1_34, %c0_35, %c0_36] : memref<4x16x32xf32, #tpu.memory_space<vmem>>, vector<1x16x32xf32>
    %58 = vector.shape_cast %57 : vector<1x16x32xf32> to vector<16x32xf32>
    %59 = vector.broadcast %47 : vector<16x1xf32> to vector<16x32xf32>
    %60 = arith.mulf %59, %58 : vector<16x32xf32>
    %61 = arith.truncf %50 : vector<16x16xf32> to vector<16x16xbf16>
    %62 = vector.extract_strided_slice %8 {offsets = [0, 32], sizes = [16, 32], strides = [1, 1]} : vector<16x128xbf16> to vector<16x32xbf16>
    %cst_37 = arith.constant dense<0.000000e+00> : vector<16x32xf32>
    %63 = tpu.matmul %61, %62, %cst_37 {dimension_numbers = #tpu.dot_dimension_numbers<[1], [0], [0], [1], [0, 0, 1, 1], [], []>} : vector<16x16xbf16>, vector<16x32xbf16>, vector<16x32xf32> -> vector<16x32xf32>
    %64 = arith.addf %60, %63 : vector<16x32xf32>
    %c1_38 = arith.constant 1 : index
    %c0_39 = arith.constant 0 : index
    %c0_40 = arith.constant 0 : index
    %65 = vector.load %arg9[%c1_38, %c0_39, %c0_40] : memref<4x16x32xf32, #tpu.memory_space<vmem>>, vector<1x16x32xf32>
    %66 = vector.shape_cast %65 : vector<1x16x32xf32> to vector<16x32xf32>
    %67 = vector.shape_cast %64 : vector<16x32xf32> to vector<1x16x32xf32>
    tpu.vector_store %arg9[%c1_38, %c0_39, %c0_40], %67 {strides = array<i32>} : memref<4x16x32xf32, #tpu.memory_space<vmem>>, vector<1x16x32xf32>,
    %c0_41 = arith.constant 0 : index
    %c1_42 = arith.constant 1 : index
    %68 = vector.load %arg7[%c0_41, %c1_42] : memref<16x4xf32, #tpu.memory_space<vmem>>, vector<16x1xf32>
    tpu.vector_store %arg7[%c0_41, %c1_42], %45 {strides = array<i32>} : memref<16x4xf32, #tpu.memory_space<vmem>>, vector<16x1xf32>,
    %69 = vector.extract_strided_slice %4 {offsets = [0, 64], sizes = [16, 32], strides = [1, 1]} : vector<16x128xbf16> to vector<16x32xbf16>
    %70 = vector.extract_strided_slice %6 {offsets = [0, 64], sizes = [16, 32], strides = [1, 1]} : vector<16x128xbf16> to vector<16x32xbf16>
    %cst_43 = arith.constant dense<0.000000e+00> : vector<16x16xf32>
    %71 = tpu.matmul %69, %70, %cst_43 {dimension_numbers = #tpu.dot_dimension_numbers<[1], [1], [0], [0], [0, 0, 1, 0], [], []>} : vector<16x32xbf16>, vector<16x32xbf16>, vector<16x16xf32> -> vector<16x16xf32>
    %c0_44 = arith.constant 0 : index
    %c2 = arith.constant 2 : index
    %72 = vector.load %arg7[%c0_44, %c2] : memref<16x4xf32, #tpu.memory_space<vmem>>, vector<16x1xf32>
    %cst_45 = arith.constant dense<0xFF800000> : vector<16xf32>
    %73 = vector.multi_reduction <maximumf>, %71, %cst_45 [1] : vector<16x16xf32> to vector<16xf32>
    %74 = vector.shape_cast %73 : vector<16xf32> to vector<16x1xf32>
    %75 = arith.maximumf %72, %74 : vector<16x1xf32>
    %76 = arith.subf %72, %75 : vector<16x1xf32>
    %77 = math.exp %76 : vector<16x1xf32>
    %78 = vector.broadcast %75 : vector<16x1xf32> to vector<16x16xf32>
    %79 = arith.subf %71, %78 : vector<16x16xf32>
    %80 = math.exp %79 : vector<16x16xf32>
    %c0_46 = arith.constant 0 : index
    %c2_47 = arith.constant 2 : index
    %81 = vector.load %arg8[%c0_46, %c2_47] : memref<16x4xf32, #tpu.memory_space<vmem>>, vector<16x1xf32>
    %82 = arith.mulf %77, %81 : vector<16x1xf32>
    %cst_48 = arith.constant dense<0.000000e+00> : vector<16xf32>
    %83 = vector.multi_reduction <add>, %80, %cst_48 [1] : vector<16x16xf32> to vector<16xf32>
    %84 = vector.shape_cast %83 : vector<16xf32> to vector<16x1xf32>
    %85 = arith.addf %82, %84 : vector<16x1xf32>
    %c0_49 = arith.constant 0 : index
    %c2_50 = arith.constant 2 : index
    %86 = vector.load %arg8[%c0_49, %c2_50] : memref<16x4xf32, #tpu.memory_space<vmem>>, vector<16x1xf32>
    tpu.vector_store %arg8[%c0_49, %c2_50], %85 {strides = array<i32>} : memref<16x4xf32, #tpu.memory_space<vmem>>, vector<16x1xf32>,
    %c2_51 = arith.constant 2 : index
    %c0_52 = arith.constant 0 : index
    %c0_53 = arith.constant 0 : index
    %87 = vector.load %arg9[%c2_51, %c0_52, %c0_53] : memref<4x16x32xf32, #tpu.memory_space<vmem>>, vector<1x16x32xf32>
    %88 = vector.shape_cast %87 : vector<1x16x32xf32> to vector<16x32xf32>
    %89 = vector.broadcast %77 : vector<16x1xf32> to vector<16x32xf32>
    %90 = arith.mulf %89, %88 : vector<16x32xf32>
    %91 = arith.truncf %80 : vector<16x16xf32> to vector<16x16xbf16>
    %92 = vector.extract_strided_slice %8 {offsets = [0, 64], sizes = [16, 32], strides = [1, 1]} : vector<16x128xbf16> to vector<16x32xbf16>
    %cst_54 = arith.constant dense<0.000000e+00> : vector<16x32xf32>
    %93 = tpu.matmul %91, %92, %cst_54 {dimension_numbers = #tpu.dot_dimension_numbers<[1], [0], [0], [1], [0, 0, 1, 1], [], []>} : vector<16x16xbf16>, vector<16x32xbf16>, vector<16x32xf32> -> vector<16x32xf32>
    %94 = arith.addf %90, %93 : vector<16x32xf32>
    %c2_55 = arith.constant 2 : index
    %c0_56 = arith.constant 0 : index
    %c0_57 = arith.constant 0 : index
    %95 = vector.load %arg9[%c2_55, %c0_56, %c0_57] : memref<4x16x32xf32, #tpu.memory_space<vmem>>, vector<1x16x32xf32>
    %96 = vector.shape_cast %95 : vector<1x16x32xf32> to vector<16x32xf32>
    %97 = vector.shape_cast %94 : vector<16x32xf32> to vector<1x16x32xf32>
    tpu.vector_store %arg9[%c2_55, %c0_56, %c0_57], %97 {strides = array<i32>} : memref<4x16x32xf32, #tpu.memory_space<vmem>>, vector<1x16x32xf32>,
    %c0_58 = arith.constant 0 : index
    %c2_59 = arith.constant 2 : index
    %98 = vector.load %arg7[%c0_58, %c2_59] : memref<16x4xf32, #tpu.memory_space<vmem>>, vector<16x1xf32>
    tpu.vector_store %arg7[%c0_58, %c2_59], %75 {strides = array<i32>} : memref<16x4xf32, #tpu.memory_space<vmem>>, vector<16x1xf32>,
    %99 = vector.extract_strided_slice %4 {offsets = [0, 96], sizes = [16, 32], strides = [1, 1]} : vector<16x128xbf16> to vector<16x32xbf16>
    %100 = vector.extract_strided_slice %6 {offsets = [0, 96], sizes = [16, 32], strides = [1, 1]} : vector<16x128xbf16> to vector<16x32xbf16>
    %cst_60 = arith.constant dense<0.000000e+00> : vector<16x16xf32>
    %101 = tpu.matmul %99, %100, %cst_60 {dimension_numbers = #tpu.dot_dimension_numbers<[1], [1], [0], [0], [0, 0, 1, 0], [], []>} : vector<16x32xbf16>, vector<16x32xbf16>, vector<16x16xf32> -> vector<16x16xf32>
    %c0_61 = arith.constant 0 : index
    %c3 = arith.constant 3 : index
    %102 = vector.load %arg7[%c0_61, %c3] : memref<16x4xf32, #tpu.memory_space<vmem>>, vector<16x1xf32>
    %cst_62 = arith.constant dense<0xFF800000> : vector<16xf32>
    %103 = vector.multi_reduction <maximumf>, %101, %cst_62 [1] : vector<16x16xf32> to vector<16xf32>
    %104 = vector.shape_cast %103 : vector<16xf32> to vector<16x1xf32>
    %105 = arith.maximumf %102, %104 : vector<16x1xf32>
    %106 = arith.subf %102, %105 : vector<16x1xf32>
    %107 = math.exp %106 : vector<16x1xf32>
    %108 = vector.broadcast %105 : vector<16x1xf32> to vector<16x16xf32>
    %109 = arith.subf %101, %108 : vector<16x16xf32>
    %110 = math.exp %109 : vector<16x16xf32>
    %c0_63 = arith.constant 0 : index
    %c3_64 = arith.constant 3 : index
    %111 = vector.load %arg8[%c0_63, %c3_64] : memref<16x4xf32, #tpu.memory_space<vmem>>, vector<16x1xf32>
    %112 = arith.mulf %107, %111 : vector<16x1xf32>
    %cst_65 = arith.constant dense<0.000000e+00> : vector<16xf32>
    %113 = vector.multi_reduction <add>, %110, %cst_65 [1] : vector<16x16xf32> to vector<16xf32>
    %114 = vector.shape_cast %113 : vector<16xf32> to vector<16x1xf32>
    %115 = arith.addf %112, %114 : vector<16x1xf32>
    %c0_66 = arith.constant 0 : index
    %c3_67 = arith.constant 3 : index
    %116 = vector.load %arg8[%c0_66, %c3_67] : memref<16x4xf32, #tpu.memory_space<vmem>>, vector<16x1xf32>
    tpu.vector_store %arg8[%c0_66, %c3_67], %115 {strides = array<i32>} : memref<16x4xf32, #tpu.memory_space<vmem>>, vector<16x1xf32>,
    %c3_68 = arith.constant 3 : index
    %c0_69 = arith.constant 0 : index
    %c0_70 = arith.constant 0 : index
    %117 = vector.load %arg9[%c3_68, %c0_69, %c0_70] : memref<4x16x32xf32, #tpu.memory_space<vmem>>, vector<1x16x32xf32>
    %118 = vector.shape_cast %117 : vector<1x16x32xf32> to vector<16x32xf32>
    %119 = vector.broadcast %107 : vector<16x1xf32> to vector<16x32xf32>
    %120 = arith.mulf %119, %118 : vector<16x32xf32>
    %121 = arith.truncf %110 : vector<16x16xf32> to vector<16x16xbf16>
    %122 = vector.extract_strided_slice %8 {offsets = [0, 96], sizes = [16, 32], strides = [1, 1]} : vector<16x128xbf16> to vector<16x32xbf16>
    %cst_71 = arith.constant dense<0.000000e+00> : vector<16x32xf32>
    %123 = tpu.matmul %121, %122, %cst_71 {dimension_numbers = #tpu.dot_dimension_numbers<[1], [0], [0], [1], [0, 0, 1, 1], [], []>} : vector<16x16xbf16>, vector<16x32xbf16>, vector<16x32xf32> -> vector<16x32xf32>
    %124 = arith.addf %120, %123 : vector<16x32xf32>
    %c3_72 = arith.constant 3 : index
    %c0_73 = arith.constant 0 : index
    %c0_74 = arith.constant 0 : index
    %125 = vector.load %arg9[%c3_72, %c0_73, %c0_74] : memref<4x16x32xf32, #tpu.memory_space<vmem>>, vector<1x16x32xf32>
    %126 = vector.shape_cast %125 : vector<1x16x32xf32> to vector<16x32xf32>
    %127 = vector.shape_cast %124 : vector<16x32xf32> to vector<1x16x32xf32>
    tpu.vector_store %arg9[%c3_72, %c0_73, %c0_74], %127 {strides = array<i32>} : memref<4x16x32xf32, #tpu.memory_space<vmem>>, vector<1x16x32xf32>,
    %c0_75 = arith.constant 0 : index
    %c3_76 = arith.constant 3 : index
    %128 = vector.load %arg7[%c0_75, %c3_76] : memref<16x4xf32, #tpu.memory_space<vmem>>, vector<16x1xf32>
    tpu.vector_store %arg7[%c0_75, %c3_76], %105 {strides = array<i32>} : memref<16x4xf32, #tpu.memory_space<vmem>>, vector<16x1xf32>,
    %c0_i32_77 = arith.constant 0 : i32
    %129 = arith.cmpi eq, %arg2, %c0_i32_77 : i32
    %130 = arith.extui %129 : i1 to i32
    %c0_i32_78 = arith.constant 0 : i32
    %131 = arith.cmpi ne, %130, %c0_i32_78 : i32
    scf.if %131 {
      %c0_79 = arith.constant 0 : index
      %c0_80 = arith.constant 0 : index
      %132 = vector.load %arg8[%c0_79, %c0_80] : memref<16x4xf32, #tpu.memory_space<vmem>>, vector<16x1xf32>
      %133 = tpu.reciprocal %132 {approx = true} : vector<16x1xf32> -> vector<16x1xf32>
      %c0_81 = arith.constant 0 : index
      %c0_82 = arith.constant 0 : index
      %c0_83 = arith.constant 0 : index
      %134 = vector.load %arg9[%c0_81, %c0_82, %c0_83] : memref<4x16x32xf32, #tpu.memory_space<vmem>>, vector<1x16x32xf32>
      %135 = vector.shape_cast %134 : vector<1x16x32xf32> to vector<16x32xf32>
      %136 = vector.broadcast %133 : vector<16x1xf32> to vector<16x32xf32>
      %137 = arith.mulf %135, %136 : vector<16x32xf32>
      %c0_84 = arith.constant 0 : index
      %c1_85 = arith.constant 1 : index
      %138 = vector.load %arg8[%c0_84, %c1_85] : memref<16x4xf32, #tpu.memory_space<vmem>>, vector<16x1xf32>
      %139 = tpu.reciprocal %138 {approx = true} : vector<16x1xf32> -> vector<16x1xf32>
      %c1_86 = arith.constant 1 : index
      %c0_87 = arith.constant 0 : index
      %c0_88 = arith.constant 0 : index
      %140 = vector.load %arg9[%c1_86, %c0_87, %c0_88] : memref<4x16x32xf32, #tpu.memory_space<vmem>>, vector<1x16x32xf32>
      %141 = vector.shape_cast %140 : vector<1x16x32xf32> to vector<16x32xf32>
      %142 = vector.broadcast %139 : vector<16x1xf32> to vector<16x32xf32>
      %143 = arith.mulf %141, %142 : vector<16x32xf32>
      %c0_89 = arith.constant 0 : index
      %c2_90 = arith.constant 2 : index
      %144 = vector.load %arg8[%c0_89, %c2_90] : memref<16x4xf32, #tpu.memory_space<vmem>>, vector<16x1xf32>
      %145 = tpu.reciprocal %144 {approx = true} : vector<16x1xf32> -> vector<16x1xf32>
      %c2_91 = arith.constant 2 : index
      %c0_92 = arith.constant 0 : index
      %c0_93 = arith.constant 0 : index
      %146 = vector.load %arg9[%c2_91, %c0_92, %c0_93] : memref<4x16x32xf32, #tpu.memory_space<vmem>>, vector<1x16x32xf32>
      %147 = vector.shape_cast %146 : vector<1x16x32xf32> to vector<16x32xf32>
      %148 = vector.broadcast %145 : vector<16x1xf32> to vector<16x32xf32>
      %149 = arith.mulf %147, %148 : vector<16x32xf32>
      %c0_94 = arith.constant 0 : index
      %c3_95 = arith.constant 3 : index
      %150 = vector.load %arg8[%c0_94, %c3_95] : memref<16x4xf32, #tpu.memory_space<vmem>>, vector<16x1xf32>
      %151 = tpu.reciprocal %150 {approx = true} : vector<16x1xf32> -> vector<16x1xf32>
      %c3_96 = arith.constant 3 : index
      %c0_97 = arith.constant 0 : index
      %c0_98 = arith.constant 0 : index
      %152 = vector.load %arg9[%c3_96, %c0_97, %c0_98] : memref<4x16x32xf32, #tpu.memory_space<vmem>>, vector<1x16x32xf32>
      %153 = vector.shape_cast %152 : vector<1x16x32xf32> to vector<16x32xf32>
      %154 = vector.broadcast %151 : vector<16x1xf32> to vector<16x32xf32>
      %155 = arith.mulf %153, %154 : vector<16x32xf32>
      %156 = tpu.concatenate %137, %143, %149, %155 in 1 : vector<16x32xf32>, vector<16x32xf32>, vector<16x32xf32>, vector<16x32xf32> -> vector<16x128xf32>
      %157 = arith.truncf %156 : vector<16x128xf32> to vector<16x128xbf16>
      %c0_99 = arith.constant 0 : index
      %c0_100 = arith.constant 0 : index
      %c0_101 = arith.constant 0 : index
      %158 = vector.load %arg6[%c0_99, %c0_100, %c0_101] : memref<1x16x128xbf16, #tpu.memory_space<vmem>>, vector<1x16x128xbf16>
      %159 = vector.shape_cast %158 : vector<1x16x128xbf16> to vector<16x128xbf16>
      %160 = vector.shape_cast %157 : vector<16x128xbf16> to vector<1x16x128xbf16>
      tpu.vector_store %arg6[%c0_99, %c0_100, %c0_101], %160 {strides = array<i32>} : memref<1x16x128xbf16, #tpu.memory_space<vmem>>, vector<1x16x128xbf16>,
    } else {
    }
    return
  }
  func.func @transform_0(%arg0: i32, %arg1: i32, %arg2: i32) -> (i32, i32, i32) {
    %c0_i32 = arith.constant 0 : i32
    %c0_i32_0 = arith.constant 0 : i32
    return %arg0, %arg1, %c0_i32 : i32, i32, i32
  }
  func.func @transform_1(%arg0: i32, %arg1: i32, %arg2: i32) -> (i32, i32, i32) {
    %c0_i32 = arith.constant 0 : i32
    %c0_i32_0 = arith.constant 0 : i32
    return %arg0, %arg2, %c0_i32 : i32, i32, i32
  }
  func.func @transform_2(%arg0: i32, %arg1: i32, %arg2: i32) -> (i32, i32, i32) {
    %c1_i32 = arith.constant 1 : i32
    %c0_i32 = arith.constant 0 : i32
    return %arg0, %arg2, %c1_i32 : i32, i32, i32
  }
  func.func @transform_3(%arg0: i32, %arg1: i32, %arg2: i32) -> (i32, i32, i32) {
    %c0_i32 = arith.constant 0 : i32
    %c0_i32_0 = arith.constant 0 : i32
    return %arg0, %arg1, %c0_i32 : i32, i32, i32
  }
}

</mosaic_0001>

<bundles_post_ra>
// kernel: forward.41
= control target key start
LH: loop header
LB: loop body
LE: loop exit
PB: predicated region body
PF: predicated region fallthrough
CT: control target
= control target key end

     0   :  { %s182_s0 = inlined_call_operand.vmem [shape: f32[32,128], index: 0, kind: input, shape index: {}]   ;;  %s183_s1 = inlined_call_operand.vmem [shape: f32[1,128], index: 1, kind: input, shape index: {}]   ;;  %s184_s2 = inlined_call_operand.vmem [shape: f32[1,128], index: 2, kind: input, shape index: {}]   ;;  %s185_s3 = inlined_call_operand.vmem [shape: bf16[32,128], index: 3, kind: output, shape index: {}]  }
   0x1   :  { %v14_v0 = vld [vmem:[%s182_s0] sm:$0xff]  ;;  %v16_v1 = vld [vmem:[%s182_s0 + $0x10] sm:$0xff]  ;;  %v15_v2 = vld [vmem:[%s182_s0 + $0x8] sm:$0xff] }
   0x2   :  { %18 = vadd.xlane.f32.xlu0 %v14_v0  ;;  %22 = vadd.xlane.f32.xlu1 %v16_v1  ;;  %v17_v3 = vld [vmem:[%s182_s0 + $0x18] sm:$0xff]  ;;  %v109_v34 = vld [vmem:[%s183_s1] ss:$0 sm:$0xff] }
   0x3   :  { %v110_v39 = vld [vmem:[%s184_s2] ss:$0 sm:$0xff] }
   0x6   :  { %20 = vadd.xlane.f32.xlu0 %v15_v2  ;;  %24 = vadd.xlane.f32.xlu1 %v17_v3 }
  0x8f   :  { %v19_v4 = vpop.xlane.xlu0 %18  ;;  %v23_v5 = vpop.xlane.xlu1 %22 }
  0x90   :  { %v27_v6 = vmul.f32 0.0078125, %v19_v4  ;;  %v29_v7 = vmul.f32 0.0078125, %v23_v5 }
  0x92   :  { %v31_v8 = vsub.f32 %v14_v0, %v27_v6  ;;  %v33_v9 = vsub.f32 %v16_v1, %v29_v7 }
  0x93   :  { %v21_v10 = vpop.xlane.xlu0 %20  ;;  %v25_v11 = vpop.xlane.xlu1 %24 }
  0x94   :  { %v28_v12 = vmul.f32 0.0078125, %v21_v10  ;;  %v35_v13 = vmul.f32 %v31_v8, %v31_v8  ;;  %v30_v14 = vmul.f32 0.0078125, %v25_v11  ;;  %v37_v17 = vmul.f32 %v33_v9, %v33_v9 }
  0x96   :  { %v32_v15 = vsub.f32 %v15_v2, %v28_v12  ;;  %39 = vadd.xlane.f32.xlu0 %v35_v13  ;;  %v34_v16 = vsub.f32 %v17_v3, %v30_v14 }
  0x98   :  { %v36_v18 = vmul.f32 %v32_v15, %v32_v15  ;;  %v38_v19 = vmul.f32 %v34_v16, %v34_v16 }
  0x9a   :  { %43 = vadd.xlane.f32.xlu0 %v37_v17  ;;  %41 = vadd.xlane.f32.xlu1 %v36_v18 }
  0x9e   :  { %45 = vadd.xlane.f32.xlu1 %v38_v19 }
 0x123   :  { %v40_v20 = vpop.xlane.xlu0 %39 }
 0x124   :  { %v47_v21 = vmul.f32 0.0078125, %v40_v20 }
 0x126   :  { %v51_v22 = vadd.f32 1e-05, %v47_v21 }
 0x127   :  { %v42_v23 = vpop.xlane.xlu1 %41  ;;  %v44_v24 = vpop.xlane.xlu0 %43 }
 0x128   :  { %130 = vrsqrt.f32 %v51_v22  ;;  %v48_v25 = vmul.f32 0.0078125, %v42_v23  ;;  %v49_v26 = vmul.f32 0.0078125, %v44_v24 }
 0x12a   :  { %v52_v27 = vadd.f32 1e-05, %v48_v25  ;;  %v53_v28 = vadd.f32 1e-05, %v49_v26 }
 0x12b   :  { %v46_v29 = vpop.xlane.xlu1 %45 }
 0x12c   :  { %132 = vrsqrt.f32 %v52_v27  ;;  %v50_v30 = vmul.f32 0.0078125, %v46_v29 }
 0x12d   :  { %134 = vrsqrt.f32 %v53_v28 }
 0x12e   :  { %v54_v31 = vadd.f32 1e-05, %v50_v30 }
 0x130   :  { %136 = vrsqrt.f32 %v54_v31 }
 0x132   :  { %v131_v32 = vpop.eup %130 }
 0x133   :  { %v59_v33 = vmul.f32 %v131_v32, %v31_v8 }
 0x135   :  { %v70_v37 = vmul.f32 %v109_v34, %v59_v33 }
 0x136   :  { %v133_v35 = vpop.eup %132 }
 0x137   :  { %v135_v36 = vpop.eup %134  ;;  %v60_v38 = vmul.f32 %v133_v35, %v32_v15  ;;  %v81_v43 = vadd.f32 %v110_v39, %v70_v37 }
 0x138   :  { %v61_v40 = vmul.f32 %v135_v36, %v33_v9 }
 0x139   :  { %v71_v41 = vmul.f32 %v109_v34, %v60_v38 }
 0x13a   :  { %v137_v42 = vpop.eup %136  ;;  %v72_v45 = vmul.f32 %v109_v34, %v61_v40 }
 0x13b   :  { %v82_v44 = vadd.f32 %v110_v39, %v71_v41  ;;  %v62_v46 = vmul.f32 %v137_v42, %v34_v16 }
 0x13c   :  { %v83_v49 = vadd.f32 %v110_v39, %v72_v45 }
 0x13d   :  { %v122_v47 = vpack.c.bf16 %v82_v44, %v81_v43  ;;  %v73_v48 = vmul.f32 %v109_v34, %v62_v46 }
 0x13f   :  { %123 = vst [vmem:[%s185_s3] sm:$0xff] %v122_v47   ;;  %v84_v50 = vadd.f32 %v110_v39, %v73_v48 }
 0x141   :  { %v127_v51 = vpack.c.bf16 %v84_v50, %v83_v49 }
 0x143   :  { %129 = vst [vmem:[%s185_s3 + $0x8] sm:$0xff] %v127_v51  }

// kernel: forward.44
= control target key start
LH: loop header
LB: loop body
LE: loop exit
PB: predicated region body
PF: predicated region fallthrough
CT: control target
= control target key end

     0   :  { %s334_s1 = inlined_call_operand.vmem [shape: bf16[128,128], index: 1, kind: input, shape index: {}]   ;;  %s335_s0 = inlined_call_operand.vmem [shape: bf16[32,128], index: 0, kind: input, shape index: {}]   ;;  %s336_s2 = inlined_call_operand.vmem [shape: f32[1,128], index: 2, kind: input, shape index: {}]   ;;  %s337_s3 = inlined_call_operand.vmem [shape: f32[32,128], index: 3, kind: input, shape index: {}]   ;;  %s338_s4 = inlined_call_operand.vmem [shape: f32[32,128], index: 4, kind: output, shape index: {}]  }
   0x1   :  { %v242_v0 = vld [vmem:[%s334_s1] sm:$0xff]   ;;  %v243_v1 = vld [vmem:[%s334_s1 + $0x8] sm:$0xff]   ;;  %v244_v2 = vld [vmem:[%s334_s1 + $0x10] sm:$0xff]  }
   0x2   :  { %222 = vmatprep.subr.bf16.mxu0 %v242_v0  ;;  %v245_v3 = vld [vmem:[%s334_s1 + $0x18] sm:$0xff]   ;;  %v250_v4 = vld [vmem:[%s335_s0] sm:$0xff]   ;;  %v247_v6 = vld [vmem:[%s334_s1 + $0x28] sm:$0xff]  }
   0x3   :  { %223 = vmatpush3.bf16.msra.mxu0 %v242_v0  ;;  %238 = vmatprep.mubr.bf16.mxu0 %v250_v4  ;;  %v246_v5 = vld [vmem:[%s334_s1 + $0x20] sm:$0xff]   ;;  %v248_v7 = vld [vmem:[%s334_s1 + $0x30] sm:$0xff]   ;;  %v249_v8 = vld [vmem:[%s334_s1 + $0x38] sm:$0xff]  }
   0x4   :  { %224 = vmatprep.subr.bf16.mxu0 %v243_v1  ;;  %v251_v9 = vld [vmem:[%s335_s0 + $0x8] sm:$0xff]   ;;  %v211_v10 = vld [vmem:[%s336_s2] ss:$0 sm:$0xff]  ;;  %v187_v12 = vld [vmem:[%s337_s3 + $0x10] sm:$0xff] }
   0x5   :  { %v185_v15 = vld [vmem:[%s337_s3] sm:$0xff]  ;;  %v188_v18 = vld [vmem:[%s337_s3 + $0x18] sm:$0xff]  ;;  %v186_v22 = vld [vmem:[%s337_s3 + $0x8] sm:$0xff] }
   0x7   :  { %225 = vmatpush3.bf16.msra.mxu0 %v243_v1 }
   0x8   :  { %226 = vmatprep.subr.bf16.mxu0 %v244_v2 }
   0xb   :  { %227 = vmatpush3.bf16.msra.mxu0 %v244_v2 }
   0xc   :  { %228 = vmatprep.subr.bf16.mxu0 %v245_v3 }
   0xf   :  { %229 = vmatpush3.bf16.msra.mxu0 %v245_v3 }
  0x10   :  { %230 = vmatprep.subr.bf16.mxu0 %v246_v5 }
  0x13   :  { %231 = vmatpush3.bf16.msra.mxu0 %v246_v5 }
  0x14   :  { %232 = vmatprep.subr.bf16.mxu0 %v247_v6 }
  0x17   :  { %233 = vmatpush3.bf16.msra.mxu0 %v247_v6 }
  0x18   :  { %234 = vmatprep.subr.bf16.mxu0 %v248_v7 }
  0x1b   :  { %235 = vmatpush3.bf16.msra.mxu0 %v248_v7 }
  0x1c   :  { %236 = vmatprep.subr.bf16.mxu0 %v249_v8 }
  0x1f   :  { %237 = vmatpush3.bf16.msra.mxu0 %v249_v8 }
  0x22   :  { %239 = vmatmul.mubr.bf16.vlgmr.msra.gmra.mrb[0].mxu0 %v251_v9 }
  0xf5   :  { %v240_v11 = vpop.f32.mrb[0].mxu0 }
  0xf6   :  { %v183_v13 = vadd.f32 %v240_v11, %v211_v10  ;;  %v144_v14 = vpop.f32.mrb[1].mxu0 }
  0xf7   :  { %v181_v16 = vadd.f32 %v211_v10, %v144_v14  ;;  %v241_v17 = vpop.f32.mrb[2].mxu0 }
  0xf8   :  { %v191_v19 = vadd.f32 %v187_v12, %v183_v13  ;;  %v184_v20 = vadd.f32 %v241_v17, %v211_v10  ;;  %v147_v21 = vpop.f32.mrb[3].mxu0 }
  0xf9   :  { %v189_v23 = vadd.f32 %v185_v15, %v181_v16  ;;  %v182_v24 = vadd.f32 %v211_v10, %v147_v21 }
  0xfa   :  { %195 = vst [vmem:[%s338_s4 + $0x10] sm:$0xff] %v191_v19  ;;  %v192_v25 = vadd.f32 %v188_v18, %v184_v20 }
  0xfb   :  { %193 = vst [vmem:[%s338_s4] sm:$0xff] %v189_v23  ;;  %v190_v26 = vadd.f32 %v186_v22, %v182_v24 }
  0xfc   :  { %196 = vst [vmem:[%s338_s4 + $0x18] sm:$0xff] %v192_v25 }
  0xfd   :  { %194 = vst [vmem:[%s338_s4 + $0x8] sm:$0xff] %v190_v26 }

// kernel: forward.42
= control target key start
LH: loop header
LB: loop body
LE: loop exit
PB: predicated region body
PF: predicated region fallthrough
CT: control target
= control target key end

     0   :  { %s875_s12 = smov 0   ;;  %s877_s13 = smov 0   ;;  %s980_s0 = inlined_call_operand.vmem [shape: bf16[32,128], index: 0, kind: input, shape index: {}]   ;;  %s981_s1 = inlined_call_operand.vmem [shape: bf16[128,384], index: 1, kind: input, shape index: {}]   ;;  %s982_s2 = inlined_call_operand.vmem [shape: f32[1,384], index: 2, kind: input, shape index: {}]   ;;  %s983_s3 = inlined_call_operand.vmem [shape: bf16[32,384], index: 3, kind: output, shape index: {}]  }
   0x1   :  { %s879_s14 = smov 0   ;;  %s881_s15 = smov 0  }
   0x2   :  { %s883_s16 = smov 0  }
   0x3 LB: > { %s28_s17 = sadd.s32 1, %s849_s15  ;;  %s691_s18 = sadd.s32 4294967295, %s853_s16   ;;  %s853_s16 = sphi %s883_s16, %s13_s16   ;;  %s849_s15 = sphi %s881_s15, %s988_s15   ;;  %s845_s14 = sphi %s879_s14, %s987_s14   ;;  %s841_s13 = sphi %s877_s13, %s986_s13   ;;  %s837_s12 = sphi %s875_s12, %s985_s12  }
   0x4   : > { %p30_p0 = scmp.ge.s32.totalorder %s28_s17, 3  ;;  %p76_p1 = scmp.ne.s32.totalorder %s841_s13, %s837_s12 }
   0x5   : > { %p77_p2 = scmp.eq.s32.totalorder %s853_s16, 0  ;;  %p134_p4 = scmp.eq.s32.totalorder %s691_s18, 2 }
   0x6   : > { %s990_s17 = smov (%p30_p0, %s28_s17), 0  ;;  %s69_s20 = sadd.s32 1, %s841_s13 }
   0x7   : > { %p78_p3 = por %p77_p2, %p76_p1  ;;  %s65_s19 = ssub.s32 %s849_s15, %s990_s17 }
   0x8   : > { %p67_p5 = scmp.eq.s32.totalorder %s65_s19, 0  ;;  %p910_p6 = por %p134_p4, %p76_p1 }
   0x9   : > { %p695_p7 = scmp.ge.s32.totalorder %s853_s16, 3 }
   0xa   : > { %s915_s22 = scalar_select %p67_p5, %s841_s13, %s69_s20  }
   0xb   : > { %168 = sbr.rel (%p695_p7) target bundleno = 32 (0x20), region = 20 }
  0x12   : > { %171 = sbr.rel (!%p78_p3) target bundleno = 32 (0x20), region = 24  ;;  %s173_s23 = sand.u32 (%p78_p3), 1, %s841_s13  }
  0x13   : > { %s697_s24 = sshll.u32 (%p78_p3), %s849_s15, 2  ;;  %s696_s25 = sshll.u32 (%p78_p3), %s173_s23, 6 }
  0x14   : > { %s923_s28 = scalar_lea.vmem (%p78_p3), %s981_s1, %s697_s24  ;;  %s175_s29 = scalar_lea.vmem (%p78_p3), [#allocation3], %s696_s25 }
  0x15   : > { %v196_v0 = vld [vmem:[%s923_s28] sm:$0xf] (%p78_p3)  ;;  %v198_v1 = vld [vmem:[%s923_s28 + $0xc] sm:$0xf] (%p78_p3)  ;;  %v200_v2 = vld [vmem:[%s923_s28 + $0x18] sm:$0xf] (%p78_p3) }
  0x16   : > { %197 = vst [vmem:[%s175_s29] sm:$0xf] (%p78_p3), %v196_v0  ;;  %199 = vst [vmem:[%s175_s29 + $0x4] sm:$0xf] (%p78_p3), %v198_v1  ;;  %v202_v3 = vld [vmem:[%s923_s28 + $0x24] sm:$0xf] (%p78_p3) }
  0x17   : > { %v204_v4 = vld [vmem:[%s923_s28 + $0x30] sm:$0xf] (%p78_p3)  ;;  %201 = vst [vmem:[%s175_s29 + $0x8] sm:$0xf] (%p78_p3), %v200_v2  ;;  %203 = vst [vmem:[%s175_s29 + $0xc] sm:$0xf] (%p78_p3), %v202_v3 }
  0x18   : > { %205 = vst [vmem:[%s175_s29 + $0x10] sm:$0xf] (%p78_p3), %v204_v4  ;;  %v206_v5 = vld [vmem:[%s923_s28 + $0x3c] sm:$0xf] (%p78_p3)  ;;  %v208_v6 = vld [vmem:[%s923_s28 + $0x48] sm:$0xf] (%p78_p3) }
  0x19   : > { %v210_v7 = vld [vmem:[%s923_s28 + $0x54] sm:$0xf]  ;;  %207 = vst [vmem:[%s175_s29 + $0x14] sm:$0xf] %v206_v5  ;;  %209 = vst [vmem:[%s175_s29 + $0x18] sm:$0xf] %v208_v6 }
  0x1a   : > { %211 = vst [vmem:[%s175_s29 + $0x1c] sm:$0xf] %v210_v7  ;;  %v212_v8 = vld [vmem:[%s923_s28 + $0x60] sm:$0xf]  ;;  %v214_v9 = vld [vmem:[%s923_s28 + $0x6c] sm:$0xf] }
  0x1b   : > { %v216_v10 = vld [vmem:[%s923_s28 + $0x78] sm:$0xf]  ;;  %213 = vst [vmem:[%s175_s29 + $0x20] sm:$0xf] %v212_v8  ;;  %215 = vst [vmem:[%s175_s29 + $0x24] sm:$0xf] %v214_v9 }
  0x1c   : > { %217 = vst [vmem:[%s175_s29 + $0x28] sm:$0xf] %v216_v10  ;;  %v218_v11 = vld [vmem:[%s923_s28 + $0x84] sm:$0xf]  ;;  %v220_v12 = vld [vmem:[%s923_s28 + $0x90] sm:$0xf] }
  0x1d   : > { %v222_v13 = vld [vmem:[%s923_s28 + $0x9c] sm:$0xf]  ;;  %219 = vst [vmem:[%s175_s29 + $0x2c] sm:$0xf] %v218_v11  ;;  %221 = vst [vmem:[%s175_s29 + $0x30] sm:$0xf] %v220_v12 }
  0x1e   : > { %223 = vst [vmem:[%s175_s29 + $0x34] sm:$0xf] %v222_v13  ;;  %v224_v14 = vld [vmem:[%s923_s28 + $0xa8] sm:$0xf]  ;;  %v226_v15 = vld [vmem:[%s923_s28 + $0xb4] sm:$0xf] }
  0x1f   : > { %225 = vst [vmem:[%s175_s29 + $0x38] sm:$0xf] %v224_v14  ;;  %227 = vst [vmem:[%s175_s29 + $0x3c] sm:$0xf] %v226_v15 }
  0x20 PF: > { %p698_p8 = scmp.ge.s32.totalorder %s853_s16, 1  ;;  %p287_p9 = scmp.lt.s32.totalorder %s853_s16, 4 }
  0x22   : > { %p288_p10 = pnand %p698_p8, %p287_p9 }
  0x23   : > { %s294_s30 = sand.u32 (!%p288_p10), 1, %s837_s12   ;;  %v813_v16 = vld [vmem:[%s980_s0] sm:$0xff] (!%p288_p10)   ;;  %v814_v25 = vld [vmem:[%s980_s0 + $0x8] sm:$0xff] (!%p288_p10)   ;;  %p337_p11 = scmp.lt.s32.totalorder (!%p288_p10), %s845_s14, 2 }
  0x24   : > { %291 = sbr.rel (%p288_p10) target bundleno = 300 (0x12c), region = 69  ;;  %s699_s6 = sshll.u32 (!%p288_p10), %s294_s30, 6  ;;  %761 = vmatprep.mubr.bf16.mxu0 (!%p288_p10), %v813_v16 }
  0x25   : > { %s296_s7 = scalar_lea.vmem (!%p288_p10), [#allocation3], %s699_s6  ;;  %s700_s20 = sshll.u32 (!%p288_p10), %s294_s30, 4 }
  0x26   : > { %v805_v17 = vld [vmem:[%s296_s7] sm:$0xff] (!%p288_p10)   ;;  %v806_v18 = vld [vmem:[%s296_s7 + $0x8] sm:$0xff] (!%p288_p10)   ;;  %v807_v19 = vld [vmem:[%s296_s7 + $0x10] sm:$0xff] (!%p288_p10)   ;;  %s326_s23 = scalar_lea.vmem (!%p288_p10), [#allocation4], %s700_s20 }
  0x27   : > { %745 = vmatprep.subr.bf16.mxu0 (!%p288_p10), %v805_v17  ;;  %v808_v20 = vld [vmem:[%s296_s7 + $0x18] sm:$0xff] (!%p288_p10)   ;;  %v809_v21 = vld [vmem:[%s296_s7 + $0x20] sm:$0xff] (!%p288_p10)   ;;  %v810_v22 = vld [vmem:[%s296_s7 + $0x28] sm:$0xff] (!%p288_p10)  }
  0x28   : > { %746 = vmatpush3.bf16.msra.mxu0 (!%p288_p10), %v805_v17  ;;  %v811_v23 = vld [vmem:[%s296_s7 + $0x30] sm:$0xff] (!%p288_p10)   ;;  %v812_v24 = vld [vmem:[%s296_s7 + $0x38] sm:$0xff] (!%p288_p10)  }
  0x29   : > { %747 = vmatprep.subr.bf16.mxu0 (!%p288_p10), %v806_v18 }
  0x2b   : > { %s338_s10 = scalar_select %p337_p11, %s845_s14, 2 }
  0x2c   : > { %748 = vmatpush3.bf16.msra.mxu0 %v806_v18  ;;  %s717_s24 = sshll.u32 (%p910_p6), %s845_s14, 2 }
  0x2d   : > { %749 = vmatprep.subr.bf16.mxu0 %v807_v19  ;;  %s339_s19 = scalar_lea.vmem %s982_s2, %s338_s10  ;;  %s540_s26 = scalar_lea.vmem (%p910_p6), %s983_s3, %s717_s24 }
  0x2e   : > { %v711_v27 = vld [vmem:[%s339_s19] ss:$0 sm:$0xff] }
  0x30   : > { %750 = vmatpush3.bf16.msra.mxu0 %v807_v19 }
  0x31   : > { %751 = vmatprep.subr.bf16.mxu0 %v808_v20 }
  0x34   : > { %752 = vmatpush3.bf16.msra.mxu0 %v808_v20 }
  0x35   : > { %753 = vmatprep.subr.bf16.mxu0 %v809_v21 }
  0x38   : > { %754 = vmatpush3.bf16.msra.mxu0 %v809_v21 }
  0x39   : > { %755 = vmatprep.subr.bf16.mxu0 %v810_v22 }
  0x3c   : > { %756 = vmatpush3.bf16.msra.mxu0 %v810_v22 }
  0x3d   : > { %757 = vmatprep.subr.bf16.mxu0 %v811_v23 }
  0x40   : > { %758 = vmatpush3.bf16.msra.mxu0 %v811_v23 }
  0x41   : > { %759 = vmatprep.subr.bf16.mxu0 %v812_v24 }
  0x44   : > { %760 = vmatpush3.bf16.msra.mxu0 %v812_v24 }
  0x47   : > { %762 = vmatmul.mubr.bf16.vlgmr.msra.gmra.mrb[0].mxu0 %v814_v25 }
 0x11a   : > { %v763_v26 = vpop.f32.mrb[0].mxu0 }
 0x11b   : > { %v468_v28 = vpop.f32.mrb[1].mxu0  ;;  %v507_v30 = vadd.f32 %v763_v26, %v711_v27 }
 0x11c   : > { %v764_v29 = vpop.f32.mrb[2].mxu0  ;;  %v505_v33 = vadd.f32 %v711_v27, %v468_v28  ;;  %535 = sbr.rel (!%p910_p6) target bundleno = 300 (0x12c), region = 85 }
 0x11d   : > { %v508_v31 = vadd.f32 %v764_v29, %v711_v27  ;;  %v471_v32 = vpop.f32.mrb[3].mxu0 }
 0x11e   : > { %v506_v34 = vadd.f32 %v711_v27, %v471_v32 }
 0x11f   : > { %v732_v35 = vpack.c.bf16 %v508_v31, %v507_v30 }
 0x120   : > { %v727_v36 = vpack.c.bf16 %v506_v34, %v505_v33 }
 0x121   : > { %734 = vst [vmem:[%s326_s23 + $0x8] sm:$0xff] %v732_v35  }
 0x122   : > { %728 = vst [vmem:[%s326_s23] sm:$0xff] %v727_v36  }
 0x128   : > { %v560_v39 = vld [vmem:[%s326_s23 + $0x8] sm:$0xf]  ;;  %v562_v40 = vld [vmem:[%s326_s23 + $0xc] sm:$0xf] }
 0x129   : > { %v556_v37 = vld [vmem:[%s326_s23] sm:$0xf]  ;;  %v558_v38 = vld [vmem:[%s326_s23 + $0x4] sm:$0xf]  ;;  %561 = vst [vmem:[%s540_s26 + $0x18] sm:$0xf] %v560_v39 }
 0x12a   : > { %557 = vst [vmem:[%s540_s26] sm:$0xf] %v556_v37  ;;  %559 = vst [vmem:[%s540_s26 + $0xc] sm:$0xf] %v558_v38 }
 0x12b   : > { %563 = vst [vmem:[%s540_s26 + $0x24] sm:$0xf] %v562_v40 }
 0x12c PF: > { %s13_s16 = sadd.s32 1, %s853_s16   ;;  %s985_s12 = smov %s841_s13 }
 0x12d   : > { %p10_p12 = scmp.ge.s32.totalorder %s13_s16, 5   ;;  %s986_s13 = smov %s915_s22 }
 0x12e   : > { %s987_s14 = smov %s849_s15  ;;  %s988_s15 = smov %s990_s17 }
 0x12f   :  { %12 = sbr.rel (!%p10_p12) target bundleno = 3 (0x3), region = 163 }

// kernel: forward.43
= control target key start
LH: loop header
LB: loop body
LE: loop exit
PB: predicated region body
PF: predicated region fallthrough
CT: control target
= control target key end

     0   :  { %s1716_s15 = smov 0   ;;  %s1718_s16 = smov 0   ;;  %s2079_s0 = inlined_call_operand.vmem [shape: bf16[2,16,384], index: 0, kind: input, shape index: {}, may-alias: {0,1,2}]   ;;  %s2080_s1 = inlined_call_operand.vmem [shape: bf16[2,16,384], index: 1, kind: input, shape index: {}, may-alias: {0,1,2}]   ;;  %s2081_s2 = inlined_call_operand.vmem [shape: bf16[2,16,384], index: 2, kind: input, shape index: {}, may-alias: {0,1,2}]   ;;  %s2082_s3 = inlined_call_operand.vmem [shape: f32[2,1,16], index: 3, kind: input, shape index: {}]   ;;  %s2083_s4 = inlined_call_operand.vmem [shape: bf16[2,16,128], index: 4, kind: output, shape index: {}]  }
   0x1   :  { %s1720_s17 = smov 0   ;;  %s1722_s18 = smov 0  }
   0x2   :  { %s1724_s19 = smov 0  }
   0x3 LB: > { %s33_s20 = sadd.s32 1, %s1675_s18  ;;  %p49_p1 = scmp.ne.s32.totalorder %s1667_s16, %s1663_s15  ;;  %s1679_s19 = sphi %s1724_s19, %s14_s19   ;;  %s1675_s18 = sphi %s1722_s18, %s2088_s18   ;;  %s1671_s17 = sphi %s1720_s17, %s2087_s17   ;;  %s1667_s16 = sphi %s1718_s16, %s2086_s16   ;;  %s1663_s15 = sphi %s1716_s15, %s2085_s15  }
   0x4   : > { %p35_p0 = scmp.ge.s32.totalorder %s33_s20, 2  ;;  %p50_p2 = scmp.eq.s32.totalorder %s1679_s19, 0 }
   0x5   : > { %s42_s23 = sadd.s32 1, %s1667_s16  ;;  %p1412_p5 = scmp.ge.s32.totalorder %s1679_s19, 2 }
   0x6   : > { %s2090_s20 = smov (%p35_p0, %s33_s20), 0  ;;  %p1747_p3 = por %p50_p2, %p49_p1 }
   0x7   : > { %s37_s22 = ssub.s32 %s1675_s18, %s2090_s20  ;;  %187 = sbr.rel (%p1412_p5) target bundleno = 35 (0x23), region = 16 }
   0x8   : > { %p40_p4 = scmp.eq.s32.totalorder %s37_s22, 0 }
   0xa   : > { %s1755_s24 = scalar_select %p40_p4, %s1667_s16, %s42_s23  }
   0xe   : > { %190 = sbr.rel (!%p1747_p3) target bundleno = 21 (0x15), region = 20  ;;  %s192_s25 = sand.u32 (%p1747_p3), 1, %s1667_s16  }
   0xf   : > { %s1517_s26 = smul.u32 (%p1747_p3), 24, %s1675_s18  ;;  %s1413_s27 = sshll.u32 (%p1747_p3), %s192_s25, 3 }
  0x10   : > { %s194_s5 = scalar_lea.vmem (%p1747_p3), [#allocation5], %s1413_s27 }
  0x11   : > { %s200_s30 = scalar_lea.vmem (%p1747_p3), %s2079_s0, %s1517_s26 }
  0x12   : > { %v216_v0 = vld [vmem:[%s200_s30] sm:$0xf] (%p1747_p3)  ;;  %v218_v1 = vld [vmem:[%s200_s30 + $0xc] sm:$0xf] (%p1747_p3) }
  0x13   : > { %217 = vst [vmem:[%s194_s5] sm:$0xf] (%p1747_p3), %v216_v0  ;;  %219 = vst [vmem:[%s194_s5 + $0x4] sm:$0xf] (%p1747_p3), %v218_v1 }
  0x15 PF: > { %246 = sbr.rel (!%p1747_p3) target bundleno = 28 (0x1c), region = 61  ;;  %s248_s6 = sand.u32 (%p1747_p3), 1, %s1667_s16  }
  0x16   : > { %s1416_s7 = smul.u32 (%p1747_p3), 24, %s1675_s18  ;;  %s1415_s8 = sshll.u32 (%p1747_p3), %s248_s6, 3 }
  0x17   : > { %s250_s12 = scalar_lea.vmem (%p1747_p3), [#allocation6], %s1415_s8 }
  0x18   : > { %s1303_s11 = scalar_lea.vmem (%p1747_p3), %s2080_s1, %s1416_s7 }
  0x19   : > { %v1417_v2 = vld [vmem:[%s1303_s11 + $0x4] sm:$0xf] (%p1747_p3)  ;;  %v1418_v3 = vld [vmem:[%s1303_s11 + $0x10] sm:$0xf] (%p1747_p3) }
  0x1a   : > { %274 = vst [vmem:[%s250_s12] sm:$0xf] (%p1747_p3), %v1417_v2  ;;  %276 = vst [vmem:[%s250_s12 + $0x4] sm:$0xf] (%p1747_p3), %v1418_v3 }
  0x1c PF: > { %303 = sbr.rel (!%p1747_p3) target bundleno = 35 (0x23), region = 102  ;;  %s305_s13 = sand.u32 (%p1747_p3), 1, %s1667_s16  }
  0x1d   : > { %s1420_s14 = smul.u32 (%p1747_p3), 24, %s1675_s18  ;;  %s1419_s22 = sshll.u32 (%p1747_p3), %s305_s13, 3 }
  0x1e   : > { %s307_s27 = scalar_lea.vmem (%p1747_p3), [#allocation7], %s1419_s22 }
  0x1f   : > { %s1311_s26 = scalar_lea.vmem (%p1747_p3), %s2081_s2, %s1420_s14 }
  0x20   : > { %v1421_v4 = vld [vmem:[%s1311_s26 + $0x8] sm:$0xf] (%p1747_p3)  ;;  %v1422_v5 = vld [vmem:[%s1311_s26 + $0x14] sm:$0xf] (%p1747_p3) }
  0x21   : > { %331 = vst [vmem:[%s307_s27] sm:$0xf] (%p1747_p3), %v1421_v4  ;;  %333 = vst [vmem:[%s307_s27 + $0x4] sm:$0xf] (%p1747_p3), %v1422_v5 }
  0x23 PF: > { %p1423_p6 = scmp.ge.s32.totalorder %s1679_s19, 1  ;;  %p368_p7 = scmp.lt.s32.totalorder %s1679_s19, 3 }
  0x25   : > { %p369_p8 = pnand %p1423_p6, %p368_p7 }
  0x26   : > { %s375_s21 = sand.u32 (!%p369_p8), 1, %s1663_s15   ;;  %vm461_vm0 = vcmask (!%p369_p8), 261120   ;;  %v1681_v6 = vmov (!%p369_p8), 0.0   ;;  %vm1682_vm1 = vmmov (!%p369_p8), 0   ;;  %vm456_vm2 = vcmask (!%p369_p8), 31744   ;;  %p435_p9 = scmp.lt.s32.totalorder (!%p369_p8), %s1671_s17, 1 }
  0x27   : > { %372 = sbr.rel (%p369_p8) target bundleno = 1528 (0x5f8), region = 147  ;;  %1469 = vmatprep.subr.bf16.mxu0 (!%p369_p8), %v1681_v6  ;;  %s1783_s28 = sshll.u32 (!%p369_p8), %s375_s21, 3  ;;  %462 = vst.msk [vmem:[#allocation4] sm:$0xff] (!%p369_p8), %vm461_vm0, %v1681_v6  ;;  %463 = vst.msk [vmem:[#allocation4 + $0x8] sm:$0xff] (!%p369_p8), %vm461_vm0, %v1681_v6  ;;  %1471 = vmatprep.mubr.msk.bf16.mxu0 (!%p369_p8), %vm1682_vm1, %v1681_v6  ;;  %v1683_v10 = vmov (!%p369_p8), -1e+30  }
  0x28   : > { %464 = vst.msk [vmem:[#allocation4 + $0x10] sm:$0xff] (!%p369_p8), %vm461_vm0, %v1681_v6  ;;  %465 = vst.msk [vmem:[#allocation4 + $0x18] sm:$0xff] (!%p369_p8), %vm461_vm0, %v1681_v6  ;;  %1475 = vmatprep.subr.bf16.mxu1 (!%p369_p8), %v1681_v6  ;;  %1477 = vmatprep.mubr.msk.bf16.mxu1 (!%p369_p8), %vm1682_vm1, %v1681_v6  ;;  %s384_s15 = scalar_lea.vmem (!%p369_p8), [#allocation6], %s1783_s28  ;;  %s377_s29 = scalar_lea.vmem (!%p369_p8), [#allocation5], %s1783_s28  ;;  %vm543_vm3 = vcmask (!%p369_p8), 130048   ;;  %v1684_v20 = vmov (!%p369_p8), 0  }
  0x29   : > { %466 = vst.msk [vmem:[#allocation4 + $0x20] sm:$0xff] (!%p369_p8), %vm461_vm0, %v1681_v6  ;;  %467 = vst.msk [vmem:[#allocation4 + $0x28] sm:$0xff] (!%p369_p8), %vm461_vm0, %v1681_v6  ;;  %v1602_v7 = vld [vmem:[%s384_s15] sm:$0xff] (!%p369_p8)   ;;  %v1603_v9 = vld [vmem:[%s377_s29] sm:$0xff] (!%p369_p8)   ;;  %1568 = vset.pattern.permute.xlu1 (!%p369_p8), %v1684_v20  ;;  %s1685_s7 = smov (!%p369_p8), 96   ;;  %vm586_vm4 = vcmask (!%p369_p8), 7168  }
  0x2a   : > { %468 = vst.msk [vmem:[#allocation4 + $0x30] sm:$0xff] (!%p369_p8), %vm461_vm0, %v1681_v6  ;;  %469 = vst.msk [vmem:[#allocation4 + $0x38] sm:$0xff] (!%p369_p8), %vm461_vm0, %v1681_v6  ;;  %v498_v8 = vsel (!%p369_p8), %vm461_vm0, %v1602_v7, 0  ;;  %s391_s8 = scalar_lea.vmem (!%p369_p8), [#allocation7], %s1783_s28  ;;  %s1686_s9 = smov (!%p369_p8), 64   ;;  %vm755_vm5 = vcmask (!%p369_p8), 15368  }
  0x2b   : > { %1470 = vmatpush3.bf16.xpose.msra.mxu0 (!%p369_p8), %v498_v8  ;;  %457 = vst.msk [vmem:[#allocation2] sm:$0xff] (!%p369_p8), %vm456_vm2, %v1683_v10  ;;  %458 = vst.msk [vmem:[#allocation2 + $0x8] sm:$0xff] (!%p369_p8), %vm456_vm2, %v1683_v10  ;;  %v1853_v29 = vld [vmem:[%s391_s8] sm:$0xff] (!%p369_p8)   ;;  %s1687_s10 = smov (!%p369_p8), 32   ;;  %vm922_vm6 = vcmask (!%p369_p8), 23568   ;;  %vm1089_vm7 = vcmask (!%p369_p8), 31768  }
  0x2c   : > { %1487 = vmatprep.subr.bf16.mxu0 (!%p369_p8), %v1681_v6  ;;  %459 = vst.msk [vmem:[#allocation3] sm:$0xff] (!%p369_p8), %vm456_vm2, %v1681_v6  ;;  %460 = vst.msk [vmem:[#allocation3 + $0x8] sm:$0xff] (!%p369_p8), %vm456_vm2, %v1681_v6  ;;  %1476 = vmatpush3.bf16.msra.mxu1 (!%p369_p8), %v1853_v29  ;;  %vm1244_vm8 = vcmask (!%p369_p8), 523264   ;;  %vm1247_vm9 = vcmask (!%p369_p8), 785408  }
  0x2d   : > { %1481 = vmatprep.subr.bf16.mxu1 (!%p369_p8), %v1681_v6 }
  0x2e   : > { %s2092_s17 = smov (!%p435_p9, %s1671_s17), 1 }
  0x2f   : > { %s440_s6 = scalar_lea.vmem %s2082_s3, %s2092_s17  ;;  %s1445_s11 = sshll.u32 %s2092_s17, 3 }
  0x30   : > { %v1823_v11 = vld [vmem:[%s440_s6] ss:$0 sm:$0xff]  ;;  %s449_s14 = scalar_lea.vmem %s2083_s4, %s1445_s11 }
  0x32   : > { %1472 = vmatmul.mubr.msk.bf16.vlgmr.msra.gmra.mrb[0].mxu0 %vm461_vm0, %v1603_v9  ;;  %v1831_v21 = vld [vmem:[#allocation2] sm:$0xff]  ;;  %v1836_v24 = vld [vmem:[#allocation2 + $0x8] sm:$0xff] }
  0x33   : > { %1489 = vmatprep.mubr.msk.bf16.mxu0 %vm1682_vm1, %v1681_v6 }
 0x105   : > { %v534_v12 = vpop.f32.mrb[0].mxu0 }
 0x106   : > { %v535_v13 = vadd.f32 %v1823_v11, %v534_v12  ;;  %v1473_v14 = vpop.f32.mrb[1].mxu0 }
 0x107   : > { %v537_v15 = vpop.f32.mrb[2].mxu0 }
 0x108   : > { %v538_v16 = vadd.f32 %v1823_v11, %v537_v15  ;;  %v1474_v17 = vpop.f32.mrb[3].mxu0  ;;  %v544_v18 = vsel %vm543_vm3, %v535_v13, -inf }
 0x109   : > { %545 = vmax.xlane.f32.xlu0 %v544_v18 }
 0x10a   : > { %v547_v19 = vsel %vm543_vm3, %v538_v16, -inf }
 0x10d   : > { %548 = vmax.xlane.f32.xlu0 %v547_v19 }
 0x123   : > { %662 = vrot.lane.b32.xlu0 %v1602_v7, %s1685_s7 }
 0x196   : > { %v546_v22 = vpop.xlane.xlu0 %545 }
 0x197   : > { %v1834_v23 = vmax.f32 %v1831_v21, %v546_v22 }
 0x199   : > { %v552_v25 = vsub.f32 %v1831_v21, %v1834_v23  ;;  %658 = vst.msk [vmem:[#allocation2] sm:$0xff] %vm586_vm4, %v1834_v23  ;;  %560 = vperm.xlu1 %1568, %v1834_v23  }
 0x19a   : > { %v549_v26 = vpop.xlane.xlu0 %548 }
 0x19b   : > { %v1844_v27 = vmax.f32 %v1836_v24, %v549_v26 }
 0x19d   : > { %v553_v28 = vsub.f32 %v1836_v24, %v1844_v27  ;;  %659 = vst.msk [vmem:[#allocation2 + $0x8] sm:$0xff] %vm586_vm4, %v1844_v27  ;;  %565 = vperm.xlu1 %1568, %v1844_v27  }
 0x19e   : > { %v663_v36 = vpop.permute.xlu0 %662 }
 0x19f   : > { %v668_v40 = vsel %vm461_vm0, %v663_v36, 0 }
 0x1a0   : > { %v1918_v15 = vld [vmem:[#allocation2] sm:$0xff] }
 0x1a1   : > { %660 = vrot.lane.b32.xlu1 %v1603_v9, %s1685_s7 }
 0x1a4   : > { %v712_v17 = vld [vmem:[#allocation2 + $0x8] sm:$0xff] }
 0x1a5   : > { %829 = vrot.lane.b32.xlu1 %v1602_v7, %s1686_s9 }
 0x1a9   : > { %827 = vrot.lane.b32.xlu1 %v1603_v9, %s1686_s9 }
 0x1ad   : > { %996 = vrot.lane.b32.xlu1 %v1602_v7, %s1687_s10 }
 0x1b1   : > { %994 = vrot.lane.b32.xlu1 %v1603_v9, %s1687_s10 }
 0x218   : > { %v561_v30 = vpop.permute.xlu1 %560 }
 0x219   : > { %v568_v31 = vsub.f32 %v535_v13, %v561_v30  ;;  %v1688_v13 = vmov 1   ;;  %v1689_v30 = vmov 2  }
 0x21a   : > { %1569 = vset.pattern.permute.xlu0 %v1688_v13  ;;  %1570 = vset.pattern.permute.xlu1 %v1688_v13 }
 0x21b   : > { %v570_v32 = vmul.f32 1.442695, %v568_v31 }
 0x21c   : > { %v566_v33 = vpop.permute.xlu1 %565 }
 0x21d   : > { %v569_v34 = vsub.f32 %v538_v16, %v566_v33  ;;  %1605 = vpow2.f32 %v570_v32 }
 0x21f   : > { %v572_v35 = vmul.f32 1.442695, %v569_v34 }
 0x220   : > { %v661_v37 = vpop.permute.xlu1 %660 }
 0x221   : > { %1607 = vpow2.f32 %v572_v35 }
 0x224   : > { %v830_v42 = vpop.permute.xlu1 %829 }
 0x225   : > { %v835_v44 = vsel %vm461_vm0, %v830_v42, 0 }
 0x227   : > { %v1861_v38 = vpop.eup %1605 }
 0x228   : > { %v828_v43 = vpop.permute.xlu1 %827  ;;  %v578_v21 = vsel %vm543_vm3, %v1861_v38, 0.0 }
 0x22b   : > { %v1863_v39 = vpop.eup %1607 }
 0x22c   : > { %v603_v41 = vpack.c.bf16 %v1863_v39, %v1861_v38  ;;  %v997_v45 = vpop.permute.xlu1 %996 }
 0x22d   : > { %v1002_v46 = vsel %vm461_vm0, %v997_v45, 0 }
 0x22e   : > { %1478 = vmatmul.mubr.msk.bf16.vlgmr.msra.gmra.mrb[0].mxu1 %vm543_vm3, %v603_v41 }
 0x22f   : > { %1482 = vmatpush3.bf16.xpose.msra.mxu1 %v668_v40  ;;  %1483 = vmatprep.mubr.msk.bf16.mxu1 %vm1682_vm1, %v1681_v6 }
 0x230   : > { %1493 = vmatprep.subr.bf16.mxu1 %v1681_v6  ;;  %v995_v47 = vpop.permute.xlu1 %994 }
 0x236   : > { %1484 = vmatmul.mubr.msk.bf16.vlgmr.msra.gmra.mrb[4].mxu1 %vm461_vm0, %v661_v37 }
 0x237   : > { %1494 = vmatpush3.bf16.xpose.msra.mxu1 %v835_v44  ;;  %1495 = vmatprep.mubr.msk.bf16.mxu1 %vm1682_vm1, %v1681_v6  ;;  %v1690_v44 = vmov 3  }
 0x238   : > { %1505 = vmatprep.subr.bf16.mxu1 %v1681_v6 }
 0x23e   : > { %1496 = vmatmul.mubr.msk.bf16.vlgmr.msra.gmra.mrb[8].mxu1 %vm461_vm0, %v828_v43 }
 0x23f   : > { %1506 = vmatpush3.bf16.xpose.msra.mxu1 %v1002_v46  ;;  %1507 = vmatprep.mubr.msk.bf16.mxu1 %vm1682_vm1, %v1681_v6 }
 0x246   : > { %1508 = vmatmul.mubr.msk.bf16.vlgmr.msra.gmra.mrb[12].mxu1 %vm461_vm0, %v995_v47 }
 0x301   : > { %v1882_v48 = vpop.f32.mrb[0].mxu1 }
 0x302   : > { %v1479_v49 = vpop.f32.mrb[1].mxu1 }
 0x303   : > { %v1884_v50 = vpop.f32.mrb[2].mxu1  ;;  %v581_v49 = vsel %vm543_vm3, %v1863_v39, 0.0 }
 0x304   : > { %v1480_v51 = vpop.f32.mrb[3].mxu1 }
 0x305   : > { %v554_v51 = vmul.f32 1.442695, %v552_v25 }
 0x307   : > { %1609 = vpow2.f32 %v554_v51 }
 0x309   : > { %v704_v52 = vpop.f32.mrb[4].mxu1 }
 0x30a   : > { %v1887_v53 = vadd.f32 %v1823_v11, %v704_v52  ;;  %v1485_v54 = vpop.f32.mrb[5].mxu1 }
 0x30b   : > { %v707_v55 = vpop.f32.mrb[6].mxu1 }
 0x30c   : > { %v1890_v56 = vadd.f32 %v1823_v11, %v707_v55  ;;  %v1486_v57 = vpop.f32.mrb[7].mxu1  ;;  %v713_v58 = vsel %vm543_vm3, %v1887_v53, -inf }
 0x30d   : > { %714 = vmax.xlane.f32.xlu1 %v713_v58 }
 0x30e   : > { %v716_v59 = vsel %vm543_vm3, %v1890_v56, -inf }
 0x30f   : > { %717 = vmax.xlane.f32.xlu0 %v716_v59 }
 0x311   : > { %v871_v60 = vpop.f32.mrb[8].mxu1  ;;  %v1975_v58 = vpop.eup %1609 }
 0x312   : > { %v1897_v61 = vadd.f32 %v1823_v11, %v871_v60  ;;  %v1497_v62 = vpop.f32.mrb[9].mxu1 }
 0x313   : > { %v874_v63 = vpop.f32.mrb[10].mxu1 }
 0x314   : > { %v1900_v0 = vadd.f32 %v1823_v11, %v874_v63  ;;  %v1498_v1 = vpop.f32.mrb[11].mxu1  ;;  %v880_v2 = vsel %vm543_vm3, %v1897_v61, -inf }
 0x315   : > { %881 = vmax.xlane.f32.xlu0 %v880_v2 }
 0x316   : > { %v883_v3 = vsel %vm543_vm3, %v1900_v0, -inf }
 0x317   : > { %884 = vmax.xlane.f32.xlu1 %v883_v3 }
 0x319   : > { %v1038_v4 = vpop.f32.mrb[12].mxu1 }
 0x31a   : > { %v1907_v5 = vadd.f32 %v1823_v11, %v1038_v4  ;;  %v1509_v7 = vpop.f32.mrb[13].mxu1 }
 0x31b   : > { %v1041_v8 = vpop.f32.mrb[14].mxu1 }
 0x31c   : > { %v1910_v9 = vadd.f32 %v1823_v11, %v1041_v8  ;;  %v1047_v10 = vsel %vm543_vm3, %v1907_v5, -inf  ;;  %v1510_v12 = vpop.f32.mrb[15].mxu1 }
 0x31d   : > { %1048 = vmax.xlane.f32.xlu0 %v1047_v10 }
 0x31e   : > { %v1050_v14 = vsel %vm543_vm3, %v1910_v9, -inf }
 0x31f   : > { %1051 = vmax.xlane.f32.xlu1 %v1050_v14 }
 0x39a   : > { %v715_v16 = vpop.xlane.xlu1 %714 }
 0x39b   : > { %v1921_v11 = vmax.f32 %v1918_v15, %v715_v16 }
 0x39c   : > { %v718_v18 = vpop.xlane.xlu0 %717 }
 0x39d   : > { %v721_v19 = vsub.f32 %v1918_v15, %v1921_v11  ;;  %825 = vst.msk [vmem:[#allocation2] sm:$0xff] %vm755_vm5, %v1921_v11  ;;  %v720_v22 = vmax.f32 %v712_v17, %v718_v18  ;;  %729 = vperm.xlu0 %1569, %v1921_v11  }
 0x39f   : > { %826 = vst.msk [vmem:[#allocation2 + $0x8] sm:$0xff] %vm755_vm5, %v720_v22  ;;  %734 = vperm.xlu1 %1570, %v720_v22   ;;  %v722_v52 = vsub.f32 %v712_v17, %v720_v22 }
 0x3a1   : > { %1108 = vrot.lane.b32.xlu0 %v1853_v29, %s1687_s10  ;;  %v725_v54 = vmul.f32 1.442695, %v722_v52 }
 0x3a2   : > { %v882_v26 = vpop.xlane.xlu0 %881  ;;  %1573 = vset.pattern.permute.xlu0 %v1684_v20 }
 0x3a3   : > { %1571 = vset.pattern.permute.xlu1 %v1689_v30  ;;  %1611 = vpow2.f32 %v725_v54 }
 0x3a4   : > { %v1933_v31 = vld [vmem:[#allocation2] sm:$0xff]  ;;  %v885_v32 = vpop.xlane.xlu1 %884 }
 0x3a5   : > { %v1936_v33 = vmax.f32 %v1933_v31, %v882_v26 }
 0x3a6   : > { %v1938_v34 = vld [vmem:[#allocation2 + $0x8] sm:$0xff] }
 0x3a7   : > { %v888_v35 = vsub.f32 %v1933_v31, %v1936_v33  ;;  %992 = vst.msk [vmem:[#allocation2] sm:$0xff] %vm922_vm6, %v1936_v33  ;;  %v1945_v36 = vmax.f32 %v1938_v34, %v885_v32  ;;  %896 = vperm.xlu1 %1571, %v1936_v33  }
 0x3a9   : > { %v889_v37 = vsub.f32 %v1938_v34, %v1945_v36  ;;  %993 = vst.msk [vmem:[#allocation2 + $0x8] sm:$0xff] %vm922_vm6, %v1945_v36 }
 0x3aa   : > { %v1049_v40 = vpop.xlane.xlu0 %1048 }
 0x3ab   : > { %901 = vperm.xlu1 %1571, %v1945_v36  }
 0x3ac   : > { %v1052_v42 = vpop.xlane.xlu1 %1051 }
 0x3ae   : > { %v1045_v41 = vld [vmem:[#allocation2] sm:$0xff] }
 0x3af   : > { %v1053_v43 = vmax.f32 %v1045_v41, %v1049_v40  ;;  %1572 = vset.pattern.permute.xlu1 %v1690_v44 }
 0x3b0   : > { %v1954_v45 = vld [vmem:[#allocation2 + $0x8] sm:$0xff] }
 0x3b1   : > { %1159 = vst.msk [vmem:[#allocation2] sm:$0xff] %vm1089_vm7, %v1053_v43  ;;  %v1958_v46 = vmax.f32 %v1954_v45, %v1052_v42  ;;  %1063 = vperm.xlu1 %1572, %v1053_v43   ;;  %v1055_v55 = vsub.f32 %v1045_v41, %v1053_v43 }
 0x3b3   : > { %v1056_v47 = vsub.f32 %v1954_v45, %v1958_v46  ;;  %1160 = vst.msk [vmem:[#allocation2 + $0x8] sm:$0xff] %vm1089_vm7, %v1958_v46  ;;  %v1057_v57 = vmul.f32 1.442695, %v1055_v55  ;;  %v723_v55 = vmul.f32 1.442695, %v721_v19 }
 0x3b5   : > { %1068 = vperm.xlu1 %1572, %v1958_v46   ;;  %1613 = vpow2.f32 %v1057_v57 }
 0x3b9   : > { %774 = vrot.lane.b32.xlu1 %v1853_v29, %s1685_s7 }
 0x3ba   : > { %1574 = vset.pattern.permute.xlu1 %v1684_v20 }
 0x3bd   : > { %941 = vrot.lane.b32.xlu1 %v1853_v29, %s1686_s9  ;;  %v1978_v29 = vpop.eup %1611 }
 0x3bf   : > { %v1982_v39 = vpop.eup %1613 }
 0x3c0   : > { %582 = vadd.xlane.f32.xlu0 %v581_v49 }
 0x3d6   : > { %593 = vperm.xlu0 %1573, %v1975_v58  }
 0x3da   : > { %1576 = vset.pattern.permute.xlu0 %v1688_v13 }
 0x3db   : > { %768 = vperm.xlu0 %1576, %v1978_v29  }
 0x3df   : > { %1578 = vset.pattern.permute.xlu0 %v1690_v44 }
 0x3e0   : > { %1097 = vperm.xlu0 %1578, %v1982_v39  }
 0x3e1   : > { %579 = vadd.xlane.f32.xlu1 %v578_v21 }
 0x3e4   : > { %1582 = vset.pattern.permute.xlu0 %v1689_v30 }
 0x41c   : > { %v730_v23 = vpop.permute.xlu0 %729 }
 0x41d   : > { %v737_v25 = vsub.f32 %v1887_v53, %v730_v23 }
 0x41e   : > { %v735_v59 = vpop.permute.xlu1 %734 }
 0x41f   : > { %v739_v60 = vmul.f32 1.442695, %v737_v25  ;;  %v738_v62 = vsub.f32 %v1890_v56, %v735_v59  ;;  %v890_v25 = vmul.f32 1.442695, %v888_v35  ;;  %v892_v59 = vmul.f32 1.442695, %v889_v37 }
 0x420   : > { %v1109_v51 = vpop.permute.xlu0 %1108 }
 0x421   : > { %1615 = vpow2.f32 %v739_v60  ;;  %v741_v63 = vmul.f32 1.442695, %v738_v62  ;;  %v1059_v62 = vmul.f32 1.442695, %v1056_v47 }
 0x423   : > { %1617 = vpow2.f32 %v741_v63 }
 0x426   : > { %v897_v1 = vpop.permute.xlu1 %896 }
 0x427   : > { %v904_v2 = vsub.f32 %v1897_v61, %v897_v1 }
 0x429   : > { %v906_v3 = vmul.f32 1.442695, %v904_v2 }
 0x42a   : > { %v902_v4 = vpop.permute.xlu1 %901 }
 0x42b   : > { %v1616_v7 = vpop.eup %1615  ;;  %1619 = vpow2.f32 %v906_v3  ;;  %v905_v38 = vsub.f32 %v1900_v0, %v902_v4 }
 0x42c   : > { %v747_v8 = vsel %vm543_vm3, %v1616_v7, 0.0 }
 0x42d   : > { %v1618_v10 = vpop.eup %1617  ;;  %v908_v53 = vmul.f32 1.442695, %v905_v38  ;;  %748 = vadd.xlane.f32.xlu1 %v747_v8 }
 0x42e   : > { %v750_v56 = vsel %vm543_vm3, %v1618_v10, 0.0  ;;  %v773_v41 = vpack.c.bf16 %v1618_v10, %v1616_v7 }
 0x42f   : > { %1621 = vpow2.f32 %v908_v53 }
 0x430   : > { %v1064_v12 = vpop.permute.xlu1 %1063 }
 0x431   : > { %v1071_v14 = vsub.f32 %v1907_v5, %v1064_v12  ;;  %751 = vadd.xlane.f32.xlu1 %v750_v56  ;;  %v556_v5 = vmul.f32 1.442695, %v553_v28  ;;  %v575_v28 = vld [vmem:[#allocation3 + $0x8] sm:$0xff] }
 0x433   : > { %v1073_v16 = vmul.f32 1.442695, %v1071_v14 }
 0x434   : > { %v1069_v61 = vpop.permute.xlu1 %1068 }
 0x435   : > { %v1620_v17 = vpop.eup %1619  ;;  %1623 = vpow2.f32 %v1073_v16  ;;  %v1072_v18 = vsub.f32 %v1910_v9, %v1069_v61 }
 0x436   : > { %v914_v0 = vsel %vm543_vm3, %v1620_v17, 0.0 }
 0x437   : > { %v1075_v22 = vmul.f32 1.442695, %v1072_v18  ;;  %915 = vadd.xlane.f32.xlu1 %v914_v0  ;;  %v590_v0 = vld [vmem:[#allocation4 + $0x8] sm:$0xff] }
 0x438   : > { %v775_v26 = vpop.permute.xlu1 %774 }
 0x439   : > { %v1622_v32 = vpop.eup %1621  ;;  %1625 = vpow2.f32 %v1075_v22  ;;  %1488 = vmatpush3.bf16.msra.mxu0 %v775_v26 }
 0x43a   : > { %v917_v40 = vsel %vm543_vm3, %v1622_v32, 0.0  ;;  %1499 = vmatprep.subr.bf16.mxu0 %v1681_v6  ;;  %1627 = vpow2.f32 %v556_v5  ;;  %v940_v49 = vpack.c.bf16 %v1622_v32, %v1620_v17 }
 0x43b   : > { %918 = vadd.xlane.f32.xlu1 %v917_v40  ;;  %1629 = vpow2.f32 %v723_v55 }
 0x43c   : > { %1490 = vmatmul.mubr.msk.bf16.vlgmr.msra.gmra.mrb[4].mxu0 %vm543_vm3, %v773_v41  ;;  %v942_v9 = vpop.permute.xlu1 %941  ;;  %1631 = vpow2.f32 %v890_v25 }
 0x43d   : > { %1500 = vmatpush3.bf16.msra.mxu0 %v942_v9  ;;  %1501 = vmatprep.mubr.msk.bf16.mxu0 %vm1682_vm1, %v1681_v6  ;;  %1633 = vpow2.f32 %v892_v59 }
 0x43e   : > { %1511 = vmatprep.subr.bf16.mxu0 %v1681_v6  ;;  %1635 = vpow2.f32 %v1059_v62  ;;  %v1093_v62 = vld [vmem:[#allocation4 + $0x30] sm:$0xff] }
 0x43f   : > { %v1624_v42 = vpop.eup %1623 }
 0x440   : > { %v1081_v43 = vsel %vm543_vm3, %v1624_v42, 0.0 }
 0x441   : > { %1082 = vadd.xlane.f32.xlu1 %v1081_v43  ;;  %v759_v43 = vld [vmem:[#allocation4 + $0x10] sm:$0xff] }
 0x443   : > { %v1626_v52 = vpop.eup %1625 }
 0x444   : > { %1502 = vmatmul.mubr.msk.bf16.vlgmr.msra.gmra.mrb[8].mxu0 %vm543_vm3, %v940_v49  ;;  %v1084_v24 = vsel %vm543_vm3, %v1626_v52, 0.0  ;;  %v1628_v27 = vpop.eup %1627  ;;  %v1107_v54 = vpack.c.bf16 %v1626_v52, %v1624_v42  ;;  %v760_v49 = vld [vmem:[#allocation4 + $0x18] sm:$0xff] }
 0x445   : > { %1085 = vadd.xlane.f32.xlu1 %v1084_v24  ;;  %1512 = vmatpush3.bf16.msra.mxu0 %v1109_v51  ;;  %v577_v57 = vmul.f32 %v1628_v27, %v575_v28  ;;  %v1630_v60 = vpop.eup %1629 }
 0x446   : > { %1513 = vmatprep.mubr.msk.bf16.mxu0 %vm1682_vm1, %v1681_v6  ;;  %v589_v6 = vld [vmem:[#allocation4] sm:$0xff]  ;;  %v1632_v31 = vpop.eup %1631 }
 0x447   : > { %v1634_v33 = vpop.eup %1633 }
 0x448   : > { %v1636_v34 = vpop.eup %1635 }
 0x44c   : > { %1514 = vmatmul.mubr.msk.bf16.vlgmr.msra.gmra.mrb[12].mxu0 %vm543_vm3, %v1107_v54 }
 0x44d   : > { %v583_v21 = vpop.xlane.xlu0 %582 }
 0x44e   : > { %v585_v23 = vadd.f32 %v583_v21, %v577_v57 }
 0x450   : > { %588 = vst.msk [vmem:[#allocation3 + $0x8] sm:$0xff] %vm586_vm4, %v585_v23 }
 0x455   : > { %v594_v15 = vpop.permute.xlu0 %593 }
 0x456   : > { %v601_v11 = vmul.f32 %v594_v15, %v589_v6  ;;  %598 = vperm.xlu1 %1574, %v1628_v27  }
 0x457   : > { %v744_v63 = vld [vmem:[#allocation3 + $0x8] sm:$0xff] }
 0x458   : > { %v654_v19 = vadd.f32 %v1882_v48, %v601_v11  ;;  %v574_v48 = vld [vmem:[#allocation3] sm:$0xff]  ;;  %v746_v2 = vmul.f32 %v1978_v29, %v744_v63 }
 0x459   : > { %v576_v35 = vmul.f32 %v1975_v58, %v574_v48 }
 0x45a   : > { %656 = vst.msk [vmem:[#allocation4] sm:$0xff] %vm461_vm0, %v654_v19  ;;  %1575 = vset.pattern.permute.xlu1 %v1688_v13  ;;  %v769_v51 = vpop.permute.xlu0 %768 }
 0x45b   : > { %763 = vperm.xlu1 %1575, %v1630_v60  }
 0x45f   : > { %1577 = vset.pattern.permute.xlu1 %v1689_v30 }
 0x460   : > { %930 = vperm.xlu1 %1577, %v1632_v31  }
 0x464   : > { %935 = vperm.xlu1 %1577, %v1634_v33  }
 0x468   : > { %1579 = vset.pattern.permute.xlu1 %v1690_v44 }
 0x469   : > { %1102 = vperm.xlu1 %1579, %v1636_v34  }
 0x46d   : > { %1580 = vset.pattern.permute.xlu1 %v1684_v20 }
 0x46e   : > { %v580_v36 = vpop.xlane.xlu1 %579 }
 0x46f   : > { %v584_v37 = vadd.f32 %v580_v36, %v576_v35 }
 0x471   : > { %587 = vst.msk [vmem:[#allocation3] sm:$0xff] %vm586_vm4, %v584_v37 }
 0x478   : > { %v743_v45 = vld [vmem:[#allocation3] sm:$0xff] }
 0x479   : > { %v745_v46 = vmul.f32 %v1630_v60, %v743_v45 }
 0x4ba   : > { %v749_v47 = vpop.xlane.xlu1 %748 }
 0x4bb   : > { %v753_v1 = vadd.f32 %v749_v47, %v745_v46 }
 0x4bd   : > { %756 = vst.msk [vmem:[#allocation3] sm:$0xff] %vm755_vm5, %v753_v1 }
 0x4be   : > { %v752_v3 = vpop.xlane.xlu1 %751 }
 0x4bf   : > { %v754_v4 = vadd.f32 %v752_v3, %v746_v2 }
 0x4c1   : > { %757 = vst.msk [vmem:[#allocation3 + $0x8] sm:$0xff] %vm755_vm5, %v754_v4 }
 0x4c4   : > { %v910_v58 = vld [vmem:[#allocation3] sm:$0xff]  ;;  %v916_v7 = vpop.xlane.xlu1 %915 }
 0x4c5   : > { %v912_v38 = vmul.f32 %v1632_v31, %v910_v58  ;;  %v1098_v31 = vpop.permute.xlu0 %1097 }
 0x4c6   : > { %v1105_v48 = vmul.f32 %v1098_v31, %v1093_v62 }
 0x4c7   : > { %v920_v8 = vadd.f32 %v916_v7, %v912_v38 }
 0x4c8   : > { %v911_v10 = vld [vmem:[#allocation3 + $0x8] sm:$0xff]  ;;  %v919_v12 = vpop.xlane.xlu1 %918 }
 0x4c9   : > { %923 = vst.msk [vmem:[#allocation3] sm:$0xff] %vm922_vm6, %v920_v8  ;;  %v913_v53 = vmul.f32 %v1634_v33, %v911_v10  ;;  %v1094_v33 = vld [vmem:[#allocation4 + $0x38] sm:$0xff] }
 0x4cb   : > { %v921_v56 = vadd.f32 %v919_v12, %v913_v53 }
 0x4cd   : > { %924 = vst.msk [vmem:[#allocation3 + $0x8] sm:$0xff] %vm922_vm6, %v921_v56 }
 0x4ce   : > { %v1083_v14 = vpop.xlane.xlu1 %1082 }
 0x4d0   : > { %v1077_v16 = vld [vmem:[#allocation3] sm:$0xff] }
 0x4d1   : > { %v1079_v29 = vmul.f32 %v1982_v39, %v1077_v16 }
 0x4d2   : > { %v1086_v61 = vpop.xlane.xlu1 %1085 }
 0x4d3   : > { %v1087_v17 = vadd.f32 %v1083_v14, %v1079_v29 }
 0x4d4   : > { %v1078_v18 = vld [vmem:[#allocation3 + $0x8] sm:$0xff] }
 0x4d5   : > { %1090 = vst.msk [vmem:[#allocation3] sm:$0xff] %vm1089_vm7, %v1087_v17  ;;  %v1080_v22 = vmul.f32 %v1636_v34, %v1078_v18 }
 0x4d6   : > { %v599_v26 = vpop.permute.xlu1 %598 }
 0x4d7   : > { %v1088_v32 = vadd.f32 %v1086_v61, %v1080_v22  ;;  %v602_v40 = vmul.f32 %v599_v26, %v590_v0 }
 0x4d9   : > { %1091 = vst.msk [vmem:[#allocation3 + $0x8] sm:$0xff] %vm1089_vm7, %v1088_v32  ;;  %v655_v41 = vadd.f32 %v1884_v50, %v602_v40 }
 0x4da   : > { %v764_v50 = vpop.permute.xlu1 %763 }
 0x4db   : > { %657 = vst.msk [vmem:[#allocation4 + $0x8] sm:$0xff] %vm461_vm0, %v655_v41  ;;  %v771_v52 = vmul.f32 %v764_v50, %v759_v43 }
 0x4dc   : > { %v1164_v5 = vld [vmem:[#allocation3] sm:$0xff] }
 0x4dd   : > { %1637 = vrcp.f32 %v1164_v5 }
 0x4e0   : > { %v1165_v9 = vld [vmem:[#allocation3 + $0x8] sm:$0xff] }
 0x4e1   : > { %1639 = vrcp.f32 %v1165_v9 }
 0x4e2   : > { %v1169_v50 = vld [vmem:[#allocation4 + $0x8] sm:$0xff] }
 0x4e7   : > { %v1638_v39 = vpop.eup %1637 }
 0x4e8   : > { %1197 = vperm.xlu0 %1582, %v1638_v39   ;;  %1172 = vperm.xlu1 %1580, %v1638_v39  }
 0x4eb   : > { %v1640_v42 = vpop.eup %1639 }
 0x4ec   : > { %1583 = vset.pattern.permute.xlu0 %v1684_v20  ;;  %1581 = vset.pattern.permute.xlu1 %v1688_v13  ;;  %v931_v20 = vpop.permute.xlu1 %930  ;;  %v772_v13 = vmul.f32 %v769_v51, %v760_v49 }
 0x4ed   : > { %1185 = vperm.xlu1 %1581, %v1638_v39   ;;  %1177 = vperm.xlu0 %1583, %v1640_v42  }
 0x4f0   : > { %v936_v21 = vpop.permute.xlu1 %935 }
 0x4f1   : > { %1189 = vperm.xlu1 %1581, %v1640_v42   ;;  %1586 = vset.pattern.permute.xlu0 %v1690_v44 }
 0x4f2   : > { %1213 = vperm.xlu0 %1586, %v1640_v42  }
 0x4f4   : > { %v1103_v34 = vpop.permute.xlu1 %1102 }
 0x4f5   : > { %1584 = vset.pattern.permute.xlu1 %v1689_v30  ;;  %v926_v30 = vld [vmem:[#allocation4 + $0x20] sm:$0xff]  ;;  %v1106_v36 = vmul.f32 %v1103_v34, %v1094_v33 }
 0x4f6   : > { %1201 = vperm.xlu1 %1584, %v1640_v42   ;;  %v938_v23 = vmul.f32 %v931_v20, %v926_v30  ;;  %v1168_v42 = vld [vmem:[#allocation4] sm:$0xff] }
 0x4fa   : > { %1585 = vset.pattern.permute.xlu1 %v1690_v44  ;;  %v927_v44 = vld [vmem:[#allocation4 + $0x28] sm:$0xff] }
 0x4fb   : > { %1209 = vperm.xlu1 %1585, %v1638_v39   ;;  %v939_v6 = vmul.f32 %v936_v21, %v927_v44 }
 0x50f   : > { %v814_v24 = vpop.f32.mrb[4].mxu0 }
 0x510   : > { %v821_v27 = vadd.f32 %v814_v24, %v771_v52  ;;  %v1491_v28 = vpop.f32.mrb[5].mxu0 }
 0x511   : > { %v817_v54 = vpop.f32.mrb[6].mxu0 }
 0x512   : > { %823 = vst.msk [vmem:[#allocation4 + $0x10] sm:$0xff] %vm461_vm0, %v821_v27  ;;  %v822_v55 = vadd.f32 %v817_v54, %v772_v13  ;;  %v1492_v57 = vpop.f32.mrb[7].mxu0 }
 0x514   : > { %824 = vst.msk [vmem:[#allocation4 + $0x18] sm:$0xff] %vm461_vm0, %v822_v55 }
 0x517   : > { %v981_v25 = vpop.f32.mrb[8].mxu0 }
 0x518   : > { %v988_v59 = vadd.f32 %v981_v25, %v938_v23  ;;  %v1503_v15 = vpop.f32.mrb[9].mxu0 }
 0x519   : > { %v984_v11 = vpop.f32.mrb[10].mxu0  ;;  %v1182_v4 = vld [vmem:[#allocation4 + $0x10] sm:$0xff] }
 0x51a   : > { %990 = vst.msk [vmem:[#allocation4 + $0x20] sm:$0xff] %vm461_vm0, %v988_v59  ;;  %v989_v19 = vadd.f32 %v984_v11, %v939_v6  ;;  %v1504_v60 = vpop.f32.mrb[11].mxu0 }
 0x51b   : > { %v1183_v7 = vld [vmem:[#allocation4 + $0x18] sm:$0xff] }
 0x51c   : > { %991 = vst.msk [vmem:[#allocation4 + $0x28] sm:$0xff] %vm461_vm0, %v989_v19 }
 0x51f   : > { %v1148_v35 = vpop.f32.mrb[12].mxu0 }
 0x520   : > { %v1155_v37 = vadd.f32 %v1148_v35, %v1105_v48  ;;  %v1515_v45 = vpop.f32.mrb[13].mxu0 }
 0x521   : > { %v1151_v46 = vpop.f32.mrb[14].mxu0  ;;  %v1194_v12 = vld [vmem:[#allocation4 + $0x20] sm:$0xff] }
 0x522   : > { %1157 = vst.msk [vmem:[#allocation4 + $0x30] sm:$0xff] %vm461_vm0, %v1155_v37  ;;  %v1156_v47 = vadd.f32 %v1151_v46, %v1106_v36  ;;  %v1516_v63 = vpop.f32.mrb[15].mxu0 }
 0x523   : > { %v1195_v14 = vld [vmem:[#allocation4 + $0x28] sm:$0xff] }
 0x524   : > { %1158 = vst.msk [vmem:[#allocation4 + $0x38] sm:$0xff] %vm461_vm0, %v1156_v47 }
 0x529   : > { %v1206_v22 = vld [vmem:[#allocation4 + $0x30] sm:$0xff] }
 0x52b   : > { %v1207_v18 = vld [vmem:[#allocation4 + $0x38] sm:$0xff] }
 0x567   : > { %v1173_v1 = vpop.permute.xlu1 %1172  ;;  %v1198_v2 = vpop.permute.xlu0 %1197 }
 0x568   : > { %v1204_v16 = vmul.f32 %v1198_v2, %v1194_v12  ;;  %v1180_v51 = vmul.f32 %v1173_v1, %v1168_v42 }
 0x56c   : > { %v1186_v3 = vpop.permute.xlu1 %1185  ;;  %v1178_v10 = vpop.permute.xlu0 %1177 }
 0x56d   : > { %v1192_v38 = vmul.f32 %v1186_v3, %v1182_v4  ;;  %v1181_v52 = vmul.f32 %v1178_v10, %v1169_v50 }
 0x570   : > { %v1190_v58 = vpop.permute.xlu1 %1189 }
 0x571   : > { %v1193_v8 = vmul.f32 %v1190_v58, %v1183_v7  ;;  %v1214_v61 = vpop.permute.xlu0 %1213 }
 0x572   : > { %v1217_v26 = vmul.f32 %v1214_v61, %v1207_v18 }
 0x573   : > { %v1587_v53 = vpack.i.bf16 %v1193_v8, %v1192_v38 }
 0x575   : > { %v1202_v56 = vpop.permute.xlu1 %1201  ;;  %1588 = vrot.lane.b32.xlu1 %v1587_v53, %s1687_s10 }
 0x576   : > { %v1205_v29 = vmul.f32 %v1202_v56, %v1195_v14 }
 0x578   : > { %v1592_v17 = vpack.i.bf16 %v1205_v29, %v1204_v16 }
 0x57a   : > { %v1210_v0 = vpop.permute.xlu1 %1209  ;;  %1593 = vrot.lane.b32.xlu1 %v1592_v17, %s1686_s9 }
 0x57b   : > { %v1216_v32 = vmul.f32 %v1210_v0, %v1206_v22 }
 0x57d   : > { %v1597_v40 = vpack.i.bf16 %v1217_v26, %v1216_v32 }
 0x57f   : > { %1598 = vrot.lane.b32.xlu0 %v1597_v40, %s1685_s7 }
 0x5e7   : > { %v1589_v41 = vpop.permute.xlu1 %1588 }
 0x5e8   : > { %v1591_v9 = vunpack.i.h.bf16 %v1589_v41  ;;  %v1590_v39 = vunpack.i.l.bf16 %v1589_v41 }
 0x5ea   : > { %v1243_v24 = vsel %vm461_vm0, %v1181_v52, %v1591_v9  ;;  %v1242_v13 = vsel %vm461_vm0, %v1180_v51, %v1590_v39 }
 0x5ec   : > { %v1594_v5 = vpop.permute.xlu1 %1593 }
 0x5ed   : > { %v1596_v43 = vunpack.i.h.bf16 %v1594_v5  ;;  %v1595_v49 = vunpack.i.l.bf16 %v1594_v5 }
 0x5ef   : > { %v1246_v54 = vsel %vm1244_vm8, %v1243_v24, %v1596_v43  ;;  %v1245_v55 = vsel %vm1244_vm8, %v1242_v13, %v1595_v49 }
 0x5f1   : > { %v1599_v20 = vpop.permute.xlu0 %1598 }
 0x5f2   : > { %v1601_v27 = vunpack.i.h.bf16 %v1599_v20  ;;  %v1600_v28 = vunpack.i.l.bf16 %v1599_v20 }
 0x5f4   : > { %v1249_v57 = vsel %vm1247_vm9, %v1246_v54, %v1601_v27  ;;  %v1248_v30 = vsel %vm1247_vm9, %v1245_v55, %v1600_v28 }
 0x5f5   : > { %v1451_v44 = vpack.c.bf16 %v1249_v57, %v1248_v30 }
 0x5f7   : > { %1452 = vst [vmem:[%s449_s14] sm:$0xff] %v1451_v44  }
 0x5f8 PF: > { %s14_s19 = sadd.s32 1, %s1679_s19   ;;  %s2085_s15 = smov %s1667_s16 }
 0x5f9   : > { %p11_p10 = scmp.ge.s32.totalorder %s14_s19, 4   ;;  %s2086_s16 = smov %s1755_s24 }
 0x5fa   : > { %s2087_s17 = smov %s1675_s18  ;;  %s2088_s18 = smov %s2090_s20 }
 0x5fb   :  { %13 = sbr.rel (!%p11_p10) target bundleno = 3 (0x3), region = 224 }

// kernel: forward.46
= control target key start
LH: loop header
LB: loop body
LE: loop exit
PB: predicated region body
PF: predicated region fallthrough
CT: control target
= control target key end

     0   :  { %v597_v1 = vmov 0   ;;  %v229_v19 = vlaneseq  ;;  %s811_s1 = inlined_call_operand.vmem [shape: bf16[128,256], index: 1, kind: input, shape index: {}]   ;;  %s812_s0 = inlined_call_operand.vmem [shape: bf16[32,128], index: 0, kind: input, shape index: {}]   ;;  %s813_s2 = inlined_call_operand.vmem [shape: f32[1,256], index: 2, kind: input, shape index: {}]   ;;  %s814_s3 = inlined_call_operand.vmem [shape: bf16[32,256], index: 3, kind: output, shape index: {}]  }
   0x1   :  { %v539_v0 = vld [vmem:[%s811_s1 + $0x4] ss:$8 sps:$4 sm:$0xff]   ;;  %179 = vmatprep.mubr.bf16.mxu0 %v597_v1  ;;  %189 = vmatprep.mubr.bf16.mxu1 %v597_v1  ;;  %v541_v2 = vld [vmem:[%s811_s1] ss:$8 sps:$4 sm:$0xff]   ;;  %v542_v3 = vld [vmem:[%s811_s1 + $0x14] ss:$8 sps:$4 sm:$0xff]  }
   0x2   :  { %147 = vmatprep.subr.bf16.mxu0 %v539_v0  ;;  %521 = vmatprep.subr.bf16.mxu1 %v539_v0  ;;  %v544_v4 = vld [vmem:[%s811_s1 + $0x10] ss:$8 sps:$4 sm:$0xff]   ;;  %v545_v5 = vld [vmem:[%s811_s1 + $0x24] ss:$8 sps:$4 sm:$0xff]   ;;  %v547_v6 = vld [vmem:[%s811_s1 + $0x20] ss:$8 sps:$4 sm:$0xff]  }
   0x3   :  { %148 = vmatpush1.bf16.msra.mxu0 %v541_v2  ;;  %529 = vmatpush1.bf16.msra.mxu1 %v541_v2  ;;  %v548_v7 = vld [vmem:[%s811_s1 + $0x34] ss:$8 sps:$4 sm:$0xff]   ;;  %v550_v8 = vld [vmem:[%s811_s1 + $0x30] ss:$8 sps:$4 sm:$0xff]   ;;  %v551_v9 = vld [vmem:[%s811_s1 + $0x44] ss:$8 sps:$4 sm:$0xff]  }
   0x4   :  { %149 = vmatprep.subr.bf16.mxu0 %v542_v3  ;;  %522 = vmatprep.subr.bf16.mxu1 %v542_v3  ;;  %v553_v10 = vld [vmem:[%s811_s1 + $0x40] ss:$8 sps:$4 sm:$0xff]   ;;  %v554_v11 = vld [vmem:[%s811_s1 + $0x54] ss:$8 sps:$4 sm:$0xff]   ;;  %v556_v12 = vld [vmem:[%s811_s1 + $0x50] ss:$8 sps:$4 sm:$0xff]  }
   0x5   :  { %v557_v13 = vld [vmem:[%s811_s1 + $0x64] ss:$8 sps:$4 sm:$0xff]   ;;  %v559_v14 = vld [vmem:[%s811_s1 + $0x60] ss:$8 sps:$4 sm:$0xff]   ;;  %v560_v15 = vld [vmem:[%s811_s1 + $0x74] ss:$8 sps:$4 sm:$0xff]  }
   0x6   :  { %v562_v16 = vld [vmem:[%s811_s1 + $0x70] ss:$8 sps:$4 sm:$0xff]   ;;  %v563_v17 = vld [vmem:[%s812_s0] sm:$0xff]   ;;  %v564_v18 = vld [vmem:[%s812_s0 + $0x8] sm:$0xff]   ;;  %v230_v20 = vshrl.u32 %v229_v19, 7 }
   0x7   :  { %150 = vmatpush1.bf16.msra.mxu0 %v544_v4  ;;  %530 = vmatpush1.bf16.msra.mxu1 %v544_v4  ;;  %v227_v22 = vld [vmem:[%s813_s2] sm:$0x3] }
   0x8   :  { %151 = vmatprep.subr.bf16.mxu0 %v545_v5  ;;  %523 = vmatprep.subr.bf16.mxu1 %v545_v5  ;;  %v231_v21 = vsub.s32 0, %v230_v20  ;;  %v235_v23 = vsub.s32 1, %v230_v20 }
   0xa   :  { %v232_v24 = vrot.slane %v227_v22, %v231_v21  ;;  %v236_v25 = vrot.slane %v227_v22, %v235_v23 }
   0xb   :  { %152 = vmatpush1.bf16.msra.mxu0 %v547_v6  ;;  %531 = vmatpush1.bf16.msra.mxu1 %v547_v6 }
   0xc   :  { %153 = vmatprep.subr.bf16.mxu0 %v548_v7  ;;  %524 = vmatprep.subr.bf16.mxu1 %v548_v7  ;;  %v598_v7 = vmov -1.0  }
   0xf   :  { %154 = vmatpush1.bf16.msra.mxu0 %v550_v8  ;;  %532 = vmatpush1.bf16.msra.mxu1 %v550_v8 }
  0x10   :  { %155 = vmatprep.subr.bf16.mxu0 %v551_v9  ;;  %525 = vmatprep.subr.bf16.mxu1 %v551_v9 }
  0x13   :  { %156 = vmatpush1.bf16.msra.mxu0 %v553_v10  ;;  %533 = vmatpush1.bf16.msra.mxu1 %v553_v10 }
  0x14   :  { %157 = vmatprep.subr.bf16.mxu0 %v554_v11  ;;  %526 = vmatprep.subr.bf16.mxu1 %v554_v11 }
  0x17   :  { %158 = vmatpush1.bf16.msra.mxu0 %v556_v12  ;;  %534 = vmatpush1.bf16.msra.mxu1 %v556_v12 }
  0x18   :  { %159 = vmatprep.subr.bf16.mxu0 %v557_v13  ;;  %527 = vmatprep.subr.bf16.mxu1 %v557_v13 }
  0x1b   :  { %160 = vmatpush1.bf16.msra.mxu0 %v559_v14  ;;  %535 = vmatpush1.bf16.msra.mxu1 %v559_v14 }
  0x1c   :  { %161 = vmatprep.subr.bf16.mxu0 %v560_v15  ;;  %528 = vmatprep.subr.bf16.mxu1 %v560_v15 }
  0x1f   :  { %162 = vmatpush1.bf16.msra.mxu0 %v562_v16  ;;  %536 = vmatpush1.bf16.msra.mxu1 %v562_v16 }
  0x22   :  { %180 = vmatmul.mubr.bf16.vlgmr.msra.gmra.mrb[0].mxu0 %v563_v17  ;;  %190 = vmatmul.mubr.bf16.vlgmr.msra.gmra.mrb[0].mxu1 %v564_v18 }
  0xf5   :  { %v181_v26 = vpop.f32.mrb[0].mxu0  ;;  %v191_v27 = vpop.f32.mrb[0].mxu1 }
  0xf6   :  { %v239_v28 = vadd.f32 %v232_v24, %v181_v26  ;;  %v243_v29 = vadd.f32 %v232_v24, %v191_v27  ;;  %v183_v30 = vpop.f32.mrb[1].mxu0  ;;  %v193_v31 = vpop.f32.mrb[1].mxu1 }
  0xf7   :  { %v240_v32 = vadd.f32 %v236_v25, %v183_v30  ;;  %v244_v33 = vadd.f32 %v236_v25, %v193_v31  ;;  %v185_v34 = vpop.f32.mrb[2].mxu0  ;;  %v195_v35 = vpop.f32.mrb[2].mxu1 }
  0xf8   :  { %v255_v36 = vmul.f32 0.70710677, %v239_v28  ;;  %v259_v37 = vmul.f32 0.70710677, %v243_v29  ;;  %v187_v43 = vpop.f32.mrb[3].mxu0  ;;  %v197_v47 = vpop.f32.mrb[3].mxu1  ;;  %v679_v52 = vadd.f32 %v232_v24, %v185_v34  ;;  %v684_v56 = vadd.f32 %v232_v24, %v195_v35 }
  0xf9   :  { %v256_v38 = vmul.f32 0.70710677, %v240_v32  ;;  %v676_v42 = vmul.f32 0.70710677, %v244_v33  ;;  %v686_v57 = vmul.f32 0.5, %v239_v28  ;;  %v688_v59 = vadd.f32 %v236_v25, %v187_v43 }
  0xfa   :  { %v279_v39 = vand.u32 2147483647, %v255_v36  ;;  %v283_v40 = vand.u32 2147483647, %v259_v37  ;;  %v682_v55 = vmul.f32 0.70710677, %v679_v52  ;;  %v707_v11 = vadd.f32 %v236_v25, %v197_v47 }
  0xfb   :  { %v280_v41 = vand.u32 2147483647, %v256_v38  ;;  %v284_v50 = vand.u32 2147483647, %v676_v42  ;;  %v690_v60 = vmul.f32 0.5, %v243_v29  ;;  %vm263_vm0 = vcmp.ge.f32.partialorder %v255_v36, 0.0 }
  0xfc   :  { %v287_v44 = vmul.f32 0.3275911, %v279_v39  ;;  %v291_v45 = vmul.f32 0.3275911, %v283_v40  ;;  %v391_v54 = vsub.f32 0.0, %v279_v39  ;;  %v395_v61 = vsub.f32 0.0, %v283_v40 }
  0xfd   :  { %v288_v46 = vmul.f32 0.3275911, %v280_v41  ;;  %v292_v53 = vmul.f32 0.3275911, %v284_v50  ;;  %v281_v62 = vand.u32 2147483647, %v682_v55 }
  0xfe   :  { %v295_v48 = vadd.f32 1.0, %v287_v44  ;;  %v299_v49 = vadd.f32 1.0, %v291_v45  ;;  %v693_v63 = vmul.f32 0.5, %v240_v32  ;;  %v392_v0 = vsub.f32 0.0, %v280_v41 }
  0xff   :  { %v296_v51 = vadd.f32 1.0, %v288_v46  ;;  %v300_v58 = vadd.f32 1.0, %v292_v53  ;;  %v696_v1 = vmul.f32 0.70710677, %v684_v56  ;;  %v399_v2 = vmul.f32 %v391_v54, %v279_v39 }
 0x100   :  { %565 = vrcp.f32 %v295_v48  ;;  %vm267_vm1 = vcmp.ge.f32.partialorder %v259_v37, 0.0  ;;  %v289_v3 = vmul.f32 0.3275911, %v281_v62  ;;  %vm264_vm2 = vcmp.ge.f32.partialorder %v256_v38, 0.0 }
 0x101   :  { %567 = vrcp.f32 %v299_v49  ;;  %v698_v4 = vmul.f32 0.5, %v244_v33  ;;  %v285_v5 = vand.u32 2147483647, %v696_v1  ;;  %v702_v6 = vmul.f32 0.70710677, %v688_v59 }
 0x102   :  { %569 = vrcp.f32 %v296_v51  ;;  %v705_v8 = vsel %vm263_vm0, 1.0, %v598_v7  ;;  %v403_v9 = vmul.f32 %v395_v61, %v283_v40  ;;  %v297_v10 = vadd.f32 1.0, %v289_v3 }
 0x103   :  { %571 = vrcp.f32 %v300_v58  ;;  %v710_v12 = vsel %vm267_vm1, 1.0, %v598_v7  ;;  %v400_v13 = vmul.f32 %v392_v0, %v280_v41  ;;  %v293_v14 = vmul.f32 0.3275911, %v285_v5 }
 0x104   :  { %v282_v15 = vand.u32 2147483647, %v702_v6  ;;  %v407_v17 = vmul.f32 1.442695, %v399_v2  ;;  %v716_v18 = vsel %vm264_vm2, 1.0, %v598_v7  ;;  %v396_v19 = vsub.f32 0.0, %v284_v50 }
 0x105   :  { %573 = vrcp.f32 %v297_v10  ;;  %v393_v22 = vsub.f32 0.0, %v281_v62  ;;  %v301_v23 = vadd.f32 1.0, %v293_v14  ;;  %v415_v26 = vmul.f32 1.442695, %v403_v9 }
 0x106   :  { %v290_v24 = vmul.f32 0.3275911, %v282_v15  ;;  %v723_v27 = vmul.f32 0.70710677, %v707_v11  ;;  %v409_v29 = vmul.f32 1.442695, %v400_v13  ;;  %v404_v33 = vmul.f32 %v396_v19, %v284_v50 }
 0x107   :  { %575 = vrcp.f32 %v301_v23  ;;  %v397_v34 = vsub.f32 0.0, %v285_v5  ;;  %v401_v38 = vmul.f32 %v393_v22, %v281_v62  ;;  %v394_v41 = vsub.f32 0.0, %v282_v15 }
 0x108   :  { %v298_v30 = vadd.f32 1.0, %v290_v24  ;;  %v286_v35 = vand.u32 2147483647, %v723_v27  ;;  %577 = vpow2.f32 %v407_v17  ;;  %v417_v48 = vmul.f32 1.442695, %v404_v33 }
 0x109   :  { %v405_v49 = vmul.f32 %v397_v34, %v285_v5  ;;  %v411_v62 = vmul.f32 1.442695, %v401_v38  ;;  %v402_v0 = vmul.f32 %v394_v41, %v282_v15  ;;  %vm268_vm3 = vcmp.ge.f32.partialorder %v676_v42, 0.0 }
 0x10a   :  { %v713_v16 = vpop.eup %565  ;;  %579 = vrcp.f32 %v298_v30  ;;  %v294_v43 = vmul.f32 0.3275911, %v286_v35  ;;  %v398_v14 = vsub.f32 0.0, %v286_v35  ;;  %vm265_vm4 = vcmp.ge.f32.partialorder %v682_v55, 0.0 }
 0x10b   :  { %v718_v20 = vpop.eup %567  ;;  %v319_v21 = vmul.f32 1.0614054, %v713_v16  ;;  %581 = vpow2.f32 %v415_v26  ;;  %v419_v13 = vmul.f32 1.442695, %v405_v49  ;;  %v273_v55 = vsel %vm265_vm4, 1.0, %v598_v7 }
 0x10c   :  { %v323_v25 = vmul.f32 1.0614054, %v718_v20  ;;  %v725_v31 = vpop.eup %569  ;;  %v302_v50 = vadd.f32 1.0, %v294_v43  ;;  %583 = vpow2.f32 %v409_v29  ;;  %vm269_vm5 = vcmp.ge.f32.partialorder %v696_v1, 0.0 }
 0x10d   :  { %v327_v28 = vadd.f32 -1.4531521, %v319_v21  ;;  %v320_v37 = vmul.f32 1.0614054, %v725_v31  ;;  %v730_v39 = vpop.eup %571  ;;  %vm266_vm6 = vcmp.ge.f32.partialorder %v702_v6, 0.0  ;;  %v277_v1 = vsel %vm269_vm5, 1.0, %v598_v7 }
 0x10e   :  { %v331_v32 = vadd.f32 -1.4531521, %v323_v25  ;;  %v324_v46 = vmul.f32 1.0614054, %v730_v39  ;;  %585 = vrcp.f32 %v302_v50  ;;  %v413_v25 = vmul.f32 1.442695, %v402_v0 }
 0x10f   :  { %v335_v36 = vmul.f32 %v713_v16, %v327_v28  ;;  %v328_v45 = vadd.f32 -1.4531521, %v320_v37  ;;  %v736_v58 = vpop.eup %573  ;;  %587 = vpow2.f32 %v417_v48  ;;  %v406_v37 = vmul.f32 %v398_v14, %v286_v35 }
 0x110   :  { %v339_v40 = vmul.f32 %v718_v20, %v331_v32  ;;  %v332_v54 = vadd.f32 -1.4531521, %v324_v46  ;;  %v321_v5 = vmul.f32 1.0614054, %v736_v58  ;;  %589 = vpow2.f32 %v411_v62 }
 0x111   :  { %v343_v44 = vadd.f32 1.4214138, %v335_v36  ;;  %v336_v53 = vmul.f32 %v725_v31, %v328_v45  ;;  %v741_v17 = vpop.eup %575  ;;  %591 = vpow2.f32 %v419_v13  ;;  %v421_v62 = vmul.f32 1.442695, %v406_v37 }
 0x112   :  { %v347_v47 = vadd.f32 1.4214138, %v339_v40  ;;  %v340_v9 = vmul.f32 %v730_v39, %v332_v54  ;;  %v329_v23 = vadd.f32 -1.4531521, %v321_v5  ;;  %v325_v24 = vmul.f32 1.0614054, %v741_v17  ;;  %v578_v26 = vpop.eup %577 }
 0x113   :  { %v351_v51 = vmul.f32 %v713_v16, %v343_v44  ;;  %v344_v3 = vadd.f32 1.4214138, %v336_v53  ;;  %593 = vpow2.f32 %v413_v25  ;;  %vm270_vm7 = vcmp.ge.f32.partialorder %v723_v27, 0.0 }
 0x114   :  { %v355_v61 = vmul.f32 %v718_v20, %v347_v47  ;;  %v348_v22 = vadd.f32 1.4214138, %v340_v9  ;;  %v337_v32 = vmul.f32 %v736_v58, %v329_v23  ;;  %v750_v33 = vpop.eup %579  ;;  %v333_v36 = vadd.f32 -1.4531521, %v325_v24 }
 0x115   :  { %v359_v2 = vadd.f32 -0.28449672, %v351_v51  ;;  %v352_v21 = vmul.f32 %v725_v31, %v344_v3  ;;  %v582_v38 = vpop.eup %581  ;;  %v322_v47 = vmul.f32 1.0614054, %v750_v33  ;;  %595 = vpow2.f32 %v421_v62 }
 0x116   :  { %v363_v10 = vadd.f32 -0.28449672, %v355_v61  ;;  %v356_v30 = vmul.f32 %v730_v39, %v348_v22  ;;  %v345_v44 = vadd.f32 1.4214138, %v337_v32  ;;  %v341_v46 = vmul.f32 %v741_v17, %v333_v36  ;;  %v584_v48 = vpop.eup %583 }
 0x117   :  { %v367_v19 = vmul.f32 %v713_v16, %v359_v2  ;;  %v360_v29 = vadd.f32 -0.28449672, %v352_v21  ;;  %v330_v61 = vadd.f32 -1.4531521, %v322_v47 }
 0x118   :  { %v371_v15 = vmul.f32 %v718_v20, %v363_v10  ;;  %v364_v43 = vadd.f32 -0.28449672, %v356_v30  ;;  %v353_v35 = vmul.f32 %v736_v58, %v345_v44  ;;  %v759_v53 = vpop.eup %585  ;;  %v349_v54 = vadd.f32 1.4214138, %v341_v46 }
 0x119   :  { %v375_v28 = vadd.f32 0.2548296, %v367_v19  ;;  %v368_v41 = vmul.f32 %v725_v31, %v360_v29  ;;  %v588_v9 = vpop.eup %587  ;;  %v338_v13 = vmul.f32 %v750_v33, %v330_v61  ;;  %v326_v14 = vmul.f32 1.0614054, %v759_v53 }
 0x11a   :  { %v379_v34 = vadd.f32 0.2548296, %v371_v15  ;;  %v372_v51 = vmul.f32 %v730_v39, %v364_v43  ;;  %v361_v3 = vadd.f32 -0.28449672, %v353_v35  ;;  %v357_v10 = vmul.f32 %v741_v17, %v349_v54  ;;  %v590_v15 = vpop.eup %589 }
 0x11b   :  { %v383_v40 = vmul.f32 %v713_v16, %v375_v28  ;;  %v376_v50 = vadd.f32 0.2548296, %v368_v41  ;;  %v346_v25 = vadd.f32 1.4214138, %v338_v13 }
 0x11c   :  { %v387_v45 = vmul.f32 %v718_v20, %v379_v34  ;;  %v380_v2 = vadd.f32 0.2548296, %v372_v51  ;;  %v369_v23 = vmul.f32 %v736_v58, %v361_v3  ;;  %v365_v24 = vadd.f32 -0.28449672, %v357_v10  ;;  %v592_v34 = vpop.eup %591 }
 0x11d   :  { %v423_v49 = vmul.f32 %v578_v26, %v383_v40  ;;  %v384_v20 = vmul.f32 %v725_v31, %v376_v50  ;;  %v334_v26 = vadd.f32 -1.4531521, %v326_v14  ;;  %v594_v43 = vpop.eup %593 }
 0x11e   :  { %v427_v16 = vmul.f32 %v582_v38, %v387_v45  ;;  %v388_v22 = vmul.f32 %v730_v39, %v380_v2  ;;  %v377_v32 = vadd.f32 0.2548296, %v369_v23  ;;  %v373_v36 = vmul.f32 %v741_v17, %v365_v24 }
 0x11f   :  { %v431_v0 = vsub.f32 1.0, %v423_v49  ;;  %v424_v21 = vmul.f32 %v584_v48, %v384_v20  ;;  %v354_v39 = vmul.f32 %v750_v33, %v346_v25  ;;  %v342_v37 = vmul.f32 %v759_v53, %v334_v26 }
 0x120   :  { %v435_v5 = vsub.f32 1.0, %v427_v16  ;;  %v428_v30 = vmul.f32 %v588_v9, %v388_v22  ;;  %v385_v41 = vmul.f32 %v736_v58, %v377_v32  ;;  %v381_v44 = vadd.f32 0.2548296, %v373_v36 }
 0x121   :  { %v439_v19 = vmul.f32 %v431_v0, %v705_v8  ;;  %v432_v29 = vsub.f32 1.0, %v424_v21  ;;  %v276_v8 = vsel %vm268_vm3, 1.0, %v598_v7  ;;  %v362_v45 = vadd.f32 -0.28449672, %v354_v39 }
 0x122   :  { %v443_v31 = vmul.f32 %v435_v5, %v710_v12  ;;  %v436_v40 = vsub.f32 1.0, %v428_v30  ;;  %v350_v46 = vadd.f32 1.4214138, %v342_v37  ;;  %v425_v49 = vmul.f32 %v590_v15, %v385_v41 }
 0x123   :  { %v447_v28 = vadd.f32 1.0, %v439_v19  ;;  %v440_v12 = vmul.f32 %v432_v29, %v716_v18  ;;  %v389_v50 = vmul.f32 %v741_v17, %v381_v44  ;;  %v370_v51 = vmul.f32 %v750_v33, %v362_v45 }
 0x124   :  { %v451_v38 = vadd.f32 1.0, %v443_v31  ;;  %v444_v48 = vmul.f32 %v436_v40, %v276_v8  ;;  %v358_v18 = vmul.f32 %v759_v53, %v350_v46  ;;  %v433_v54 = vsub.f32 1.0, %v425_v49 }
 0x125   :  { %v455_v42 = vmul.f32 %v447_v28, %v686_v57  ;;  %v448_v47 = vadd.f32 1.0, %v440_v12  ;;  %v429_v61 = vmul.f32 %v592_v34, %v389_v50  ;;  %v378_v62 = vadd.f32 0.2548296, %v370_v51 }
 0x126   :  { %v459_v58 = vmul.f32 %v451_v38, %v690_v60  ;;  %v452_v16 = vadd.f32 1.0, %v444_v48  ;;  %v366_v57 = vadd.f32 -0.28449672, %v358_v18  ;;  %v441_v17 = vmul.f32 %v433_v54, %v273_v55 }
 0x127   :  { %v456_v35 = vmul.f32 %v448_v47, %v693_v63  ;;  %v437_v2 = vsub.f32 1.0, %v429_v61  ;;  %v386_v3 = vmul.f32 %v750_v33, %v378_v62  ;;  %v274_v19 = vsel %vm266_vm6, 1.0, %v598_v7 }
 0x128   :  { %v460_v20 = vmul.f32 %v452_v16, %v698_v4  ;;  %v374_v60 = vmul.f32 %v759_v53, %v366_v57  ;;  %v596_v4 = vpop.eup %595  ;;  %v449_v10 = vadd.f32 1.0, %v441_v17  ;;  %v249_v21 = vmul.f32 0.5, %v679_v52 }
 0x129   :  { %v517_v0 = vpack.c.bf16 %v456_v35, %v455_v42  ;;  %v426_v9 = vmul.f32 %v594_v43, %v386_v3  ;;  %v445_v33 = vmul.f32 %v437_v2, %v277_v1  ;;  %v250_v23 = vmul.f32 0.5, %v688_v59 }
 0x12a   :  { %v519_v63 = vpack.c.bf16 %v460_v20, %v459_v58  ;;  %v382_v5 = vadd.f32 0.2548296, %v374_v60  ;;  %v457_v15 = vmul.f32 %v449_v10, %v249_v21  ;;  %v278_v26 = vsel %vm270_vm7, 1.0, %v598_v7 }
 0x12b   :  { %487 = vst [vmem:[%s814_s3] sm:$0xff] %v517_v0  ;;  %v434_v13 = vsub.f32 1.0, %v426_v9  ;;  %v453_v31 = vadd.f32 1.0, %v445_v33  ;;  %v253_v28 = vmul.f32 0.5, %v684_v56  ;;  %v254_v52 = vmul.f32 0.5, %v707_v11 }
 0x12c   :  { %489 = vst [vmem:[%s814_s3 + $0x10] sm:$0xff] %v519_v63  ;;  %v390_v14 = vmul.f32 %v759_v53, %v382_v5 }
 0x12d   :  { %v442_v22 = vmul.f32 %v434_v13, %v274_v19  ;;  %v461_v30 = vmul.f32 %v453_v31, %v253_v28 }
 0x12e   :  { %v430_v6 = vmul.f32 %v596_v4, %v390_v14 }
 0x12f   :  { %v450_v24 = vadd.f32 1.0, %v442_v22 }
 0x130   :  { %v438_v25 = vsub.f32 1.0, %v430_v6 }
 0x131   :  { %v458_v29 = vmul.f32 %v450_v24, %v250_v23 }
 0x132   :  { %v446_v53 = vmul.f32 %v438_v25, %v278_v26 }
 0x133   :  { %v518_v32 = vpack.c.bf16 %v458_v29, %v457_v15 }
 0x134   :  { %v454_v34 = vadd.f32 1.0, %v446_v53 }
 0x135   :  { %488 = vst [vmem:[%s814_s3 + $0x8] sm:$0xff] %v518_v32 }
 0x136   :  { %v462_v59 = vmul.f32 %v454_v34, %v254_v52 }
 0x138   :  { %v520_v27 = vpack.c.bf16 %v462_v59, %v461_v30 }
 0x13a   :  { %490 = vst [vmem:[%s814_s3 + $0x18] sm:$0xff] %v520_v27 }

// kernel: forward.47
= control target key start
LH: loop header
LB: loop body
LE: loop exit
PB: predicated region body
PF: predicated region fallthrough
CT: control target
= control target key end

     0   :  { %s472_s1 = inlined_call_operand.vmem [shape: bf16[256,128], index: 1, kind: input, shape index: {}]   ;;  %s473_s0 = inlined_call_operand.vmem [shape: bf16[32,256], index: 0, kind: input, shape index: {}]   ;;  %s474_s2 = inlined_call_operand.vmem [shape: f32[1,128], index: 2, kind: input, shape index: {}]   ;;  %s475_s3 = inlined_call_operand.vmem [shape: f32[32,128], index: 3, kind: input, shape index: {}]   ;;  %s476_s4 = inlined_call_operand.vmem [shape: f32[32,128], index: 4, kind: output, shape index: {}]  }
   0x1   :  { %v338_v0 = vld [vmem:[%s472_s1 + $0x40] sm:$0xff]   ;;  %v340_v2 = vld [vmem:[%s472_s1 + $0x48] sm:$0xff]   ;;  %v342_v4 = vld [vmem:[%s472_s1 + $0x50] sm:$0xff]  }
   0x2   :  { %v339_v1 = vld [vmem:[%s472_s1] sm:$0xff]   ;;  %294 = vmatprep.subr.bf16.mxu0 %v338_v0  ;;  %322 = vmatprep.subr.bf16.mxu1 %v338_v0  ;;  %v341_v3 = vld [vmem:[%s472_s1 + $0x8] sm:$0xff]   ;;  %v343_v5 = vld [vmem:[%s472_s1 + $0x10] sm:$0xff]  }
   0x3   :  { %295 = vmatpush3.bf16.msra.mxu0 %v339_v1  ;;  %330 = vmatpush3.bf16.msra.mxu1 %v339_v1  ;;  %v344_v6 = vld [vmem:[%s472_s1 + $0x58] sm:$0xff]   ;;  %v346_v8 = vld [vmem:[%s472_s1 + $0x60] sm:$0xff]   ;;  %v348_v10 = vld [vmem:[%s472_s1 + $0x68] sm:$0xff]  }
   0x4   :  { %296 = vmatprep.subr.bf16.mxu0 %v340_v2  ;;  %323 = vmatprep.subr.bf16.mxu1 %v340_v2  ;;  %v345_v7 = vld [vmem:[%s472_s1 + $0x18] sm:$0xff]   ;;  %v347_v9 = vld [vmem:[%s472_s1 + $0x20] sm:$0xff]   ;;  %v349_v13 = vld [vmem:[%s472_s1 + $0x28] sm:$0xff]  }
   0x5   :  { %v356_v11 = vld [vmem:[%s473_s0 + $0x4] ss:$8 sps:$4 sm:$0xff]   ;;  %v359_v12 = vld [vmem:[%s473_s0 + $0x14] ss:$8 sps:$4 sm:$0xff]   ;;  %v354_v18 = vld [vmem:[%s473_s0] ss:$8 sps:$4 sm:$0xff]  }
   0x6   :  { %v350_v14 = vld [vmem:[%s472_s1 + $0x70] sm:$0xff]   ;;  %214 = vmatprep.mubr.bf16.mxu0 %v356_v11  ;;  %222 = vmatprep.mubr.bf16.mxu1 %v359_v12  ;;  %v352_v16 = vld [vmem:[%s472_s1 + $0x78] sm:$0xff]   ;;  %v293_v23 = vld [vmem:[%s474_s2] ss:$0 sm:$0xff] }
   0x7   :  { %297 = vmatpush3.bf16.msra.mxu0 %v341_v3  ;;  %331 = vmatpush3.bf16.msra.mxu1 %v341_v3  ;;  %v351_v15 = vld [vmem:[%s472_s1 + $0x30] sm:$0xff]   ;;  %v353_v17 = vld [vmem:[%s472_s1 + $0x38] sm:$0xff]   ;;  %v257_v29 = vld [vmem:[%s475_s3] sm:$0xff] }
   0x8   :  { %298 = vmatprep.subr.bf16.mxu0 %v342_v4  ;;  %324 = vmatprep.subr.bf16.mxu1 %v342_v4  ;;  %v357_v19 = vld [vmem:[%s473_s0 + $0x10] ss:$8 sps:$4 sm:$0xff]   ;;  %v258_v37 = vld [vmem:[%s475_s3 + $0x8] sm:$0xff] }
   0x9   :  { %v259_v30 = vld [vmem:[%s475_s3 + $0x10] sm:$0xff]  ;;  %v260_v38 = vld [vmem:[%s475_s3 + $0x18] sm:$0xff] }
   0xb   :  { %299 = vmatpush3.bf16.msra.mxu0 %v343_v5  ;;  %332 = vmatpush3.bf16.msra.mxu1 %v343_v5 }
   0xc   :  { %300 = vmatprep.subr.bf16.mxu0 %v344_v6  ;;  %325 = vmatprep.subr.bf16.mxu1 %v344_v6 }
   0xf   :  { %301 = vmatpush3.bf16.msra.mxu0 %v345_v7  ;;  %333 = vmatpush3.bf16.msra.mxu1 %v345_v7 }
  0x10   :  { %302 = vmatprep.subr.bf16.mxu0 %v346_v8  ;;  %326 = vmatprep.subr.bf16.mxu1 %v346_v8 }
  0x13   :  { %303 = vmatpush3.bf16.msra.mxu0 %v347_v9  ;;  %334 = vmatpush3.bf16.msra.mxu1 %v347_v9 }
  0x14   :  { %304 = vmatprep.subr.bf16.mxu0 %v348_v10  ;;  %327 = vmatprep.subr.bf16.mxu1 %v348_v10 }
  0x17   :  { %305 = vmatpush3.bf16.msra.mxu0 %v349_v13  ;;  %335 = vmatpush3.bf16.msra.mxu1 %v349_v13 }
  0x18   :  { %306 = vmatprep.subr.bf16.mxu0 %v350_v14  ;;  %328 = vmatprep.subr.bf16.mxu1 %v350_v14 }
  0x1b   :  { %307 = vmatpush3.bf16.msra.mxu0 %v351_v15  ;;  %336 = vmatpush3.bf16.msra.mxu1 %v351_v15 }
  0x1c   :  { %308 = vmatprep.subr.bf16.mxu0 %v352_v16  ;;  %329 = vmatprep.subr.bf16.mxu1 %v352_v16 }
  0x1f   :  { %309 = vmatpush3.bf16.msra.mxu0 %v353_v17  ;;  %337 = vmatpush3.bf16.msra.mxu1 %v353_v17 }
  0x22   :  { %215 = vmatmul.mubr.bf16.vlgmr.msra.gmra.mrb[0].mxu0 %v354_v18  ;;  %223 = vmatmul.mubr.bf16.vlgmr.msra.gmra.mrb[0].mxu1 %v357_v19 }
  0xf5   :  { %v310_v20 = vpop.f32.mrb[0].mxu0  ;;  %v316_v21 = vpop.f32.mrb[0].mxu1 }
  0xf6   :  { %v311_v22 = vpop.f32.mrb[1].mxu0  ;;  %v317_v24 = vpop.f32.mrb[1].mxu1 }
  0xf7   :  { %v312_v25 = vadd.f32 %v311_v22, %v310_v20  ;;  %v318_v26 = vadd.f32 %v317_v24, %v316_v21  ;;  %v313_v27 = vpop.f32.mrb[2].mxu0  ;;  %v319_v28 = vpop.f32.mrb[2].mxu1 }
  0xf8   :  { %v314_v31 = vpop.f32.mrb[3].mxu0  ;;  %v320_v32 = vpop.f32.mrb[3].mxu1 }
  0xf9   :  { %v253_v33 = vadd.f32 %v312_v25, %v293_v23  ;;  %v255_v34 = vadd.f32 %v318_v26, %v293_v23  ;;  %v315_v35 = vadd.f32 %v314_v31, %v313_v27  ;;  %v321_v36 = vadd.f32 %v320_v32, %v319_v28 }
  0xfb   :  { %v261_v39 = vadd.f32 %v257_v29, %v253_v33  ;;  %v263_v40 = vadd.f32 %v259_v30, %v255_v34  ;;  %v254_v41 = vadd.f32 %v315_v35, %v293_v23  ;;  %v256_v42 = vadd.f32 %v321_v36, %v293_v23 }
  0xfd   :  { %265 = vst [vmem:[%s476_s4] sm:$0xff] %v261_v39  ;;  %267 = vst [vmem:[%s476_s4 + $0x10] sm:$0xff] %v263_v40  ;;  %v262_v43 = vadd.f32 %v258_v37, %v254_v41  ;;  %v264_v44 = vadd.f32 %v260_v38, %v256_v42 }
  0xff   :  { %266 = vst [vmem:[%s476_s4 + $0x8] sm:$0xff] %v262_v43  ;;  %268 = vst [vmem:[%s476_s4 + $0x18] sm:$0xff] %v264_v44 }

// kernel: forward.62
= control target key start
LH: loop header
LB: loop body
LE: loop exit
PB: predicated region body
PF: predicated region fallthrough
CT: control target
= control target key end

     0   :  { %v348_v1 = vmov 0   ;;  %v229_v19 = vlaneseq  ;;  %s438_s1 = inlined_call_operand.vmem [shape: bf16[128,256], index: 1, kind: input, shape index: {}]   ;;  %s439_s0 = inlined_call_operand.vmem [shape: bf16[32,128], index: 0, kind: input, shape index: {}]   ;;  %s440_s2 = inlined_call_operand.vmem [shape: f32[1,256], index: 2, kind: input, shape index: {}]   ;;  %s441_s3 = inlined_call_operand.vmem [shape: bf16[32,256], index: 3, kind: output, shape index: {}]  }
   0x1   :  { %v322_v0 = vld [vmem:[%s438_s1 + $0x4] ss:$8 sps:$4 sm:$0xff]   ;;  %179 = vmatprep.mubr.bf16.mxu0 %v348_v1  ;;  %189 = vmatprep.mubr.bf16.mxu1 %v348_v1  ;;  %v324_v2 = vld [vmem:[%s438_s1] ss:$8 sps:$4 sm:$0xff]   ;;  %v325_v3 = vld [vmem:[%s438_s1 + $0x14] ss:$8 sps:$4 sm:$0xff]  }
   0x2   :  { %147 = vmatprep.subr.bf16.mxu0 %v322_v0  ;;  %305 = vmatprep.subr.bf16.mxu1 %v322_v0  ;;  %v327_v4 = vld [vmem:[%s438_s1 + $0x10] ss:$8 sps:$4 sm:$0xff]   ;;  %v328_v5 = vld [vmem:[%s438_s1 + $0x24] ss:$8 sps:$4 sm:$0xff]   ;;  %v330_v6 = vld [vmem:[%s438_s1 + $0x20] ss:$8 sps:$4 sm:$0xff]  }
   0x3   :  { %148 = vmatpush1.bf16.msra.mxu0 %v324_v2  ;;  %313 = vmatpush1.bf16.msra.mxu1 %v324_v2  ;;  %v331_v7 = vld [vmem:[%s438_s1 + $0x34] ss:$8 sps:$4 sm:$0xff]   ;;  %v333_v8 = vld [vmem:[%s438_s1 + $0x30] ss:$8 sps:$4 sm:$0xff]   ;;  %v334_v9 = vld [vmem:[%s438_s1 + $0x44] ss:$8 sps:$4 sm:$0xff]  }
   0x4   :  { %149 = vmatprep.subr.bf16.mxu0 %v325_v3  ;;  %306 = vmatprep.subr.bf16.mxu1 %v325_v3  ;;  %v336_v10 = vld [vmem:[%s438_s1 + $0x40] ss:$8 sps:$4 sm:$0xff]   ;;  %v337_v11 = vld [vmem:[%s438_s1 + $0x54] ss:$8 sps:$4 sm:$0xff]   ;;  %v339_v12 = vld [vmem:[%s438_s1 + $0x50] ss:$8 sps:$4 sm:$0xff]  }
   0x5   :  { %v340_v13 = vld [vmem:[%s438_s1 + $0x64] ss:$8 sps:$4 sm:$0xff]   ;;  %v342_v14 = vld [vmem:[%s438_s1 + $0x60] ss:$8 sps:$4 sm:$0xff]   ;;  %v343_v15 = vld [vmem:[%s438_s1 + $0x74] ss:$8 sps:$4 sm:$0xff]  }
   0x6   :  { %v345_v16 = vld [vmem:[%s438_s1 + $0x70] ss:$8 sps:$4 sm:$0xff]   ;;  %v346_v17 = vld [vmem:[%s439_s0] sm:$0xff]   ;;  %v347_v18 = vld [vmem:[%s439_s0 + $0x8] sm:$0xff]   ;;  %v230_v20 = vshrl.u32 %v229_v19, 7 }
   0x7   :  { %150 = vmatpush1.bf16.msra.mxu0 %v327_v4  ;;  %314 = vmatpush1.bf16.msra.mxu1 %v327_v4  ;;  %v227_v22 = vld [vmem:[%s440_s2] sm:$0x3] }
   0x8   :  { %151 = vmatprep.subr.bf16.mxu0 %v328_v5  ;;  %307 = vmatprep.subr.bf16.mxu1 %v328_v5  ;;  %v231_v21 = vsub.s32 0, %v230_v20  ;;  %v235_v23 = vsub.s32 1, %v230_v20 }
   0xa   :  { %v232_v24 = vrot.slane %v227_v22, %v231_v21  ;;  %v236_v25 = vrot.slane %v227_v22, %v235_v23 }
   0xb   :  { %152 = vmatpush1.bf16.msra.mxu0 %v330_v6  ;;  %315 = vmatpush1.bf16.msra.mxu1 %v330_v6 }
   0xc   :  { %153 = vmatprep.subr.bf16.mxu0 %v331_v7  ;;  %308 = vmatprep.subr.bf16.mxu1 %v331_v7 }
   0xf   :  { %154 = vmatpush1.bf16.msra.mxu0 %v333_v8  ;;  %316 = vmatpush1.bf16.msra.mxu1 %v333_v8 }
  0x10   :  { %155 = vmatprep.subr.bf16.mxu0 %v334_v9  ;;  %309 = vmatprep.subr.bf16.mxu1 %v334_v9 }
  0x13   :  { %156 = vmatpush1.bf16.msra.mxu0 %v336_v10  ;;  %317 = vmatpush1.bf16.msra.mxu1 %v336_v10 }
  0x14   :  { %157 = vmatprep.subr.bf16.mxu0 %v337_v11  ;;  %310 = vmatprep.subr.bf16.mxu1 %v337_v11 }
  0x17   :  { %158 = vmatpush1.bf16.msra.mxu0 %v339_v12  ;;  %318 = vmatpush1.bf16.msra.mxu1 %v339_v12 }
  0x18   :  { %159 = vmatprep.subr.bf16.mxu0 %v340_v13  ;;  %311 = vmatprep.subr.bf16.mxu1 %v340_v13 }
  0x1b   :  { %160 = vmatpush1.bf16.msra.mxu0 %v342_v14  ;;  %319 = vmatpush1.bf16.msra.mxu1 %v342_v14 }
  0x1c   :  { %161 = vmatprep.subr.bf16.mxu0 %v343_v15  ;;  %312 = vmatprep.subr.bf16.mxu1 %v343_v15 }
  0x1f   :  { %162 = vmatpush1.bf16.msra.mxu0 %v345_v16  ;;  %320 = vmatpush1.bf16.msra.mxu1 %v345_v16 }
  0x22   :  { %180 = vmatmul.mubr.bf16.vlgmr.msra.gmra.mrb[0].mxu0 %v346_v17  ;;  %190 = vmatmul.mubr.bf16.vlgmr.msra.gmra.mrb[0].mxu1 %v347_v18 }
  0xf5   :  { %v181_v26 = vpop.f32.mrb[0].mxu0  ;;  %v191_v27 = vpop.f32.mrb[0].mxu1 }
  0xf6   :  { %v239_v28 = vadd.f32 %v232_v24, %v181_v26  ;;  %v243_v29 = vadd.f32 %v232_v24, %v191_v27  ;;  %v183_v30 = vpop.f32.mrb[1].mxu0  ;;  %v193_v31 = vpop.f32.mrb[1].mxu1 }
  0xf7   :  { %v240_v32 = vadd.f32 %v236_v25, %v183_v30  ;;  %v244_v33 = vadd.f32 %v236_v25, %v193_v31  ;;  %v185_v34 = vpop.f32.mrb[2].mxu0  ;;  %v195_v35 = vpop.f32.mrb[2].mxu1 }
  0xf8   :  { %v241_v36 = vadd.f32 %v232_v24, %v185_v34  ;;  %v245_v37 = vadd.f32 %v232_v24, %v195_v35  ;;  %v187_v38 = vpop.f32.mrb[3].mxu0  ;;  %v197_v39 = vpop.f32.mrb[3].mxu1 }
  0xf9   :  { %v301_v40 = vpack.c.bf16 %v240_v32, %v239_v28  ;;  %v303_v41 = vpack.c.bf16 %v244_v33, %v243_v29  ;;  %v242_v42 = vadd.f32 %v236_v25, %v187_v38  ;;  %v246_v43 = vadd.f32 %v236_v25, %v197_v39 }
  0xfb   :  { %271 = vst [vmem:[%s441_s3] sm:$0xff] %v301_v40  ;;  %273 = vst [vmem:[%s441_s3 + $0x10] sm:$0xff] %v303_v41  ;;  %v302_v44 = vpack.c.bf16 %v242_v42, %v241_v36  ;;  %v304_v45 = vpack.c.bf16 %v246_v43, %v245_v37 }
  0xfd   :  { %272 = vst [vmem:[%s441_s3 + $0x8] sm:$0xff] %v302_v44  ;;  %274 = vst [vmem:[%s441_s3 + $0x18] sm:$0xff] %v304_v45 }

// kernel: forward.61
= control target key start
LH: loop header
LB: loop body
LE: loop exit
PB: predicated region body
PF: predicated region fallthrough
CT: control target
= control target key end

     0   :  { %s335_s1 = inlined_call_operand.vmem [shape: bf16[128,128], index: 1, kind: input, shape index: {}]   ;;  %s336_s0 = inlined_call_operand.vmem [shape: bf16[32,128], index: 0, kind: input, shape index: {}]   ;;  %s337_s2 = inlined_call_operand.vmem [shape: f32[1,128], index: 2, kind: input, shape index: {}]   ;;  %s338_s3 = inlined_call_operand.vmem [shape: bf16[32,128], index: 3, kind: output, shape index: {}]  }
   0x1   :  { %v266_v0 = vld [vmem:[%s335_s1] sm:$0xff]   ;;  %v267_v1 = vld [vmem:[%s335_s1 + $0x8] sm:$0xff]   ;;  %v268_v2 = vld [vmem:[%s335_s1 + $0x10] sm:$0xff]  }
   0x2   :  { %246 = vmatprep.subr.bf16.mxu0 %v266_v0  ;;  %v269_v3 = vld [vmem:[%s335_s1 + $0x18] sm:$0xff]   ;;  %v274_v4 = vld [vmem:[%s336_s0] sm:$0xff]   ;;  %v271_v6 = vld [vmem:[%s335_s1 + $0x28] sm:$0xff]  }
   0x3   :  { %247 = vmatpush3.bf16.msra.mxu0 %v266_v0  ;;  %262 = vmatprep.mubr.bf16.mxu0 %v274_v4  ;;  %v270_v5 = vld [vmem:[%s335_s1 + $0x20] sm:$0xff]   ;;  %v272_v7 = vld [vmem:[%s335_s1 + $0x30] sm:$0xff]   ;;  %v273_v8 = vld [vmem:[%s335_s1 + $0x38] sm:$0xff]  }
   0x4   :  { %248 = vmatprep.subr.bf16.mxu0 %v267_v1  ;;  %v275_v9 = vld [vmem:[%s336_s0 + $0x8] sm:$0xff]   ;;  %v216_v11 = vld [vmem:[%s337_s2] ss:$0 sm:$0xff] }
   0x7   :  { %249 = vmatpush3.bf16.msra.mxu0 %v267_v1 }
   0x8   :  { %250 = vmatprep.subr.bf16.mxu0 %v268_v2 }
   0xb   :  { %251 = vmatpush3.bf16.msra.mxu0 %v268_v2 }
   0xc   :  { %252 = vmatprep.subr.bf16.mxu0 %v269_v3 }
   0xf   :  { %253 = vmatpush3.bf16.msra.mxu0 %v269_v3 }
  0x10   :  { %254 = vmatprep.subr.bf16.mxu0 %v270_v5 }
  0x13   :  { %255 = vmatpush3.bf16.msra.mxu0 %v270_v5 }
  0x14   :  { %256 = vmatprep.subr.bf16.mxu0 %v271_v6 }
  0x17   :  { %257 = vmatpush3.bf16.msra.mxu0 %v271_v6 }
  0x18   :  { %258 = vmatprep.subr.bf16.mxu0 %v272_v7 }
  0x1b   :  { %259 = vmatpush3.bf16.msra.mxu0 %v272_v7 }
  0x1c   :  { %260 = vmatprep.subr.bf16.mxu0 %v273_v8 }
  0x1f   :  { %261 = vmatpush3.bf16.msra.mxu0 %v273_v8 }
  0x22   :  { %263 = vmatmul.mubr.bf16.vlgmr.msra.gmra.mrb[0].mxu0 %v275_v9 }
  0xf5   :  { %v264_v10 = vpop.f32.mrb[0].mxu0 }
  0xf6   :  { %v141_v12 = vpop.f32.mrb[1].mxu0  ;;  %v180_v14 = vadd.f32 %v264_v10, %v216_v11 }
  0xf7   :  { %v265_v13 = vpop.f32.mrb[2].mxu0  ;;  %v178_v17 = vadd.f32 %v216_v11, %v141_v12 }
  0xf8   :  { %v181_v15 = vadd.f32 %v265_v13, %v216_v11  ;;  %v144_v16 = vpop.f32.mrb[3].mxu0 }
  0xf9   :  { %v179_v18 = vadd.f32 %v216_v11, %v144_v16 }
  0xfa   :  { %v233_v19 = vpack.c.bf16 %v181_v15, %v180_v14 }
  0xfb   :  { %v228_v20 = vpack.c.bf16 %v179_v18, %v178_v17 }
  0xfc   :  { %235 = vst [vmem:[%s338_s3 + $0x8] sm:$0xff] %v233_v19  }
  0xfd   :  { %229 = vst [vmem:[%s338_s3] sm:$0xff] %v228_v20  }

// kernel: forward.81
= control target key start
LH: loop header
LB: loop body
LE: loop exit
PB: predicated region body
PF: predicated region fallthrough
CT: control target
= control target key end

     0   :  { %s326_s0 = inlined_call_operand.vmem [shape: bf16[32,128], index: 0, kind: input, shape index: {}]   ;;  %s327_s1 = inlined_call_operand.vmem [shape: bf16[128,128], index: 1, kind: input, shape index: {}]   ;;  %s328_s2 = inlined_call_operand.hbm [shape: f32[32,128], index: 2, kind: output, shape index: {}]  }
   0x1   :  { %v232_v0 = vld [vmem:[%s327_s1] sm:$0xff]   ;;  %v233_v1 = vld [vmem:[%s327_s1 + $0x8] sm:$0xff]   ;;  %v234_v2 = vld [vmem:[%s327_s1 + $0x10] sm:$0xff]  }
   0x2   :  { %209 = vmatprep.subr.bf16.mxu0 %v232_v0  ;;  %v235_v3 = vld [vmem:[%s327_s1 + $0x18] sm:$0xff]   ;;  %v240_v4 = vld [vmem:[%s326_s0] sm:$0xff]  }
   0x3   :  { %210 = vmatpush3.bf16.msra.mxu0 %v232_v0  ;;  %225 = vmatprep.mubr.bf16.mxu0 %v240_v4 }
   0x4   :  { %211 = vmatprep.subr.bf16.mxu0 %v233_v1 }
   0x7   :  { %212 = vmatpush3.bf16.msra.mxu0 %v233_v1 }
   0x8   :  { %213 = vmatprep.subr.bf16.mxu0 %v234_v2 }
   0x9   :  { %7 = vsyncpa [#allocation4], 0  ;;  %v236_v5 = vld [vmem:[%s327_s1 + $0x20] sm:$0xff]   ;;  %v237_v6 = vld [vmem:[%s327_s1 + $0x28] sm:$0xff]   ;;  %s266_s29 = smov [#allocation3]  }
   0xa   :  { %v238_v7 = vld [vmem:[%s327_s1 + $0x30] sm:$0xff]   ;;  %v239_v8 = vld [vmem:[%s327_s1 + $0x38] sm:$0xff]   ;;  %v241_v9 = vld [vmem:[%s326_s0 + $0x8] sm:$0xff]   ;;  %s178_s30 = sshll.u32 %s266_s29, 4  ;;  %s179_s30 = int_to_ptr.vmem [resolvable:$true] %s178_s30 }
   0xb   :  { %214 = vmatpush3.bf16.msra.mxu0 %v234_v2  ;;  %s242_s1 = scalar_lea.vmem %s179_s30, 512  ;;  %p247_p1 = scmp.lt.s32.totalorder %s179_s30, %s179_s30 }
   0xc   :  { %215 = vmatprep.subr.bf16.mxu0 %v235_v3  ;;  %p243_p0 = scmp.ne.s32.totalorder %s179_s30, %s242_s1  ;;  %p248_p2 = scmp.lt.s32.totalorder %s242_s1, %s242_s1 }
   0xe   :  { %p249_p3 = por %p248_p2, %p247_p1 }
   0xf   :  { %216 = vmatpush3.bf16.msra.mxu0 %v235_v3 }
  0x10   :  { %217 = vmatprep.subr.bf16.mxu0 %v236_v5  ;;  %p250_p4 = pnand %p249_p3, %p243_p0 }
  0x13   :  { %218 = vmatpush3.bf16.msra.mxu0 %v236_v5 }
  0x14   :  { %219 = vmatprep.subr.bf16.mxu0 %v237_v6 }
  0x17   :  { %220 = vmatpush3.bf16.msra.mxu0 %v237_v6 }
  0x18   :  { %221 = vmatprep.subr.bf16.mxu0 %v238_v7 }
  0x1b   :  { %222 = vmatpush3.bf16.msra.mxu0 %v238_v7 }
  0x1c   :  { %223 = vmatprep.subr.bf16.mxu0 %v239_v8 }
  0x1f   :  { %224 = vmatpush3.bf16.msra.mxu0 %v239_v8 }
  0x22   :  { %226 = vmatmul.mubr.bf16.vlgmr.msra.gmra.mrb[0].mxu0 %v241_v9 }
  0xf5   :  { %v227_v10 = vpop.f32.mrb[0].mxu0 }
  0xf6   :  { %171 = vst [vmem:[#allocation3 + $0x10] sm:$0xff] %v227_v10  ;;  %v139_v11 = vpop.f32.mrb[1].mxu0 }
  0xf7   :  { %169 = vst [vmem:[#allocation3] sm:$0xff] %v139_v11  ;;  %v228_v12 = vpop.f32.mrb[2].mxu0 }
  0xf8   :  { %172 = vst [vmem:[#allocation3 + $0x18] sm:$0xff] %v228_v12  ;;  %v142_v13 = vpop.f32.mrb[3].mxu0 }
  0xf9   :  { %170 = vst [vmem:[#allocation3 + $0x8] sm:$0xff] %v142_v13 }
  0xfa   :  { %253 = shalt.err (!%p250_p4)
}
  0xfb   :  { %s254_s4 = scalar_lea.hbm %s328_s2, 512 }
  0xfc   :  { %p255_p5 = scmp.ne.s32.totalorder %s328_s2, %s254_s4  ;;  %p258_p6 = scmp.lt.u32.totalorder %s254_s4, %s328_s2 }
  0xfe   :  { %p260_p7 = pnand %p258_p6, %p255_p5 }
 0x100   :  { %263 = shalt.err (!%p260_p7)
}
 0x101   :  { %s267_s9 = smov 128   ;;  %s268_s10 = smov 8  }
 0x102   :  { %184 = dma.vmem_to_hbm [thread:$0]  %s179_s30, 512, %s328_s2, [#allocation4], %s267_s9, %s267_s9, %s268_s10  }
 0x103   :  { %264 = dma.done.wait [#allocation4], 512  }
 0x104   :  { %265 = vsyncadd [#allocation4], 4294966784 }
 0x105   :  { %188 = vsyncpa [#allocation4], 1 }

// kernel: forward.58
= control target key start
LH: loop header
LB: loop body
LE: loop exit
PB: predicated region body
PF: predicated region fallthrough
CT: control target
= control target key end

     0   :  { %s1734_s15 = smov 0   ;;  %s1736_s16 = smov 0   ;;  %s2105_s0 = inlined_call_operand.vmem [shape: bf16[2,16,384], index: 0, kind: input, shape index: {}, may-alias: {0,1,2}]   ;;  %s2106_s1 = inlined_call_operand.vmem [shape: bf16[2,16,384], index: 1, kind: input, shape index: {}, may-alias: {0,1,2}]   ;;  %s2107_s2 = inlined_call_operand.vmem [shape: bf16[2,16,384], index: 2, kind: input, shape index: {}, may-alias: {0,1,2}]   ;;  %s2108_s3 = inlined_call_operand.vmem [shape: f32[2,1,16], index: 3, kind: input, shape index: {}]   ;;  %s2109_s4 = inlined_call_operand.vmem [shape: bf16[2,16,128], index: 4, kind: output, shape index: {}]  }
   0x1   :  { %s1738_s17 = smov 0   ;;  %s1740_s18 = smov 0  }
   0x2   :  { %s1742_s19 = smov 0  }
   0x3 LB: > { %s33_s20 = sadd.s32 1, %s1693_s18  ;;  %p49_p1 = scmp.ne.s32.totalorder %s1685_s16, %s1681_s15  ;;  %s1697_s19 = sphi %s1742_s19, %s14_s19   ;;  %s1693_s18 = sphi %s1740_s18, %s2114_s18   ;;  %s1689_s17 = sphi %s1738_s17, %s2113_s17   ;;  %s1685_s16 = sphi %s1736_s16, %s2112_s16   ;;  %s1681_s15 = sphi %s1734_s15, %s2111_s15  }
   0x4   : > { %p35_p0 = scmp.ge.s32.totalorder %s33_s20, 2  ;;  %p50_p2 = scmp.eq.s32.totalorder %s1697_s19, 0 }
   0x5   : > { %s42_s23 = sadd.s32 1, %s1685_s16  ;;  %p1430_p5 = scmp.ge.s32.totalorder %s1697_s19, 2 }
   0x6   : > { %s2116_s20 = smov (%p35_p0, %s33_s20), 0  ;;  %p1765_p3 = por %p50_p2, %p49_p1 }
   0x7   : > { %s37_s22 = ssub.s32 %s1693_s18, %s2116_s20  ;;  %187 = sbr.rel (%p1430_p5) target bundleno = 35 (0x23), region = 16 }
   0x8   : > { %p40_p4 = scmp.eq.s32.totalorder %s37_s22, 0 }
   0xa   : > { %s1773_s24 = scalar_select %p40_p4, %s1685_s16, %s42_s23  }
   0xe   : > { %190 = sbr.rel (!%p1765_p3) target bundleno = 21 (0x15), region = 20  ;;  %s192_s25 = sand.u32 (%p1765_p3), 1, %s1685_s16  }
   0xf   : > { %s1535_s26 = smul.u32 (%p1765_p3), 24, %s1693_s18  ;;  %s1431_s27 = sshll.u32 (%p1765_p3), %s192_s25, 3 }
  0x10   : > { %s194_s5 = scalar_lea.vmem (%p1765_p3), [#allocation5], %s1431_s27 }
  0x11   : > { %s200_s30 = scalar_lea.vmem (%p1765_p3), %s2105_s0, %s1535_s26 }
  0x12   : > { %v216_v0 = vld [vmem:[%s200_s30] sm:$0xf] (%p1765_p3)  ;;  %v218_v1 = vld [vmem:[%s200_s30 + $0xc] sm:$0xf] (%p1765_p3) }
  0x13   : > { %217 = vst [vmem:[%s194_s5] sm:$0xf] (%p1765_p3), %v216_v0  ;;  %219 = vst [vmem:[%s194_s5 + $0x4] sm:$0xf] (%p1765_p3), %v218_v1 }
  0x15 PF: > { %246 = sbr.rel (!%p1765_p3) target bundleno = 28 (0x1c), region = 61  ;;  %s248_s6 = sand.u32 (%p1765_p3), 1, %s1685_s16  }
  0x16   : > { %s1434_s7 = smul.u32 (%p1765_p3), 24, %s1693_s18  ;;  %s1433_s8 = sshll.u32 (%p1765_p3), %s248_s6, 3 }
  0x17   : > { %s250_s12 = scalar_lea.vmem (%p1765_p3), [#allocation6], %s1433_s8 }
  0x18   : > { %s1321_s11 = scalar_lea.vmem (%p1765_p3), %s2106_s1, %s1434_s7 }
  0x19   : > { %v1435_v2 = vld [vmem:[%s1321_s11 + $0x4] sm:$0xf] (%p1765_p3)  ;;  %v1436_v3 = vld [vmem:[%s1321_s11 + $0x10] sm:$0xf] (%p1765_p3) }
  0x1a   : > { %274 = vst [vmem:[%s250_s12] sm:$0xf] (%p1765_p3), %v1435_v2  ;;  %276 = vst [vmem:[%s250_s12 + $0x4] sm:$0xf] (%p1765_p3), %v1436_v3 }
  0x1c PF: > { %303 = sbr.rel (!%p1765_p3) target bundleno = 35 (0x23), region = 102  ;;  %s305_s13 = sand.u32 (%p1765_p3), 1, %s1685_s16  }
  0x1d   : > { %s1438_s14 = smul.u32 (%p1765_p3), 24, %s1693_s18  ;;  %s1437_s22 = sshll.u32 (%p1765_p3), %s305_s13, 3 }
  0x1e   : > { %s307_s27 = scalar_lea.vmem (%p1765_p3), [#allocation7], %s1437_s22 }
  0x1f   : > { %s1329_s26 = scalar_lea.vmem (%p1765_p3), %s2107_s2, %s1438_s14 }
  0x20   : > { %v1439_v4 = vld [vmem:[%s1329_s26 + $0x8] sm:$0xf] (%p1765_p3)  ;;  %v1440_v5 = vld [vmem:[%s1329_s26 + $0x14] sm:$0xf] (%p1765_p3) }
  0x21   : > { %331 = vst [vmem:[%s307_s27] sm:$0xf] (%p1765_p3), %v1439_v4  ;;  %333 = vst [vmem:[%s307_s27 + $0x4] sm:$0xf] (%p1765_p3), %v1440_v5 }
  0x23 PF: > { %p1441_p6 = scmp.ge.s32.totalorder %s1697_s19, 1  ;;  %p368_p7 = scmp.lt.s32.totalorder %s1697_s19, 3 }
  0x25   : > { %p369_p8 = pnand %p1441_p6, %p368_p7 }
  0x26   : > { %s375_s21 = sand.u32 (!%p369_p8), 1, %s1681_s15   ;;  %vm461_vm0 = vcmask (!%p369_p8), 261120   ;;  %v1699_v6 = vmov (!%p369_p8), 0.0   ;;  %vm1700_vm1 = vmmov (!%p369_p8), 0   ;;  %vm456_vm2 = vcmask (!%p369_p8), 31744   ;;  %p435_p9 = scmp.lt.s32.totalorder (!%p369_p8), %s1689_s17, 1 }
  0x27   : > { %372 = sbr.rel (%p369_p8) target bundleno = 1528 (0x5f8), region = 147  ;;  %1487 = vmatprep.subr.bf16.mxu0 (!%p369_p8), %v1699_v6  ;;  %s1801_s28 = sshll.u32 (!%p369_p8), %s375_s21, 3  ;;  %462 = vst.msk [vmem:[#allocation4] sm:$0xff] (!%p369_p8), %vm461_vm0, %v1699_v6  ;;  %463 = vst.msk [vmem:[#allocation4 + $0x8] sm:$0xff] (!%p369_p8), %vm461_vm0, %v1699_v6  ;;  %1489 = vmatprep.mubr.msk.bf16.mxu0 (!%p369_p8), %vm1700_vm1, %v1699_v6  ;;  %v1701_v10 = vmov (!%p369_p8), -1e+30   ;;  %v478_v11 = vlaneseq (!%p369_p8) }
  0x28   : > { %464 = vst.msk [vmem:[#allocation4 + $0x10] sm:$0xff] (!%p369_p8), %vm461_vm0, %v1699_v6  ;;  %465 = vst.msk [vmem:[#allocation4 + $0x18] sm:$0xff] (!%p369_p8), %vm461_vm0, %v1699_v6  ;;  %1493 = vmatprep.subr.bf16.mxu1 (!%p369_p8), %v1699_v6  ;;  %1495 = vmatprep.mubr.msk.bf16.mxu1 (!%p369_p8), %vm1700_vm1, %v1699_v6  ;;  %s384_s15 = scalar_lea.vmem (!%p369_p8), [#allocation6], %s1801_s28  ;;  %s377_s29 = scalar_lea.vmem (!%p369_p8), [#allocation5], %s1801_s28  ;;  %vm561_vm5 = vcmask (!%p369_p8), 130048   ;;  %v1702_v28 = vmov (!%p369_p8), 0  }
  0x29   : > { %466 = vst.msk [vmem:[#allocation4 + $0x20] sm:$0xff] (!%p369_p8), %vm461_vm0, %v1699_v6  ;;  %467 = vst.msk [vmem:[#allocation4 + $0x28] sm:$0xff] (!%p369_p8), %vm461_vm0, %v1699_v6  ;;  %v1825_v7 = vld [vmem:[%s384_s15] sm:$0xff] (!%p369_p8)   ;;  %v1621_v9 = vld [vmem:[%s377_s29] sm:$0xff] (!%p369_p8)   ;;  %v479_v12 = vshrl.u32 (!%p369_p8), %v478_v11, 7  ;;  %v486_v13 = vand.u32 (!%p369_p8), 127, %v478_v11  ;;  %1586 = vset.pattern.permute.xlu1 (!%p369_p8), %v1702_v28 }
  0x2a   : > { %468 = vst.msk [vmem:[#allocation4 + $0x30] sm:$0xff] (!%p369_p8), %vm461_vm0, %v1699_v6  ;;  %469 = vst.msk [vmem:[#allocation4 + $0x38] sm:$0xff] (!%p369_p8), %vm461_vm0, %v1699_v6  ;;  %v516_v8 = vsel (!%p369_p8), %vm461_vm0, %v1825_v7, 0  ;;  %s1703_s7 = smov (!%p369_p8), 96   ;;  %vm604_vm6 = vcmask (!%p369_p8), 7168   ;;  %s391_s8 = scalar_lea.vmem (!%p369_p8), [#allocation7], %s1801_s28 }
  0x2b   : > { %1488 = vmatpush3.bf16.xpose.msra.mxu0 (!%p369_p8), %v516_v8  ;;  %457 = vst.msk [vmem:[#allocation2] sm:$0xff] (!%p369_p8), %vm456_vm2, %v1701_v10  ;;  %458 = vst.msk [vmem:[#allocation2 + $0x8] sm:$0xff] (!%p369_p8), %vm456_vm2, %v1701_v10  ;;  %v480_v14 = vadd.s32 (!%p369_p8), 8, %v479_v12  ;;  %vm489_vm3 = vcmp.ge.s32.totalorder (!%p369_p8), %v479_v12, %v486_v13  ;;  %v1877_v37 = vld [vmem:[%s391_s8] sm:$0xff] (!%p369_p8)   ;;  %s1704_s9 = smov (!%p369_p8), 64   ;;  %s1705_s10 = smov (!%p369_p8), 32  }
  0x2c   : > { %1505 = vmatprep.subr.bf16.mxu0 (!%p369_p8), %v1699_v6  ;;  %459 = vst.msk [vmem:[#allocation3] sm:$0xff] (!%p369_p8), %vm456_vm2, %v1699_v6  ;;  %460 = vst.msk [vmem:[#allocation3 + $0x8] sm:$0xff] (!%p369_p8), %vm456_vm2, %v1699_v6  ;;  %v491_v16 = vsel (!%p369_p8), %vm489_vm3, 0.0, %v1701_v10  ;;  %1494 = vmatpush3.bf16.msra.mxu1 (!%p369_p8), %v1877_v37  ;;  %vm773_vm7 = vcmask (!%p369_p8), 15368   ;;  %vm940_vm8 = vcmask (!%p369_p8), 23568   ;;  %vm1107_vm9 = vcmask (!%p369_p8), 31768  }
  0x2d   : > { %vm490_vm4 = vcmp.ge.s32.totalorder (!%p369_p8), %v480_v14, %v486_v13  ;;  %1499 = vmatprep.subr.bf16.mxu1 (!%p369_p8), %v1699_v6  ;;  %vm1262_vm10 = vcmask (!%p369_p8), 523264   ;;  %vm1265_vm11 = vcmask (!%p369_p8), 785408  }
  0x2e   : > { %s2118_s17 = smov (!%p435_p9, %s1689_s17), 1  ;;  %v492_v17 = vsel %vm490_vm4, 0.0, %v1701_v10 }
  0x2f   : > { %s440_s6 = scalar_lea.vmem %s2108_s3, %s2118_s17  ;;  %s1463_s11 = sshll.u32 %s2118_s17, 3 }
  0x30   : > { %v1447_v15 = vld [vmem:[%s440_s6] ss:$0 sm:$0xff]  ;;  %s449_s14 = scalar_lea.vmem %s2109_s4, %s1463_s11 }
  0x31   : > { %v1844_v18 = vadd.f32 %v1447_v15, %v491_v16  ;;  %v1846_v19 = vadd.f32 %v1447_v15, %v492_v17 }
  0x32   : > { %1490 = vmatmul.mubr.msk.bf16.vlgmr.msra.gmra.mrb[0].mxu0 %vm461_vm0, %v1621_v9  ;;  %v1855_v29 = vld [vmem:[#allocation2] sm:$0xff]  ;;  %v1860_v32 = vld [vmem:[#allocation2 + $0x8] sm:$0xff] }
  0x33   : > { %1507 = vmatprep.mubr.msk.bf16.mxu0 %vm1700_vm1, %v1699_v6 }
 0x105   : > { %v552_v20 = vpop.f32.mrb[0].mxu0 }
 0x106   : > { %v553_v21 = vadd.f32 %v552_v20, %v1844_v18  ;;  %v1491_v22 = vpop.f32.mrb[1].mxu0 }
 0x107   : > { %v555_v23 = vpop.f32.mrb[2].mxu0  ;;  %v1706_v22 = vmov 1  }
 0x108   : > { %v556_v24 = vadd.f32 %v555_v23, %v1846_v19  ;;  %v1492_v25 = vpop.f32.mrb[3].mxu0  ;;  %v562_v26 = vsel %vm561_vm5, %v553_v21, -inf  ;;  %1587 = vset.pattern.permute.xlu0 %v1706_v22 }
 0x109   : > { %563 = vmax.xlane.f32.xlu0 %v562_v26 }
 0x10a   : > { %v565_v27 = vsel %vm561_vm5, %v556_v24, -inf }
 0x10d   : > { %566 = vmax.xlane.f32.xlu0 %v565_v27 }
 0x123   : > { %680 = vrot.lane.b32.xlu0 %v1825_v7, %s1703_s7 }
 0x196   : > { %v564_v30 = vpop.xlane.xlu0 %563 }
 0x197   : > { %v1858_v31 = vmax.f32 %v1855_v29, %v564_v30 }
 0x199   : > { %v570_v33 = vsub.f32 %v1855_v29, %v1858_v31  ;;  %676 = vst.msk [vmem:[#allocation2] sm:$0xff] %vm604_vm6, %v1858_v31  ;;  %578 = vperm.xlu1 %1586, %v1858_v31  }
 0x19a   : > { %v567_v34 = vpop.xlane.xlu0 %566 }
 0x19b   : > { %v1868_v35 = vmax.f32 %v1860_v32, %v567_v34 }
 0x19d   : > { %v571_v36 = vsub.f32 %v1860_v32, %v1868_v35  ;;  %677 = vst.msk [vmem:[#allocation2 + $0x8] sm:$0xff] %vm604_vm6, %v1868_v35  ;;  %583 = vperm.xlu1 %1586, %v1868_v35  }
 0x19e   : > { %v681_v44 = vpop.permute.xlu0 %680 }
 0x19f   : > { %v686_v48 = vsel %vm461_vm0, %v681_v44, 0 }
 0x1a1   : > { %678 = vrot.lane.b32.xlu1 %v1621_v9, %s1703_s7 }
 0x1a2   : > { %1588 = vset.pattern.permute.xlu1 %v1706_v22 }
 0x1a4   : > { %v730_v25 = vld [vmem:[#allocation2 + $0x8] sm:$0xff] }
 0x1a5   : > { %847 = vrot.lane.b32.xlu1 %v1825_v7, %s1704_s9 }
 0x1a9   : > { %845 = vrot.lane.b32.xlu1 %v1621_v9, %s1704_s9 }
 0x1ad   : > { %1014 = vrot.lane.b32.xlu1 %v1825_v7, %s1705_s10 }
 0x1b1   : > { %1012 = vrot.lane.b32.xlu1 %v1621_v9, %s1705_s10 }
 0x218   : > { %v579_v38 = vpop.permute.xlu1 %578 }
 0x219   : > { %v586_v39 = vsub.f32 %v553_v21, %v579_v38  ;;  %v1707_v38 = vmov 2  }
 0x21b   : > { %v588_v40 = vmul.f32 1.442695, %v586_v39 }
 0x21c   : > { %v584_v41 = vpop.permute.xlu1 %583 }
 0x21d   : > { %v587_v42 = vsub.f32 %v556_v24, %v584_v41  ;;  %1623 = vpow2.f32 %v588_v40 }
 0x21f   : > { %v590_v43 = vmul.f32 1.442695, %v587_v42 }
 0x220   : > { %v679_v45 = vpop.permute.xlu1 %678 }
 0x221   : > { %1625 = vpow2.f32 %v590_v43 }
 0x224   : > { %v848_v50 = vpop.permute.xlu1 %847 }
 0x225   : > { %v853_v52 = vsel %vm461_vm0, %v848_v50, 0 }
 0x227   : > { %v1887_v46 = vpop.eup %1623 }
 0x228   : > { %v846_v51 = vpop.permute.xlu1 %845  ;;  %v596_v29 = vsel %vm561_vm5, %v1887_v46, 0.0 }
 0x22b   : > { %v1889_v47 = vpop.eup %1625 }
 0x22c   : > { %v621_v49 = vpack.c.bf16 %v1889_v47, %v1887_v46  ;;  %v1015_v53 = vpop.permute.xlu1 %1014 }
 0x22d   : > { %v1020_v54 = vsel %vm461_vm0, %v1015_v53, 0 }
 0x22e   : > { %1496 = vmatmul.mubr.msk.bf16.vlgmr.msra.gmra.mrb[0].mxu1 %vm561_vm5, %v621_v49 }
 0x22f   : > { %1500 = vmatpush3.bf16.xpose.msra.mxu1 %v686_v48  ;;  %1501 = vmatprep.mubr.msk.bf16.mxu1 %vm1700_vm1, %v1699_v6 }
 0x230   : > { %1511 = vmatprep.subr.bf16.mxu1 %v1699_v6  ;;  %v1013_v55 = vpop.permute.xlu1 %1012 }
 0x236   : > { %1502 = vmatmul.mubr.msk.bf16.vlgmr.msra.gmra.mrb[4].mxu1 %vm461_vm0, %v679_v45 }
 0x237   : > { %1512 = vmatpush3.bf16.xpose.msra.mxu1 %v853_v52  ;;  %1513 = vmatprep.mubr.msk.bf16.mxu1 %vm1700_vm1, %v1699_v6  ;;  %v1708_v52 = vmov 3  }
 0x238   : > { %1523 = vmatprep.subr.bf16.mxu1 %v1699_v6 }
 0x23e   : > { %1514 = vmatmul.mubr.msk.bf16.vlgmr.msra.gmra.mrb[8].mxu1 %vm461_vm0, %v846_v51 }
 0x23f   : > { %1524 = vmatpush3.bf16.xpose.msra.mxu1 %v1020_v54  ;;  %1525 = vmatprep.mubr.msk.bf16.mxu1 %vm1700_vm1, %v1699_v6 }
 0x246   : > { %1526 = vmatmul.mubr.msk.bf16.vlgmr.msra.gmra.mrb[12].mxu1 %vm461_vm0, %v1013_v55 }
 0x301   : > { %v1908_v56 = vpop.f32.mrb[0].mxu1 }
 0x302   : > { %v1497_v57 = vpop.f32.mrb[1].mxu1 }
 0x303   : > { %v1910_v58 = vpop.f32.mrb[2].mxu1  ;;  %v599_v57 = vsel %vm561_vm5, %v1889_v47, 0.0 }
 0x304   : > { %v1498_v59 = vpop.f32.mrb[3].mxu1 }
 0x305   : > { %v572_v59 = vmul.f32 1.442695, %v570_v33 }
 0x307   : > { %1627 = vpow2.f32 %v572_v59 }
 0x309   : > { %v722_v60 = vpop.f32.mrb[4].mxu1 }
 0x30a   : > { %v1913_v61 = vadd.f32 %v722_v60, %v1844_v18  ;;  %v1503_v62 = vpop.f32.mrb[5].mxu1 }
 0x30b   : > { %v725_v63 = vpop.f32.mrb[6].mxu1 }
 0x30c   : > { %v1916_v0 = vadd.f32 %v725_v63, %v1846_v19  ;;  %v1504_v1 = vpop.f32.mrb[7].mxu1  ;;  %v731_v2 = vsel %vm561_vm5, %v1913_v61, -inf }
 0x30d   : > { %732 = vmax.xlane.f32.xlu1 %v731_v2 }
 0x30e   : > { %v734_v3 = vsel %vm561_vm5, %v1916_v0, -inf }
 0x30f   : > { %735 = vmax.xlane.f32.xlu0 %v734_v3 }
 0x311   : > { %v889_v4 = vpop.f32.mrb[8].mxu1  ;;  %v2001_v2 = vpop.eup %1627 }
 0x312   : > { %v1923_v5 = vadd.f32 %v889_v4, %v1844_v18  ;;  %v1515_v7 = vpop.f32.mrb[9].mxu1 }
 0x313   : > { %v892_v8 = vpop.f32.mrb[10].mxu1 }
 0x314   : > { %v1926_v9 = vadd.f32 %v892_v8, %v1846_v19  ;;  %v1516_v10 = vpop.f32.mrb[11].mxu1  ;;  %v898_v11 = vsel %vm561_vm5, %v1923_v5, -inf }
 0x315   : > { %899 = vmax.xlane.f32.xlu0 %v898_v11 }
 0x316   : > { %v901_v12 = vsel %vm561_vm5, %v1926_v9, -inf }
 0x317   : > { %902 = vmax.xlane.f32.xlu1 %v901_v12 }
 0x319   : > { %v1056_v13 = vpop.f32.mrb[12].mxu1 }
 0x31a   : > { %v1933_v14 = vadd.f32 %v1056_v13, %v1844_v18  ;;  %v1527_v15 = vpop.f32.mrb[13].mxu1  ;;  %v1944_v18 = vld [vmem:[#allocation2] sm:$0xff] }
 0x31b   : > { %v1059_v16 = vpop.f32.mrb[14].mxu1 }
 0x31c   : > { %v1936_v17 = vadd.f32 %v1059_v16, %v1846_v19  ;;  %v1065_v20 = vsel %vm561_vm5, %v1933_v14, -inf  ;;  %v1528_v21 = vpop.f32.mrb[15].mxu1 }
 0x31d   : > { %1066 = vmax.xlane.f32.xlu0 %v1065_v20 }
 0x31e   : > { %v1068_v23 = vsel %vm561_vm5, %v1936_v17, -inf }
 0x31f   : > { %1069 = vmax.xlane.f32.xlu1 %v1068_v23 }
 0x39a   : > { %v733_v24 = vpop.xlane.xlu1 %732 }
 0x39b   : > { %v1947_v19 = vmax.f32 %v1944_v18, %v733_v24 }
 0x39c   : > { %v736_v26 = vpop.xlane.xlu0 %735 }
 0x39d   : > { %v739_v27 = vsub.f32 %v1944_v18, %v1947_v19  ;;  %843 = vst.msk [vmem:[#allocation2] sm:$0xff] %vm773_vm7, %v1947_v19  ;;  %v738_v30 = vmax.f32 %v730_v25, %v736_v26  ;;  %747 = vperm.xlu0 %1587, %v1947_v19  }
 0x39f   : > { %844 = vst.msk [vmem:[#allocation2 + $0x8] sm:$0xff] %vm773_vm7, %v738_v30  ;;  %752 = vperm.xlu1 %1588, %v738_v30   ;;  %v740_v60 = vsub.f32 %v730_v25, %v738_v30 }
 0x3a1   : > { %1126 = vrot.lane.b32.xlu0 %v1877_v37, %s1705_s10  ;;  %v743_v62 = vmul.f32 1.442695, %v740_v60 }
 0x3a2   : > { %v900_v34 = vpop.xlane.xlu0 %899  ;;  %1591 = vset.pattern.permute.xlu0 %v1702_v28 }
 0x3a3   : > { %1589 = vset.pattern.permute.xlu1 %v1707_v38  ;;  %1629 = vpow2.f32 %v743_v62 }
 0x3a4   : > { %v1959_v39 = vld [vmem:[#allocation2] sm:$0xff]  ;;  %v903_v40 = vpop.xlane.xlu1 %902 }
 0x3a5   : > { %v1962_v41 = vmax.f32 %v1959_v39, %v900_v34 }
 0x3a6   : > { %v1964_v42 = vld [vmem:[#allocation2 + $0x8] sm:$0xff] }
 0x3a7   : > { %v906_v43 = vsub.f32 %v1959_v39, %v1962_v41  ;;  %1010 = vst.msk [vmem:[#allocation2] sm:$0xff] %vm940_vm8, %v1962_v41  ;;  %v1971_v44 = vmax.f32 %v1964_v42, %v903_v40  ;;  %914 = vperm.xlu1 %1589, %v1962_v41  }
 0x3a9   : > { %v907_v45 = vsub.f32 %v1964_v42, %v1971_v44  ;;  %1011 = vst.msk [vmem:[#allocation2 + $0x8] sm:$0xff] %vm940_vm8, %v1971_v44 }
 0x3aa   : > { %v1067_v48 = vpop.xlane.xlu0 %1066 }
 0x3ab   : > { %919 = vperm.xlu1 %1589, %v1971_v44  }
 0x3ac   : > { %v1070_v50 = vpop.xlane.xlu1 %1069 }
 0x3ae   : > { %v1063_v49 = vld [vmem:[#allocation2] sm:$0xff] }
 0x3af   : > { %v1071_v51 = vmax.f32 %v1063_v49, %v1067_v48  ;;  %1590 = vset.pattern.permute.xlu1 %v1708_v52 }
 0x3b0   : > { %v1980_v53 = vld [vmem:[#allocation2 + $0x8] sm:$0xff] }
 0x3b1   : > { %1177 = vst.msk [vmem:[#allocation2] sm:$0xff] %vm1107_vm9, %v1071_v51  ;;  %v1984_v54 = vmax.f32 %v1980_v53, %v1070_v50  ;;  %1081 = vperm.xlu1 %1590, %v1071_v51   ;;  %v1073_v63 = vsub.f32 %v1063_v49, %v1071_v51 }
 0x3b3   : > { %v1074_v55 = vsub.f32 %v1980_v53, %v1984_v54  ;;  %1178 = vst.msk [vmem:[#allocation2 + $0x8] sm:$0xff] %vm1107_vm9, %v1984_v54  ;;  %v1075_v1 = vmul.f32 1.442695, %v1073_v63  ;;  %v741_v63 = vmul.f32 1.442695, %v739_v27 }
 0x3b5   : > { %1086 = vperm.xlu1 %1590, %v1984_v54   ;;  %1631 = vpow2.f32 %v1075_v1 }
 0x3b9   : > { %792 = vrot.lane.b32.xlu1 %v1877_v37, %s1703_s7 }
 0x3ba   : > { %1592 = vset.pattern.permute.xlu1 %v1702_v28 }
 0x3bd   : > { %959 = vrot.lane.b32.xlu1 %v1877_v37, %s1704_s9  ;;  %v2004_v37 = vpop.eup %1629 }
 0x3bf   : > { %v2008_v47 = vpop.eup %1631 }
 0x3c0   : > { %600 = vadd.xlane.f32.xlu0 %v599_v57 }
 0x3d6   : > { %611 = vperm.xlu0 %1591, %v2001_v2  }
 0x3da   : > { %1594 = vset.pattern.permute.xlu0 %v1706_v22 }
 0x3db   : > { %786 = vperm.xlu0 %1594, %v2004_v37  }
 0x3df   : > { %1596 = vset.pattern.permute.xlu0 %v1708_v52 }
 0x3e0   : > { %1115 = vperm.xlu0 %1596, %v2008_v47  }
 0x3e1   : > { %597 = vadd.xlane.f32.xlu1 %v596_v29 }
 0x3e4   : > { %1600 = vset.pattern.permute.xlu0 %v1707_v38 }
 0x41c   : > { %v748_v31 = vpop.permute.xlu0 %747 }
 0x41d   : > { %v755_v33 = vsub.f32 %v1913_v61, %v748_v31 }
 0x41e   : > { %v753_v3 = vpop.permute.xlu1 %752 }
 0x41f   : > { %v757_v4 = vmul.f32 1.442695, %v755_v33  ;;  %v756_v7 = vsub.f32 %v1916_v0, %v753_v3  ;;  %v908_v33 = vmul.f32 1.442695, %v906_v43  ;;  %v910_v3 = vmul.f32 1.442695, %v907_v45 }
 0x420   : > { %v1127_v59 = vpop.permute.xlu0 %1126 }
 0x421   : > { %1633 = vpow2.f32 %v757_v4  ;;  %v759_v8 = vmul.f32 1.442695, %v756_v7  ;;  %v1077_v7 = vmul.f32 1.442695, %v1074_v55 }
 0x423   : > { %1635 = vpow2.f32 %v759_v8 }
 0x426   : > { %v915_v10 = vpop.permute.xlu1 %914 }
 0x427   : > { %v922_v11 = vsub.f32 %v1923_v5, %v915_v10 }
 0x429   : > { %v924_v12 = vmul.f32 1.442695, %v922_v11 }
 0x42a   : > { %v920_v13 = vpop.permute.xlu1 %919 }
 0x42b   : > { %v1634_v15 = vpop.eup %1633  ;;  %1637 = vpow2.f32 %v924_v12  ;;  %v923_v46 = vsub.f32 %v1926_v9, %v920_v13 }
 0x42c   : > { %v765_v16 = vsel %vm561_vm5, %v1634_v15, 0.0 }
 0x42d   : > { %v1636_v20 = vpop.eup %1635  ;;  %v926_v61 = vmul.f32 1.442695, %v923_v46  ;;  %766 = vadd.xlane.f32.xlu1 %v765_v16 }
 0x42e   : > { %v768_v0 = vsel %vm561_vm5, %v1636_v20, 0.0  ;;  %v791_v49 = vpack.c.bf16 %v1636_v20, %v1634_v15 }
 0x42f   : > { %1639 = vpow2.f32 %v926_v61 }
 0x430   : > { %v1082_v21 = vpop.permute.xlu1 %1081 }
 0x431   : > { %v1089_v23 = vsub.f32 %v1933_v14, %v1082_v21  ;;  %769 = vadd.xlane.f32.xlu1 %v768_v0  ;;  %v574_v14 = vmul.f32 1.442695, %v571_v36  ;;  %v593_v36 = vld [vmem:[#allocation3 + $0x8] sm:$0xff] }
 0x433   : > { %v1091_v24 = vmul.f32 1.442695, %v1089_v23 }
 0x434   : > { %v1087_v5 = vpop.permute.xlu1 %1086 }
 0x435   : > { %v1638_v25 = vpop.eup %1637  ;;  %1641 = vpow2.f32 %v1091_v24  ;;  %v1090_v26 = vsub.f32 %v1936_v17, %v1087_v5 }
 0x436   : > { %v932_v9 = vsel %vm561_vm5, %v1638_v25, 0.0 }
 0x437   : > { %v1093_v30 = vmul.f32 1.442695, %v1090_v26  ;;  %933 = vadd.xlane.f32.xlu1 %v932_v9  ;;  %v608_v9 = vld [vmem:[#allocation4 + $0x8] sm:$0xff] }
 0x438   : > { %v793_v34 = vpop.permute.xlu1 %792 }
 0x439   : > { %v1640_v40 = vpop.eup %1639  ;;  %1643 = vpow2.f32 %v1093_v30  ;;  %1506 = vmatpush3.bf16.msra.mxu0 %v793_v34 }
 0x43a   : > { %v935_v48 = vsel %vm561_vm5, %v1640_v40, 0.0  ;;  %1517 = vmatprep.subr.bf16.mxu0 %v1699_v6  ;;  %1645 = vpow2.f32 %v574_v14  ;;  %v958_v57 = vpack.c.bf16 %v1640_v40, %v1638_v25 }
 0x43b   : > { %936 = vadd.xlane.f32.xlu1 %v935_v48  ;;  %1647 = vpow2.f32 %v741_v63 }
 0x43c   : > { %1508 = vmatmul.mubr.msk.bf16.vlgmr.msra.gmra.mrb[4].mxu0 %vm561_vm5, %v791_v49  ;;  %v960_v17 = vpop.permute.xlu1 %959  ;;  %1649 = vpow2.f32 %v908_v33 }
 0x43d   : > { %1518 = vmatpush3.bf16.msra.mxu0 %v960_v17  ;;  %1519 = vmatprep.mubr.msk.bf16.mxu0 %vm1700_vm1, %v1699_v6  ;;  %1651 = vpow2.f32 %v910_v3 }
 0x43e   : > { %1529 = vmatprep.subr.bf16.mxu0 %v1699_v6  ;;  %1653 = vpow2.f32 %v1077_v7  ;;  %v1111_v7 = vld [vmem:[#allocation4 + $0x30] sm:$0xff] }
 0x43f   : > { %v1642_v50 = vpop.eup %1641 }
 0x440   : > { %v1099_v51 = vsel %vm561_vm5, %v1642_v50, 0.0 }
 0x441   : > { %1100 = vadd.xlane.f32.xlu1 %v1099_v51  ;;  %v777_v51 = vld [vmem:[#allocation4 + $0x10] sm:$0xff] }
 0x443   : > { %v1644_v60 = vpop.eup %1643 }
 0x444   : > { %1520 = vmatmul.mubr.msk.bf16.vlgmr.msra.gmra.mrb[8].mxu0 %vm561_vm5, %v958_v57  ;;  %v1102_v32 = vsel %vm561_vm5, %v1644_v60, 0.0  ;;  %v1646_v35 = vpop.eup %1645  ;;  %v1125_v62 = vpack.c.bf16 %v1644_v60, %v1642_v50  ;;  %v778_v57 = vld [vmem:[#allocation4 + $0x18] sm:$0xff] }
 0x445   : > { %1103 = vadd.xlane.f32.xlu1 %v1102_v32  ;;  %1530 = vmatpush3.bf16.msra.mxu0 %v1127_v59  ;;  %v595_v1 = vmul.f32 %v1646_v35, %v593_v36  ;;  %v1648_v4 = vpop.eup %1647 }
 0x446   : > { %1531 = vmatprep.mubr.msk.bf16.mxu0 %vm1700_vm1, %v1699_v6  ;;  %v607_v6 = vld [vmem:[#allocation4] sm:$0xff]  ;;  %v1650_v39 = vpop.eup %1649 }
 0x447   : > { %v1652_v41 = vpop.eup %1651 }
 0x448   : > { %v1654_v42 = vpop.eup %1653 }
 0x44c   : > { %1532 = vmatmul.mubr.msk.bf16.vlgmr.msra.gmra.mrb[12].mxu0 %vm561_vm5, %v1125_v62 }
 0x44d   : > { %v601_v29 = vpop.xlane.xlu0 %600 }
 0x44e   : > { %v603_v31 = vadd.f32 %v601_v29, %v595_v1 }
 0x450   : > { %606 = vst.msk [vmem:[#allocation3 + $0x8] sm:$0xff] %vm604_vm6, %v603_v31 }
 0x455   : > { %v612_v18 = vpop.permute.xlu0 %611 }
 0x456   : > { %v619_v19 = vmul.f32 %v612_v18, %v607_v6  ;;  %616 = vperm.xlu1 %1592, %v1646_v35  }
 0x457   : > { %v762_v8 = vld [vmem:[#allocation3 + $0x8] sm:$0xff] }
 0x458   : > { %v672_v27 = vadd.f32 %v1908_v56, %v619_v19  ;;  %v592_v56 = vld [vmem:[#allocation3] sm:$0xff]  ;;  %v764_v11 = vmul.f32 %v2004_v37, %v762_v8 }
 0x459   : > { %v594_v43 = vmul.f32 %v2001_v2, %v592_v56 }
 0x45a   : > { %674 = vst.msk [vmem:[#allocation4] sm:$0xff] %vm461_vm0, %v672_v27  ;;  %1593 = vset.pattern.permute.xlu1 %v1706_v22  ;;  %v787_v59 = vpop.permute.xlu0 %786 }
 0x45b   : > { %781 = vperm.xlu1 %1593, %v1648_v4  }
 0x45f   : > { %1595 = vset.pattern.permute.xlu1 %v1707_v38 }
 0x460   : > { %948 = vperm.xlu1 %1595, %v1650_v39  }
 0x464   : > { %953 = vperm.xlu1 %1595, %v1652_v41  }
 0x468   : > { %1597 = vset.pattern.permute.xlu1 %v1708_v52 }
 0x469   : > { %1120 = vperm.xlu1 %1597, %v1654_v42  }
 0x46d   : > { %1598 = vset.pattern.permute.xlu1 %v1702_v28 }
 0x46e   : > { %v598_v44 = vpop.xlane.xlu1 %597 }
 0x46f   : > { %v602_v45 = vadd.f32 %v598_v44, %v594_v43 }
 0x471   : > { %605 = vst.msk [vmem:[#allocation3] sm:$0xff] %vm604_vm6, %v602_v45 }
 0x478   : > { %v761_v53 = vld [vmem:[#allocation3] sm:$0xff] }
 0x479   : > { %v763_v54 = vmul.f32 %v1648_v4, %v761_v53 }
 0x4ba   : > { %v767_v55 = vpop.xlane.xlu1 %766 }
 0x4bb   : > { %v771_v10 = vadd.f32 %v767_v55, %v763_v54 }
 0x4bd   : > { %774 = vst.msk [vmem:[#allocation3] sm:$0xff] %vm773_vm7, %v771_v10 }
 0x4be   : > { %v770_v12 = vpop.xlane.xlu1 %769 }
 0x4bf   : > { %v772_v13 = vadd.f32 %v770_v12, %v764_v11 }
 0x4c1   : > { %775 = vst.msk [vmem:[#allocation3 + $0x8] sm:$0xff] %vm773_vm7, %v772_v13 }
 0x4c4   : > { %v928_v2 = vld [vmem:[#allocation3] sm:$0xff]  ;;  %v934_v15 = vpop.xlane.xlu1 %933 }
 0x4c5   : > { %v930_v46 = vmul.f32 %v1650_v39, %v928_v2  ;;  %v1116_v39 = vpop.permute.xlu0 %1115 }
 0x4c6   : > { %v1123_v56 = vmul.f32 %v1116_v39, %v1111_v7 }
 0x4c7   : > { %v938_v16 = vadd.f32 %v934_v15, %v930_v46 }
 0x4c8   : > { %v929_v20 = vld [vmem:[#allocation3 + $0x8] sm:$0xff]  ;;  %v937_v21 = vpop.xlane.xlu1 %936 }
 0x4c9   : > { %941 = vst.msk [vmem:[#allocation3] sm:$0xff] %vm940_vm8, %v938_v16  ;;  %v931_v61 = vmul.f32 %v1652_v41, %v929_v20  ;;  %v1112_v41 = vld [vmem:[#allocation4 + $0x38] sm:$0xff] }
 0x4cb   : > { %v939_v0 = vadd.f32 %v937_v21, %v931_v61 }
 0x4cd   : > { %942 = vst.msk [vmem:[#allocation3 + $0x8] sm:$0xff] %vm940_vm8, %v939_v0 }
 0x4ce   : > { %v1101_v23 = vpop.xlane.xlu1 %1100 }
 0x4d0   : > { %v1095_v24 = vld [vmem:[#allocation3] sm:$0xff] }
 0x4d1   : > { %v1097_v37 = vmul.f32 %v2008_v47, %v1095_v24 }
 0x4d2   : > { %v1104_v5 = vpop.xlane.xlu1 %1103 }
 0x4d3   : > { %v1105_v25 = vadd.f32 %v1101_v23, %v1097_v37 }
 0x4d4   : > { %v1096_v26 = vld [vmem:[#allocation3 + $0x8] sm:$0xff] }
 0x4d5   : > { %1108 = vst.msk [vmem:[#allocation3] sm:$0xff] %vm1107_vm9, %v1105_v25  ;;  %v1098_v30 = vmul.f32 %v1654_v42, %v1096_v26 }
 0x4d6   : > { %v617_v34 = vpop.permute.xlu1 %616 }
 0x4d7   : > { %v1106_v40 = vadd.f32 %v1104_v5, %v1098_v30  ;;  %v620_v48 = vmul.f32 %v617_v34, %v608_v9 }
 0x4d9   : > { %1109 = vst.msk [vmem:[#allocation3 + $0x8] sm:$0xff] %vm1107_vm9, %v1106_v40  ;;  %v673_v49 = vadd.f32 %v1910_v58, %v620_v48 }
 0x4da   : > { %v782_v58 = vpop.permute.xlu1 %781 }
 0x4db   : > { %675 = vst.msk [vmem:[#allocation4 + $0x8] sm:$0xff] %vm461_vm0, %v673_v49  ;;  %v789_v60 = vmul.f32 %v782_v58, %v777_v51 }
 0x4dc   : > { %v1182_v14 = vld [vmem:[#allocation3] sm:$0xff] }
 0x4dd   : > { %1655 = vrcp.f32 %v1182_v14 }
 0x4e0   : > { %v1183_v17 = vld [vmem:[#allocation3 + $0x8] sm:$0xff] }
 0x4e1   : > { %1657 = vrcp.f32 %v1183_v17 }
 0x4e2   : > { %v1187_v58 = vld [vmem:[#allocation4 + $0x8] sm:$0xff] }
 0x4e7   : > { %v1656_v47 = vpop.eup %1655 }
 0x4e8   : > { %1215 = vperm.xlu0 %1600, %v1656_v47   ;;  %1190 = vperm.xlu1 %1598, %v1656_v47  }
 0x4eb   : > { %v1658_v50 = vpop.eup %1657 }
 0x4ec   : > { %1601 = vset.pattern.permute.xlu0 %v1702_v28  ;;  %1599 = vset.pattern.permute.xlu1 %v1706_v22  ;;  %v949_v28 = vpop.permute.xlu1 %948  ;;  %v790_v22 = vmul.f32 %v787_v59, %v778_v57 }
 0x4ed   : > { %1203 = vperm.xlu1 %1599, %v1656_v47   ;;  %1195 = vperm.xlu0 %1601, %v1658_v50  }
 0x4f0   : > { %v954_v29 = vpop.permute.xlu1 %953 }
 0x4f1   : > { %1207 = vperm.xlu1 %1599, %v1658_v50   ;;  %1604 = vset.pattern.permute.xlu0 %v1708_v52 }
 0x4f2   : > { %1231 = vperm.xlu0 %1604, %v1658_v50  }
 0x4f4   : > { %v1121_v42 = vpop.permute.xlu1 %1120 }
 0x4f5   : > { %1602 = vset.pattern.permute.xlu1 %v1707_v38  ;;  %v944_v38 = vld [vmem:[#allocation4 + $0x20] sm:$0xff]  ;;  %v1124_v44 = vmul.f32 %v1121_v42, %v1112_v41 }
 0x4f6   : > { %1219 = vperm.xlu1 %1602, %v1658_v50   ;;  %v956_v31 = vmul.f32 %v949_v28, %v944_v38  ;;  %v1186_v50 = vld [vmem:[#allocation4] sm:$0xff] }
 0x4fa   : > { %1603 = vset.pattern.permute.xlu1 %v1708_v52  ;;  %v945_v52 = vld [vmem:[#allocation4 + $0x28] sm:$0xff] }
 0x4fb   : > { %1227 = vperm.xlu1 %1603, %v1656_v47   ;;  %v957_v6 = vmul.f32 %v954_v29, %v945_v52 }
 0x50f   : > { %v832_v32 = vpop.f32.mrb[4].mxu0 }
 0x510   : > { %v839_v35 = vadd.f32 %v832_v32, %v789_v60  ;;  %v1509_v36 = vpop.f32.mrb[5].mxu0 }
 0x511   : > { %v835_v62 = vpop.f32.mrb[6].mxu0 }
 0x512   : > { %841 = vst.msk [vmem:[#allocation4 + $0x10] sm:$0xff] %vm461_vm0, %v839_v35  ;;  %v840_v63 = vadd.f32 %v835_v62, %v790_v22  ;;  %v1510_v1 = vpop.f32.mrb[7].mxu0 }
 0x514   : > { %842 = vst.msk [vmem:[#allocation4 + $0x18] sm:$0xff] %vm461_vm0, %v840_v63 }
 0x517   : > { %v999_v33 = vpop.f32.mrb[8].mxu0 }
 0x518   : > { %v1006_v3 = vadd.f32 %v999_v33, %v956_v31  ;;  %v1521_v18 = vpop.f32.mrb[9].mxu0 }
 0x519   : > { %v1002_v19 = vpop.f32.mrb[10].mxu0  ;;  %v1200_v13 = vld [vmem:[#allocation4 + $0x10] sm:$0xff] }
 0x51a   : > { %1008 = vst.msk [vmem:[#allocation4 + $0x20] sm:$0xff] %vm461_vm0, %v1006_v3  ;;  %v1007_v27 = vadd.f32 %v1002_v19, %v957_v6  ;;  %v1522_v4 = vpop.f32.mrb[11].mxu0 }
 0x51b   : > { %v1201_v15 = vld [vmem:[#allocation4 + $0x18] sm:$0xff] }
 0x51c   : > { %1009 = vst.msk [vmem:[#allocation4 + $0x28] sm:$0xff] %vm461_vm0, %v1007_v27 }
 0x51f   : > { %v1166_v43 = vpop.f32.mrb[12].mxu0 }
 0x520   : > { %v1173_v45 = vadd.f32 %v1166_v43, %v1123_v56  ;;  %v1533_v53 = vpop.f32.mrb[13].mxu0 }
 0x521   : > { %v1169_v54 = vpop.f32.mrb[14].mxu0  ;;  %v1212_v21 = vld [vmem:[#allocation4 + $0x20] sm:$0xff] }
 0x522   : > { %1175 = vst.msk [vmem:[#allocation4 + $0x30] sm:$0xff] %vm461_vm0, %v1173_v45  ;;  %v1174_v55 = vadd.f32 %v1169_v54, %v1124_v44  ;;  %v1534_v8 = vpop.f32.mrb[15].mxu0 }
 0x523   : > { %v1213_v23 = vld [vmem:[#allocation4 + $0x28] sm:$0xff] }
 0x524   : > { %1176 = vst.msk [vmem:[#allocation4 + $0x38] sm:$0xff] %vm461_vm0, %v1174_v55 }
 0x529   : > { %v1224_v30 = vld [vmem:[#allocation4 + $0x30] sm:$0xff] }
 0x52b   : > { %v1225_v26 = vld [vmem:[#allocation4 + $0x38] sm:$0xff] }
 0x567   : > { %v1191_v10 = vpop.permute.xlu1 %1190  ;;  %v1216_v11 = vpop.permute.xlu0 %1215 }
 0x568   : > { %v1222_v24 = vmul.f32 %v1216_v11, %v1212_v21  ;;  %v1198_v59 = vmul.f32 %v1191_v10, %v1186_v50 }
 0x56c   : > { %v1204_v12 = vpop.permute.xlu1 %1203  ;;  %v1196_v20 = vpop.permute.xlu0 %1195 }
 0x56d   : > { %v1210_v46 = vmul.f32 %v1204_v12, %v1200_v13  ;;  %v1199_v60 = vmul.f32 %v1196_v20, %v1187_v58 }
 0x570   : > { %v1208_v2 = vpop.permute.xlu1 %1207 }
 0x571   : > { %v1211_v16 = vmul.f32 %v1208_v2, %v1201_v15  ;;  %v1232_v5 = vpop.permute.xlu0 %1231 }
 0x572   : > { %v1235_v34 = vmul.f32 %v1232_v5, %v1225_v26 }
 0x573   : > { %v1605_v61 = vpack.i.bf16 %v1211_v16, %v1210_v46 }
 0x575   : > { %v1220_v0 = vpop.permute.xlu1 %1219  ;;  %1606 = vrot.lane.b32.xlu1 %v1605_v61, %s1705_s10 }
 0x576   : > { %v1223_v37 = vmul.f32 %v1220_v0, %v1213_v23 }
 0x578   : > { %v1610_v25 = vpack.i.bf16 %v1223_v37, %v1222_v24 }
 0x57a   : > { %v1228_v9 = vpop.permute.xlu1 %1227  ;;  %1611 = vrot.lane.b32.xlu1 %v1610_v25, %s1704_s9 }
 0x57b   : > { %v1234_v40 = vmul.f32 %v1228_v9, %v1224_v30 }
 0x57d   : > { %v1615_v48 = vpack.i.bf16 %v1235_v34, %v1234_v40 }
 0x57f   : > { %1616 = vrot.lane.b32.xlu0 %v1615_v48, %s1703_s7 }
 0x5e7   : > { %v1607_v49 = vpop.permute.xlu1 %1606 }
 0x5e8   : > { %v1609_v17 = vunpack.i.h.bf16 %v1607_v49  ;;  %v1608_v47 = vunpack.i.l.bf16 %v1607_v49 }
 0x5ea   : > { %v1261_v32 = vsel %vm461_vm0, %v1199_v60, %v1609_v17  ;;  %v1260_v22 = vsel %vm461_vm0, %v1198_v59, %v1608_v47 }
 0x5ec   : > { %v1612_v14 = vpop.permute.xlu1 %1611 }
 0x5ed   : > { %v1614_v51 = vunpack.i.h.bf16 %v1612_v14  ;;  %v1613_v57 = vunpack.i.l.bf16 %v1612_v14 }
 0x5ef   : > { %v1264_v62 = vsel %vm1262_vm10, %v1261_v32, %v1614_v51  ;;  %v1263_v63 = vsel %vm1262_vm10, %v1260_v22, %v1613_v57 }
 0x5f1   : > { %v1617_v28 = vpop.permute.xlu0 %1616 }
 0x5f2   : > { %v1619_v35 = vunpack.i.h.bf16 %v1617_v28  ;;  %v1618_v36 = vunpack.i.l.bf16 %v1617_v28 }
 0x5f4   : > { %v1267_v1 = vsel %vm1265_vm11, %v1264_v62, %v1619_v35  ;;  %v1266_v38 = vsel %vm1265_vm11, %v1263_v63, %v1618_v36 }
 0x5f5   : > { %v1469_v52 = vpack.c.bf16 %v1267_v1, %v1266_v38 }
 0x5f7   : > { %1470 = vst [vmem:[%s449_s14] sm:$0xff] %v1469_v52  }
 0x5f8 PF: > { %s14_s19 = sadd.s32 1, %s1697_s19   ;;  %s2111_s15 = smov %s1685_s16 }
 0x5f9   : > { %p11_p10 = scmp.ge.s32.totalorder %s14_s19, 4   ;;  %s2112_s16 = smov %s1773_s24 }
 0x5fa   : > { %s2113_s17 = smov %s1693_s18  ;;  %s2114_s18 = smov %s2116_s20 }
 0x5fb   :  { %13 = sbr.rel (!%p11_p10) target bundleno = 3 (0x3), region = 224 }

// kernel: forward.63
= control target key start
LH: loop header
LB: loop body
LE: loop exit
PB: predicated region body
PF: predicated region fallthrough
CT: control target
= control target key end

     0   :  { %s1599_s12 = smov 0   ;;  %s1601_s13 = smov 0   ;;  %s1949_s0 = inlined_call_operand.vmem [shape: bf16[2,16,128], index: 0, kind: input, shape index: {}]   ;;  %s1950_s1 = inlined_call_operand.vmem [shape: bf16[2,16,256], index: 1, kind: input, shape index: {}, may-alias: {1,2}]   ;;  %s1951_s2 = inlined_call_operand.vmem [shape: bf16[2,16,256], index: 2, kind: input, shape index: {}, may-alias: {1,2}]   ;;  %s1952_s3 = inlined_call_operand.vmem [shape: bf16[2,16,128], index: 3, kind: output, shape index: {}]  }
   0x1   :  { %s1603_s14 = smov 0   ;;  %s1605_s15 = smov 0  }
   0x2   :  { %s1607_s16 = smov 0  }
   0x3 LB: > { %s32_s17 = sadd.s32 1, %s1563_s15  ;;  %p76_p1 = scmp.ne.s32.totalorder %s1555_s13, %s1551_s12  ;;  %s1567_s16 = sphi %s1607_s16, %s13_s16   ;;  %s1563_s15 = sphi %s1605_s15, %s1957_s15   ;;  %s1559_s14 = sphi %s1603_s14, %s1956_s14   ;;  %s1555_s13 = sphi %s1601_s13, %s1955_s13   ;;  %s1551_s12 = sphi %s1599_s12, %s1954_s12  }
   0x4   : > { %p34_p0 = scmp.ge.s32.totalorder %s32_s17, 2  ;;  %p77_p2 = scmp.eq.s32.totalorder %s1567_s16, 0 }
   0x5   : > { %s69_s20 = sadd.s32 1, %s1555_s13  ;;  %p1300_p5 = scmp.ge.s32.totalorder %s1567_s16, 2 }
   0x6   : > { %s1959_s17 = smov (%p34_p0, %s32_s17), 0  ;;  %p1630_p3 = por %p77_p2, %p76_p1 }
   0x7   : > { %s64_s19 = ssub.s32 %s1563_s15, %s1959_s17  ;;  %158 = sbr.rel (%p1300_p5) target bundleno = 28 (0x1c), region = 16 }
   0x8   : > { %p67_p4 = scmp.eq.s32.totalorder %s64_s19, 0 }
   0xa   : > { %s1638_s21 = scalar_select %p67_p4, %s1555_s13, %s69_s20  }
   0xe   : > { %174 = sbr.rel (!%p1630_p3) target bundleno = 21 (0x15), region = 24  ;;  %s176_s22 = sand.u32 (%p1630_p3), 1, %s1555_s13  }
   0xf   : > { %s1331_s23 = sshll.u32 (%p1630_p3), %s1563_s15, 4  ;;  %s1301_s24 = sshll.u32 (%p1630_p3), %s176_s22, 3 }
  0x10   : > { %s184_s27 = scalar_lea.vmem (%p1630_p3), %s1950_s1, %s1331_s23  ;;  %s178_s28 = scalar_lea.vmem (%p1630_p3), [#allocation5], %s1301_s24 }
  0x11   : > { %v200_v0 = vld [vmem:[%s184_s27] sm:$0xf] (%p1630_p3)  ;;  %v202_v1 = vld [vmem:[%s184_s27 + $0x8] sm:$0xf] (%p1630_p3) }
  0x12   : > { %201 = vst [vmem:[%s178_s28] sm:$0xf] (%p1630_p3), %v200_v0  ;;  %203 = vst [vmem:[%s178_s28 + $0x4] sm:$0xf] (%p1630_p3), %v202_v1 }
  0x15 PF: > { %230 = sbr.rel (!%p1630_p3) target bundleno = 28 (0x1c), region = 65  ;;  %s232_s29 = sand.u32 (%p1630_p3), 1, %s1555_s13  }
  0x16   : > { %s1332_s30 = sshll.u32 (%p1630_p3), %s1563_s15, 4  ;;  %s1304_s4 = sshll.u32 (%p1630_p3), %s232_s29, 3 }
  0x17   : > { %s1211_s7 = scalar_lea.vmem (%p1630_p3), %s1951_s2, %s1332_s30  ;;  %s234_s8 = scalar_lea.vmem (%p1630_p3), [#allocation6], %s1304_s4 }
  0x18   : > { %v1307_v2 = vld [vmem:[%s1211_s7 + $0x4] sm:$0xf] (%p1630_p3)  ;;  %v1308_v3 = vld [vmem:[%s1211_s7 + $0xc] sm:$0xf] (%p1630_p3) }
  0x19   : > { %258 = vst [vmem:[%s234_s8] sm:$0xf] (%p1630_p3), %v1307_v2  ;;  %260 = vst [vmem:[%s234_s8 + $0x4] sm:$0xf] (%p1630_p3), %v1308_v3 }
  0x1c PF: > { %p1309_p6 = scmp.ge.s32.totalorder %s1567_s16, 1  ;;  %p286_p7 = scmp.lt.s32.totalorder %s1567_s16, 3 }
  0x1e   : > { %p287_p8 = pnand %p1309_p6, %p286_p7 }
  0x1f   : > { %s293_s9 = sand.u32 (!%p287_p8), 1, %s1551_s12   ;;  %vm372_vm0 = vcmask (!%p287_p8), 261120   ;;  %p341_p9 = scmp.lt.s32.totalorder (!%p287_p8), %s1559_s14, 1  ;;  %v1569_v4 = vmov (!%p287_p8), 0.0   ;;  %vm1570_vm1 = vmmov (!%p287_p8), 0   ;;  %vm367_vm2 = vcmask (!%p287_p8), 31744  }
  0x20   : > { %290 = sbr.rel (%p287_p8) target bundleno = 1517 (0x5ed), region = 106  ;;  %1358 = vmatprep.subr.bf16.mxu0 (!%p287_p8), %v1569_v4  ;;  %s1660_s10 = sshll.u32 (!%p287_p8), %s293_s9, 3  ;;  %373 = vst.msk [vmem:[#allocation4] sm:$0xff] (!%p287_p8), %vm372_vm0, %v1569_v4  ;;  %374 = vst.msk [vmem:[#allocation4 + $0x8] sm:$0xff] (!%p287_p8), %vm372_vm0, %v1569_v4  ;;  %1360 = vmatprep.mubr.msk.bf16.mxu0 (!%p287_p8), %vm1570_vm1, %v1569_v4  ;;  %v1571_v8 = vmov (!%p287_p8), -1e+30  }
  0x21   : > { %375 = vst.msk [vmem:[#allocation4 + $0x10] sm:$0xff] (!%p287_p8), %vm372_vm0, %v1569_v4  ;;  %376 = vst.msk [vmem:[#allocation4 + $0x18] sm:$0xff] (!%p287_p8), %vm372_vm0, %v1569_v4  ;;  %1364 = vmatprep.subr.bf16.mxu1 (!%p287_p8), %v1569_v4  ;;  %1366 = vmatprep.mubr.msk.bf16.mxu1 (!%p287_p8), %vm1570_vm1, %v1569_v4  ;;  %s295_s11 = scalar_lea.vmem (!%p287_p8), [#allocation5], %s1660_s10  ;;  %vm447_vm3 = vcmask (!%p287_p8), 130048   ;;  %v1572_v15 = vmov (!%p287_p8), 0   ;;  %s1573_s22 = smov (!%p287_p8), 96  }
  0x22   : > { %377 = vst.msk [vmem:[#allocation4 + $0x20] sm:$0xff] (!%p287_p8), %vm372_vm0, %v1569_v4  ;;  %378 = vst.msk [vmem:[#allocation4 + $0x28] sm:$0xff] (!%p287_p8), %vm372_vm0, %v1569_v4  ;;  %v1490_v5 = vld [vmem:[%s295_s11] sm:$0xff] (!%p287_p8)   ;;  %1456 = vset.pattern.permute.xlu1 (!%p287_p8), %v1572_v15  ;;  %vm490_vm4 = vcmask (!%p287_p8), 7168   ;;  %s302_s23 = scalar_lea.vmem (!%p287_p8), [#allocation6], %s1660_s10  ;;  %s1574_s24 = smov (!%p287_p8), 64  }
  0x23   : > { %379 = vst.msk [vmem:[#allocation4 + $0x30] sm:$0xff] (!%p287_p8), %vm372_vm0, %v1569_v4  ;;  %380 = vst.msk [vmem:[#allocation4 + $0x38] sm:$0xff] (!%p287_p8), %vm372_vm0, %v1569_v4  ;;  %v402_v6 = vsel (!%p287_p8), %vm372_vm0, %v1490_v5, 0  ;;  %v1728_v24 = vld [vmem:[%s302_s23] sm:$0xff] (!%p287_p8)   ;;  %s1575_s25 = smov (!%p287_p8), 32   ;;  %v1576_v62 = vmov (!%p287_p8), 1  }
  0x24   : > { %1359 = vmatpush3.bf16.xpose.msra.mxu0 (!%p287_p8), %v402_v6  ;;  %368 = vst.msk [vmem:[#allocation2] sm:$0xff] (!%p287_p8), %vm367_vm2, %v1571_v8  ;;  %369 = vst.msk [vmem:[#allocation2 + $0x8] sm:$0xff] (!%p287_p8), %vm367_vm2, %v1571_v8  ;;  %1365 = vmatpush3.bf16.msra.mxu1 (!%p287_p8), %v1728_v24  ;;  %vm659_vm5 = vcmask (!%p287_p8), 15368   ;;  %vm826_vm6 = vcmask (!%p287_p8), 23568   ;;  %vm993_vm7 = vcmask (!%p287_p8), 31768   ;;  %vm1148_vm8 = vcmask (!%p287_p8), 523264  }
  0x25   : > { %1376 = vmatprep.subr.bf16.mxu0 (!%p287_p8), %v1569_v4  ;;  %370 = vst.msk [vmem:[#allocation3] sm:$0xff] (!%p287_p8), %vm367_vm2, %v1569_v4  ;;  %371 = vst.msk [vmem:[#allocation3 + $0x8] sm:$0xff] (!%p287_p8), %vm367_vm2, %v1569_v4  ;;  %1370 = vmatprep.subr.bf16.mxu1 (!%p287_p8), %v1569_v4  ;;  %vm1151_vm9 = vcmask (!%p287_p8), 785408  }
  0x26   : > { %1457 = vset.pattern.permute.xlu0 (!%p287_p8), %v1576_v62 }
  0x27   : > { %s1961_s14 = smov (!%p341_p9, %s1559_s14), 1 }
  0x28   : > { %s1333_s12 = sshll.u32 %s1961_s14, 3 }
  0x29   : > { %s348_s20 = scalar_lea.vmem %s1949_s0, %s1333_s12  ;;  %s360_s28 = scalar_lea.vmem %s1952_s3, %s1333_s12 }
  0x2a   : > { %v1491_v7 = vld [vmem:[%s348_s20] sm:$0xff]  }
  0x2b   : > { %1361 = vmatmul.mubr.msk.bf16.vlgmr.msra.gmra.mrb[0].mxu0 %vm372_vm0, %v1491_v7  ;;  %v1706_v16 = vld [vmem:[#allocation2] sm:$0xff]  ;;  %v1711_v19 = vld [vmem:[#allocation2 + $0x8] sm:$0xff] }
  0x2c   : > { %1378 = vmatprep.mubr.msk.bf16.mxu0 %vm1570_vm1, %v1569_v4 }
  0xfe   : > { %v438_v9 = vpop.f32.mrb[0].mxu0 }
  0xff   : > { %v1362_v10 = vpop.f32.mrb[1].mxu0  ;;  %v448_v11 = vsel %vm447_vm3, %v438_v9, -inf }
 0x100   : > { %449 = vmax.xlane.f32.xlu0 %v448_v11  ;;  %v441_v12 = vpop.f32.mrb[2].mxu0  ;;  %v1577_v11 = vmov 2  }
 0x101   : > { %v1363_v13 = vpop.f32.mrb[3].mxu0  ;;  %v451_v14 = vsel %vm447_vm3, %v441_v12, -inf }
 0x104   : > { %452 = vmax.xlane.f32.xlu0 %v451_v14 }
 0x11a   : > { %566 = vrot.lane.b32.xlu0 %v1490_v5, %s1573_s22 }
 0x18d   : > { %v450_v17 = vpop.xlane.xlu0 %449 }
 0x18e   : > { %v1709_v18 = vmax.f32 %v1706_v16, %v450_v17 }
 0x190   : > { %v456_v20 = vsub.f32 %v1706_v16, %v1709_v18  ;;  %562 = vst.msk [vmem:[#allocation2] sm:$0xff] %vm490_vm4, %v1709_v18  ;;  %464 = vperm.xlu1 %1456, %v1709_v18  }
 0x191   : > { %v453_v21 = vpop.xlane.xlu0 %452 }
 0x192   : > { %v1719_v22 = vmax.f32 %v1711_v19, %v453_v21 }
 0x194   : > { %v457_v23 = vsub.f32 %v1711_v19, %v1719_v22  ;;  %563 = vst.msk [vmem:[#allocation2 + $0x8] sm:$0xff] %vm490_vm4, %v1719_v22  ;;  %469 = vperm.xlu1 %1456, %v1719_v22  }
 0x195   : > { %v567_v31 = vpop.permute.xlu0 %566 }
 0x196   : > { %v572_v35 = vsel %vm372_vm0, %v567_v31, 0  ;;  %v1578_v31 = vmov 3  }
 0x197   : > { %v1787_v2 = vld [vmem:[#allocation2] sm:$0xff] }
 0x198   : > { %564 = vrot.lane.b32.xlu1 %v1491_v7, %s1573_s22 }
 0x199   : > { %1458 = vset.pattern.permute.xlu1 %v1576_v62 }
 0x19b   : > { %v616_v6 = vld [vmem:[#allocation2 + $0x8] sm:$0xff] }
 0x19c   : > { %733 = vrot.lane.b32.xlu1 %v1490_v5, %s1574_s24 }
 0x1a0   : > { %731 = vrot.lane.b32.xlu1 %v1491_v7, %s1574_s24 }
 0x1a4   : > { %900 = vrot.lane.b32.xlu1 %v1490_v5, %s1575_s25 }
 0x1a8   : > { %898 = vrot.lane.b32.xlu1 %v1491_v7, %s1575_s25 }
 0x20f   : > { %v465_v25 = vpop.permute.xlu1 %464 }
 0x210   : > { %v472_v26 = vsub.f32 %v438_v9, %v465_v25 }
 0x212   : > { %v474_v27 = vmul.f32 1.442695, %v472_v26 }
 0x213   : > { %v470_v28 = vpop.permute.xlu1 %469 }
 0x214   : > { %v473_v29 = vsub.f32 %v441_v12, %v470_v28  ;;  %1493 = vpow2.f32 %v474_v27 }
 0x216   : > { %v476_v30 = vmul.f32 1.442695, %v473_v29 }
 0x217   : > { %v565_v32 = vpop.permute.xlu1 %564 }
 0x218   : > { %1495 = vpow2.f32 %v476_v30 }
 0x21b   : > { %v734_v37 = vpop.permute.xlu1 %733 }
 0x21c   : > { %v739_v39 = vsel %vm372_vm0, %v734_v37, 0 }
 0x21e   : > { %v1736_v33 = vpop.eup %1493 }
 0x21f   : > { %v732_v38 = vpop.permute.xlu1 %731  ;;  %v482_v16 = vsel %vm447_vm3, %v1736_v33, 0.0 }
 0x222   : > { %v1738_v34 = vpop.eup %1495 }
 0x223   : > { %v507_v36 = vpack.c.bf16 %v1738_v34, %v1736_v33  ;;  %v901_v40 = vpop.permute.xlu1 %900  ;;  %v485_v37 = vsel %vm447_vm3, %v1738_v34, 0.0 }
 0x224   : > { %v906_v41 = vsel %vm372_vm0, %v901_v40, 0 }
 0x225   : > { %1367 = vmatmul.mubr.msk.bf16.vlgmr.msra.gmra.mrb[0].mxu1 %vm447_vm3, %v507_v36 }
 0x226   : > { %1371 = vmatpush3.bf16.xpose.msra.mxu1 %v572_v35  ;;  %1372 = vmatprep.mubr.msk.bf16.mxu1 %vm1570_vm1, %v1569_v4 }
 0x227   : > { %1382 = vmatprep.subr.bf16.mxu1 %v1569_v4  ;;  %v899_v42 = vpop.permute.xlu1 %898 }
 0x22d   : > { %1373 = vmatmul.mubr.msk.bf16.vlgmr.msra.gmra.mrb[4].mxu1 %vm372_vm0, %v565_v32 }
 0x22e   : > { %1383 = vmatpush3.bf16.xpose.msra.mxu1 %v739_v39  ;;  %1384 = vmatprep.mubr.msk.bf16.mxu1 %vm1570_vm1, %v1569_v4 }
 0x22f   : > { %1394 = vmatprep.subr.bf16.mxu1 %v1569_v4 }
 0x235   : > { %1385 = vmatmul.mubr.msk.bf16.vlgmr.msra.gmra.mrb[8].mxu1 %vm372_vm0, %v732_v38  ;;  %v458_v38 = vmul.f32 1.442695, %v456_v20 }
 0x236   : > { %1395 = vmatpush3.bf16.xpose.msra.mxu1 %v906_v41  ;;  %1396 = vmatprep.mubr.msk.bf16.mxu1 %vm1570_vm1, %v1569_v4 }
 0x237   : > { %1497 = vpow2.f32 %v458_v38 }
 0x23d   : > { %1397 = vmatmul.mubr.msk.bf16.vlgmr.msra.gmra.mrb[12].mxu1 %vm372_vm0, %v899_v42 }
 0x2f8   : > { %v1757_v43 = vpop.f32.mrb[0].mxu1 }
 0x2f9   : > { %v1368_v44 = vpop.f32.mrb[1].mxu1 }
 0x2fa   : > { %v1759_v45 = vpop.f32.mrb[2].mxu1  ;;  %v1844_v44 = vpop.eup %1497 }
 0x2fb   : > { %v1369_v46 = vpop.f32.mrb[3].mxu1 }
 0x300   : > { %v1761_v47 = vpop.f32.mrb[4].mxu1 }
 0x301   : > { %v1374_v48 = vpop.f32.mrb[5].mxu1  ;;  %v617_v49 = vsel %vm447_vm3, %v1761_v47, -inf }
 0x302   : > { %618 = vmax.xlane.f32.xlu1 %v617_v49  ;;  %v1765_v50 = vpop.f32.mrb[6].mxu1 }
 0x303   : > { %v1375_v51 = vpop.f32.mrb[7].mxu1  ;;  %v620_v52 = vsel %vm447_vm3, %v1765_v50, -inf }
 0x304   : > { %621 = vmax.xlane.f32.xlu0 %v620_v52 }
 0x308   : > { %v1769_v53 = vpop.f32.mrb[8].mxu1 }
 0x309   : > { %v1386_v54 = vpop.f32.mrb[9].mxu1  ;;  %v784_v55 = vsel %vm447_vm3, %v1769_v53, -inf }
 0x30a   : > { %v1773_v56 = vpop.f32.mrb[10].mxu1  ;;  %785 = vmax.xlane.f32.xlu0 %v784_v55 }
 0x30b   : > { %v1387_v57 = vpop.f32.mrb[11].mxu1  ;;  %v787_v58 = vsel %vm447_vm3, %v1773_v56, -inf }
 0x30c   : > { %788 = vmax.xlane.f32.xlu1 %v787_v58 }
 0x310   : > { %v1777_v59 = vpop.f32.mrb[12].mxu1 }
 0x311   : > { %v1398_v60 = vpop.f32.mrb[13].mxu1  ;;  %v951_v61 = vsel %vm447_vm3, %v1777_v59, -inf }
 0x312   : > { %952 = vmax.xlane.f32.xlu0 %v951_v61  ;;  %v1783_v63 = vpop.f32.mrb[14].mxu1 }
 0x313   : > { %v954_v0 = vsel %vm447_vm3, %v1783_v63, -inf  ;;  %v1399_v1 = vpop.f32.mrb[15].mxu1 }
 0x314   : > { %955 = vmax.xlane.f32.xlu1 %v954_v0 }
 0x38f   : > { %v619_v3 = vpop.xlane.xlu1 %618 }
 0x390   : > { %v1790_v5 = vmax.f32 %v1787_v2, %v619_v3 }
 0x391   : > { %v622_v7 = vpop.xlane.xlu0 %621 }
 0x392   : > { %v625_v8 = vsub.f32 %v1787_v2, %v1790_v5  ;;  %729 = vst.msk [vmem:[#allocation2] sm:$0xff] %vm659_vm5, %v1790_v5  ;;  %v624_v9 = vmax.f32 %v616_v6, %v622_v7  ;;  %633 = vperm.xlu0 %1457, %v1790_v5  }
 0x394   : > { %730 = vst.msk [vmem:[#allocation2 + $0x8] sm:$0xff] %vm659_vm5, %v624_v9  ;;  %638 = vperm.xlu1 %1458, %v624_v9   ;;  %v626_v39 = vsub.f32 %v616_v6, %v624_v9 }
 0x396   : > { %1012 = vrot.lane.b32.xlu0 %v1728_v24, %s1575_s25  ;;  %v629_v40 = vmul.f32 1.442695, %v626_v39 }
 0x397   : > { %v786_v10 = vpop.xlane.xlu0 %785  ;;  %1461 = vset.pattern.permute.xlu0 %v1572_v15 }
 0x398   : > { %1459 = vset.pattern.permute.xlu1 %v1577_v11  ;;  %1499 = vpow2.f32 %v629_v40  ;;  %v479_v40 = vld [vmem:[#allocation3 + $0x8] sm:$0xff] }
 0x399   : > { %v1802_v12 = vld [vmem:[#allocation2] sm:$0xff]  ;;  %v789_v13 = vpop.xlane.xlu1 %788 }
 0x39a   : > { %v1805_v14 = vmax.f32 %v1802_v12, %v786_v10 }
 0x39b   : > { %v1807_v17 = vld [vmem:[#allocation2 + $0x8] sm:$0xff] }
 0x39c   : > { %v792_v21 = vsub.f32 %v1802_v12, %v1805_v14  ;;  %896 = vst.msk [vmem:[#allocation2] sm:$0xff] %vm826_vm6, %v1805_v14  ;;  %v1814_v25 = vmax.f32 %v1807_v17, %v789_v13  ;;  %800 = vperm.xlu1 %1459, %v1805_v14  }
 0x39e   : > { %v793_v26 = vsub.f32 %v1807_v17, %v1814_v25  ;;  %897 = vst.msk [vmem:[#allocation2 + $0x8] sm:$0xff] %vm826_vm6, %v1814_v25 }
 0x39f   : > { %v953_v27 = vpop.xlane.xlu0 %952 }
 0x3a0   : > { %805 = vperm.xlu1 %1459, %v1814_v25  }
 0x3a1   : > { %v956_v29 = vpop.xlane.xlu1 %955 }
 0x3a3   : > { %v949_v28 = vld [vmem:[#allocation2] sm:$0xff] }
 0x3a4   : > { %v957_v30 = vmax.f32 %v949_v28, %v953_v27  ;;  %1460 = vset.pattern.permute.xlu1 %v1578_v31 }
 0x3a5   : > { %v1823_v32 = vld [vmem:[#allocation2 + $0x8] sm:$0xff] }
 0x3a6   : > { %1063 = vst.msk [vmem:[#allocation2] sm:$0xff] %vm993_vm7, %v957_v30  ;;  %v1827_v35 = vmax.f32 %v1823_v32, %v956_v29  ;;  %967 = vperm.xlu1 %1460, %v957_v30   ;;  %v959_v41 = vsub.f32 %v949_v28, %v957_v30  ;;  %v460_v29 = vmul.f32 1.442695, %v457_v23 }
 0x3a8   : > { %v960_v36 = vsub.f32 %v1823_v32, %v1827_v35  ;;  %1064 = vst.msk [vmem:[#allocation2 + $0x8] sm:$0xff] %vm993_vm7, %v1827_v35  ;;  %v961_v42 = vmul.f32 1.442695, %v959_v41  ;;  %v627_v41 = vmul.f32 1.442695, %v625_v8 }
 0x3aa   : > { %972 = vperm.xlu1 %1460, %v1827_v35   ;;  %1501 = vpow2.f32 %v961_v42 }
 0x3ae   : > { %678 = vrot.lane.b32.xlu1 %v1728_v24, %s1573_s22 }
 0x3af   : > { %1462 = vset.pattern.permute.xlu1 %v1572_v15 }
 0x3b2   : > { %845 = vrot.lane.b32.xlu1 %v1728_v24, %s1574_s24  ;;  %v1847_v24 = vpop.eup %1499 }
 0x3b4   : > { %v1851_v34 = vpop.eup %1501 }
 0x3b5   : > { %486 = vadd.xlane.f32.xlu0 %v485_v37 }
 0x3cb   : > { %497 = vperm.xlu0 %1461, %v1844_v44  }
 0x3cf   : > { %1464 = vset.pattern.permute.xlu0 %v1576_v62 }
 0x3d0   : > { %672 = vperm.xlu0 %1464, %v1847_v24  }
 0x3d4   : > { %1466 = vset.pattern.permute.xlu0 %v1578_v31 }
 0x3d5   : > { %1001 = vperm.xlu0 %1466, %v1851_v34  }
 0x3d6   : > { %483 = vadd.xlane.f32.xlu1 %v482_v16 }
 0x3d9   : > { %1470 = vset.pattern.permute.xlu0 %v1577_v11 }
 0x411   : > { %v634_v18 = vpop.permute.xlu0 %633 }
 0x412   : > { %v641_v20 = vsub.f32 %v1761_v47, %v634_v18 }
 0x413   : > { %v639_v46 = vpop.permute.xlu1 %638 }
 0x414   : > { %v643_v48 = vmul.f32 1.442695, %v641_v20  ;;  %v642_v49 = vsub.f32 %v1765_v50, %v639_v46  ;;  %v794_v20 = vmul.f32 1.442695, %v792_v21  ;;  %v493_v46 = vld [vmem:[#allocation4] sm:$0xff] }
 0x415   : > { %v1013_v38 = vpop.permute.xlu0 %1012 }
 0x416   : > { %1503 = vpow2.f32 %v643_v48  ;;  %v645_v51 = vmul.f32 1.442695, %v642_v49  ;;  %v963_v49 = vmul.f32 1.442695, %v960_v36 }
 0x418   : > { %1505 = vpow2.f32 %v645_v51 }
 0x41b   : > { %v801_v52 = vpop.permute.xlu1 %800 }
 0x41c   : > { %v808_v54 = vsub.f32 %v1769_v53, %v801_v52 }
 0x41e   : > { %v810_v55 = vmul.f32 1.442695, %v808_v54 }
 0x41f   : > { %v806_v57 = vpop.permute.xlu1 %805 }
 0x420   : > { %v1504_v58 = vpop.eup %1503  ;;  %1507 = vpow2.f32 %v810_v55  ;;  %v809_v33 = vsub.f32 %v1773_v56, %v806_v57 }
 0x421   : > { %v651_v60 = vsel %vm447_vm3, %v1504_v58, 0.0 }
 0x422   : > { %v1506_v61 = vpop.eup %1505  ;;  %v812_v47 = vmul.f32 1.442695, %v809_v33  ;;  %652 = vadd.xlane.f32.xlu1 %v651_v60 }
 0x423   : > { %v677_v0 = vpack.c.bf16 %v1506_v61, %v1504_v58  ;;  %v654_v1 = vsel %vm447_vm3, %v1506_v61, 0.0 }
 0x424   : > { %1509 = vpow2.f32 %v812_v47 }
 0x425   : > { %v968_v50 = vpop.permute.xlu1 %967 }
 0x426   : > { %v975_v3 = vsub.f32 %v1777_v59, %v968_v50  ;;  %655 = vadd.xlane.f32.xlu1 %v654_v1 }
 0x428   : > { %v977_v53 = vmul.f32 1.442695, %v975_v3 }
 0x429   : > { %v973_v6 = vpop.permute.xlu1 %972 }
 0x42a   : > { %v1508_v7 = vpop.eup %1507  ;;  %1511 = vpow2.f32 %v977_v53  ;;  %v976_v9 = vsub.f32 %v1783_v63, %v973_v6 }
 0x42b   : > { %v818_v56 = vsel %vm447_vm3, %v1508_v7, 0.0 }
 0x42c   : > { %v979_v10 = vmul.f32 1.442695, %v976_v9  ;;  %819 = vadd.xlane.f32.xlu1 %v818_v56  ;;  %v494_v9 = vld [vmem:[#allocation4 + $0x8] sm:$0xff] }
 0x42d   : > { %v679_v13 = vpop.permute.xlu1 %678 }
 0x42e   : > { %v1510_v27 = vpop.eup %1509  ;;  %1513 = vpow2.f32 %v979_v10  ;;  %1377 = vmatpush3.bf16.msra.mxu0 %v679_v13 }
 0x42f   : > { %v821_v28 = vsel %vm447_vm3, %v1510_v27, 0.0  ;;  %1388 = vmatprep.subr.bf16.mxu0 %v1569_v4  ;;  %v844_v59 = vpack.c.bf16 %v1510_v27, %v1508_v7  ;;  %1515 = vpow2.f32 %v460_v29 }
 0x430   : > { %822 = vadd.xlane.f32.xlu1 %v821_v28  ;;  %1517 = vpow2.f32 %v627_v41 }
 0x431   : > { %1379 = vmatmul.mubr.msk.bf16.vlgmr.msra.gmra.mrb[4].mxu0 %vm447_vm3, %v677_v0  ;;  %v846_v63 = vpop.permute.xlu1 %845  ;;  %1519 = vpow2.f32 %v794_v20 }
 0x432   : > { %1389 = vmatpush3.bf16.msra.mxu0 %v846_v63  ;;  %1390 = vmatprep.mubr.msk.bf16.mxu0 %vm1570_vm1, %v1569_v4 }
 0x433   : > { %1400 = vmatprep.subr.bf16.mxu0 %v1569_v4 }
 0x434   : > { %v1512_v30 = vpop.eup %1511 }
 0x435   : > { %v985_v37 = vsel %vm447_vm3, %v1512_v30, 0.0 }
 0x436   : > { %986 = vadd.xlane.f32.xlu1 %v985_v37  ;;  %v664_v37 = vld [vmem:[#allocation4 + $0x18] sm:$0xff] }
 0x438   : > { %v1514_v39 = vpop.eup %1513 }
 0x439   : > { %1391 = vmatmul.mubr.msk.bf16.vlgmr.msra.gmra.mrb[8].mxu0 %vm447_vm3, %v844_v59  ;;  %v988_v19 = vsel %vm447_vm3, %v1514_v39, 0.0  ;;  %v1011_v22 = vpack.c.bf16 %v1514_v39, %v1512_v30  ;;  %v1516_v23 = vpop.eup %1515  ;;  %v663_v30 = vld [vmem:[#allocation4 + $0x10] sm:$0xff] }
 0x43a   : > { %989 = vadd.xlane.f32.xlu1 %v988_v19  ;;  %1401 = vmatpush3.bf16.msra.mxu0 %v1013_v38  ;;  %v481_v42 = vmul.f32 %v1516_v23, %v479_v40  ;;  %v1518_v48 = vpop.eup %1517 }
 0x43b   : > { %1402 = vmatprep.mubr.msk.bf16.mxu0 %vm1570_vm1, %v1569_v4  ;;  %v796_v4 = vmul.f32 1.442695, %v793_v26  ;;  %v1520_v12 = vpop.eup %1519 }
 0x43d   : > { %1521 = vpow2.f32 %v796_v4 }
 0x43e   : > { %1523 = vpow2.f32 %v963_v49  ;;  %v997_v49 = vld [vmem:[#allocation4 + $0x30] sm:$0xff] }
 0x441   : > { %1403 = vmatmul.mubr.msk.bf16.vlgmr.msra.gmra.mrb[12].mxu0 %vm447_vm3, %v1011_v22 }
 0x442   : > { %v487_v16 = vpop.xlane.xlu0 %486 }
 0x443   : > { %v489_v18 = vadd.f32 %v487_v16, %v481_v42 }
 0x445   : > { %492 = vst.msk [vmem:[#allocation3 + $0x8] sm:$0xff] %vm490_vm4, %v489_v18 }
 0x447   : > { %v1522_v14 = vpop.eup %1521 }
 0x448   : > { %v1524_v17 = vpop.eup %1523 }
 0x44a   : > { %v498_v2 = vpop.permute.xlu0 %497 }
 0x44b   : > { %v505_v5 = vmul.f32 %v498_v2, %v493_v46  ;;  %502 = vperm.xlu1 %1462, %v1516_v23  }
 0x44c   : > { %v648_v51 = vld [vmem:[#allocation3 + $0x8] sm:$0xff] }
 0x44d   : > { %v558_v8 = vadd.f32 %v1757_v43, %v505_v5  ;;  %v478_v43 = vld [vmem:[#allocation3] sm:$0xff]  ;;  %v650_v54 = vmul.f32 %v1847_v24, %v648_v51 }
 0x44e   : > { %v480_v21 = vmul.f32 %v1844_v44, %v478_v43 }
 0x44f   : > { %560 = vst.msk [vmem:[#allocation4] sm:$0xff] %vm372_vm0, %v558_v8  ;;  %1463 = vset.pattern.permute.xlu1 %v1576_v62  ;;  %v673_v38 = vpop.permute.xlu0 %672 }
 0x450   : > { %667 = vperm.xlu1 %1463, %v1518_v48  }
 0x454   : > { %1465 = vset.pattern.permute.xlu1 %v1577_v11 }
 0x455   : > { %834 = vperm.xlu1 %1465, %v1520_v12  }
 0x459   : > { %839 = vperm.xlu1 %1465, %v1522_v14  }
 0x45d   : > { %1467 = vset.pattern.permute.xlu1 %v1578_v31 }
 0x45e   : > { %1006 = vperm.xlu1 %1467, %v1524_v17  }
 0x462   : > { %1468 = vset.pattern.permute.xlu1 %v1572_v15 }
 0x463   : > { %v484_v25 = vpop.xlane.xlu1 %483 }
 0x464   : > { %v488_v26 = vadd.f32 %v484_v25, %v480_v21 }
 0x466   : > { %491 = vst.msk [vmem:[#allocation3] sm:$0xff] %vm490_vm4, %v488_v26 }
 0x46d   : > { %v647_v32 = vld [vmem:[#allocation3] sm:$0xff] }
 0x46e   : > { %v649_v35 = vmul.f32 %v1518_v48, %v647_v32 }
 0x4af   : > { %v653_v36 = vpop.xlane.xlu1 %652 }
 0x4b0   : > { %v657_v52 = vadd.f32 %v653_v36, %v649_v35 }
 0x4b2   : > { %660 = vst.msk [vmem:[#allocation3] sm:$0xff] %vm659_vm5, %v657_v52 }
 0x4b3   : > { %v656_v55 = vpop.xlane.xlu1 %655 }
 0x4b4   : > { %v658_v57 = vadd.f32 %v656_v55, %v650_v54 }
 0x4b6   : > { %661 = vst.msk [vmem:[#allocation3 + $0x8] sm:$0xff] %vm659_vm5, %v658_v57 }
 0x4b9   : > { %v814_v44 = vld [vmem:[#allocation3] sm:$0xff]  ;;  %v820_v58 = vpop.xlane.xlu1 %819 }
 0x4ba   : > { %v816_v33 = vmul.f32 %v1520_v12, %v814_v44  ;;  %v1002_v12 = vpop.permute.xlu0 %1001 }
 0x4bb   : > { %v1009_v43 = vmul.f32 %v1002_v12, %v997_v49 }
 0x4bc   : > { %v824_v60 = vadd.f32 %v820_v58, %v816_v33 }
 0x4bd   : > { %v815_v61 = vld [vmem:[#allocation3 + $0x8] sm:$0xff]  ;;  %v823_v0 = vpop.xlane.xlu1 %822 }
 0x4be   : > { %827 = vst.msk [vmem:[#allocation3] sm:$0xff] %vm826_vm6, %v824_v60  ;;  %v817_v47 = vmul.f32 %v1522_v14, %v815_v61  ;;  %v998_v14 = vld [vmem:[#allocation4 + $0x38] sm:$0xff] }
 0x4c0   : > { %v825_v50 = vadd.f32 %v823_v0, %v817_v47 }
 0x4c2   : > { %828 = vst.msk [vmem:[#allocation3 + $0x8] sm:$0xff] %vm826_vm6, %v825_v50 }
 0x4c3   : > { %v987_v1 = vpop.xlane.xlu1 %986 }
 0x4c5   : > { %v981_v3 = vld [vmem:[#allocation3] sm:$0xff] }
 0x4c6   : > { %v983_v24 = vmul.f32 %v1851_v34, %v981_v3 }
 0x4c7   : > { %v990_v53 = vpop.xlane.xlu1 %989 }
 0x4c8   : > { %v991_v6 = vadd.f32 %v987_v1, %v983_v24 }
 0x4c9   : > { %v982_v7 = vld [vmem:[#allocation3 + $0x8] sm:$0xff] }
 0x4ca   : > { %994 = vst.msk [vmem:[#allocation3] sm:$0xff] %vm993_vm7, %v991_v6  ;;  %v984_v56 = vmul.f32 %v1524_v17, %v982_v7 }
 0x4cb   : > { %v503_v10 = vpop.permute.xlu1 %502 }
 0x4cc   : > { %v992_v13 = vadd.f32 %v990_v53, %v984_v56  ;;  %v506_v27 = vmul.f32 %v503_v10, %v494_v9 }
 0x4ce   : > { %995 = vst.msk [vmem:[#allocation3 + $0x8] sm:$0xff] %vm993_vm7, %v992_v13  ;;  %v559_v28 = vadd.f32 %v1759_v45, %v506_v27 }
 0x4cf   : > { %v668_v45 = vpop.permute.xlu1 %667 }
 0x4d0   : > { %561 = vst.msk [vmem:[#allocation4 + $0x8] sm:$0xff] %vm372_vm0, %v559_v28  ;;  %v675_v39 = vmul.f32 %v668_v45, %v663_v30 }
 0x4d1   : > { %v1068_v59 = vld [vmem:[#allocation3] sm:$0xff] }
 0x4d2   : > { %1525 = vrcp.f32 %v1068_v59 }
 0x4d5   : > { %v1069_v29 = vld [vmem:[#allocation3 + $0x8] sm:$0xff] }
 0x4d6   : > { %1527 = vrcp.f32 %v1069_v29 }
 0x4d7   : > { %v1073_v45 = vld [vmem:[#allocation4 + $0x8] sm:$0xff] }
 0x4dc   : > { %v1526_v34 = vpop.eup %1525 }
 0x4dd   : > { %1101 = vperm.xlu0 %1470, %v1526_v34   ;;  %1076 = vperm.xlu1 %1468, %v1526_v34  }
 0x4e0   : > { %v1528_v63 = vpop.eup %1527 }
 0x4e1   : > { %1471 = vset.pattern.permute.xlu0 %v1572_v15  ;;  %1469 = vset.pattern.permute.xlu1 %v1576_v62  ;;  %v835_v15 = vpop.permute.xlu1 %834  ;;  %v676_v62 = vmul.f32 %v673_v38, %v664_v37 }
 0x4e2   : > { %1089 = vperm.xlu1 %1469, %v1526_v34   ;;  %1081 = vperm.xlu0 %1471, %v1528_v63  }
 0x4e5   : > { %v840_v16 = vpop.permute.xlu1 %839 }
 0x4e6   : > { %1093 = vperm.xlu1 %1469, %v1528_v63   ;;  %1474 = vset.pattern.permute.xlu0 %v1578_v31 }
 0x4e7   : > { %1117 = vperm.xlu0 %1474, %v1528_v63  }
 0x4e9   : > { %v1007_v17 = vpop.permute.xlu1 %1006 }
 0x4ea   : > { %1472 = vset.pattern.permute.xlu1 %v1577_v11  ;;  %v830_v11 = vld [vmem:[#allocation4 + $0x20] sm:$0xff]  ;;  %v1010_v25 = vmul.f32 %v1007_v17, %v998_v14 }
 0x4eb   : > { %1105 = vperm.xlu1 %1472, %v1528_v63   ;;  %v842_v18 = vmul.f32 %v835_v15, %v830_v11  ;;  %v1072_v63 = vld [vmem:[#allocation4] sm:$0xff] }
 0x4ef   : > { %1473 = vset.pattern.permute.xlu1 %v1578_v31  ;;  %v831_v31 = vld [vmem:[#allocation4 + $0x28] sm:$0xff] }
 0x4f0   : > { %1113 = vperm.xlu1 %1473, %v1526_v34   ;;  %v843_v46 = vmul.f32 %v840_v16, %v831_v31 }
 0x504   : > { %v718_v19 = vpop.f32.mrb[4].mxu0 }
 0x505   : > { %v725_v22 = vadd.f32 %v718_v19, %v675_v39  ;;  %v1380_v23 = vpop.f32.mrb[5].mxu0 }
 0x506   : > { %v721_v40 = vpop.f32.mrb[6].mxu0 }
 0x507   : > { %727 = vst.msk [vmem:[#allocation4 + $0x10] sm:$0xff] %vm372_vm0, %v725_v22  ;;  %v726_v41 = vadd.f32 %v721_v40, %v676_v62  ;;  %v1381_v42 = vpop.f32.mrb[7].mxu0 }
 0x509   : > { %728 = vst.msk [vmem:[#allocation4 + $0x18] sm:$0xff] %vm372_vm0, %v726_v41 }
 0x50c   : > { %v885_v20 = vpop.f32.mrb[8].mxu0 }
 0x50d   : > { %v892_v4 = vadd.f32 %v885_v20, %v842_v18  ;;  %v1392_v2 = vpop.f32.mrb[9].mxu0 }
 0x50e   : > { %v888_v5 = vpop.f32.mrb[10].mxu0  ;;  %v1086_v57 = vld [vmem:[#allocation4 + $0x10] sm:$0xff] }
 0x50f   : > { %894 = vst.msk [vmem:[#allocation4 + $0x20] sm:$0xff] %vm372_vm0, %v892_v4  ;;  %v893_v8 = vadd.f32 %v888_v5, %v843_v46  ;;  %v1393_v48 = vpop.f32.mrb[11].mxu0 }
 0x510   : > { %v1087_v58 = vld [vmem:[#allocation4 + $0x18] sm:$0xff] }
 0x511   : > { %895 = vst.msk [vmem:[#allocation4 + $0x28] sm:$0xff] %vm372_vm0, %v893_v8 }
 0x514   : > { %v1052_v21 = vpop.f32.mrb[12].mxu0 }
 0x515   : > { %v1059_v26 = vadd.f32 %v1052_v21, %v1009_v43  ;;  %v1404_v32 = vpop.f32.mrb[13].mxu0 }
 0x516   : > { %v1055_v35 = vpop.f32.mrb[14].mxu0  ;;  %v1098_v0 = vld [vmem:[#allocation4 + $0x20] sm:$0xff] }
 0x517   : > { %1061 = vst.msk [vmem:[#allocation4 + $0x30] sm:$0xff] %vm372_vm0, %v1059_v26  ;;  %v1060_v36 = vadd.f32 %v1055_v35, %v1010_v25  ;;  %v1405_v51 = vpop.f32.mrb[15].mxu0 }
 0x518   : > { %v1099_v1 = vld [vmem:[#allocation4 + $0x28] sm:$0xff] }
 0x519   : > { %1062 = vst.msk [vmem:[#allocation4 + $0x38] sm:$0xff] %vm372_vm0, %v1060_v36 }
 0x51e   : > { %v1110_v56 = vld [vmem:[#allocation4 + $0x30] sm:$0xff] }
 0x520   : > { %v1111_v7 = vld [vmem:[#allocation4 + $0x38] sm:$0xff] }
 0x55c   : > { %v1077_v52 = vpop.permute.xlu1 %1076  ;;  %v1102_v54 = vpop.permute.xlu0 %1101 }
 0x55d   : > { %v1108_v3 = vmul.f32 %v1102_v54, %v1098_v0  ;;  %v1084_v38 = vmul.f32 %v1077_v52, %v1072_v63 }
 0x561   : > { %v1090_v55 = vpop.permute.xlu1 %1089  ;;  %v1082_v61 = vpop.permute.xlu0 %1081 }
 0x562   : > { %v1096_v33 = vmul.f32 %v1090_v55, %v1086_v57  ;;  %v1085_v39 = vmul.f32 %v1082_v61, %v1073_v45 }
 0x565   : > { %v1094_v44 = vpop.permute.xlu1 %1093 }
 0x566   : > { %v1097_v60 = vmul.f32 %v1094_v44, %v1087_v58  ;;  %v1118_v53 = vpop.permute.xlu0 %1117 }
 0x567   : > { %v1121_v10 = vmul.f32 %v1118_v53, %v1111_v7 }
 0x568   : > { %v1475_v47 = vpack.i.bf16 %v1097_v60, %v1096_v33 }
 0x56a   : > { %v1106_v50 = vpop.permute.xlu1 %1105  ;;  %1476 = vrot.lane.b32.xlu1 %v1475_v47, %s1575_s25 }
 0x56b   : > { %v1109_v24 = vmul.f32 %v1106_v50, %v1099_v1 }
 0x56d   : > { %v1480_v6 = vpack.i.bf16 %v1109_v24, %v1108_v3 }
 0x56f   : > { %v1114_v9 = vpop.permute.xlu1 %1113  ;;  %1481 = vrot.lane.b32.xlu1 %v1480_v6, %s1574_s24 }
 0x570   : > { %v1120_v13 = vmul.f32 %v1114_v9, %v1110_v56 }
 0x572   : > { %v1485_v27 = vpack.i.bf16 %v1121_v10, %v1120_v13 }
 0x574   : > { %1486 = vrot.lane.b32.xlu0 %v1485_v27, %s1573_s22 }
 0x5dc   : > { %v1477_v28 = vpop.permute.xlu1 %1476 }
 0x5dd   : > { %v1479_v29 = vunpack.i.h.bf16 %v1477_v28  ;;  %v1478_v34 = vunpack.i.l.bf16 %v1477_v28 }
 0x5df   : > { %v1147_v19 = vsel %vm372_vm0, %v1085_v39, %v1479_v29  ;;  %v1146_v62 = vsel %vm372_vm0, %v1084_v38, %v1478_v34 }
 0x5e1   : > { %v1482_v59 = vpop.permute.xlu1 %1481 }
 0x5e2   : > { %v1484_v30 = vunpack.i.h.bf16 %v1482_v59  ;;  %v1483_v37 = vunpack.i.l.bf16 %v1482_v59 }
 0x5e4   : > { %v1150_v40 = vsel %vm1148_vm8, %v1147_v19, %v1484_v30  ;;  %v1149_v41 = vsel %vm1148_vm8, %v1146_v62, %v1483_v37 }
 0x5e6   : > { %v1487_v15 = vpop.permute.xlu0 %1486 }
 0x5e7   : > { %v1489_v22 = vunpack.i.h.bf16 %v1487_v15  ;;  %v1488_v23 = vunpack.i.l.bf16 %v1487_v15 }
 0x5e9   : > { %v1153_v42 = vsel %vm1151_vm9, %v1150_v40, %v1489_v22  ;;  %v1152_v11 = vsel %vm1151_vm9, %v1149_v41, %v1488_v23 }
 0x5ea   : > { %v1340_v31 = vpack.c.bf16 %v1153_v42, %v1152_v11 }
 0x5ec   : > { %1341 = vst [vmem:[%s360_s28] sm:$0xff] %v1340_v31  }
 0x5ed PF: > { %s13_s16 = sadd.s32 1, %s1567_s16   ;;  %s1954_s12 = smov %s1555_s13 }
 0x5ee   : > { %p10_p10 = scmp.ge.s32.totalorder %s13_s16, 4   ;;  %s1955_s13 = smov %s1638_s21 }
 0x5ef   : > { %s1956_s14 = smov %s1563_s15  ;;  %s1957_s15 = smov %s1959_s17 }
 0x5f0   :  { %12 = sbr.rel (!%p10_p10) target bundleno = 3 (0x3), region = 171 }

</bundles_post_ra>
